<compile_context>
chip_gen: v6e
topology: v6e:2x2x1
jax: 0.10.0
libtpu: 0.0.40
codegen_flags: <defaults>
</compile_context>

<pallas_src>
import numpy as np
import jax
import jax.numpy as jnp
from jax.experimental import pallas as pl
from jax.experimental.pallas import tpu as pltpu

_B_TILE = 64  # batch rows per grid step (multiple of 8)


# ----------------------------------------------------------------------------
# Fused forward kernel: one batch tile per grid step, everything in VMEM.
# ----------------------------------------------------------------------------
def _fused_forward_kernel(x_ref,
                          w1_ref, b1_ref, w2_ref, b2_ref, w3_ref, b3_ref,
                          w4_ref, b4_ref, w5_ref, b5_ref, w6_ref, b6_ref,
                          o_ref):
    def conv_relu_pool(a, w_ph_ref, b_ref):
        # a: (B, Hi*Wi*Cin) f32.  w_ph_ref: (4, Hi*Wi*Cin, Ho*Wo*Cout) bf16.
        # Each phase matmul gives the conv output at pre-pool pixels
        # (2*h2+hp, 2*w2+wp); elementwise max over the 4 phases == 2x2 maxpool.
        a16 = a.astype(jnp.bfloat16)
        m = jnp.dot(a16, w_ph_ref[0], preferred_element_type=jnp.float32)
        for ph in range(1, 4):
            m = jnp.maximum(
                m, jnp.dot(a16, w_ph_ref[ph], preferred_element_type=jnp.float32))
        # bias is identical across phases, ReLU is monotonic -> add/relu after max.
        return jnp.maximum(m + b_ref[...], 0.0)

    def linear(a, w_ref, b_ref):
        return jnp.dot(a.astype(jnp.bfloat16), w_ref[...],
                       preferred_element_type=jnp.float32) + b_ref[...]

    h = x_ref[...]                               # (B, 256) f32
    h = conv_relu_pool(h, w1_ref, b1_ref)        # (B, 8*8*16 = 1024)
    h = conv_relu_pool(h, w2_ref, b2_ref)        # (B, 4*4*32 = 512)
    h = conv_relu_pool(h, w3_ref, b3_ref)        # (B, 2*2*64 = 256)
    h = jnp.maximum(linear(h, w4_ref, b4_ref), 0.0)   # (B, 128)
    h = jnp.maximum(linear(h, w5_ref, b5_ref), 0.0)   # (B, 64)
    o_ref[...] = linear(h, w6_ref, b6_ref)             # (B, 2*nout)


# ----------------------------------------------------------------------------
# Wrapper
# ----------------------------------------------------------------------------
def _round_up(x, m):
    return (x + m - 1) // m * m


def _full_block(a):
    nd = a.ndim
    return pl.BlockSpec(a.shape, lambda i, _nd=nd: (0,) * _nd)


def _compiler_params():
    cp_cls = getattr(pltpu, "CompilerParams", None) or getattr(pltpu, "TPUCompilerParams")
    return cp_cls(dimension_semantics=("parallel",),
                  vmem_limit_bytes=32 * 1024 * 1024)


@jax.jit
def nn_conv_v2_forward(x, kp):
    """x: (N, 256) f32.  kp: dict from prepare_kernel_params()."""
    N = x.shape[0]
    nout2 = kp["w6"].shape[1]

    bt = min(_B_TILE, _round_up(N, 8))
    Np = _round_up(N, bt)
    x = x.astype(jnp.float32)
    if Np != N:
        x = jnp.pad(x, ((0, Np - N), (0, 0)))

    weights = (kp["w1"], kp["b1"], kp["w2"], kp["b2"], kp["w3"], kp["b3"],
               kp["w4"], kp["b4"], kp["w5"], kp["b5"], kp["w6"], kp["b6"])

    extra = {}
    if hasattr(pl, "CostEstimate"):
        flops = 2 * Np * (256 * 1024 * 4 + 1024 * 512 * 4 + 512 * 256 * 4
                          + 256 * 128 + 128 * 64 + 64 * nout2)
        bytes_accessed = (Np * 256 * 4 + Np * nout2 * 4
                          + sum(int(w.size) * w.dtype.itemsize for w in weights))
        extra["cost_estimate"] = pl.CostEstimate(
            flops=flops, transcendentals=0, bytes_accessed=bytes_accessed)

    out = pl.pallas_call(
        _fused_forward_kernel,
        out_shape=jax.ShapeDtypeStruct((Np, nout2), jnp.float32),
        grid=(Np // bt,),
        in_specs=[pl.BlockSpec((bt, 256), lambda i: (i, 0))]
                 + [_full_block(w) for w in weights],
        out_specs=pl.BlockSpec((bt, nout2), lambda i: (i, 0)),
        compiler_params=_compiler_params(),
        **extra,
    )(x, *weights)
    return out[:N]


# ----------------------------------------------------------------------------
# Parameters: PyTorch-layout init + one-time expansion to kernel form
# ----------------------------------------------------------------------------
def init_params(key, nsipms, nout):
    """PyTorch-layout parameters (Conv2d: (Cout,Cin,3,3); Linear: (out,in))."""
    side = int(nsipms ** 0.5)
    assert side * side == nsipms and side == 16, \
        "NN_conv_v2 requires nsipms=256 (16x16 image -> 2x2 after 3 pools)"
    ks = jax.random.split(key, 12)

    def dense_init(kw, kb, shape_w, fan_in):
        scale = 1.0 / jnp.sqrt(jnp.float32(fan_in))
        w = jax.random.normal(kw, shape_w, jnp.float32) * scale
        b = jax.random.normal(kb, (shape_w[0],), jnp.float32) * scale
        return w, b

    w1, b1 = dense_init(ks[0], ks[1], (16, 1, 3, 3), 1 * 9)
    w2, b2 = dense_init(ks[2], ks[3], (32, 16, 3, 3), 16 * 9)
    w3, b3 = dense_init(ks[4], ks[5], (64, 32, 3, 3), 32 * 9)
    w4, b4 = dense_init(ks[6], ks[7], (128, 2 * 2 * 64), 2 * 2 * 64)
    w5, b5 = dense_init(ks[8], ks[9], (64, 128), 128)
    w6, b6 = dense_init(ks[10], ks[11], (nout * 2, 64), 64)
    return dict(w1=w1, b1=b1, w2=w2, b2=b2, w3=w3, b3=b3,
                w4=w4, b4=b4, w5=w5, b5=b5, w6=w6, b6=b6)


def _expand_conv(w, b, hi, wi):
    """Fold conv3x3(pad=1) + 2x2 maxpool into 4 phase matmul matrices.

    Returns K: (4, hi*wi*cin, (hi//2)*(wi//2)*cout) and b_exp: (1, Ho*Wo*cout).
    Rows are ordered (h, w, cin); pooled-output columns are ordered
    (h2, w2, cout) -- identical to the row order expected by the next layer.
    """
    w = np.asarray(jax.device_get(w), np.float32)      # (cout, cin, 3, 3)
    b = np.asarray(jax.device_get(b), np.float32)
    cout, cin = w.shape[0], w.shape[1]
    ho, wo = hi // 2, wi // 2
    K = np.zeros((4, hi * wi * cin, ho * wo * cout), np.float32)
    for ph in range(4):
        hp, wp = ph // 2, ph % 2
        for h2 in range(ho):
            for w2 in range(wo):
                hpre, wpre = 2 * h2 + hp, 2 * w2 + wp          # pre-pool pixel
                col = (h2 * wo + w2) * cout
                for dh in range(3):
                    for dw in range(3):
                        hin, win = hpre + dh - 1, wpre + dw - 1
                        if 0 <= hin < hi and 0 <= win < wi:
                            row = (hin * wi + win) * cin
                            K[ph, row:row + cin, col:col + cout] = w[:, :, dh, dw].T
    b_exp = np.tile(b, ho * wo).reshape(1, -1)
    return K, b_exp


def prepare_kernel_params(params):
    """One-time prep (outside the hot path): expanded conv matrices, permuted w4."""
    k1, b1 = _expand_conv(params["w1"], params["b1"], 16, 16)
    k2, b2 = _expand_conv(params["w2"], params["b2"], 8, 8)
    k3, b3 = _expand_conv(params["w3"], params["b3"], 4, 4)

    # layer4 consumes the (h2, w2, c)-ordered 2*2*64 lanes directly; PyTorch
    # flattens (c, h2, w2)-major, so permute w4's input rows once here.
    w4 = np.asarray(jax.device_get(params["w4"]), np.float32)        # (128, 256)
    w4p = np.transpose(w4.reshape(128, 64, 2, 2), (2, 3, 1, 0)).reshape(256, 128)
    w5p = np.asarray(jax.device_get(params["w5"]), np.float32).T     # (128, 64)
    w6p = np.asarray(jax.device_get(params["w6"]), np.float32).T     # (64, 2*nout)

    bf = lambda a: jnp.asarray(a, jnp.bfloat16)
    f32 = lambda a: jnp.asarray(np.asarray(jax.device_get(a), np.float32))
    return dict(
        w1=bf(k1), b1=f32(b1),
        w2=bf(k2), b2=f32(b2),
        w3=bf(k3), b3=f32(b3),
        w4=bf(w4p), b4=f32(np.asarray(jax.device_get(params["b4"])).reshape(1, -1)),
        w5=bf(w5p), b5=f32(np.asarray(jax.device_get(params["b5"])).reshape(1, -1)),
        w6=bf(w6p), b6=f32(np.asarray(jax.device_get(params["b6"])).reshape(1, -1)),
    )


if __name__ == "__main__":
    # Module constraint: after 3 pools the spatial map must be 2x2 -> side=16 -> nsipms=256.
    nsipms, nout, batch = 256, 3, 2
    key = jax.random.PRNGKey(0)
    k_param, k_x = jax.random.split(key)

    params = init_params(k_param, nsipms, nout)
    kparams = prepare_kernel_params(params)
    x = jax.random.normal(k_x, (batch, nsipms), jnp.float32)

    out = nn_conv_v2_forward(x, kparams)
    out = jax.block_until_ready(out)
    assert out.shape == (batch, nout * 2), out.shape
    print("KERNEL_OK")
</pallas_src>

<mosaic_0001>
module attributes {stable_mosaic.version = 11 : i64} {
  func.func @_fused_forward_kernel(%arg0: i32, %arg1: memref<8x256xf32, #tpu.memory_space<vmem>>, %arg2: memref<4x256x1024xbf16, #tpu.memory_space<vmem>>, %arg3: memref<1x1024xf32, #tpu.memory_space<vmem>>, %arg4: memref<4x1024x512xbf16, #tpu.memory_space<vmem>>, %arg5: memref<1x512xf32, #tpu.memory_space<vmem>>, %arg6: memref<4x512x256xbf16, #tpu.memory_space<vmem>>, %arg7: memref<1x256xf32, #tpu.memory_space<vmem>>, %arg8: memref<256x128xbf16, #tpu.memory_space<vmem>>, %arg9: memref<1x128xf32, #tpu.memory_space<vmem>>, %arg10: memref<128x64xbf16, #tpu.memory_space<vmem>>, %arg11: memref<1x64xf32, #tpu.memory_space<vmem>>, %arg12: memref<64x6xbf16, #tpu.memory_space<vmem>>, %arg13: memref<1x6xf32, #tpu.memory_space<vmem>>, %arg14: memref<8x6xf32, #tpu.memory_space<vmem>>) attributes {dimension_semantics = [#tpu.dimension_semantics<parallel>], iteration_bounds = array<i64: 1>, scalar_prefetch = 0 : i64, scratch_operands = 0 : i64, tpu.core_type = #tpu.core_type<tc>, window_params = [{transform_indices = @transform_0, window_bounds = array<i64: 8, 256>}, {pipeline_mode = #tpu.pipeline_mode<synchronous>, transform_indices = @transform_1, window_bounds = array<i64: 4, 256, 1024>}, {pipeline_mode = #tpu.pipeline_mode<synchronous>, transform_indices = @transform_2, window_bounds = array<i64: 1, 1024>}, {pipeline_mode = #tpu.pipeline_mode<synchronous>, transform_indices = @transform_3, window_bounds = array<i64: 4, 1024, 512>}, {pipeline_mode = #tpu.pipeline_mode<synchronous>, transform_indices = @transform_4, window_bounds = array<i64: 1, 512>}, {pipeline_mode = #tpu.pipeline_mode<synchronous>, transform_indices = @transform_5, window_bounds = array<i64: 4, 512, 256>}, {pipeline_mode = #tpu.pipeline_mode<synchronous>, transform_indices = @transform_6, window_bounds = array<i64: 1, 256>}, {pipeline_mode = #tpu.pipeline_mode<synchronous>, transform_indices = @transform_7, window_bounds = array<i64: 256, 128>}, {pipeline_mode = #tpu.pipeline_mode<synchronous>, transform_indices = @transform_8, window_bounds = array<i64: 1, 128>}, {pipeline_mode = #tpu.pipeline_mode<synchronous>, transform_indices = @transform_9, window_bounds = array<i64: 128, 64>}, {pipeline_mode = #tpu.pipeline_mode<synchronous>, transform_indices = @transform_10, window_bounds = array<i64: 1, 64>}, {pipeline_mode = #tpu.pipeline_mode<synchronous>, transform_indices = @transform_11, window_bounds = array<i64: 64, 6>}, {pipeline_mode = #tpu.pipeline_mode<synchronous>, transform_indices = @transform_12, window_bounds = array<i64: 1, 6>}, {transform_indices = @transform_13, window_bounds = array<i64: 8, 6>}]} {
    %c0 = arith.constant 0 : index
    %c0_0 = arith.constant 0 : index
    %0 = vector.load %arg1[%c0, %c0_0] : memref<8x256xf32, #tpu.memory_space<vmem>>, vector<8x256xf32>
    %1 = arith.truncf %0 : vector<8x256xf32> to vector<8x256xbf16>
    %c0_1 = arith.constant 0 : index
    %c0_2 = arith.constant 0 : index
    %c0_3 = arith.constant 0 : index
    %2 = vector.load %arg2[%c0_1, %c0_2, %c0_3] : memref<4x256x1024xbf16, #tpu.memory_space<vmem>>, vector<1x256x1024xbf16>
    %3 = vector.shape_cast %2 : vector<1x256x1024xbf16> to vector<256x1024xbf16>
    %cst = arith.constant dense<0.000000e+00> : vector<8x1024xf32>
    %4 = tpu.matmul %1, %3, %cst {dimension_numbers = #tpu.dot_dimension_numbers<[1], [0], [0], [1], [0, 0, 1, 1], [], []>} : vector<8x256xbf16>, vector<256x1024xbf16>, vector<8x1024xf32> -> vector<8x1024xf32>
    %c1 = arith.constant 1 : index
    %c0_4 = arith.constant 0 : index
    %c0_5 = arith.constant 0 : index
    %5 = vector.load %arg2[%c1, %c0_4, %c0_5] : memref<4x256x1024xbf16, #tpu.memory_space<vmem>>, vector<1x256x1024xbf16>
    %6 = vector.shape_cast %5 : vector<1x256x1024xbf16> to vector<256x1024xbf16>
    %cst_6 = arith.constant dense<0.000000e+00> : vector<8x1024xf32>
    %7 = tpu.matmul %1, %6, %cst_6 {dimension_numbers = #tpu.dot_dimension_numbers<[1], [0], [0], [1], [0, 0, 1, 1], [], []>} : vector<8x256xbf16>, vector<256x1024xbf16>, vector<8x1024xf32> -> vector<8x1024xf32>
    %8 = arith.maximumf %4, %7 : vector<8x1024xf32>
    %c2 = arith.constant 2 : index
    %c0_7 = arith.constant 0 : index
    %c0_8 = arith.constant 0 : index
    %9 = vector.load %arg2[%c2, %c0_7, %c0_8] : memref<4x256x1024xbf16, #tpu.memory_space<vmem>>, vector<1x256x1024xbf16>
    %10 = vector.shape_cast %9 : vector<1x256x1024xbf16> to vector<256x1024xbf16>
    %cst_9 = arith.constant dense<0.000000e+00> : vector<8x1024xf32>
    %11 = tpu.matmul %1, %10, %cst_9 {dimension_numbers = #tpu.dot_dimension_numbers<[1], [0], [0], [1], [0, 0, 1, 1], [], []>} : vector<8x256xbf16>, vector<256x1024xbf16>, vector<8x1024xf32> -> vector<8x1024xf32>
    %12 = arith.maximumf %8, %11 : vector<8x1024xf32>
    %c3 = arith.constant 3 : index
    %c0_10 = arith.constant 0 : index
    %c0_11 = arith.constant 0 : index
    %13 = vector.load %arg2[%c3, %c0_10, %c0_11] : memref<4x256x1024xbf16, #tpu.memory_space<vmem>>, vector<1x256x1024xbf16>
    %14 = vector.shape_cast %13 : vector<1x256x1024xbf16> to vector<256x1024xbf16>
    %cst_12 = arith.constant dense<0.000000e+00> : vector<8x1024xf32>
    %15 = tpu.matmul %1, %14, %cst_12 {dimension_numbers = #tpu.dot_dimension_numbers<[1], [0], [0], [1], [0, 0, 1, 1], [], []>} : vector<8x256xbf16>, vector<256x1024xbf16>, vector<8x1024xf32> -> vector<8x1024xf32>
    %16 = arith.maximumf %12, %15 : vector<8x1024xf32>
    %c0_13 = arith.constant 0 : index
    %c0_14 = arith.constant 0 : index
    %17 = vector.load %arg3[%c0_13, %c0_14] : memref<1x1024xf32, #tpu.memory_space<vmem>>, vector<1x1024xf32>
    %18 = vector.broadcast %17 : vector<1x1024xf32> to vector<8x1024xf32>
    %19 = arith.addf %16, %18 : vector<8x1024xf32>
    %cst_15 = arith.constant 0.000000e+00 : f32
    %20 = vector.broadcast %cst_15 : f32 to vector<8x1024xf32>
    %21 = arith.maximumf %19, %20 : vector<8x1024xf32>
    %22 = arith.truncf %21 : vector<8x1024xf32> to vector<8x1024xbf16>
    %c0_16 = arith.constant 0 : index
    %c0_17 = arith.constant 0 : index
    %c0_18 = arith.constant 0 : index
    %23 = vector.load %arg4[%c0_16, %c0_17, %c0_18] : memref<4x1024x512xbf16, #tpu.memory_space<vmem>>, vector<1x1024x512xbf16>
    %24 = vector.shape_cast %23 : vector<1x1024x512xbf16> to vector<1024x512xbf16>
    %cst_19 = arith.constant dense<0.000000e+00> : vector<8x512xf32>
    %25 = tpu.matmul %22, %24, %cst_19 {dimension_numbers = #tpu.dot_dimension_numbers<[1], [0], [0], [1], [0, 0, 1, 1], [], []>} : vector<8x1024xbf16>, vector<1024x512xbf16>, vector<8x512xf32> -> vector<8x512xf32>
    %c1_20 = arith.constant 1 : index
    %c0_21 = arith.constant 0 : index
    %c0_22 = arith.constant 0 : index
    %26 = vector.load %arg4[%c1_20, %c0_21, %c0_22] : memref<4x1024x512xbf16, #tpu.memory_space<vmem>>, vector<1x1024x512xbf16>
    %27 = vector.shape_cast %26 : vector<1x1024x512xbf16> to vector<1024x512xbf16>
    %cst_23 = arith.constant dense<0.000000e+00> : vector<8x512xf32>
    %28 = tpu.matmul %22, %27, %cst_23 {dimension_numbers = #tpu.dot_dimension_numbers<[1], [0], [0], [1], [0, 0, 1, 1], [], []>} : vector<8x1024xbf16>, vector<1024x512xbf16>, vector<8x512xf32> -> vector<8x512xf32>
    %29 = arith.maximumf %25, %28 : vector<8x512xf32>
    %c2_24 = arith.constant 2 : index
    %c0_25 = arith.constant 0 : index
    %c0_26 = arith.constant 0 : index
    %30 = vector.load %arg4[%c2_24, %c0_25, %c0_26] : memref<4x1024x512xbf16, #tpu.memory_space<vmem>>, vector<1x1024x512xbf16>
    %31 = vector.shape_cast %30 : vector<1x1024x512xbf16> to vector<1024x512xbf16>
    %cst_27 = arith.constant dense<0.000000e+00> : vector<8x512xf32>
    %32 = tpu.matmul %22, %31, %cst_27 {dimension_numbers = #tpu.dot_dimension_numbers<[1], [0], [0], [1], [0, 0, 1, 1], [], []>} : vector<8x1024xbf16>, vector<1024x512xbf16>, vector<8x512xf32> -> vector<8x512xf32>
    %33 = arith.maximumf %29, %32 : vector<8x512xf32>
    %c3_28 = arith.constant 3 : index
    %c0_29 = arith.constant 0 : index
    %c0_30 = arith.constant 0 : index
    %34 = vector.load %arg4[%c3_28, %c0_29, %c0_30] : memref<4x1024x512xbf16, #tpu.memory_space<vmem>>, vector<1x1024x512xbf16>
    %35 = vector.shape_cast %34 : vector<1x1024x512xbf16> to vector<1024x512xbf16>
    %cst_31 = arith.constant dense<0.000000e+00> : vector<8x512xf32>
    %36 = tpu.matmul %22, %35, %cst_31 {dimension_numbers = #tpu.dot_dimension_numbers<[1], [0], [0], [1], [0, 0, 1, 1], [], []>} : vector<8x1024xbf16>, vector<1024x512xbf16>, vector<8x512xf32> -> vector<8x512xf32>
    %37 = arith.maximumf %33, %36 : vector<8x512xf32>
    %c0_32 = arith.constant 0 : index
    %c0_33 = arith.constant 0 : index
    %38 = vector.load %arg5[%c0_32, %c0_33] : memref<1x512xf32, #tpu.memory_space<vmem>>, vector<1x512xf32>
    %39 = vector.broadcast %38 : vector<1x512xf32> to vector<8x512xf32>
    %40 = arith.addf %37, %39 : vector<8x512xf32>
    %cst_34 = arith.constant 0.000000e+00 : f32
    %41 = vector.broadcast %cst_34 : f32 to vector<8x512xf32>
    %42 = arith.maximumf %40, %41 : vector<8x512xf32>
    %43 = arith.truncf %42 : vector<8x512xf32> to vector<8x512xbf16>
    %c0_35 = arith.constant 0 : index
    %c0_36 = arith.constant 0 : index
    %c0_37 = arith.constant 0 : index
    %44 = vector.load %arg6[%c0_35, %c0_36, %c0_37] : memref<4x512x256xbf16, #tpu.memory_space<vmem>>, vector<1x512x256xbf16>
    %45 = vector.shape_cast %44 : vector<1x512x256xbf16> to vector<512x256xbf16>
    %cst_38 = arith.constant dense<0.000000e+00> : vector<8x256xf32>
    %46 = tpu.matmul %43, %45, %cst_38 {dimension_numbers = #tpu.dot_dimension_numbers<[1], [0], [0], [1], [0, 0, 1, 1], [], []>} : vector<8x512xbf16>, vector<512x256xbf16>, vector<8x256xf32> -> vector<8x256xf32>
    %c1_39 = arith.constant 1 : index
    %c0_40 = arith.constant 0 : index
    %c0_41 = arith.constant 0 : index
    %47 = vector.load %arg6[%c1_39, %c0_40, %c0_41] : memref<4x512x256xbf16, #tpu.memory_space<vmem>>, vector<1x512x256xbf16>
    %48 = vector.shape_cast %47 : vector<1x512x256xbf16> to vector<512x256xbf16>
    %cst_42 = arith.constant dense<0.000000e+00> : vector<8x256xf32>
    %49 = tpu.matmul %43, %48, %cst_42 {dimension_numbers = #tpu.dot_dimension_numbers<[1], [0], [0], [1], [0, 0, 1, 1], [], []>} : vector<8x512xbf16>, vector<512x256xbf16>, vector<8x256xf32> -> vector<8x256xf32>
    %50 = arith.maximumf %46, %49 : vector<8x256xf32>
    %c2_43 = arith.constant 2 : index
    %c0_44 = arith.constant 0 : index
    %c0_45 = arith.constant 0 : index
    %51 = vector.load %arg6[%c2_43, %c0_44, %c0_45] : memref<4x512x256xbf16, #tpu.memory_space<vmem>>, vector<1x512x256xbf16>
    %52 = vector.shape_cast %51 : vector<1x512x256xbf16> to vector<512x256xbf16>
    %cst_46 = arith.constant dense<0.000000e+00> : vector<8x256xf32>
    %53 = tpu.matmul %43, %52, %cst_46 {dimension_numbers = #tpu.dot_dimension_numbers<[1], [0], [0], [1], [0, 0, 1, 1], [], []>} : vector<8x512xbf16>, vector<512x256xbf16>, vector<8x256xf32> -> vector<8x256xf32>
    %54 = arith.maximumf %50, %53 : vector<8x256xf32>
    %c3_47 = arith.constant 3 : index
    %c0_48 = arith.constant 0 : index
    %c0_49 = arith.constant 0 : index
    %55 = vector.load %arg6[%c3_47, %c0_48, %c0_49] : memref<4x512x256xbf16, #tpu.memory_space<vmem>>, vector<1x512x256xbf16>
    %56 = vector.shape_cast %55 : vector<1x512x256xbf16> to vector<512x256xbf16>
    %cst_50 = arith.constant dense<0.000000e+00> : vector<8x256xf32>
    %57 = tpu.matmul %43, %56, %cst_50 {dimension_numbers = #tpu.dot_dimension_numbers<[1], [0], [0], [1], [0, 0, 1, 1], [], []>} : vector<8x512xbf16>, vector<512x256xbf16>, vector<8x256xf32> -> vector<8x256xf32>
    %58 = arith.maximumf %54, %57 : vector<8x256xf32>
    %c0_51 = arith.constant 0 : index
    %c0_52 = arith.constant 0 : index
    %59 = vector.load %arg7[%c0_51, %c0_52] : memref<1x256xf32, #tpu.memory_space<vmem>>, vector<1x256xf32>
    %60 = vector.broadcast %59 : vector<1x256xf32> to vector<8x256xf32>
    %61 = arith.addf %58, %60 : vector<8x256xf32>
    %cst_53 = arith.constant 0.000000e+00 : f32
    %62 = vector.broadcast %cst_53 : f32 to vector<8x256xf32>
    %63 = arith.maximumf %61, %62 : vector<8x256xf32>
    %64 = arith.truncf %63 : vector<8x256xf32> to vector<8x256xbf16>
    %c0_54 = arith.constant 0 : index
    %c0_55 = arith.constant 0 : index
    %65 = vector.load %arg8[%c0_54, %c0_55] : memref<256x128xbf16, #tpu.memory_space<vmem>>, vector<256x128xbf16>
    %cst_56 = arith.constant dense<0.000000e+00> : vector<8x128xf32>
    %66 = tpu.matmul %64, %65, %cst_56 {dimension_numbers = #tpu.dot_dimension_numbers<[1], [0], [0], [1], [0, 0, 1, 1], [], []>} : vector<8x256xbf16>, vector<256x128xbf16>, vector<8x128xf32> -> vector<8x128xf32>
    %c0_57 = arith.constant 0 : index
    %c0_58 = arith.constant 0 : index
    %67 = vector.load %arg9[%c0_57, %c0_58] : memref<1x128xf32, #tpu.memory_space<vmem>>, vector<1x128xf32>
    %68 = vector.broadcast %67 : vector<1x128xf32> to vector<8x128xf32>
    %69 = arith.addf %66, %68 : vector<8x128xf32>
    %cst_59 = arith.constant 0.000000e+00 : f32
    %70 = vector.broadcast %cst_59 : f32 to vector<8x128xf32>
    %71 = arith.maximumf %69, %70 : vector<8x128xf32>
    %72 = arith.truncf %71 : vector<8x128xf32> to vector<8x128xbf16>
    %c0_60 = arith.constant 0 : index
    %c0_61 = arith.constant 0 : index
    %73 = vector.load %arg10[%c0_60, %c0_61] : memref<128x64xbf16, #tpu.memory_space<vmem>>, vector<128x64xbf16>
    %cst_62 = arith.constant dense<0.000000e+00> : vector<8x64xf32>
    %74 = tpu.matmul %72, %73, %cst_62 {dimension_numbers = #tpu.dot_dimension_numbers<[1], [0], [0], [1], [0, 0, 1, 1], [], []>} : vector<8x128xbf16>, vector<128x64xbf16>, vector<8x64xf32> -> vector<8x64xf32>
    %c0_63 = arith.constant 0 : index
    %c0_64 = arith.constant 0 : index
    %75 = vector.load %arg11[%c0_63, %c0_64] : memref<1x64xf32, #tpu.memory_space<vmem>>, vector<1x64xf32>
    %76 = vector.broadcast %75 : vector<1x64xf32> to vector<8x64xf32>
    %77 = arith.addf %74, %76 : vector<8x64xf32>
    %cst_65 = arith.constant 0.000000e+00 : f32
    %78 = vector.broadcast %cst_65 : f32 to vector<8x64xf32>
    %79 = arith.maximumf %77, %78 : vector<8x64xf32>
    %80 = arith.truncf %79 : vector<8x64xf32> to vector<8x64xbf16>
    %c0_66 = arith.constant 0 : index
    %c0_67 = arith.constant 0 : index
    %81 = vector.load %arg12[%c0_66, %c0_67] : memref<64x6xbf16, #tpu.memory_space<vmem>>, vector<64x6xbf16>
    %cst_68 = arith.constant dense<0.000000e+00> : vector<8x6xf32>
    %82 = tpu.matmul %80, %81, %cst_68 {dimension_numbers = #tpu.dot_dimension_numbers<[1], [0], [0], [1], [0, 0, 1, 1], [], []>} : vector<8x64xbf16>, vector<64x6xbf16>, vector<8x6xf32> -> vector<8x6xf32>
    %c0_69 = arith.constant 0 : index
    %c0_70 = arith.constant 0 : index
    %83 = vector.load %arg13[%c0_69, %c0_70] : memref<1x6xf32, #tpu.memory_space<vmem>>, vector<1x6xf32>
    %84 = vector.broadcast %83 : vector<1x6xf32> to vector<8x6xf32>
    %85 = arith.addf %82, %84 : vector<8x6xf32>
    %c0_71 = arith.constant 0 : index
    %c0_72 = arith.constant 0 : index
    %86 = vector.load %arg14[%c0_71, %c0_72] : memref<8x6xf32, #tpu.memory_space<vmem>>, vector<8x6xf32>
    tpu.vector_store %arg14[%c0_71, %c0_72], %85 {strides = array<i32>} : memref<8x6xf32, #tpu.memory_space<vmem>>, vector<8x6xf32>,
    return
  }
  func.func @transform_0(%arg0: i32) -> (i32, i32) {
    %c0_i32 = arith.constant 0 : i32
    %c0_i32_0 = arith.constant 0 : i32
    return %arg0, %c0_i32 : i32, i32
  }
  func.func @transform_1(%arg0: i32) -> (i32, i32, i32) {
    %c0_i32 = arith.constant 0 : i32
    %c0_i32_0 = arith.constant 0 : i32
    %c0_i32_1 = arith.constant 0 : i32
    %c0_i32_2 = arith.constant 0 : i32
    return %c0_i32, %c0_i32_0, %c0_i32_1 : i32, i32, i32
  }
  func.func @transform_2(%arg0: i32) -> (i32, i32) {
    %c0_i32 = arith.constant 0 : i32
    %c0_i32_0 = arith.constant 0 : i32
    %c0_i32_1 = arith.constant 0 : i32
    return %c0_i32, %c0_i32_0 : i32, i32
  }
  func.func @transform_3(%arg0: i32) -> (i32, i32, i32) {
    %c0_i32 = arith.constant 0 : i32
    %c0_i32_0 = arith.constant 0 : i32
    %c0_i32_1 = arith.constant 0 : i32
    %c0_i32_2 = arith.constant 0 : i32
    return %c0_i32, %c0_i32_0, %c0_i32_1 : i32, i32, i32
  }
  func.func @transform_4(%arg0: i32) -> (i32, i32) {
    %c0_i32 = arith.constant 0 : i32
    %c0_i32_0 = arith.constant 0 : i32
    %c0_i32_1 = arith.constant 0 : i32
    return %c0_i32, %c0_i32_0 : i32, i32
  }
  func.func @transform_5(%arg0: i32) -> (i32, i32, i32) {
    %c0_i32 = arith.constant 0 : i32
    %c0_i32_0 = arith.constant 0 : i32
    %c0_i32_1 = arith.constant 0 : i32
    %c0_i32_2 = arith.constant 0 : i32
    return %c0_i32, %c0_i32_0, %c0_i32_1 : i32, i32, i32
  }
  func.func @transform_6(%arg0: i32) -> (i32, i32) {
    %c0_i32 = arith.constant 0 : i32
    %c0_i32_0 = arith.constant 0 : i32
    %c0_i32_1 = arith.constant 0 : i32
    return %c0_i32, %c0_i32_0 : i32, i32
  }
  func.func @transform_7(%arg0: i32) -> (i32, i32) {
    %c0_i32 = arith.constant 0 : i32
    %c0_i32_0 = arith.constant 0 : i32
    %c0_i32_1 = arith.constant 0 : i32
    return %c0_i32, %c0_i32_0 : i32, i32
  }
  func.func @transform_8(%arg0: i32) -> (i32, i32) {
    %c0_i32 = arith.constant 0 : i32
    %c0_i32_0 = arith.constant 0 : i32
    %c0_i32_1 = arith.constant 0 : i32
    return %c0_i32, %c0_i32_0 : i32, i32
  }
  func.func @transform_9(%arg0: i32) -> (i32, i32) {
    %c0_i32 = arith.constant 0 : i32
    %c0_i32_0 = arith.constant 0 : i32
    %c0_i32_1 = arith.constant 0 : i32
    return %c0_i32, %c0_i32_0 : i32, i32
  }
  func.func @transform_10(%arg0: i32) -> (i32, i32) {
    %c0_i32 = arith.constant 0 : i32
    %c0_i32_0 = arith.constant 0 : i32
    %c0_i32_1 = arith.constant 0 : i32
    return %c0_i32, %c0_i32_0 : i32, i32
  }
  func.func @transform_11(%arg0: i32) -> (i32, i32) {
    %c0_i32 = arith.constant 0 : i32
    %c0_i32_0 = arith.constant 0 : i32
    %c0_i32_1 = arith.constant 0 : i32
    return %c0_i32, %c0_i32_0 : i32, i32
  }
  func.func @transform_12(%arg0: i32) -> (i32, i32) {
    %c0_i32 = arith.constant 0 : i32
    %c0_i32_0 = arith.constant 0 : i32
    %c0_i32_1 = arith.constant 0 : i32
    return %c0_i32, %c0_i32_0 : i32, i32
  }
  func.func @transform_13(%arg0: i32) -> (i32, i32) {
    %c0_i32 = arith.constant 0 : i32
    %c0_i32_0 = arith.constant 0 : i32
    return %arg0, %c0_i32 : i32, i32
  }
}

</mosaic_0001>

<bundles_post_ra>
// kernel: nn_conv_v2_forward.1
= control target key start
LH: loop header
LB: loop body
LE: loop exit
PB: predicated region body
PF: predicated region fallthrough
CT: control target
= control target key end

     0   :  { %18 = vsyncpa [#allocation3], 0  ;;  %s18402_s0 = inlined_call_operand.vmem [shape: f32[8,256], index: 0, kind: input, shape index: {}]   ;;  %s18403_s1 = inlined_call_operand.hbm [shape: bf16[4,256,1024], index: 1, kind: input, shape index: {}]   ;;  %s18404_s2 = inlined_call_operand.hbm [shape: f32[1,1024], index: 2, kind: input, shape index: {}]   ;;  %s18405_s3 = inlined_call_operand.hbm [shape: bf16[4,1024,512], index: 3, kind: input, shape index: {}]   ;;  %s18406_s4 = inlined_call_operand.hbm [shape: f32[1,512], index: 4, kind: input, shape index: {}]   ;;  %s18407_s5 = inlined_call_operand.hbm [shape: bf16[4,512,256], index: 5, kind: input, shape index: {}]   ;;  %s18408_s6 = inlined_call_operand.hbm [shape: f32[1,256], index: 6, kind: input, shape index: {}]   ;;  %s18409_s7 = inlined_call_operand.hbm [shape: bf16[256,128], index: 7, kind: input, shape index: {}]   ;;  %s18410_s8 = inlined_call_operand.hbm [shape: f32[1,128], index: 8, kind: input, shape index: {}]   ;;  %s18411_s9 = inlined_call_operand.vmem [shape: bf16[128,64], index: 9, kind: input, shape index: {}]   ;;  %s18412_s10 = inlined_call_operand.hbm [shape: f32[1,64], index: 10, kind: input, shape index: {}]   ;;  %s18413_s11 = inlined_call_operand.vmem [shape: bf16[64,6], index: 11, kind: input, shape index: {}]   ;;  %s18414_s12 = inlined_call_operand.hbm [shape: f32[1,6], index: 12, kind: input, shape index: {}]   ;;  %s18415_s13 = inlined_call_operand.vmem [shape: f32[8,6], index: 13, kind: output, shape index: {}]  }
   0x1   :  { %19 = vsyncpa [#allocation5], 0 }
   0x2   :  { %20 = vsyncpa [#allocation8], 0 }
   0x3   :  { %21 = vsyncpa [#allocation11], 0 }
   0x4   :  { %22 = vsyncpa [#allocation14], 0 }
   0x5   :  { %23 = vsyncpa [#allocation17], 0  ;;  %s17847_s25 = smov [#allocation4]   ;;  %s17848_s27 = smov [#allocation7]  }
   0x6   :  { %s44_s26 = sshll.u32 %s17847_s25, 4  ;;  %s66_s28 = sshll.u32 %s17848_s27, 4  ;;  %s45_s26 = int_to_ptr.vmem [resolvable:$true] %s44_s26  ;;  %s67_s28 = int_to_ptr.vmem [resolvable:$true] %s66_s28 }
   0x7   :  { %s17643_s29 = scalar_lea.vmem %s45_s26, 128  ;;  %p17648_p1 = scmp.lt.s32.totalorder %s45_s26, %s45_s26 }
   0x8   :  { %p17644_p0 = scmp.ne.s32.totalorder %s45_s26, %s17643_s29  ;;  %p17649_p2 = scmp.lt.s32.totalorder %s17643_s29, %s17643_s29 }
   0xa   :  { %p17650_p3 = por %p17649_p2, %p17648_p1 }
   0xc   :  { %p17651_p4 = pnand %p17650_p3, %p17644_p0 }
   0xe   :  { %17654 = shalt.err (!%p17651_p4)
}
   0xf   :  { %47 = dma.hbm_to_vmem [thread:$0]  %s18404_s2, 128, %s45_s26, [#allocation5]  }
  0x10   :  { %s17663_s15 = scalar_lea.vmem %s67_s28, 64  ;;  %p17668_p6 = scmp.lt.s32.totalorder %s67_s28, %s67_s28 }
  0x11   :  { %p17664_p5 = scmp.ne.s32.totalorder %s67_s28, %s17663_s15  ;;  %p17669_p7 = scmp.lt.s32.totalorder %s17663_s15, %s17663_s15 }
  0x13   :  { %p17670_p8 = por %p17669_p7, %p17668_p6 }
  0x15   :  { %p17671_p9 = pnand %p17670_p8, %p17664_p5 }
  0x17   :  { %17674 = shalt.err (!%p17671_p9)
}
  0x18   :  { %69 = dma.hbm_to_vmem [thread:$0]  %s18406_s4, 64, %s67_s28, [#allocation8]  }
  0x19   :  { %s17849_s18 = smov [#allocation10]   ;;  %s17850_s20 = smov [#allocation13]  }
  0x1a   :  { %s88_s19 = sshll.u32 %s17849_s18, 4  ;;  %s110_s21 = sshll.u32 %s17850_s20, 4  ;;  %s89_s19 = int_to_ptr.vmem [resolvable:$true] %s88_s19  ;;  %s111_s21 = int_to_ptr.vmem [resolvable:$true] %s110_s21 }
  0x1b   :  { %s17683_s22 = scalar_lea.vmem %s89_s19, 32  ;;  %p17688_p11 = scmp.lt.s32.totalorder %s89_s19, %s89_s19 }
  0x1c   :  { %p17684_p10 = scmp.ne.s32.totalorder %s89_s19, %s17683_s22  ;;  %p17689_p12 = scmp.lt.s32.totalorder %s17683_s22, %s17683_s22 }
  0x1e   :  { %p17690_p13 = por %p17689_p12, %p17688_p11 }
  0x20   :  { %p17691_p0 = pnand %p17690_p13, %p17684_p10 }
  0x22   :  { %17694 = shalt.err (!%p17691_p0)
}
  0x23   :  { %91 = dma.hbm_to_vmem [thread:$0]  %s18408_s6, 32, %s89_s19, [#allocation11]  }
  0x24   :  { %s17703_s24 = scalar_lea.vmem %s111_s21, 16  ;;  %s17707_s4 = scalar_lea.vmem %s111_s21, 32 }
  0x25   :  { %p17704_p1 = scmp.ne.s32.totalorder %s111_s21, %s17703_s24  ;;  %p17708_p2 = scmp.lt.s32.totalorder %s111_s21, %s111_s21 }
  0x26   :  { %p17709_p3 = scmp.lt.s32.totalorder %s17707_s4, %s17703_s24 }
  0x28   :  { %p17710_p4 = por %p17709_p3, %p17708_p2 }
  0x2a   :  { %p17711_p5 = pnand %p17710_p4, %p17704_p1 }
  0x2c   :  { %17714 = shalt.err (!%p17711_p5)
}
  0x2d   :  { %113 = dma.hbm_to_vmem [thread:$0]  %s18410_s8, 16, %s111_s21, [#allocation14]  }
  0x2e   :  { %s17851_s27 = smov [#allocation2]  }
  0x2f   :  { %s31_s28 = sshll.u32 %s17851_s27, 4  ;;  %s32_s28 = int_to_ptr.vmem [resolvable:$true] %s31_s28 }
  0x30   :  { %s17723_s29 = scalar_lea.vmem %s32_s28, 65536  ;;  %p17728_p7 = scmp.lt.s32.totalorder %s32_s28, %s32_s28 }
  0x31   :  { %p17724_p6 = scmp.ne.s32.totalorder %s32_s28, %s17723_s29  ;;  %p17729_p8 = scmp.lt.s32.totalorder %s17723_s29, %s17723_s29 }
  0x33   :  { %p17730_p9 = por %p17729_p8, %p17728_p7 }
  0x35   :  { %p17731_p10 = pnand %p17730_p9, %p17724_p6 }
  0x37   :  { %17734 = shalt.err (!%p17731_p10)
}
  0x38   :  { %s17852_s6 = smov 512   ;;  %s17853_s30 = smov 32  }
  0x39   :  { %37 = dma.hbm_to_vmem [thread:$0]  %s18403_s1, 65536, %s32_s28, [#allocation3], %s17852_s6, %s17852_s6, %s17853_s30  }
  0x3a   :  { %s17854_s16 = smov [#allocation6]  }
  0x3b   :  { %s53_s17 = sshll.u32 %s17854_s16, 4  ;;  %s54_s17 = int_to_ptr.vmem [resolvable:$true] %s53_s17 }
  0x3c   :  { %s17743_s8 = scalar_lea.vmem %s54_s17, 131072  ;;  %p17748_p12 = scmp.lt.s32.totalorder %s54_s17, %s54_s17 }
  0x3d   :  { %p17744_p11 = scmp.ne.s32.totalorder %s54_s17, %s17743_s8  ;;  %p17749_p13 = scmp.lt.s32.totalorder %s17743_s8, %s17743_s8 }
  0x3f   :  { %p17750_p0 = por %p17749_p13, %p17748_p12 }
  0x41   :  { %p17751_p1 = pnand %p17750_p0, %p17744_p11 }
  0x43   :  { %17754 = shalt.err (!%p17751_p1)
}
  0x44   :  { %s17855_s18 = smov 256   ;;  %s17856_s19 = smov 16  }
  0x45   :  { %59 = dma.hbm_to_vmem [thread:$0]  %s18405_s3, 131072, %s54_s17, [#allocation5], %s17855_s18, %s17855_s18, %s17856_s19  }
  0x46   :  { %s17857_s22 = smov [#allocation9]  }
  0x47   :  { %s75_s2 = sshll.u32 %s17857_s22, 4  ;;  %s76_s2 = int_to_ptr.vmem [resolvable:$true] %s75_s2 }
  0x48   :  { %s17763_s1 = scalar_lea.vmem %s76_s2, 32768  ;;  %p17768_p3 = scmp.lt.s32.totalorder %s76_s2, %s76_s2 }
  0x49   :  { %p17764_p2 = scmp.ne.s32.totalorder %s76_s2, %s17763_s1  ;;  %p17769_p4 = scmp.lt.s32.totalorder %s17763_s1, %s17763_s1 }
  0x4b   :  { %p17770_p5 = por %p17769_p4, %p17768_p3 }
  0x4d   :  { %p17771_p6 = pnand %p17770_p5, %p17764_p2 }
  0x4f   :  { %17774 = shalt.err (!%p17771_p6)
}
  0x50   :  { %s17858_s23 = smov 128   ;;  %s17859_s24 = smov 8  }
  0x51   :  { %81 = dma.hbm_to_vmem [thread:$0]  %s18407_s5, 32768, %s76_s2, [#allocation8], %s17858_s23, %s17858_s23, %s17859_s24  }
  0x52   :  { %s17860_s26 = smov [#allocation12]  }
  0x53   :  { %s97_s27 = sshll.u32 %s17860_s26, 4  ;;  %s98_s27 = int_to_ptr.vmem [resolvable:$true] %s97_s27 }
  0x54   :  { %s17783_s3 = scalar_lea.vmem %s98_s27, 2048  ;;  %p17788_p8 = scmp.lt.s32.totalorder %s98_s27, %s98_s27 }
  0x55   :  { %p17784_p7 = scmp.ne.s32.totalorder %s98_s27, %s17783_s3  ;;  %p17789_p9 = scmp.lt.s32.totalorder %s17783_s3, %s17783_s3 }
  0x57   :  { %p17790_p10 = por %p17789_p9, %p17788_p8 }
  0x59   :  { %p17791_p11 = pnand %p17790_p10, %p17784_p7 }
  0x5b   :  { %17794 = shalt.err (!%p17791_p11)
}
  0x5c   :  { %s17861_s28 = smov 64   ;;  %s17862_s29 = smov 4  }
  0x5d   :  { %103 = dma.hbm_to_vmem [thread:$0]  %s18409_s7, 2048, %s98_s27, [#allocation11], %s17861_s28, %s17861_s28, %s17862_s29  }
  0x5e   :  { %s17863_s14 = smov [#allocation15]   ;;  %s17864_s16 = smov [#allocation16]  }
  0x5f   :  { %s122_s15 = sshll.u32 %s17863_s14, 4  ;;  %s134_s5 = sshll.u32 %s17864_s16, 4  ;;  %s123_s15 = int_to_ptr.vmem [resolvable:$true] %s122_s15  ;;  %s135_s5 = int_to_ptr.vmem [resolvable:$true] %s134_s5 }
  0x60   :  { %s17803_s17 = scalar_lea.vmem %s123_s15, 16  ;;  %s17807_s8 = scalar_lea.vmem %s123_s15, 32 }
  0x61   :  { %p17804_p12 = scmp.ne.s32.totalorder %s123_s15, %s17803_s17  ;;  %p17808_p13 = scmp.lt.s32.totalorder %s123_s15, %s123_s15 }
  0x62   :  { %p17809_p0 = scmp.lt.s32.totalorder %s17807_s8, %s17803_s17 }
  0x64   :  { %p17810_p1 = por %p17809_p0, %p17808_p13 }
  0x66   :  { %p17811_p2 = pnand %p17810_p1, %p17804_p12 }
  0x68   :  { %17814 = shalt.err (!%p17811_p2)
}
  0x69   :  { %125 = dma.hbm_to_vmem [thread:$0]  %s18412_s10, 16, %s123_s15, [#allocation14]  }
  0x6a   :  { %s17823_s20 = scalar_lea.vmem %s135_s5, 16  ;;  %s17827_s7 = scalar_lea.vmem %s135_s5, 32 }
  0x6b   :  { %p17824_p3 = scmp.ne.s32.totalorder %s135_s5, %s17823_s20  ;;  %p17828_p4 = scmp.lt.s32.totalorder %s135_s5, %s135_s5 }
  0x6c   :  { %p17829_p5 = scmp.lt.s32.totalorder %s17827_s7, %s17823_s20 }
  0x6e   :  { %p17830_p6 = por %p17829_p5, %p17828_p4 }
  0x70   :  { %p17831_p7 = pnand %p17830_p6, %p17824_p3 }
  0x72   :  { %17834 = shalt.err (!%p17831_p7)
}
  0x73   :  { %137 = dma.hbm_to_vmem [thread:$0]  %s18414_s12, 16, %s135_s5, [#allocation17]  }
  0x74   :  { %17835 = dma.done.wait [#allocation3], 65536  }
  0x75   :  { %17836 = vsyncadd [#allocation3], 4294901760 }
  0x76   :  { %17837 = dma.done.wait [#allocation5], 131200  }
  0x77   :  { %17838 = vsyncadd [#allocation5], 4294836096 }
  0x78   :  { %17839 = dma.done.wait [#allocation8], 32832  }
  0x79   :  { %17840 = vsyncadd [#allocation8], 4294934464 }
  0x7a   :  { %17841 = dma.done.wait [#allocation11], 2080  }
  0x7b   :  { %17842 = vsyncadd [#allocation11], 4294965216 }
  0x7c   :  { %17843 = dma.done.wait [#allocation14], 32  }
  0x7d   :  { %17844 = vsyncadd [#allocation14], 4294967264 }
  0x7e   :  { %17845 = dma.done.wait [#allocation17], 16  }
  0x7f   :  { %17846 = vsyncadd [#allocation17], 4294967280  ;;  %v229_v0 = vld [vmem:[#allocation2 + $0x1c0] sm:$0xff]  ;;  %v230_v2 = vld [vmem:[#allocation2 + $0x1c8] sm:$0xff]  ;;  %vm17866_vm0 = vmmov 0   ;;  %vm13719_vm1 = vcmask 523264  }
  0x80   :  { %v233_v1 = vld [vmem:[#allocation2 + $0x1e0] sm:$0xff]  ;;  %v234_v4 = vld [vmem:[#allocation2 + $0x1e8] sm:$0xff]  ;;  %vm13763_vm2 = vcmask 48128  }
  0x81   :  { %v13832_v3 = vcombine.high %v229_v0, %v233_v1  ;;  %v13831_v5 = vcombine.low %v229_v0, %v233_v1  ;;  %v221_v6 = vld [vmem:[#allocation2 + $0x180] sm:$0xff]  ;;  %v13834_v8 = vcombine.high %v230_v2, %v234_v4  ;;  %v13833_v9 = vcombine.low %v230_v2, %v234_v4  ;;  %v222_v11 = vld [vmem:[#allocation2 + $0x188] sm:$0xff] }
  0x82   :  { %v225_v7 = vld [vmem:[#allocation2 + $0x1a0] sm:$0xff]  ;;  %v226_v12 = vld [vmem:[#allocation2 + $0x1a8] sm:$0xff] }
  0x83   :  { %v13824_v10 = vcombine.high %v221_v6, %v225_v7  ;;  %v213_v13 = vld [vmem:[#allocation2 + $0x140] sm:$0xff]  ;;  %941 = vmatprep.subr.bf16.mxu0 %v13832_v3  ;;  %v13826_v14 = vcombine.high %v222_v11, %v226_v12  ;;  %v214_v16 = vld [vmem:[#allocation2 + $0x148] sm:$0xff]  ;;  %982 = vmatprep.subr.bf16.mxu1 %v13834_v8  ;;  %v13823_v18 = vcombine.low %v221_v6, %v225_v7 }
  0x84   :  { %v217_v15 = vld [vmem:[#allocation2 + $0x160] sm:$0xff]  ;;  %v218_v17 = vld [vmem:[#allocation2 + $0x168] sm:$0xff]  ;;  %942 = vmatpush1.bf16.msra.mxu0 %v13831_v5  ;;  %983 = vmatpush1.bf16.msra.mxu1 %v13833_v9  ;;  %v13825_v19 = vcombine.low %v222_v11, %v226_v12 }
  0x85   :  { %943 = vmatprep.subr.bf16.mxu0 %v13824_v10  ;;  %v13816_v20 = vcombine.high %v213_v13, %v217_v15  ;;  %984 = vmatprep.subr.bf16.mxu1 %v13826_v14  ;;  %v13818_v21 = vcombine.high %v214_v16, %v218_v17  ;;  %v205_v22 = vld [vmem:[#allocation2 + $0x100] sm:$0xff]  ;;  %v206_v24 = vld [vmem:[#allocation2 + $0x108] sm:$0xff]  ;;  %v13815_v26 = vcombine.low %v213_v13, %v217_v15 }
  0x86   :  { %v209_v23 = vld [vmem:[#allocation2 + $0x120] sm:$0xff]  ;;  %v210_v25 = vld [vmem:[#allocation2 + $0x128] sm:$0xff]  ;;  %v13817_v27 = vcombine.low %v214_v16, %v218_v17 }
  0x87   :  { %v13808_v28 = vcombine.high %v205_v22, %v209_v23  ;;  %v13810_v29 = vcombine.high %v206_v24, %v210_v25  ;;  %v197_v30 = vld [vmem:[#allocation2 + $0xc0] sm:$0xff]  ;;  %v198_v32 = vld [vmem:[#allocation2 + $0xc8] sm:$0xff]  ;;  %v13807_v34 = vcombine.low %v205_v22, %v209_v23  ;;  %v13809_v35 = vcombine.low %v206_v24, %v210_v25 }
  0x88   :  { %944 = vmatpush1.bf16.msra.mxu0 %v13823_v18  ;;  %985 = vmatpush1.bf16.msra.mxu1 %v13825_v19  ;;  %v201_v31 = vld [vmem:[#allocation2 + $0xe0] sm:$0xff]  ;;  %v202_v33 = vld [vmem:[#allocation2 + $0xe8] sm:$0xff] }
  0x89   :  { %945 = vmatprep.subr.bf16.mxu0 %v13816_v20  ;;  %986 = vmatprep.subr.bf16.mxu1 %v13818_v21  ;;  %v13800_v36 = vcombine.high %v197_v30, %v201_v31  ;;  %v13802_v37 = vcombine.high %v198_v32, %v202_v33  ;;  %v189_v38 = vld [vmem:[#allocation2 + $0x80] sm:$0xff]  ;;  %v190_v40 = vld [vmem:[#allocation2 + $0x88] sm:$0xff]  ;;  %v13799_v42 = vcombine.low %v197_v30, %v201_v31 }
  0x8a   :  { %v193_v39 = vld [vmem:[#allocation2 + $0xa0] sm:$0xff]  ;;  %v194_v41 = vld [vmem:[#allocation2 + $0xa8] sm:$0xff]  ;;  %v13801_v43 = vcombine.low %v198_v32, %v202_v33 }
  0x8b   :  { %v13792_v44 = vcombine.high %v189_v38, %v193_v39  ;;  %v13794_v45 = vcombine.high %v190_v40, %v194_v41  ;;  %v181_v46 = vld [vmem:[#allocation2 + $0x40] sm:$0xff]  ;;  %v182_v48 = vld [vmem:[#allocation2 + $0x48] sm:$0xff]  ;;  %v13791_v50 = vcombine.low %v189_v38, %v193_v39  ;;  %v13793_v51 = vcombine.low %v190_v40, %v194_v41 }
  0x8c   :  { %946 = vmatpush1.bf16.msra.mxu0 %v13815_v26  ;;  %987 = vmatpush1.bf16.msra.mxu1 %v13817_v27  ;;  %v185_v47 = vld [vmem:[#allocation2 + $0x60] sm:$0xff]  ;;  %v186_v49 = vld [vmem:[#allocation2 + $0x68] sm:$0xff] }
  0x8d   :  { %947 = vmatprep.subr.bf16.mxu0 %v13808_v28  ;;  %988 = vmatprep.subr.bf16.mxu1 %v13810_v29  ;;  %v13784_v52 = vcombine.high %v181_v46, %v185_v47  ;;  %v170_v53 = vld [vmem:[%s18402_s0 + $0x8] sm:$0xff]  ;;  %v13786_v54 = vcombine.high %v182_v48, %v186_v49  ;;  %v173_v55 = vld [vmem:[#allocation2] sm:$0xff]  ;;  %v13783_v60 = vcombine.low %v181_v46, %v185_v47 }
  0x8e   :  { %v177_v56 = vld [vmem:[#allocation2 + $0x20] sm:$0xff]  ;;  %v17970_v57 = vpack.c.bf16 %v170_v53, %v170_v53  ;;  %v174_v58 = vld [vmem:[#allocation2 + $0x8] sm:$0xff]  ;;  %v13785_v61 = vcombine.low %v182_v48, %v186_v49 }
  0x8f   :  { %v178_v59 = vld [vmem:[#allocation2 + $0x28] sm:$0xff]  ;;  %v13776_v62 = vcombine.high %v173_v55, %v177_v56  ;;  %v293_v0 = vld [vmem:[#allocation2 + $0x3c0] sm:$0xff]  ;;  %v13775_v4 = vcombine.low %v173_v55, %v177_v56 }
  0x90   :  { %948 = vmatpush1.bf16.msra.mxu0 %v13807_v34  ;;  %989 = vmatpush1.bf16.msra.mxu1 %v13809_v35  ;;  %v13778_v63 = vcombine.high %v174_v58, %v178_v59  ;;  %v297_v1 = vld [vmem:[#allocation2 + $0x3e0] sm:$0xff]  ;;  %v294_v2 = vld [vmem:[#allocation2 + $0x3c8] sm:$0xff]  ;;  %v13777_v5 = vcombine.low %v174_v58, %v178_v59 }
  0x91   :  { %949 = vmatprep.subr.bf16.mxu0 %v13800_v36  ;;  %990 = vmatprep.subr.bf16.mxu1 %v13802_v37  ;;  %v298_v3 = vld [vmem:[#allocation2 + $0x3e8] sm:$0xff]  ;;  %v13896_v6 = vcombine.high %v293_v0, %v297_v1  ;;  %v285_v8 = vld [vmem:[#allocation2 + $0x380] sm:$0xff]  ;;  %v13895_v12 = vcombine.low %v293_v0, %v297_v1  ;;  %v231_v1 = vld [vmem:[#allocation2 + $0x1d0] sm:$0xff] }
  0x92   :  { %973 = vmatprep.mubr.bf16.mxu0 %v17970_v57  ;;  %1014 = vmatprep.mubr.bf16.mxu1 %v17970_v57  ;;  %v13898_v7 = vcombine.high %v294_v2, %v298_v3  ;;  %v289_v9 = vld [vmem:[#allocation2 + $0x3a0] sm:$0xff]  ;;  %v286_v10 = vld [vmem:[#allocation2 + $0x388] sm:$0xff]  ;;  %v13897_v13 = vcombine.low %v294_v2, %v298_v3  ;;  %v235_v2 = vld [vmem:[#allocation2 + $0x1f0] sm:$0xff] }
  0x93   :  { %v290_v11 = vld [vmem:[#allocation2 + $0x3a8] sm:$0xff]  ;;  %v13888_v14 = vcombine.high %v285_v8, %v289_v9  ;;  %v277_v16 = vld [vmem:[#allocation2 + $0x340] sm:$0xff]  ;;  %v13887_v20 = vcombine.low %v285_v8, %v289_v9  ;;  %v232_v3 = vld [vmem:[#allocation2 + $0x1d8] sm:$0xff]  ;;  %v13836_v8 = vcombine.high %v231_v1, %v235_v2 }
  0x94   :  { %950 = vmatpush1.bf16.msra.mxu0 %v13799_v42  ;;  %991 = vmatpush1.bf16.msra.mxu1 %v13801_v43  ;;  %v13890_v15 = vcombine.high %v286_v10, %v290_v11  ;;  %v281_v17 = vld [vmem:[#allocation2 + $0x360] sm:$0xff]  ;;  %v278_v18 = vld [vmem:[#allocation2 + $0x348] sm:$0xff]  ;;  %v13889_v21 = vcombine.low %v286_v10, %v290_v11  ;;  %v223_v10 = vld [vmem:[#allocation2 + $0x190] sm:$0xff] }
  0x95   :  { %951 = vmatprep.subr.bf16.mxu0 %v13792_v44  ;;  %992 = vmatprep.subr.bf16.mxu1 %v13794_v45  ;;  %v282_v19 = vld [vmem:[#allocation2 + $0x368] sm:$0xff]  ;;  %v13880_v22 = vcombine.high %v277_v16, %v281_v17  ;;  %v269_v24 = vld [vmem:[#allocation2 + $0x300] sm:$0xff]  ;;  %v13879_v28 = vcombine.low %v277_v16, %v281_v17  ;;  %v227_v11 = vld [vmem:[#allocation2 + $0x1b0] sm:$0xff] }
  0x96   :  { %v13882_v23 = vcombine.high %v278_v18, %v282_v19  ;;  %v273_v25 = vld [vmem:[#allocation2 + $0x320] sm:$0xff]  ;;  %v270_v26 = vld [vmem:[#allocation2 + $0x308] sm:$0xff]  ;;  %v13881_v29 = vcombine.low %v278_v18, %v282_v19  ;;  %v13828_v17 = vcombine.high %v223_v10, %v227_v11  ;;  %v215_v18 = vld [vmem:[#allocation2 + $0x150] sm:$0xff] }
  0x97   :  { %v274_v27 = vld [vmem:[#allocation2 + $0x328] sm:$0xff]  ;;  %v13872_v30 = vcombine.high %v269_v24, %v273_v25  ;;  %v261_v32 = vld [vmem:[#allocation2 + $0x2c0] sm:$0xff]  ;;  %v13871_v36 = vcombine.low %v269_v24, %v273_v25  ;;  %v219_v19 = vld [vmem:[#allocation2 + $0x170] sm:$0xff] }
  0x98   :  { %952 = vmatpush1.bf16.msra.mxu0 %v13791_v50  ;;  %993 = vmatpush1.bf16.msra.mxu1 %v13793_v51  ;;  %v13874_v31 = vcombine.high %v270_v26, %v274_v27  ;;  %v265_v33 = vld [vmem:[#allocation2 + $0x2e0] sm:$0xff]  ;;  %v262_v34 = vld [vmem:[#allocation2 + $0x2c8] sm:$0xff]  ;;  %v13873_v37 = vcombine.low %v270_v26, %v274_v27  ;;  %v13820_v25 = vcombine.high %v215_v18, %v219_v19  ;;  %v207_v26 = vld [vmem:[#allocation2 + $0x110] sm:$0xff] }
  0x99   :  { %953 = vmatprep.subr.bf16.mxu0 %v13784_v52  ;;  %994 = vmatprep.subr.bf16.mxu1 %v13786_v54  ;;  %v266_v35 = vld [vmem:[#allocation2 + $0x2e8] sm:$0xff]  ;;  %v13864_v38 = vcombine.high %v261_v32, %v265_v33  ;;  %v253_v40 = vld [vmem:[#allocation2 + $0x280] sm:$0xff]  ;;  %v13863_v44 = vcombine.low %v261_v32, %v265_v33  ;;  %v211_v27 = vld [vmem:[#allocation2 + $0x130] sm:$0xff] }
  0x9a   :  { %v13866_v39 = vcombine.high %v262_v34, %v266_v35  ;;  %v257_v41 = vld [vmem:[#allocation2 + $0x2a0] sm:$0xff]  ;;  %v254_v42 = vld [vmem:[#allocation2 + $0x288] sm:$0xff]  ;;  %v13865_v45 = vcombine.low %v262_v34, %v266_v35  ;;  %v13812_v33 = vcombine.high %v207_v26, %v211_v27  ;;  %v199_v34 = vld [vmem:[#allocation2 + $0xd0] sm:$0xff] }
  0x9b   :  { %v258_v43 = vld [vmem:[#allocation2 + $0x2a8] sm:$0xff]  ;;  %v13856_v46 = vcombine.high %v253_v40, %v257_v41  ;;  %v245_v48 = vld [vmem:[#allocation2 + $0x240] sm:$0xff]  ;;  %v13855_v52 = vcombine.low %v253_v40, %v257_v41  ;;  %v203_v35 = vld [vmem:[#allocation2 + $0xf0] sm:$0xff] }
  0x9c   :  { %954 = vmatpush1.bf16.msra.mxu0 %v13783_v60  ;;  %995 = vmatpush1.bf16.msra.mxu1 %v13785_v61  ;;  %v13858_v47 = vcombine.high %v254_v42, %v258_v43  ;;  %v249_v49 = vld [vmem:[#allocation2 + $0x260] sm:$0xff]  ;;  %v246_v50 = vld [vmem:[#allocation2 + $0x248] sm:$0xff]  ;;  %v13857_v53 = vcombine.low %v254_v42, %v258_v43  ;;  %v13804_v41 = vcombine.high %v199_v34, %v203_v35  ;;  %v191_v42 = vld [vmem:[#allocation2 + $0x90] sm:$0xff] }
  0x9d   :  { %955 = vmatprep.subr.bf16.mxu0 %v13776_v62  ;;  %996 = vmatprep.subr.bf16.mxu1 %v13778_v63  ;;  %v250_v51 = vld [vmem:[#allocation2 + $0x268] sm:$0xff]  ;;  %v13848_v54 = vcombine.high %v245_v48, %v249_v49  ;;  %v237_v56 = vld [vmem:[#allocation2 + $0x200] sm:$0xff]  ;;  %v13847_v61 = vcombine.low %v245_v48, %v249_v49  ;;  %v195_v43 = vld [vmem:[#allocation2 + $0xb0] sm:$0xff] }
  0x9e   :  { %v13850_v55 = vcombine.high %v246_v50, %v250_v51  ;;  %v241_v58 = vld [vmem:[#allocation2 + $0x220] sm:$0xff]  ;;  %v238_v59 = vld [vmem:[#allocation2 + $0x208] sm:$0xff]  ;;  %v13849_v62 = vcombine.low %v246_v50, %v250_v51  ;;  %v13796_v49 = vcombine.high %v191_v42, %v195_v43  ;;  %v183_v50 = vld [vmem:[#allocation2 + $0x50] sm:$0xff] }
  0x9f   :  { %v242_v60 = vld [vmem:[#allocation2 + $0x228] sm:$0xff]  ;;  %v13840_v63 = vcombine.high %v237_v56, %v241_v58  ;;  %v187_v51 = vld [vmem:[#allocation2 + $0x70] sm:$0xff] }
  0xa0   :  { %956 = vmatpush1.bf16.msra.mxu0 %v13775_v4  ;;  %997 = vmatpush1.bf16.msra.mxu1 %v13777_v5  ;;  %v13842_v0 = vcombine.high %v238_v59, %v242_v60  ;;  %v236_v4 = vld [vmem:[#allocation2 + $0x1f8] sm:$0xff]  ;;  %v13839_v5 = vcombine.low %v237_v56, %v241_v58  ;;  %v13788_v58 = vcombine.high %v183_v50, %v187_v51 }
  0xa1   :  { %957 = vmatprep.subr.bf16.mxu0 %v13896_v6  ;;  %998 = vmatprep.subr.bf16.mxu1 %v13898_v7  ;;  %v169_v6 = vld [vmem:[%s18402_s0] sm:$0xff]  ;;  %v13841_v7 = vcombine.low %v238_v59, %v242_v60  ;;  %v13838_v9 = vcombine.high %v232_v3, %v236_v4  ;;  %v13837_v16 = vcombine.low %v232_v3, %v236_v4  ;;  %v175_v59 = vld [vmem:[#allocation2 + $0x10] sm:$0xff] }
  0xa2   :  { %v179_v60 = vld [vmem:[#allocation2 + $0x30] sm:$0xff] }
  0xa3   :  { %v295_v3 = vld [vmem:[#allocation2 + $0x3d0] sm:$0xff] }
  0xa4   :  { %958 = vmatpush2.bf16.msra.mxu0 %v13895_v12  ;;  %999 = vmatpush2.bf16.msra.mxu1 %v13897_v13  ;;  %v17977_v12 = vpack.c.bf16 %v169_v6, %v169_v6  ;;  %v224_v13 = vld [vmem:[#allocation2 + $0x198] sm:$0xff]  ;;  %v299_v4 = vld [vmem:[#allocation2 + $0x3f0] sm:$0xff] }
  0xa5   :  { %959 = vmatprep.subr.bf16.mxu0 %v13888_v14  ;;  %1000 = vmatprep.subr.bf16.mxu1 %v13890_v15  ;;  %v228_v14 = vld [vmem:[#allocation2 + $0x1b8] sm:$0xff]  ;;  %v13835_v15 = vcombine.low %v231_v1, %v235_v2  ;;  %v13780_v2 = vcombine.high %v175_v59, %v179_v60 }
  0xa6   :  { %v13829_v24 = vcombine.low %v224_v13, %v228_v14 }
  0xa8   :  { %960 = vmatpush2.bf16.msra.mxu0 %v13887_v20  ;;  %1001 = vmatpush2.bf16.msra.mxu1 %v13889_v21  ;;  %v216_v20 = vld [vmem:[#allocation2 + $0x158] sm:$0xff]  ;;  %v13830_v21 = vcombine.high %v224_v13, %v228_v14  ;;  %v291_v13 = vld [vmem:[#allocation2 + $0x3b0] sm:$0xff] }
  0xa9   :  { %961 = vmatprep.subr.bf16.mxu0 %v13880_v22  ;;  %1002 = vmatprep.subr.bf16.mxu1 %v13882_v23  ;;  %v220_v22 = vld [vmem:[#allocation2 + $0x178] sm:$0xff]  ;;  %v13827_v23 = vcombine.low %v223_v10, %v227_v11  ;;  %v13900_v10 = vcombine.high %v295_v3, %v299_v4  ;;  %v287_v11 = vld [vmem:[#allocation2 + $0x390] sm:$0xff] }
  0xaa   :  { %v13821_v32 = vcombine.low %v216_v20, %v220_v22  ;;  %v288_v14 = vld [vmem:[#allocation2 + $0x398] sm:$0xff] }
  0xac   :  { %962 = vmatpush2.bf16.msra.mxu0 %v13879_v28  ;;  %1003 = vmatpush2.bf16.msra.mxu1 %v13881_v29  ;;  %v208_v28 = vld [vmem:[#allocation2 + $0x118] sm:$0xff]  ;;  %v13822_v29 = vcombine.high %v216_v20, %v220_v22  ;;  %v279_v20 = vld [vmem:[#allocation2 + $0x350] sm:$0xff] }
  0xad   :  { %963 = vmatprep.subr.bf16.mxu0 %v13872_v30  ;;  %1004 = vmatprep.subr.bf16.mxu1 %v13874_v31  ;;  %v212_v30 = vld [vmem:[#allocation2 + $0x138] sm:$0xff]  ;;  %v13819_v31 = vcombine.low %v215_v18, %v219_v19  ;;  %v13892_v19 = vcombine.high %v287_v11, %v291_v13 }
  0xae   :  { %v13813_v40 = vcombine.low %v208_v28, %v212_v30  ;;  %v280_v22 = vld [vmem:[#allocation2 + $0x358] sm:$0xff] }
  0xb0   :  { %964 = vmatpush2.bf16.msra.mxu0 %v13871_v36  ;;  %1005 = vmatpush2.bf16.msra.mxu1 %v13873_v37  ;;  %v200_v36 = vld [vmem:[#allocation2 + $0xd8] sm:$0xff]  ;;  %v13814_v37 = vcombine.high %v208_v28, %v212_v30  ;;  %v271_v28 = vld [vmem:[#allocation2 + $0x310] sm:$0xff] }
  0xb1   :  { %965 = vmatprep.subr.bf16.mxu0 %v13864_v38  ;;  %1006 = vmatprep.subr.bf16.mxu1 %v13866_v39  ;;  %v204_v38 = vld [vmem:[#allocation2 + $0xf8] sm:$0xff]  ;;  %v13811_v39 = vcombine.low %v207_v26, %v211_v27 }
  0xb2   :  { %v13805_v48 = vcombine.low %v200_v36, %v204_v38  ;;  %v272_v30 = vld [vmem:[#allocation2 + $0x318] sm:$0xff] }
  0xb4   :  { %966 = vmatpush2.bf16.msra.mxu0 %v13863_v44  ;;  %1007 = vmatpush2.bf16.msra.mxu1 %v13865_v45  ;;  %v192_v44 = vld [vmem:[#allocation2 + $0x98] sm:$0xff]  ;;  %v13806_v45 = vcombine.high %v200_v36, %v204_v38  ;;  %v263_v36 = vld [vmem:[#allocation2 + $0x2d0] sm:$0xff] }
  0xb5   :  { %967 = vmatprep.subr.bf16.mxu0 %v13856_v46  ;;  %1008 = vmatprep.subr.bf16.mxu1 %v13858_v47  ;;  %v196_v46 = vld [vmem:[#allocation2 + $0xb8] sm:$0xff]  ;;  %v13803_v47 = vcombine.low %v199_v34, %v203_v35 }
  0xb6   :  { %v13797_v56 = vcombine.low %v192_v44, %v196_v46  ;;  %v264_v38 = vld [vmem:[#allocation2 + $0x2d8] sm:$0xff] }
  0xb8   :  { %968 = vmatpush2.bf16.msra.mxu0 %v13855_v52  ;;  %1009 = vmatpush2.bf16.msra.mxu1 %v13857_v53  ;;  %v184_v52 = vld [vmem:[#allocation2 + $0x58] sm:$0xff]  ;;  %v13798_v53 = vcombine.high %v192_v44, %v196_v46  ;;  %v255_v44 = vld [vmem:[#allocation2 + $0x290] sm:$0xff] }
  0xb9   :  { %969 = vmatprep.subr.bf16.mxu0 %v13848_v54  ;;  %1010 = vmatprep.subr.bf16.mxu1 %v13850_v55  ;;  %v188_v54 = vld [vmem:[#allocation2 + $0x78] sm:$0xff]  ;;  %v13795_v55 = vcombine.low %v191_v42, %v195_v43 }
  0xba   :  { %v13789_v1 = vcombine.low %v184_v52, %v188_v54  ;;  %v256_v46 = vld [vmem:[#allocation2 + $0x298] sm:$0xff] }
  0xbc   :  { %970 = vmatpush2.bf16.msra.mxu0 %v13847_v61  ;;  %1011 = vmatpush2.bf16.msra.mxu1 %v13849_v62  ;;  %v176_v61 = vld [vmem:[#allocation2 + $0x18] sm:$0xff]  ;;  %v13790_v62 = vcombine.high %v184_v52, %v188_v54  ;;  %v247_v52 = vld [vmem:[#allocation2 + $0x250] sm:$0xff] }
  0xbd   :  { %971 = vmatprep.subr.bf16.mxu0 %v13840_v63  ;;  %1012 = vmatprep.subr.bf16.mxu1 %v13842_v0  ;;  %v180_v63 = vld [vmem:[#allocation2 + $0x38] sm:$0xff]  ;;  %v13787_v0 = vcombine.low %v183_v50, %v187_v51 }
  0xbe   :  { %v13782_v6 = vcombine.high %v176_v61, %v180_v63  ;;  %v248_v54 = vld [vmem:[#allocation2 + $0x258] sm:$0xff] }
  0xc0   :  { %972 = vmatpush2.bf16.msra.mxu0 %v13839_v5  ;;  %1013 = vmatpush2.bf16.msra.mxu1 %v13841_v7  ;;  %v296_v5 = vld [vmem:[#allocation2 + $0x3d8] sm:$0xff] }
  0xc1   :  { %1023 = vmatprep.subr.bf16.mxu0 %v13836_v8  ;;  %1064 = vmatprep.subr.bf16.mxu1 %v13838_v9  ;;  %v300_v7 = vld [vmem:[#allocation2 + $0x3f8] sm:$0xff]  ;;  %v13779_v8 = vcombine.low %v175_v59, %v179_v60  ;;  %v13781_v9 = vcombine.low %v176_v61, %v180_v63  ;;  %v239_v61 = vld [vmem:[#allocation2 + $0x210] sm:$0xff] }
  0xc2   :  { %v13901_v18 = vcombine.low %v296_v5, %v300_v7  ;;  %v240_v63 = vld [vmem:[#allocation2 + $0x218] sm:$0xff] }
  0xc3   :  { %974 = vmatmul.mubr.bf16.vlgmr.msra.gmra.mxu0 %v17977_v12  ;;  %1015 = vmatmul.mubr.bf16.vlgmr.msra.gmra.mxu1 %v17977_v12 }
  0xc4   :  { %1024 = vmatpush1.bf16.msra.mxu0 %v13835_v15  ;;  %1065 = vmatpush1.bf16.msra.mxu1 %v13837_v16  ;;  %v13902_v15 = vcombine.high %v296_v5, %v300_v7  ;;  %v292_v16 = vld [vmem:[#allocation2 + $0x3b8] sm:$0xff]  ;;  %v1162_v5 = vld [vmem:[#allocation2 + $0x5c0] sm:$0xff]  ;;  %v1163_v7 = vld [vmem:[#allocation2 + $0x5c8] sm:$0xff] }
  0xc5   :  { %1025 = vmatprep.subr.bf16.mxu0 %v13828_v17  ;;  %1066 = vmatprep.subr.bf16.mxu1 %v13830_v21  ;;  %v13899_v17 = vcombine.low %v295_v3, %v299_v4  ;;  %v283_v21 = vld [vmem:[#allocation2 + $0x370] sm:$0xff]  ;;  %v13893_v26 = vcombine.low %v288_v14, %v292_v16 }
  0xc6   :  { %1055 = vmatprep.mubr.bf16.mxu0 %v17970_v57  ;;  %1096 = vmatprep.mubr.bf16.mxu1 %v17970_v57  ;;  %v13884_v27 = vcombine.high %v279_v20, %v283_v21 }
  0xc8   :  { %1026 = vmatpush1.bf16.msra.mxu0 %v13827_v23  ;;  %1067 = vmatpush1.bf16.msra.mxu1 %v13829_v24  ;;  %v13894_v23 = vcombine.high %v288_v14, %v292_v16  ;;  %v284_v24 = vld [vmem:[#allocation2 + $0x378] sm:$0xff]  ;;  %v1154_v14 = vld [vmem:[#allocation2 + $0x580] sm:$0xff]  ;;  %v1155_v16 = vld [vmem:[#allocation2 + $0x588] sm:$0xff] }
  0xc9   :  { %1027 = vmatprep.subr.bf16.mxu0 %v13820_v25  ;;  %1068 = vmatprep.subr.bf16.mxu1 %v13822_v29  ;;  %v13891_v25 = vcombine.low %v287_v11, %v291_v13  ;;  %v275_v29 = vld [vmem:[#allocation2 + $0x330] sm:$0xff]  ;;  %v13885_v34 = vcombine.low %v280_v22, %v284_v24 }
  0xca   :  { %v13876_v35 = vcombine.high %v271_v28, %v275_v29 }
  0xcc   :  { %1028 = vmatpush1.bf16.msra.mxu0 %v13819_v31  ;;  %1069 = vmatpush1.bf16.msra.mxu1 %v13821_v32  ;;  %v13886_v31 = vcombine.high %v280_v22, %v284_v24  ;;  %v276_v32 = vld [vmem:[#allocation2 + $0x338] sm:$0xff]  ;;  %v1146_v22 = vld [vmem:[#allocation2 + $0x540] sm:$0xff]  ;;  %v1147_v24 = vld [vmem:[#allocation2 + $0x548] sm:$0xff] }
  0xcd   :  { %1029 = vmatprep.subr.bf16.mxu0 %v13812_v33  ;;  %1070 = vmatprep.subr.bf16.mxu1 %v13814_v37  ;;  %v13883_v33 = vcombine.low %v279_v20, %v283_v21  ;;  %v267_v37 = vld [vmem:[#allocation2 + $0x2f0] sm:$0xff]  ;;  %v13877_v42 = vcombine.low %v272_v30, %v276_v32 }
  0xce   :  { %v13868_v43 = vcombine.high %v263_v36, %v267_v37 }
  0xd0   :  { %1030 = vmatpush1.bf16.msra.mxu0 %v13811_v39  ;;  %1071 = vmatpush1.bf16.msra.mxu1 %v13813_v40  ;;  %v13878_v39 = vcombine.high %v272_v30, %v276_v32  ;;  %v268_v40 = vld [vmem:[#allocation2 + $0x2f8] sm:$0xff]  ;;  %v1138_v30 = vld [vmem:[#allocation2 + $0x500] sm:$0xff]  ;;  %v1139_v32 = vld [vmem:[#allocation2 + $0x508] sm:$0xff] }
  0xd1   :  { %1031 = vmatprep.subr.bf16.mxu0 %v13804_v41  ;;  %1072 = vmatprep.subr.bf16.mxu1 %v13806_v45  ;;  %v13875_v41 = vcombine.low %v271_v28, %v275_v29  ;;  %v259_v45 = vld [vmem:[#allocation2 + $0x2b0] sm:$0xff]  ;;  %v13869_v50 = vcombine.low %v264_v38, %v268_v40 }
  0xd2   :  { %v13860_v51 = vcombine.high %v255_v44, %v259_v45 }
  0xd4   :  { %1032 = vmatpush1.bf16.msra.mxu0 %v13803_v47  ;;  %1073 = vmatpush1.bf16.msra.mxu1 %v13805_v48  ;;  %v13870_v47 = vcombine.high %v264_v38, %v268_v40  ;;  %v260_v48 = vld [vmem:[#allocation2 + $0x2b8] sm:$0xff]  ;;  %v1130_v38 = vld [vmem:[#allocation2 + $0x4c0] sm:$0xff]  ;;  %v1131_v40 = vld [vmem:[#allocation2 + $0x4c8] sm:$0xff] }
  0xd5   :  { %1033 = vmatprep.subr.bf16.mxu0 %v13796_v49  ;;  %1074 = vmatprep.subr.bf16.mxu1 %v13798_v53  ;;  %v13867_v49 = vcombine.low %v263_v36, %v267_v37  ;;  %v251_v53 = vld [vmem:[#allocation2 + $0x270] sm:$0xff]  ;;  %v13861_v59 = vcombine.low %v256_v46, %v260_v48 }
  0xd6   :  { %v13852_v60 = vcombine.high %v247_v52, %v251_v53 }
  0xd8   :  { %1034 = vmatpush1.bf16.msra.mxu0 %v13795_v55  ;;  %1075 = vmatpush1.bf16.msra.mxu1 %v13797_v56  ;;  %v13862_v55 = vcombine.high %v256_v46, %v260_v48  ;;  %v252_v56 = vld [vmem:[#allocation2 + $0x278] sm:$0xff]  ;;  %v1122_v46 = vld [vmem:[#allocation2 + $0x480] sm:$0xff]  ;;  %v1123_v48 = vld [vmem:[#allocation2 + $0x488] sm:$0xff] }
  0xd9   :  { %1035 = vmatprep.subr.bf16.mxu0 %v13788_v58  ;;  %1076 = vmatprep.subr.bf16.mxu1 %v13790_v62  ;;  %v13859_v58 = vcombine.low %v255_v44, %v259_v45  ;;  %v243_v62 = vld [vmem:[#allocation2 + $0x230] sm:$0xff]  ;;  %v13853_v3 = vcombine.low %v248_v54, %v252_v56 }
  0xda   :  { %v13844_v4 = vcombine.high %v239_v61, %v243_v62 }
  0xdc   :  { %1036 = vmatpush1.bf16.msra.mxu0 %v13787_v0  ;;  %1077 = vmatpush1.bf16.msra.mxu1 %v13789_v1  ;;  %v13854_v0 = vcombine.high %v248_v54, %v252_v56  ;;  %v244_v1 = vld [vmem:[#allocation2 + $0x238] sm:$0xff]  ;;  %v1114_v54 = vld [vmem:[#allocation2 + $0x440] sm:$0xff]  ;;  %v1115_v56 = vld [vmem:[#allocation2 + $0x448] sm:$0xff] }
  0xdd   :  { %1037 = vmatprep.subr.bf16.mxu0 %v13780_v2  ;;  %1078 = vmatprep.subr.bf16.mxu1 %v13782_v6  ;;  %v13851_v2 = vcombine.low %v247_v52, %v251_v53  ;;  %v1166_v6 = vld [vmem:[#allocation2 + $0x5e0] sm:$0xff]  ;;  %v13845_v11 = vcombine.low %v240_v63, %v244_v1 }
  0xde   :  { %v13960_v13 = vcombine.high %v1162_v5, %v1166_v6 }
  0xe0   :  { %1038 = vmatpush1.bf16.msra.mxu0 %v13779_v8  ;;  %1079 = vmatpush1.bf16.msra.mxu1 %v13781_v9  ;;  %v13846_v8 = vcombine.high %v240_v63, %v244_v1  ;;  %v1167_v9 = vld [vmem:[#allocation2 + $0x5e8] sm:$0xff]  ;;  %v1106_v63 = vld [vmem:[#allocation2 + $0x400] sm:$0xff] }
  0xe1   :  { %1039 = vmatprep.subr.bf16.mxu0 %v13900_v10  ;;  %1080 = vmatprep.subr.bf16.mxu1 %v13902_v15  ;;  %v13843_v10 = vcombine.low %v239_v61, %v243_v62  ;;  %v1158_v15 = vld [vmem:[#allocation2 + $0x5a0] sm:$0xff]  ;;  %v13961_v20 = vcombine.low %v1163_v7, %v1167_v9  ;;  %v1107_v1 = vld [vmem:[#allocation2 + $0x408] sm:$0xff] }
  0xe2   :  { %v13952_v21 = vcombine.high %v1154_v14, %v1158_v15 }
  0xe4   :  { %1040 = vmatpush2.bf16.msra.mxu0 %v13899_v17  ;;  %1081 = vmatpush2.bf16.msra.mxu1 %v13901_v18  ;;  %v13962_v17 = vcombine.high %v1163_v7, %v1167_v9  ;;  %v1159_v18 = vld [vmem:[#allocation2 + $0x5a8] sm:$0xff]  ;;  %v1226_v7 = vld [vmem:[#allocation2 + $0x7c0] sm:$0xff] }
  0xe5   :  { %1041 = vmatprep.subr.bf16.mxu0 %v13892_v19  ;;  %1082 = vmatprep.subr.bf16.mxu1 %v13894_v23  ;;  %v13959_v19 = vcombine.low %v1162_v5, %v1166_v6  ;;  %v1150_v23 = vld [vmem:[#allocation2 + $0x560] sm:$0xff]  ;;  %v13953_v28 = vcombine.low %v1155_v16, %v1159_v18  ;;  %v1227_v9 = vld [vmem:[#allocation2 + $0x7c8] sm:$0xff] }
  0xe6   :  { %v13944_v29 = vcombine.high %v1146_v22, %v1150_v23 }
  0xe8   :  { %1042 = vmatpush2.bf16.msra.mxu0 %v13891_v25  ;;  %1083 = vmatpush2.bf16.msra.mxu1 %v13893_v26  ;;  %v13954_v25 = vcombine.high %v1155_v16, %v1159_v18  ;;  %v1151_v26 = vld [vmem:[#allocation2 + $0x568] sm:$0xff]  ;;  %v1218_v16 = vld [vmem:[#allocation2 + $0x780] sm:$0xff] }
  0xe9   :  { %1043 = vmatprep.subr.bf16.mxu0 %v13884_v27  ;;  %1084 = vmatprep.subr.bf16.mxu1 %v13886_v31  ;;  %v13951_v27 = vcombine.low %v1154_v14, %v1158_v15  ;;  %v1142_v31 = vld [vmem:[#allocation2 + $0x520] sm:$0xff]  ;;  %v13945_v36 = vcombine.low %v1147_v24, %v1151_v26  ;;  %v1219_v18 = vld [vmem:[#allocation2 + $0x788] sm:$0xff] }
  0xea   :  { %v13936_v37 = vcombine.high %v1138_v30, %v1142_v31 }
  0xec   :  { %1044 = vmatpush2.bf16.msra.mxu0 %v13883_v33  ;;  %1085 = vmatpush2.bf16.msra.mxu1 %v13885_v34  ;;  %v13946_v33 = vcombine.high %v1147_v24, %v1151_v26  ;;  %v1143_v34 = vld [vmem:[#allocation2 + $0x528] sm:$0xff]  ;;  %v1210_v24 = vld [vmem:[#allocation2 + $0x740] sm:$0xff] }
  0xed   :  { %1045 = vmatprep.subr.bf16.mxu0 %v13876_v35  ;;  %1086 = vmatprep.subr.bf16.mxu1 %v13878_v39  ;;  %v13943_v35 = vcombine.low %v1146_v22, %v1150_v23  ;;  %v1134_v39 = vld [vmem:[#allocation2 + $0x4e0] sm:$0xff]  ;;  %v13937_v44 = vcombine.low %v1139_v32, %v1143_v34  ;;  %v1211_v26 = vld [vmem:[#allocation2 + $0x748] sm:$0xff] }
  0xee   :  { %v13928_v45 = vcombine.high %v1130_v38, %v1134_v39 }
  0xf0   :  { %1046 = vmatpush2.bf16.msra.mxu0 %v13875_v41  ;;  %1087 = vmatpush2.bf16.msra.mxu1 %v13877_v42  ;;  %v13938_v41 = vcombine.high %v1139_v32, %v1143_v34  ;;  %v1135_v42 = vld [vmem:[#allocation2 + $0x4e8] sm:$0xff]  ;;  %v1202_v32 = vld [vmem:[#allocation2 + $0x700] sm:$0xff] }
  0xf1   :  { %1047 = vmatprep.subr.bf16.mxu0 %v13868_v43  ;;  %1088 = vmatprep.subr.bf16.mxu1 %v13870_v47  ;;  %v13935_v43 = vcombine.low %v1138_v30, %v1142_v31  ;;  %v1126_v47 = vld [vmem:[#allocation2 + $0x4a0] sm:$0xff]  ;;  %v13929_v52 = vcombine.low %v1131_v40, %v1135_v42  ;;  %v1203_v34 = vld [vmem:[#allocation2 + $0x708] sm:$0xff] }
  0xf2   :  { %v13920_v53 = vcombine.high %v1122_v46, %v1126_v47 }
  0xf4   :  { %1048 = vmatpush2.bf16.msra.mxu0 %v13867_v49  ;;  %1089 = vmatpush2.bf16.msra.mxu1 %v13869_v50  ;;  %v13930_v49 = vcombine.high %v1131_v40, %v1135_v42  ;;  %v1127_v50 = vld [vmem:[#allocation2 + $0x4a8] sm:$0xff]  ;;  %v1194_v40 = vld [vmem:[#allocation2 + $0x6c0] sm:$0xff] }
  0xf5   :  { %1049 = vmatprep.subr.bf16.mxu0 %v13860_v51  ;;  %1090 = vmatprep.subr.bf16.mxu1 %v13862_v55  ;;  %v13927_v51 = vcombine.low %v1130_v38, %v1134_v39  ;;  %v1118_v55 = vld [vmem:[#allocation2 + $0x460] sm:$0xff]  ;;  %v13921_v61 = vcombine.low %v1123_v48, %v1127_v50  ;;  %v1195_v42 = vld [vmem:[#allocation2 + $0x6c8] sm:$0xff] }
  0xf6   :  { %v13912_v62 = vcombine.high %v1114_v54, %v1118_v55 }
  0xf8   :  { %1050 = vmatpush2.bf16.msra.mxu0 %v13859_v58  ;;  %1091 = vmatpush2.bf16.msra.mxu1 %v13861_v59  ;;  %v13922_v58 = vcombine.high %v1123_v48, %v1127_v50  ;;  %v1119_v59 = vld [vmem:[#allocation2 + $0x468] sm:$0xff]  ;;  %v1186_v48 = vld [vmem:[#allocation2 + $0x680] sm:$0xff] }
  0xf9   :  { %1051 = vmatprep.subr.bf16.mxu0 %v13852_v60  ;;  %1092 = vmatprep.subr.bf16.mxu1 %v13854_v0  ;;  %v13919_v60 = vcombine.low %v1122_v46, %v1126_v47  ;;  %v1110_v0 = vld [vmem:[#allocation2 + $0x420] sm:$0xff]  ;;  %v13913_v5 = vcombine.low %v1115_v56, %v1119_v59  ;;  %v1187_v50 = vld [vmem:[#allocation2 + $0x688] sm:$0xff] }
  0xfa   :  { %v13904_v6 = vcombine.high %v1106_v63, %v1110_v0 }
  0xfc   :  { %1052 = vmatpush2.bf16.msra.mxu0 %v13851_v2  ;;  %1093 = vmatpush2.bf16.msra.mxu1 %v13853_v3  ;;  %v13914_v2 = vcombine.high %v1115_v56, %v1119_v59  ;;  %v1111_v3 = vld [vmem:[#allocation2 + $0x428] sm:$0xff]  ;;  %v1178_v56 = vld [vmem:[#allocation2 + $0x640] sm:$0xff] }
  0xfd   :  { %1053 = vmatprep.subr.bf16.mxu0 %v13844_v4  ;;  %1094 = vmatprep.subr.bf16.mxu1 %v13846_v8  ;;  %v13911_v4 = vcombine.low %v1114_v54, %v1118_v55  ;;  %v1230_v8 = vld [vmem:[#allocation2 + $0x7e0] sm:$0xff]  ;;  %v13905_v14 = vcombine.low %v1107_v1, %v1111_v3  ;;  %v1179_v59 = vld [vmem:[#allocation2 + $0x648] sm:$0xff] }
  0xfe   :  { %v14024_v15 = vcombine.high %v1226_v7, %v1230_v8 }
 0x100   :  { %1054 = vmatpush2.bf16.msra.mxu0 %v13843_v10  ;;  %1095 = vmatpush2.bf16.msra.mxu1 %v13845_v11  ;;  %v13906_v10 = vcombine.high %v1107_v1, %v1111_v3  ;;  %v1231_v11 = vld [vmem:[#allocation2 + $0x7e8] sm:$0xff]  ;;  %v1170_v1 = vld [vmem:[#allocation2 + $0x600] sm:$0xff] }
 0x101   :  { %1874 = vmatprep.subr.bf16.mxu0 %v13960_v13  ;;  %1915 = vmatprep.subr.bf16.mxu1 %v13962_v17  ;;  %v13903_v13 = vcombine.low %v1106_v63, %v1110_v0  ;;  %v1222_v17 = vld [vmem:[#allocation2 + $0x7a0] sm:$0xff]  ;;  %v14025_v22 = vcombine.low %v1227_v9, %v1231_v11  ;;  %v1171_v3 = vld [vmem:[#allocation2 + $0x608] sm:$0xff] }
 0x102   :  { %v14016_v23 = vcombine.high %v1218_v16, %v1222_v17 }
 0x103   :  { %1056 = vmatmul.mubr.bf16.vlgmr.msra.gmra.mxu0 %v17977_v12  ;;  %1097 = vmatmul.mubr.bf16.vlgmr.msra.gmra.mxu1 %v17977_v12 }
 0x104   :  { %1875 = vmatpush1.bf16.msra.mxu0 %v13959_v19  ;;  %1916 = vmatpush1.bf16.msra.mxu1 %v13961_v20  ;;  %v14026_v19 = vcombine.high %v1227_v9, %v1231_v11  ;;  %v1223_v20 = vld [vmem:[#allocation2 + $0x7a8] sm:$0xff]  ;;  %v1164_v9 = vld [vmem:[#allocation2 + $0x5d0] sm:$0xff]  ;;  %v1165_v11 = vld [vmem:[#allocation2 + $0x5d8] sm:$0xff] }
 0x105   :  { %1876 = vmatprep.subr.bf16.mxu0 %v13952_v21  ;;  %1917 = vmatprep.subr.bf16.mxu1 %v13954_v25  ;;  %v14023_v21 = vcombine.low %v1226_v7, %v1230_v8  ;;  %v1214_v25 = vld [vmem:[#allocation2 + $0x760] sm:$0xff]  ;;  %v14017_v30 = vcombine.low %v1219_v18, %v1223_v20 }
 0x106   :  { %1906 = vmatprep.mubr.bf16.mxu0 %v17970_v57  ;;  %1947 = vmatprep.mubr.bf16.mxu1 %v17970_v57  ;;  %v14008_v31 = vcombine.high %v1210_v24, %v1214_v25 }
 0x108   :  { %1877 = vmatpush1.bf16.msra.mxu0 %v13951_v27  ;;  %1918 = vmatpush1.bf16.msra.mxu1 %v13953_v28  ;;  %v14018_v27 = vcombine.high %v1219_v18, %v1223_v20  ;;  %v1215_v28 = vld [vmem:[#allocation2 + $0x768] sm:$0xff]  ;;  %v1156_v18 = vld [vmem:[#allocation2 + $0x590] sm:$0xff]  ;;  %v1157_v20 = vld [vmem:[#allocation2 + $0x598] sm:$0xff] }
 0x109   :  { %1878 = vmatprep.subr.bf16.mxu0 %v13944_v29  ;;  %1919 = vmatprep.subr.bf16.mxu1 %v13946_v33  ;;  %v14015_v29 = vcombine.low %v1218_v16, %v1222_v17  ;;  %v1206_v33 = vld [vmem:[#allocation2 + $0x720] sm:$0xff]  ;;  %v14009_v38 = vcombine.low %v1211_v26, %v1215_v28 }
 0x10a   :  { %v14000_v39 = vcombine.high %v1202_v32, %v1206_v33 }
 0x10c   :  { %1879 = vmatpush1.bf16.msra.mxu0 %v13943_v35  ;;  %1920 = vmatpush1.bf16.msra.mxu1 %v13945_v36  ;;  %v14010_v35 = vcombine.high %v1211_v26, %v1215_v28  ;;  %v1207_v36 = vld [vmem:[#allocation2 + $0x728] sm:$0xff]  ;;  %v1148_v26 = vld [vmem:[#allocation2 + $0x550] sm:$0xff]  ;;  %v1149_v28 = vld [vmem:[#allocation2 + $0x558] sm:$0xff] }
 0x10d   :  { %1880 = vmatprep.subr.bf16.mxu0 %v13936_v37  ;;  %1921 = vmatprep.subr.bf16.mxu1 %v13938_v41  ;;  %v14007_v37 = vcombine.low %v1210_v24, %v1214_v25  ;;  %v1198_v41 = vld [vmem:[#allocation2 + $0x6e0] sm:$0xff]  ;;  %v14001_v46 = vcombine.low %v1203_v34, %v1207_v36 }
 0x10e   :  { %v13992_v47 = vcombine.high %v1194_v40, %v1198_v41 }
 0x110   :  { %1881 = vmatpush1.bf16.msra.mxu0 %v13935_v43  ;;  %1922 = vmatpush1.bf16.msra.mxu1 %v13937_v44  ;;  %v14002_v43 = vcombine.high %v1203_v34, %v1207_v36  ;;  %v1199_v44 = vld [vmem:[#allocation2 + $0x6e8] sm:$0xff]  ;;  %v1140_v34 = vld [vmem:[#allocation2 + $0x510] sm:$0xff]  ;;  %v1141_v36 = vld [vmem:[#allocation2 + $0x518] sm:$0xff] }
 0x111   :  { %1882 = vmatprep.subr.bf16.mxu0 %v13928_v45  ;;  %1923 = vmatprep.subr.bf16.mxu1 %v13930_v49  ;;  %v13999_v45 = vcombine.low %v1202_v32, %v1206_v33  ;;  %v1190_v49 = vld [vmem:[#allocation2 + $0x6a0] sm:$0xff]  ;;  %v13993_v54 = vcombine.low %v1195_v42, %v1199_v44 }
 0x112   :  { %v13984_v55 = vcombine.high %v1186_v48, %v1190_v49 }
 0x114   :  { %1883 = vmatpush1.bf16.msra.mxu0 %v13927_v51  ;;  %1924 = vmatpush1.bf16.msra.mxu1 %v13929_v52  ;;  %v13994_v51 = vcombine.high %v1195_v42, %v1199_v44  ;;  %v1191_v52 = vld [vmem:[#allocation2 + $0x6a8] sm:$0xff]  ;;  %v1132_v42 = vld [vmem:[#allocation2 + $0x4d0] sm:$0xff]  ;;  %v1133_v44 = vld [vmem:[#allocation2 + $0x4d8] sm:$0xff] }
 0x115   :  { %1884 = vmatprep.subr.bf16.mxu0 %v13920_v53  ;;  %1925 = vmatprep.subr.bf16.mxu1 %v13922_v58  ;;  %v13991_v53 = vcombine.low %v1194_v40, %v1198_v41  ;;  %v1182_v58 = vld [vmem:[#allocation2 + $0x660] sm:$0xff]  ;;  %v13985_v63 = vcombine.low %v1187_v50, %v1191_v52 }
 0x116   :  { %v13976_v0 = vcombine.high %v1178_v56, %v1182_v58 }
 0x118   :  { %1885 = vmatpush1.bf16.msra.mxu0 %v13919_v60  ;;  %1926 = vmatpush1.bf16.msra.mxu1 %v13921_v61  ;;  %v13986_v60 = vcombine.high %v1187_v50, %v1191_v52  ;;  %v1183_v61 = vld [vmem:[#allocation2 + $0x668] sm:$0xff]  ;;  %v1124_v50 = vld [vmem:[#allocation2 + $0x490] sm:$0xff]  ;;  %v1125_v52 = vld [vmem:[#allocation2 + $0x498] sm:$0xff] }
 0x119   :  { %1886 = vmatprep.subr.bf16.mxu0 %v13912_v62  ;;  %1927 = vmatprep.subr.bf16.mxu1 %v13914_v2  ;;  %v13983_v62 = vcombine.low %v1186_v48, %v1190_v49  ;;  %v1174_v2 = vld [vmem:[#allocation2 + $0x620] sm:$0xff]  ;;  %v13977_v7 = vcombine.low %v1179_v59, %v1183_v61 }
 0x11a   :  { %v13968_v8 = vcombine.high %v1170_v1, %v1174_v2 }
 0x11c   :  { %1887 = vmatpush1.bf16.msra.mxu0 %v13911_v4  ;;  %1928 = vmatpush1.bf16.msra.mxu1 %v13913_v5  ;;  %v13978_v4 = vcombine.high %v1179_v59, %v1183_v61  ;;  %v1175_v5 = vld [vmem:[#allocation2 + $0x628] sm:$0xff]  ;;  %v1116_v59 = vld [vmem:[#allocation2 + $0x450] sm:$0xff]  ;;  %v1117_v61 = vld [vmem:[#allocation2 + $0x458] sm:$0xff] }
 0x11d   :  { %1888 = vmatprep.subr.bf16.mxu0 %v13904_v6  ;;  %1929 = vmatprep.subr.bf16.mxu1 %v13906_v10  ;;  %v13975_v6 = vcombine.low %v1178_v56, %v1182_v58  ;;  %v1168_v10 = vld [vmem:[#allocation2 + $0x5f0] sm:$0xff]  ;;  %v13969_v16 = vcombine.low %v1171_v3, %v1175_v5 }
 0x11e   :  { %v13964_v17 = vcombine.high %v1164_v9, %v1168_v10 }
 0x120   :  { %1889 = vmatpush1.bf16.msra.mxu0 %v13903_v13  ;;  %1930 = vmatpush1.bf16.msra.mxu1 %v13905_v14  ;;  %v13970_v13 = vcombine.high %v1171_v3, %v1175_v5  ;;  %v1169_v14 = vld [vmem:[#allocation2 + $0x5f8] sm:$0xff]  ;;  %v1108_v3 = vld [vmem:[#allocation2 + $0x410] sm:$0xff] }
 0x121   :  { %1890 = vmatprep.subr.bf16.mxu0 %v14024_v15  ;;  %1931 = vmatprep.subr.bf16.mxu1 %v14026_v19  ;;  %v13967_v15 = vcombine.low %v1170_v1, %v1174_v2  ;;  %v1160_v19 = vld [vmem:[#allocation2 + $0x5b0] sm:$0xff]  ;;  %v13965_v24 = vcombine.low %v1165_v11, %v1169_v14  ;;  %v1109_v5 = vld [vmem:[#allocation2 + $0x418] sm:$0xff] }
 0x122   :  { %v13956_v25 = vcombine.high %v1156_v18, %v1160_v19 }
 0x124   :  { %1891 = vmatpush2.bf16.msra.mxu0 %v14023_v21  ;;  %1932 = vmatpush2.bf16.msra.mxu1 %v14025_v22  ;;  %v13966_v21 = vcombine.high %v1165_v11, %v1169_v14  ;;  %v1161_v22 = vld [vmem:[#allocation2 + $0x5b8] sm:$0xff]  ;;  %v1228_v11 = vld [vmem:[#allocation2 + $0x7d0] sm:$0xff] }
 0x125   :  { %1892 = vmatprep.subr.bf16.mxu0 %v14016_v23  ;;  %1933 = vmatprep.subr.bf16.mxu1 %v14018_v27  ;;  %v13963_v23 = vcombine.low %v1164_v9, %v1168_v10  ;;  %v1152_v27 = vld [vmem:[#allocation2 + $0x570] sm:$0xff]  ;;  %v13957_v32 = vcombine.low %v1157_v20, %v1161_v22  ;;  %v1229_v14 = vld [vmem:[#allocation2 + $0x7d8] sm:$0xff] }
 0x126   :  { %v13948_v33 = vcombine.high %v1148_v26, %v1152_v27 }
 0x128   :  { %1893 = vmatpush2.bf16.msra.mxu0 %v14015_v29  ;;  %1934 = vmatpush2.bf16.msra.mxu1 %v14017_v30  ;;  %v13958_v29 = vcombine.high %v1157_v20, %v1161_v22  ;;  %v1153_v30 = vld [vmem:[#allocation2 + $0x578] sm:$0xff]  ;;  %v1220_v20 = vld [vmem:[#allocation2 + $0x790] sm:$0xff] }
 0x129   :  { %1894 = vmatprep.subr.bf16.mxu0 %v14008_v31  ;;  %1935 = vmatprep.subr.bf16.mxu1 %v14010_v35  ;;  %v13955_v31 = vcombine.low %v1156_v18, %v1160_v19  ;;  %v1144_v35 = vld [vmem:[#allocation2 + $0x530] sm:$0xff]  ;;  %v13949_v40 = vcombine.low %v1149_v28, %v1153_v30  ;;  %v1221_v22 = vld [vmem:[#allocation2 + $0x798] sm:$0xff] }
 0x12a   :  { %v13940_v41 = vcombine.high %v1140_v34, %v1144_v35 }
 0x12c   :  { %1895 = vmatpush2.bf16.msra.mxu0 %v14007_v37  ;;  %1936 = vmatpush2.bf16.msra.mxu1 %v14009_v38  ;;  %v13950_v37 = vcombine.high %v1149_v28, %v1153_v30  ;;  %v1145_v38 = vld [vmem:[#allocation2 + $0x538] sm:$0xff]  ;;  %v1212_v28 = vld [vmem:[#allocation2 + $0x750] sm:$0xff] }
 0x12d   :  { %1896 = vmatprep.subr.bf16.mxu0 %v14000_v39  ;;  %1937 = vmatprep.subr.bf16.mxu1 %v14002_v43  ;;  %v13947_v39 = vcombine.low %v1148_v26, %v1152_v27  ;;  %v1136_v43 = vld [vmem:[#allocation2 + $0x4f0] sm:$0xff]  ;;  %v13941_v48 = vcombine.low %v1141_v36, %v1145_v38  ;;  %v1213_v30 = vld [vmem:[#allocation2 + $0x758] sm:$0xff] }
 0x12e   :  { %v13932_v49 = vcombine.high %v1132_v42, %v1136_v43 }
 0x130   :  { %1897 = vmatpush2.bf16.msra.mxu0 %v13999_v45  ;;  %1938 = vmatpush2.bf16.msra.mxu1 %v14001_v46  ;;  %v13942_v45 = vcombine.high %v1141_v36, %v1145_v38  ;;  %v1137_v46 = vld [vmem:[#allocation2 + $0x4f8] sm:$0xff]  ;;  %v1204_v36 = vld [vmem:[#allocation2 + $0x710] sm:$0xff] }
 0x131   :  { %1898 = vmatprep.subr.bf16.mxu0 %v13992_v47  ;;  %1939 = vmatprep.subr.bf16.mxu1 %v13994_v51  ;;  %v13939_v47 = vcombine.low %v1140_v34, %v1144_v35  ;;  %v1128_v51 = vld [vmem:[#allocation2 + $0x4b0] sm:$0xff]  ;;  %v13933_v56 = vcombine.low %v1133_v44, %v1137_v46  ;;  %v1205_v38 = vld [vmem:[#allocation2 + $0x718] sm:$0xff] }
 0x132   :  { %v13924_v58 = vcombine.high %v1124_v50, %v1128_v51 }
 0x134   :  { %1899 = vmatpush2.bf16.msra.mxu0 %v13991_v53  ;;  %1940 = vmatpush2.bf16.msra.mxu1 %v13993_v54  ;;  %v13934_v53 = vcombine.high %v1133_v44, %v1137_v46  ;;  %v1129_v54 = vld [vmem:[#allocation2 + $0x4b8] sm:$0xff]  ;;  %v1196_v44 = vld [vmem:[#allocation2 + $0x6d0] sm:$0xff] }
 0x135   :  { %1900 = vmatprep.subr.bf16.mxu0 %v13984_v55  ;;  %1941 = vmatprep.subr.bf16.mxu1 %v13986_v60  ;;  %v13931_v55 = vcombine.low %v1132_v42, %v1136_v43  ;;  %v1120_v60 = vld [vmem:[#allocation2 + $0x470] sm:$0xff]  ;;  %v13925_v1 = vcombine.low %v1125_v52, %v1129_v54  ;;  %v1197_v46 = vld [vmem:[#allocation2 + $0x6d8] sm:$0xff] }
 0x136   :  { %v13916_v2 = vcombine.high %v1116_v59, %v1120_v60 }
 0x138   :  { %1901 = vmatpush2.bf16.msra.mxu0 %v13983_v62  ;;  %1942 = vmatpush2.bf16.msra.mxu1 %v13985_v63  ;;  %v13926_v62 = vcombine.high %v1125_v52, %v1129_v54  ;;  %v1121_v63 = vld [vmem:[#allocation2 + $0x478] sm:$0xff]  ;;  %v1188_v52 = vld [vmem:[#allocation2 + $0x690] sm:$0xff] }
 0x139   :  { %1902 = vmatprep.subr.bf16.mxu0 %v13976_v0  ;;  %1943 = vmatprep.subr.bf16.mxu1 %v13978_v4  ;;  %v13923_v0 = vcombine.low %v1124_v50, %v1128_v51  ;;  %v1112_v4 = vld [vmem:[#allocation2 + $0x430] sm:$0xff]  ;;  %v13917_v9 = vcombine.low %v1117_v61, %v1121_v63  ;;  %v1189_v54 = vld [vmem:[#allocation2 + $0x698] sm:$0xff] }
 0x13a   :  { %v13908_v10 = vcombine.high %v1108_v3, %v1112_v4 }
 0x13c   :  { %1903 = vmatpush2.bf16.msra.mxu0 %v13975_v6  ;;  %1944 = vmatpush2.bf16.msra.mxu1 %v13977_v7  ;;  %v13918_v6 = vcombine.high %v1117_v61, %v1121_v63  ;;  %v1113_v7 = vld [vmem:[#allocation2 + $0x438] sm:$0xff]  ;;  %v1180_v61 = vld [vmem:[#allocation2 + $0x650] sm:$0xff] }
 0x13d   :  { %1904 = vmatprep.subr.bf16.mxu0 %v13968_v8  ;;  %1945 = vmatprep.subr.bf16.mxu1 %v13970_v13  ;;  %v13915_v8 = vcombine.low %v1116_v59, %v1120_v60  ;;  %v1232_v13 = vld [vmem:[#allocation2 + $0x7f0] sm:$0xff]  ;;  %v13909_v18 = vcombine.low %v1109_v5, %v1113_v7  ;;  %v1181_v63 = vld [vmem:[#allocation2 + $0x658] sm:$0xff] }
 0x13e   :  { %v14028_v19 = vcombine.high %v1228_v11, %v1232_v13 }
 0x140   :  { %1905 = vmatpush2.bf16.msra.mxu0 %v13967_v15  ;;  %1946 = vmatpush2.bf16.msra.mxu1 %v13969_v16  ;;  %v13910_v15 = vcombine.high %v1109_v5, %v1113_v7  ;;  %v1233_v16 = vld [vmem:[#allocation2 + $0x7f8] sm:$0xff]  ;;  %v1172_v5 = vld [vmem:[#allocation2 + $0x610] sm:$0xff] }
 0x141   :  { %1956 = vmatprep.subr.bf16.mxu0 %v13964_v17  ;;  %1997 = vmatprep.subr.bf16.mxu1 %v13966_v21  ;;  %v13907_v17 = vcombine.low %v1108_v3, %v1112_v4  ;;  %v1224_v21 = vld [vmem:[#allocation2 + $0x7b0] sm:$0xff]  ;;  %v14029_v26 = vcombine.low %v1229_v14, %v1233_v16  ;;  %v1173_v7 = vld [vmem:[#allocation2 + $0x618] sm:$0xff] }
 0x142   :  { %v14020_v27 = vcombine.high %v1220_v20, %v1224_v21 }
 0x143   :  { %1907 = vmatmul.mubr.bf16.vlgmr.msra.gmra.mxu0 %v17977_v12  ;;  %1948 = vmatmul.mubr.bf16.vlgmr.msra.gmra.mxu1 %v17977_v12 }
 0x144   :  { %1957 = vmatpush1.bf16.msra.mxu0 %v13963_v23  ;;  %1998 = vmatpush1.bf16.msra.mxu1 %v13965_v24  ;;  %v14030_v23 = vcombine.high %v1229_v14, %v1233_v16  ;;  %v1225_v24 = vld [vmem:[#allocation2 + $0x7b8] sm:$0xff]  ;;  %v2103_v14 = vld [vmem:[#allocation2 + $0x9c0] sm:$0xff]  ;;  %v2104_v16 = vld [vmem:[#allocation2 + $0x9c8] sm:$0xff] }
 0x145   :  { %1958 = vmatprep.subr.bf16.mxu0 %v13956_v25  ;;  %1999 = vmatprep.subr.bf16.mxu1 %v13958_v29  ;;  %v14027_v25 = vcombine.low %v1228_v11, %v1232_v13  ;;  %v1216_v29 = vld [vmem:[#allocation2 + $0x770] sm:$0xff]  ;;  %v14021_v34 = vcombine.low %v1221_v22, %v1225_v24 }
 0x146   :  { %1988 = vmatprep.mubr.bf16.mxu0 %v17970_v57  ;;  %2029 = vmatprep.mubr.bf16.mxu1 %v17970_v57  ;;  %v14012_v35 = vcombine.high %v1212_v28, %v1216_v29 }
 0x148   :  { %1959 = vmatpush1.bf16.msra.mxu0 %v13955_v31  ;;  %2000 = vmatpush1.bf16.msra.mxu1 %v13957_v32  ;;  %v14022_v31 = vcombine.high %v1221_v22, %v1225_v24  ;;  %v1217_v32 = vld [vmem:[#allocation2 + $0x778] sm:$0xff]  ;;  %v2095_v22 = vld [vmem:[#allocation2 + $0x980] sm:$0xff]  ;;  %v2096_v24 = vld [vmem:[#allocation2 + $0x988] sm:$0xff] }
 0x149   :  { %1960 = vmatprep.subr.bf16.mxu0 %v13948_v33  ;;  %2001 = vmatprep.subr.bf16.mxu1 %v13950_v37  ;;  %v14019_v33 = vcombine.low %v1220_v20, %v1224_v21  ;;  %v1208_v37 = vld [vmem:[#allocation2 + $0x730] sm:$0xff]  ;;  %v14013_v42 = vcombine.low %v1213_v30, %v1217_v32 }
 0x14a   :  { %v14004_v43 = vcombine.high %v1204_v36, %v1208_v37 }
 0x14c   :  { %1961 = vmatpush1.bf16.msra.mxu0 %v13947_v39  ;;  %2002 = vmatpush1.bf16.msra.mxu1 %v13949_v40  ;;  %v14014_v39 = vcombine.high %v1213_v30, %v1217_v32  ;;  %v1209_v40 = vld [vmem:[#allocation2 + $0x738] sm:$0xff]  ;;  %v2087_v30 = vld [vmem:[#allocation2 + $0x940] sm:$0xff]  ;;  %v2088_v32 = vld [vmem:[#allocation2 + $0x948] sm:$0xff] }
 0x14d   :  { %1962 = vmatprep.subr.bf16.mxu0 %v13940_v41  ;;  %2003 = vmatprep.subr.bf16.mxu1 %v13942_v45  ;;  %v14011_v41 = vcombine.low %v1212_v28, %v1216_v29  ;;  %v1200_v45 = vld [vmem:[#allocation2 + $0x6f0] sm:$0xff]  ;;  %v14005_v50 = vcombine.low %v1205_v38, %v1209_v40 }
 0x14e   :  { %v13996_v51 = vcombine.high %v1196_v44, %v1200_v45 }
 0x150   :  { %1963 = vmatpush1.bf16.msra.mxu0 %v13939_v47  ;;  %2004 = vmatpush1.bf16.msra.mxu1 %v13941_v48  ;;  %v14006_v47 = vcombine.high %v1205_v38, %v1209_v40  ;;  %v1201_v48 = vld [vmem:[#allocation2 + $0x6f8] sm:$0xff] }
 0x151   :  { %1964 = vmatprep.subr.bf16.mxu0 %v13932_v49  ;;  %2005 = vmatprep.subr.bf16.mxu1 %v13934_v53  ;;  %v14003_v49 = vcombine.low %v1204_v36, %v1208_v37  ;;  %v1192_v53 = vld [vmem:[#allocation2 + $0x6b0] sm:$0xff]  ;;  %v13997_v59 = vcombine.low %v1197_v46, %v1201_v48 }
 0x152   :  { %v13988_v60 = vcombine.high %v1188_v52, %v1192_v53 }
 0x154   :  { %1965 = vmatpush1.bf16.msra.mxu0 %v13931_v55  ;;  %2006 = vmatpush1.bf16.msra.mxu1 %v13933_v56  ;;  %v13998_v55 = vcombine.high %v1197_v46, %v1201_v48  ;;  %v1193_v56 = vld [vmem:[#allocation2 + $0x6b8] sm:$0xff]  ;;  %v2084_v46 = vld [vmem:[#allocation2 + $0x928] sm:$0xff] }
 0x155   :  { %1966 = vmatprep.subr.bf16.mxu0 %v13924_v58  ;;  %2007 = vmatprep.subr.bf16.mxu1 %v13926_v62  ;;  %v13995_v58 = vcombine.low %v1196_v44, %v1200_v45  ;;  %v1184_v62 = vld [vmem:[#allocation2 + $0x670] sm:$0xff]  ;;  %v13989_v3 = vcombine.low %v1189_v54, %v1193_v56 }
 0x156   :  { %v13980_v4 = vcombine.high %v1180_v61, %v1184_v62 }
 0x158   :  { %1967 = vmatpush1.bf16.msra.mxu0 %v13923_v0  ;;  %2008 = vmatpush1.bf16.msra.mxu1 %v13925_v1  ;;  %v13990_v0 = vcombine.high %v1189_v54, %v1193_v56  ;;  %v1185_v1 = vld [vmem:[#allocation2 + $0x678] sm:$0xff]  ;;  %v2075_v54 = vld [vmem:[#allocation2 + $0x8e0] sm:$0xff] }
 0x159   :  { %1968 = vmatprep.subr.bf16.mxu0 %v13916_v2  ;;  %2009 = vmatprep.subr.bf16.mxu1 %v13918_v6  ;;  %v13987_v2 = vcombine.low %v1188_v52, %v1192_v53  ;;  %v1176_v6 = vld [vmem:[#allocation2 + $0x630] sm:$0xff]  ;;  %v13981_v11 = vcombine.low %v1181_v63, %v1185_v1  ;;  %v2071_v53 = vld [vmem:[#allocation2 + $0x8c0] sm:$0xff] }
 0x15a   :  { %v13972_v13 = vcombine.high %v1172_v5, %v1176_v6 }
 0x15c   :  { %1969 = vmatpush1.bf16.msra.mxu0 %v13915_v8  ;;  %2010 = vmatpush1.bf16.msra.mxu1 %v13917_v9  ;;  %v13982_v8 = vcombine.high %v1181_v63, %v1185_v1  ;;  %v1177_v9 = vld [vmem:[#allocation2 + $0x638] sm:$0xff]  ;;  %v2063_v63 = vld [vmem:[#allocation2 + $0x880] sm:$0xff]  ;;  %v2064_v1 = vld [vmem:[#allocation2 + $0x888] sm:$0xff] }
 0x15d   :  { %1970 = vmatprep.subr.bf16.mxu0 %v13908_v10  ;;  %2011 = vmatprep.subr.bf16.mxu1 %v13910_v15  ;;  %v13979_v10 = vcombine.low %v1180_v61, %v1184_v62  ;;  %v2107_v15 = vld [vmem:[#allocation2 + $0x9e0] sm:$0xff]  ;;  %v13973_v20 = vcombine.low %v1173_v7, %v1177_v9  ;;  %v14056_v62 = vcombine.high %v2071_v53, %v2075_v54 }
 0x15e   :  { %v14088_v21 = vcombine.high %v2103_v14, %v2107_v15 }
 0x160   :  { %1971 = vmatpush1.bf16.msra.mxu0 %v13907_v17  ;;  %2012 = vmatpush1.bf16.msra.mxu1 %v13909_v18  ;;  %v13974_v17 = vcombine.high %v1173_v7, %v1177_v9  ;;  %v2108_v18 = vld [vmem:[#allocation2 + $0x9e8] sm:$0xff]  ;;  %v2055_v7 = vld [vmem:[#allocation2 + $0x840] sm:$0xff] }
 0x161   :  { %1972 = vmatprep.subr.bf16.mxu0 %v14028_v19  ;;  %2013 = vmatprep.subr.bf16.mxu1 %v14030_v23  ;;  %v13971_v19 = vcombine.low %v1172_v5, %v1176_v6  ;;  %v2099_v23 = vld [vmem:[#allocation2 + $0x9a0] sm:$0xff]  ;;  %v14089_v28 = vcombine.low %v2104_v16, %v2108_v18  ;;  %v2056_v9 = vld [vmem:[#allocation2 + $0x848] sm:$0xff] }
 0x162   :  { %v14080_v29 = vcombine.high %v2095_v22, %v2099_v23  ;;  %v14079_v37 = vcombine.low %v2095_v22, %v2099_v23 }
 0x164   :  { %1973 = vmatpush2.bf16.msra.mxu0 %v14027_v25  ;;  %2014 = vmatpush2.bf16.msra.mxu1 %v14029_v26  ;;  %v14090_v25 = vcombine.high %v2104_v16, %v2108_v18  ;;  %v2100_v26 = vld [vmem:[#allocation2 + $0x9a8] sm:$0xff]  ;;  %v2047_v16 = vld [vmem:[#allocation2 + $0x800] sm:$0xff] }
 0x165   :  { %1974 = vmatprep.subr.bf16.mxu0 %v14020_v27  ;;  %2015 = vmatprep.subr.bf16.mxu1 %v14022_v31  ;;  %v14087_v27 = vcombine.low %v2103_v14, %v2107_v15  ;;  %v2091_v31 = vld [vmem:[#allocation2 + $0x960] sm:$0xff]  ;;  %v2048_v18 = vld [vmem:[#allocation2 + $0x808] sm:$0xff] }
 0x166   :  { %v14072_v40 = vcombine.high %v2087_v30, %v2091_v31 }
 0x168   :  { %1975 = vmatpush2.bf16.msra.mxu0 %v14019_v33  ;;  %2016 = vmatpush2.bf16.msra.mxu1 %v14021_v34  ;;  %v14082_v33 = vcombine.high %v2096_v24, %v2100_v26  ;;  %v2092_v34 = vld [vmem:[#allocation2 + $0x968] sm:$0xff] }
 0x169   :  { %1976 = vmatprep.subr.bf16.mxu0 %v14012_v35  ;;  %2017 = vmatprep.subr.bf16.mxu1 %v14014_v39  ;;  %v14081_v39 = vcombine.low %v2096_v24, %v2100_v26  ;;  %v14074_v45 = vcombine.high %v2088_v32, %v2092_v34  ;;  %v2167_v24 = vld [vmem:[#allocation2 + $0xbc0] sm:$0xff]  ;;  %v2168_v26 = vld [vmem:[#allocation2 + $0xbc8] sm:$0xff] }
 0x16c   :  { %1977 = vmatpush2.bf16.msra.mxu0 %v14011_v41  ;;  %2018 = vmatpush2.bf16.msra.mxu1 %v14013_v42  ;;  %v2079_v41 = vld [vmem:[#allocation2 + $0x900] sm:$0xff] }
 0x16d   :  { %1978 = vmatprep.subr.bf16.mxu0 %v14004_v43  ;;  %2019 = vmatprep.subr.bf16.mxu1 %v14006_v47  ;;  %v2083_v42 = vld [vmem:[#allocation2 + $0x920] sm:$0xff]  ;;  %v2080_v43 = vld [vmem:[#allocation2 + $0x908] sm:$0xff] }
 0x16e   :  { %v14064_v52 = vcombine.high %v2079_v41, %v2083_v42  ;;  %v14065_v61 = vcombine.low %v2080_v43, %v2084_v46 }
 0x170   :  { %1979 = vmatpush2.bf16.msra.mxu0 %v14003_v49  ;;  %2020 = vmatpush2.bf16.msra.mxu1 %v14005_v50  ;;  %v14071_v49 = vcombine.low %v2087_v30, %v2091_v31 }
 0x171   :  { %1980 = vmatprep.subr.bf16.mxu0 %v13996_v51  ;;  %2021 = vmatprep.subr.bf16.mxu1 %v13998_v55  ;;  %v14073_v51 = vcombine.low %v2088_v32, %v2092_v34  ;;  %v2072_v55 = vld [vmem:[#allocation2 + $0x8c8] sm:$0xff]  ;;  %v2159_v32 = vld [vmem:[#allocation2 + $0xb80] sm:$0xff] }
 0x172   :  { %v2160_v34 = vld [vmem:[#allocation2 + $0xb88] sm:$0xff] }
 0x174   :  { %1981 = vmatpush2.bf16.msra.mxu0 %v13995_v58  ;;  %2022 = vmatpush2.bf16.msra.mxu1 %v13997_v59  ;;  %v14066_v58 = vcombine.high %v2080_v43, %v2084_v46  ;;  %v2076_v59 = vld [vmem:[#allocation2 + $0x8e8] sm:$0xff]  ;;  %v2151_v43 = vld [vmem:[#allocation2 + $0xb40] sm:$0xff] }
 0x175   :  { %1982 = vmatprep.subr.bf16.mxu0 %v13988_v60  ;;  %2023 = vmatprep.subr.bf16.mxu1 %v13990_v0  ;;  %v14063_v60 = vcombine.low %v2079_v41, %v2083_v42  ;;  %v2067_v0 = vld [vmem:[#allocation2 + $0x8a0] sm:$0xff]  ;;  %v14057_v5 = vcombine.low %v2072_v55, %v2076_v59  ;;  %v2152_v46 = vld [vmem:[#allocation2 + $0xb48] sm:$0xff] }
 0x176   :  { %v14048_v6 = vcombine.high %v2063_v63, %v2067_v0 }
 0x178   :  { %1983 = vmatpush2.bf16.msra.mxu0 %v13987_v2  ;;  %2024 = vmatpush2.bf16.msra.mxu1 %v13989_v3  ;;  %v14058_v2 = vcombine.high %v2072_v55, %v2076_v59  ;;  %v2068_v3 = vld [vmem:[#allocation2 + $0x8a8] sm:$0xff] }
 0x179   :  { %1984 = vmatprep.subr.bf16.mxu0 %v13980_v4  ;;  %2025 = vmatprep.subr.bf16.mxu1 %v13982_v8  ;;  %v14055_v4 = vcombine.low %v2071_v53, %v2075_v54  ;;  %v2059_v8 = vld [vmem:[#allocation2 + $0x860] sm:$0xff]  ;;  %v14049_v14 = vcombine.low %v2064_v1, %v2068_v3  ;;  %v2144_v54 = vld [vmem:[#allocation2 + $0xb08] sm:$0xff] }
 0x17a   :  { %v14040_v15 = vcombine.high %v2055_v7, %v2059_v8  ;;  %v2147_v53 = vld [vmem:[#allocation2 + $0xb20] sm:$0xff] }
 0x17c   :  { %1985 = vmatpush2.bf16.msra.mxu0 %v13979_v10  ;;  %2026 = vmatpush2.bf16.msra.mxu1 %v13981_v11  ;;  %v14050_v10 = vcombine.high %v2064_v1, %v2068_v3  ;;  %v2060_v11 = vld [vmem:[#allocation2 + $0x868] sm:$0xff] }
 0x17d   :  { %1986 = vmatprep.subr.bf16.mxu0 %v13972_v13  ;;  %2027 = vmatprep.subr.bf16.mxu1 %v13974_v17  ;;  %v14047_v13 = vcombine.low %v2063_v63, %v2067_v0  ;;  %v2051_v17 = vld [vmem:[#allocation2 + $0x820] sm:$0xff]  ;;  %v14041_v22 = vcombine.low %v2056_v9, %v2060_v11  ;;  %v2136_v63 = vld [vmem:[#allocation2 + $0xac8] sm:$0xff] }
 0x17e   :  { %v14032_v23 = vcombine.high %v2047_v16, %v2051_v17  ;;  %v2140_v1 = vld [vmem:[#allocation2 + $0xae8] sm:$0xff] }
 0x180   :  { %1987 = vmatpush2.bf16.msra.mxu0 %v13971_v19  ;;  %2028 = vmatpush2.bf16.msra.mxu1 %v13973_v20  ;;  %v14042_v19 = vcombine.high %v2056_v9, %v2060_v11  ;;  %v2052_v20 = vld [vmem:[#allocation2 + $0x828] sm:$0xff]  ;;  %v14121_v11 = vcombine.low %v2136_v63, %v2140_v1 }
 0x181   :  { %2815 = vmatprep.subr.bf16.mxu0 %v14088_v21  ;;  %2856 = vmatprep.subr.bf16.mxu1 %v14090_v25  ;;  %v14039_v21 = vcombine.low %v2055_v7, %v2059_v8  ;;  %v2171_v25 = vld [vmem:[#allocation2 + $0xbe0] sm:$0xff]  ;;  %v14033_v30 = vcombine.low %v2048_v18, %v2052_v20  ;;  %v2128_v7 = vld [vmem:[#allocation2 + $0xa88] sm:$0xff]  ;;  %v14122_v8 = vcombine.high %v2136_v63, %v2140_v1  ;;  %v2085_v63 = vld [vmem:[#allocation2 + $0x930] sm:$0xff] }
 0x182   :  { %v14152_v31 = vcombine.high %v2167_v24, %v2171_v25  ;;  %v2132_v9 = vld [vmem:[#allocation2 + $0xaa8] sm:$0xff] }
 0x183   :  { %v17991_v35 = vpop.f32.mrf.mxu0  ;;  %1989 = vmatmul.mubr.bf16.vlgmr.msra.gmra.mxu0 %v17977_v12  ;;  %v17994_v36 = vpop.f32.mrf.mxu1  ;;  %2030 = vmatmul.mubr.bf16.vlgmr.msra.gmra.mxu1 %v17977_v12 }
 0x184   :  { %2816 = vmatpush1.bf16.msra.mxu0 %v14087_v27  ;;  %2857 = vmatpush1.bf16.msra.mxu1 %v14089_v28  ;;  %v14034_v27 = vcombine.high %v2048_v18, %v2052_v20  ;;  %v2172_v28 = vld [vmem:[#allocation2 + $0xbe8] sm:$0xff]  ;;  %v14113_v20 = vcombine.low %v2128_v7, %v2132_v9 }
 0x185   :  { %v17997_v38 = vpop.f32.mrf.mxu0  ;;  %2817 = vmatprep.subr.bf16.mxu0 %v14080_v29  ;;  %v17999_v44 = vpop.f32.mrf.mxu1  ;;  %2858 = vmatprep.subr.bf16.mxu1 %v14082_v33  ;;  %v14031_v29 = vcombine.low %v2047_v16, %v2051_v17  ;;  %v2163_v33 = vld [vmem:[#allocation2 + $0xba0] sm:$0xff]  ;;  %v14153_v41 = vcombine.low %v2168_v26, %v2172_v28  ;;  %v2120_v16 = vld [vmem:[#allocation2 + $0xa48] sm:$0xff]  ;;  %v14114_v17 = vcombine.high %v2128_v7, %v2132_v9 }
 0x186   :  { %2847 = vmatprep.mubr.bf16.mxu0 %v17970_v57  ;;  %2888 = vmatprep.mubr.bf16.mxu1 %v17970_v57  ;;  %v14144_v42 = vcombine.high %v2159_v32, %v2163_v33  ;;  %v2124_v18 = vld [vmem:[#allocation2 + $0xa68] sm:$0xff] }
 0x187   :  { %v979_v47 = vpop.f32.mrf.mxu0  ;;  %v1020_v48 = vpop.f32.mrf.mxu1 }
 0x188   :  { %2818 = vmatpush1.bf16.msra.mxu0 %v14079_v37  ;;  %2859 = vmatpush1.bf16.msra.mxu1 %v14081_v39  ;;  %v14154_v37 = vcombine.high %v2168_v26, %v2172_v28  ;;  %v2164_v39 = vld [vmem:[#allocation2 + $0xba8] sm:$0xff]  ;;  %v14105_v28 = vcombine.low %v2120_v16, %v2124_v18 }
 0x189   :  { %v980_v50 = vpop.f32.mrf.mxu0  ;;  %2819 = vmatprep.subr.bf16.mxu0 %v14072_v40  ;;  %v1021_v56 = vpop.f32.mrf.mxu1  ;;  %2860 = vmatprep.subr.bf16.mxu1 %v14074_v45  ;;  %v14151_v40 = vcombine.low %v2167_v24, %v2171_v25  ;;  %v2155_v45 = vld [vmem:[#allocation2 + $0xb60] sm:$0xff]  ;;  %v14146_v47 = vcombine.high %v2160_v34, %v2164_v39  ;;  %v2156_v48 = vld [vmem:[#allocation2 + $0xb68] sm:$0xff]  ;;  %v14106_v25 = vcombine.high %v2120_v16, %v2124_v18  ;;  %v2078_v16 = vld [vmem:[#allocation2 + $0x8f8] sm:$0xff] }
 0x18a   :  { %v14145_v50 = vcombine.low %v2160_v34, %v2164_v39  ;;  %v14138_v55 = vcombine.high %v2152_v46, %v2156_v48  ;;  %v2148_v56 = vld [vmem:[#allocation2 + $0xb28] sm:$0xff]  ;;  %v14137_v59 = vcombine.low %v2152_v46, %v2156_v48  ;;  %v2110_v34 = vld [vmem:[#allocation2 + $0x9f8] sm:$0xff] }
 0x18b   :  { %v14130_v0 = vcombine.high %v2144_v54, %v2148_v56  ;;  %v14129_v3 = vcombine.low %v2144_v54, %v2148_v56  ;;  %v2112_v24 = vld [vmem:[#allocation2 + $0xa08] sm:$0xff]  ;;  %v2102_v46 = vld [vmem:[#allocation2 + $0x9b8] sm:$0xff] }
 0x18c   :  { %2820 = vmatpush1.bf16.msra.mxu0 %v14071_v49  ;;  %2861 = vmatpush1.bf16.msra.mxu1 %v14073_v51  ;;  %v14143_v49 = vcombine.low %v2159_v32, %v2163_v33  ;;  %v14136_v51 = vcombine.high %v2151_v43, %v2155_v45  ;;  %v2116_v26 = vld [vmem:[#allocation2 + $0xa28] sm:$0xff]  ;;  %v2106_v32 = vld [vmem:[#allocation2 + $0x9d8] sm:$0xff] }
 0x18d   :  { %2821 = vmatprep.subr.bf16.mxu0 %v14064_v52  ;;  %2862 = vmatprep.subr.bf16.mxu1 %v14066_v58  ;;  %v2143_v52 = vld [vmem:[#allocation2 + $0xb00] sm:$0xff]  ;;  %v14135_v58 = vcombine.low %v2151_v43, %v2155_v45  ;;  %v14098_v33 = vcombine.high %v2112_v24, %v2116_v26  ;;  %v14097_v39 = vcombine.low %v2112_v24, %v2116_v26  ;;  %v2098_v43 = vld [vmem:[#allocation2 + $0x998] sm:$0xff] }
 0x18e   :  { %v14094_v45 = vcombine.high %v2106_v32, %v2110_v34  ;;  %v14093_v48 = vcombine.low %v2106_v32, %v2110_v34  ;;  %v2094_v54 = vld [vmem:[#allocation2 + $0x978] sm:$0xff] }
 0x18f   :  { %v2070_v24 = vld [vmem:[#allocation2 + $0x8b8] sm:$0xff] }
 0x190   :  { %2822 = vmatpush1.bf16.msra.mxu0 %v14063_v60  ;;  %2863 = vmatpush1.bf16.msra.mxu1 %v14065_v61  ;;  %v14128_v60 = vcombine.high %v2143_v52, %v2147_v53  ;;  %v2135_v61 = vld [vmem:[#allocation2 + $0xac0] sm:$0xff]  ;;  %v2062_v32 = vld [vmem:[#allocation2 + $0x878] sm:$0xff] }
 0x191   :  { %2823 = vmatprep.subr.bf16.mxu0 %v14056_v62  ;;  %2864 = vmatprep.subr.bf16.mxu1 %v14058_v2  ;;  %v2139_v62 = vld [vmem:[#allocation2 + $0xae0] sm:$0xff]  ;;  %v14127_v2 = vcombine.low %v2143_v52, %v2147_v53  ;;  %v2090_v52 = vld [vmem:[#allocation2 + $0x958] sm:$0xff]  ;;  %v14086_v53 = vcombine.high %v2098_v43, %v2102_v46 }
 0x194   :  { %2824 = vmatpush1.bf16.msra.mxu0 %v14055_v4  ;;  %2865 = vmatpush1.bf16.msra.mxu1 %v14057_v5  ;;  %v14120_v4 = vcombine.high %v2135_v61, %v2139_v62  ;;  %v2127_v5 = vld [vmem:[#allocation2 + $0xa80] sm:$0xff] }
 0x195   :  { %2825 = vmatprep.subr.bf16.mxu0 %v14048_v6  ;;  %2866 = vmatprep.subr.bf16.mxu1 %v14050_v10  ;;  %v2131_v6 = vld [vmem:[#allocation2 + $0xaa0] sm:$0xff]  ;;  %v14119_v10 = vcombine.low %v2135_v61, %v2139_v62  ;;  %v2081_v62 = vld [vmem:[#allocation2 + $0x910] sm:$0xff] }
 0x196   :  { %v14068_v9 = vcombine.high %v2081_v62, %v2085_v63 }
 0x198   :  { %2826 = vmatpush1.bf16.msra.mxu0 %v14047_v13  ;;  %2867 = vmatpush1.bf16.msra.mxu1 %v14049_v14  ;;  %v14112_v13 = vcombine.high %v2127_v5, %v2131_v6  ;;  %v2119_v14 = vld [vmem:[#allocation2 + $0xa40] sm:$0xff] }
 0x199   :  { %2827 = vmatprep.subr.bf16.mxu0 %v14040_v15  ;;  %2868 = vmatprep.subr.bf16.mxu1 %v14042_v19  ;;  %v2123_v15 = vld [vmem:[#allocation2 + $0xa60] sm:$0xff]  ;;  %v14111_v19 = vcombine.low %v2127_v5, %v2131_v6 }
 0x19c   :  { %2828 = vmatpush1.bf16.msra.mxu0 %v14039_v21  ;;  %2869 = vmatpush1.bf16.msra.mxu1 %v14041_v22  ;;  %v14104_v21 = vcombine.high %v2119_v14, %v2123_v15  ;;  %v2111_v22 = vld [vmem:[#allocation2 + $0xa00] sm:$0xff] }
 0x19d   :  { %2829 = vmatprep.subr.bf16.mxu0 %v14032_v23  ;;  %2870 = vmatprep.subr.bf16.mxu1 %v14034_v27  ;;  %v2115_v23 = vld [vmem:[#allocation2 + $0xa20] sm:$0xff]  ;;  %v14103_v27 = vcombine.low %v2119_v14, %v2123_v15 }
 0x1a0   :  { %2830 = vmatpush1.bf16.msra.mxu0 %v14031_v29  ;;  %2871 = vmatpush1.bf16.msra.mxu1 %v14033_v30  ;;  %v14096_v29 = vcombine.high %v2111_v22, %v2115_v23  ;;  %v2105_v30 = vld [vmem:[#allocation2 + $0x9d0] sm:$0xff] }
 0x1a1   :  { %2831 = vmatprep.subr.bf16.mxu0 %v14152_v31  ;;  %2872 = vmatprep.subr.bf16.mxu1 %v14154_v37  ;;  %v2109_v31 = vld [vmem:[#allocation2 + $0x9f0] sm:$0xff]  ;;  %v14095_v37 = vcombine.low %v2111_v22, %v2115_v23  ;;  %v2066_v22 = vld [vmem:[#allocation2 + $0x898] sm:$0xff] }
 0x1a2   :  { %v14053_v34 = vcombine.low %v2066_v22, %v2070_v24 }
 0x1a4   :  { %2832 = vmatpush2.bf16.msra.mxu0 %v14151_v40  ;;  %2873 = vmatpush2.bf16.msra.mxu1 %v14153_v41  ;;  %v14092_v40 = vcombine.high %v2105_v30, %v2109_v31  ;;  %v2097_v41 = vld [vmem:[#allocation2 + $0x990] sm:$0xff] }
 0x1a5   :  { %2833 = vmatprep.subr.bf16.mxu0 %v14144_v42  ;;  %2874 = vmatprep.subr.bf16.mxu1 %v14146_v47  ;;  %v2101_v42 = vld [vmem:[#allocation2 + $0x9b0] sm:$0xff]  ;;  %v14091_v47 = vcombine.low %v2105_v30, %v2109_v31  ;;  %v2058_v30 = vld [vmem:[#allocation2 + $0x858] sm:$0xff]  ;;  %v14054_v31 = vcombine.high %v2066_v22, %v2070_v24 }
 0x1a6   :  { %v2137_v22 = vld [vmem:[#allocation2 + $0xad0] sm:$0xff]  ;;  %v2138_v24 = vld [vmem:[#allocation2 + $0xad8] sm:$0xff] }
 0x1a8   :  { %2834 = vmatpush2.bf16.msra.mxu0 %v14143_v49  ;;  %2875 = vmatpush2.bf16.msra.mxu1 %v14145_v50  ;;  %v14084_v49 = vcombine.high %v2097_v41, %v2101_v42  ;;  %v2089_v50 = vld [vmem:[#allocation2 + $0x950] sm:$0xff] }
 0x1a9   :  { %2835 = vmatprep.subr.bf16.mxu0 %v14136_v51  ;;  %2876 = vmatprep.subr.bf16.mxu1 %v14138_v55  ;;  %v2093_v51 = vld [vmem:[#allocation2 + $0x970] sm:$0xff] }
 0x1aa   :  { %v14076_v61 = vcombine.high %v2089_v50, %v2093_v51  ;;  %v14075_v6 = vcombine.low %v2089_v50, %v2093_v51  ;;  %v2170_v50 = vld [vmem:[#allocation2 + $0xbd8] sm:$0xff] }
 0x1ac   :  { %2836 = vmatpush2.bf16.msra.mxu0 %v14135_v58  ;;  %2877 = vmatpush2.bf16.msra.mxu1 %v14137_v59  ;;  %v14083_v58 = vcombine.low %v2097_v41, %v2101_v42  ;;  %v2050_v41 = vld [vmem:[#allocation2 + $0x818] sm:$0xff]  ;;  %v14046_v42 = vcombine.high %v2058_v30, %v2062_v32 }
 0x1ad   :  { %2837 = vmatprep.subr.bf16.mxu0 %v14128_v60  ;;  %2878 = vmatprep.subr.bf16.mxu1 %v14130_v0  ;;  %v14085_v60 = vcombine.low %v2098_v43, %v2102_v46  ;;  %v2082_v0 = vld [vmem:[#allocation2 + $0x918] sm:$0xff]  ;;  %v14045_v46 = vcombine.low %v2058_v30, %v2062_v32  ;;  %v2129_v30 = vld [vmem:[#allocation2 + $0xa90] sm:$0xff] }
 0x1ae   :  { %v2054_v43 = vld [vmem:[#allocation2 + $0x838] sm:$0xff] }
 0x1af   :  { %v14038_v51 = vcombine.high %v2050_v41, %v2054_v43  ;;  %v2130_v32 = vld [vmem:[#allocation2 + $0xa98] sm:$0xff] }
 0x1b0   :  { %2838 = vmatpush2.bf16.msra.mxu0 %v14127_v2  ;;  %2879 = vmatpush2.bf16.msra.mxu1 %v14129_v3  ;;  %v14078_v2 = vcombine.high %v2090_v52, %v2094_v54  ;;  %v2086_v3 = vld [vmem:[#allocation2 + $0x938] sm:$0xff] }
 0x1b1   :  { %2839 = vmatprep.subr.bf16.mxu0 %v14120_v4  ;;  %2880 = vmatprep.subr.bf16.mxu1 %v14122_v8  ;;  %v14077_v8 = vcombine.low %v2090_v52, %v2094_v54  ;;  %v14070_v15 = vcombine.high %v2082_v0, %v2086_v3  ;;  %v14069_v18 = vcombine.low %v2082_v0, %v2086_v3  ;;  %v2174_v52 = vld [vmem:[#allocation2 + $0xbf8] sm:$0xff] }
 0x1b2   :  { %v14037_v54 = vcombine.low %v2050_v41, %v2054_v43  ;;  %v2166_v0 = vld [vmem:[#allocation2 + $0xbb8] sm:$0xff]  ;;  %v14157_v3 = vcombine.low %v2170_v50, %v2174_v52  ;;  %v2121_v41 = vld [vmem:[#allocation2 + $0xa50] sm:$0xff] }
 0x1b3   :  { %v2122_v43 = vld [vmem:[#allocation2 + $0xa58] sm:$0xff] }
 0x1b4   :  { %2840 = vmatpush2.bf16.msra.mxu0 %v14119_v10  ;;  %2881 = vmatpush2.bf16.msra.mxu1 %v14121_v11  ;;  %v2073_v10 = vld [vmem:[#allocation2 + $0x8d0] sm:$0xff] }
 0x1b5   :  { %2841 = vmatprep.subr.bf16.mxu0 %v14112_v13  ;;  %2882 = vmatprep.subr.bf16.mxu1 %v14114_v17  ;;  %v2077_v11 = vld [vmem:[#allocation2 + $0x8f0] sm:$0xff]  ;;  %v2074_v13 = vld [vmem:[#allocation2 + $0x8d8] sm:$0xff]  ;;  %v14067_v17 = vcombine.low %v2081_v62, %v2085_v63  ;;  %v14158_v63 = vcombine.high %v2170_v50, %v2174_v52 }
 0x1b6   :  { %v14062_v23 = vcombine.high %v2074_v13, %v2078_v16  ;;  %v14061_v26 = vcombine.low %v2074_v13, %v2078_v16  ;;  %v2162_v62 = vld [vmem:[#allocation2 + $0xb98] sm:$0xff]  ;;  %v2113_v50 = vld [vmem:[#allocation2 + $0xa10] sm:$0xff] }
 0x1b7   :  { %v2146_v16 = vld [vmem:[#allocation2 + $0xb18] sm:$0xff] }
 0x1b8   :  { %2842 = vmatpush2.bf16.msra.mxu0 %v14111_v19  ;;  %2883 = vmatpush2.bf16.msra.mxu1 %v14113_v20  ;;  %v14060_v19 = vcombine.high %v2073_v10, %v2077_v11  ;;  %v2065_v20 = vld [vmem:[#allocation2 + $0x890] sm:$0xff]  ;;  %v2114_v52 = vld [vmem:[#allocation2 + $0xa18] sm:$0xff] }
 0x1b9   :  { %2843 = vmatprep.subr.bf16.mxu0 %v14104_v21  ;;  %2884 = vmatprep.subr.bf16.mxu1 %v14106_v25  ;;  %v2069_v21 = vld [vmem:[#allocation2 + $0x8b0] sm:$0xff]  ;;  %v14059_v25 = vcombine.low %v2073_v10, %v2077_v11  ;;  %v14149_v11 = vcombine.low %v2162_v62, %v2166_v0 }
 0x1bc   :  { %2844 = vmatpush2.bf16.msra.mxu0 %v14103_v27  ;;  %2885 = vmatpush2.bf16.msra.mxu1 %v14105_v28  ;;  %v14052_v27 = vcombine.high %v2065_v20, %v2069_v21  ;;  %v2057_v28 = vld [vmem:[#allocation2 + $0x850] sm:$0xff] }
 0x1bd   :  { %2845 = vmatprep.subr.bf16.mxu0 %v14096_v29  ;;  %2886 = vmatprep.subr.bf16.mxu1 %v14098_v33  ;;  %v2061_v29 = vld [vmem:[#allocation2 + $0x870] sm:$0xff]  ;;  %v14051_v33 = vcombine.low %v2065_v20, %v2069_v21 }
 0x1c0   :  { %2846 = vmatpush2.bf16.msra.mxu0 %v14095_v37  ;;  %2887 = vmatpush2.bf16.msra.mxu1 %v14097_v39  ;;  %v14044_v37 = vcombine.high %v2057_v28, %v2061_v29  ;;  %v2049_v39 = vld [vmem:[#allocation2 + $0x810] sm:$0xff] }
 0x1c1   :  { %2897 = vmatprep.subr.bf16.mxu0 %v14092_v40  ;;  %2938 = vmatprep.subr.bf16.mxu1 %v14094_v45  ;;  %v2053_v40 = vld [vmem:[#allocation2 + $0x830] sm:$0xff]  ;;  %v14043_v45 = vcombine.low %v2057_v28, %v2061_v29 }
 0x1c3   :  { %v18003_v55 = vpop.f32.mrf.mxu0  ;;  %2848 = vmatmul.mubr.bf16.vlgmr.msra.gmra.mxu0 %v17977_v12  ;;  %v18006_v56 = vpop.f32.mrf.mxu1  ;;  %2889 = vmatmul.mubr.bf16.vlgmr.msra.gmra.mxu1 %v17977_v12 }
 0x1c4   :  { %2898 = vmatpush1.bf16.msra.mxu0 %v14091_v47  ;;  %2939 = vmatpush1.bf16.msra.mxu1 %v14093_v48  ;;  %v14036_v47 = vcombine.high %v2049_v39, %v2053_v40  ;;  %v2169_v48 = vld [vmem:[#allocation2 + $0xbd0] sm:$0xff] }
 0x1c5   :  { %v18009_v59 = vpop.f32.mrf.mxu0  ;;  %2899 = vmatprep.subr.bf16.mxu0 %v14084_v49  ;;  %v18011_v1 = vpop.f32.mrf.mxu1  ;;  %2940 = vmatprep.subr.bf16.mxu1 %v14086_v53  ;;  %v2173_v49 = vld [vmem:[#allocation2 + $0xbf0] sm:$0xff]  ;;  %v14035_v53 = vcombine.low %v2049_v39, %v2053_v40 }
 0x1c6   :  { %2929 = vmatprep.mubr.bf16.mxu0 %v17970_v57  ;;  %2970 = vmatprep.mubr.bf16.mxu1 %v17970_v57 }
 0x1c7   :  { %v1061_v4 = vpop.f32.mrf.mxu0  ;;  %v1102_v5 = vpop.f32.mrf.mxu1 }
 0x1c8   :  { %2900 = vmatpush1.bf16.msra.mxu0 %v14083_v58  ;;  %2941 = vmatpush1.bf16.msra.mxu1 %v14085_v60  ;;  %v14156_v58 = vcombine.high %v2169_v48, %v2173_v49  ;;  %v2161_v60 = vld [vmem:[#allocation2 + $0xb90] sm:$0xff] }
 0x1c9   :  { %v1062_v7 = vpop.f32.mrf.mxu0  ;;  %2901 = vmatprep.subr.bf16.mxu0 %v14076_v61  ;;  %v1103_v14 = vpop.f32.mrf.mxu1  ;;  %2942 = vmatprep.subr.bf16.mxu1 %v14078_v2  ;;  %v2165_v61 = vld [vmem:[#allocation2 + $0xbb0] sm:$0xff]  ;;  %v14155_v2 = vcombine.low %v2169_v48, %v2173_v49 }
 0x1ca   :  { %v14148_v4 = vcombine.high %v2161_v60, %v2165_v61  ;;  %v2153_v5 = vld [vmem:[#allocation2 + $0xb50] sm:$0xff]  ;;  %v2154_v7 = vld [vmem:[#allocation2 + $0xb58] sm:$0xff]  ;;  %v14147_v10 = vcombine.low %v2161_v60, %v2165_v61 }
 0x1cb   :  { %v2145_v14 = vld [vmem:[#allocation2 + $0xb10] sm:$0xff] }
 0x1cc   :  { %2902 = vmatpush1.bf16.msra.mxu0 %v14075_v6  ;;  %2943 = vmatpush1.bf16.msra.mxu1 %v14077_v8  ;;  %v2157_v6 = vld [vmem:[#allocation2 + $0xb70] sm:$0xff]  ;;  %v14150_v8 = vcombine.high %v2162_v62, %v2166_v0  ;;  %v3044_v62 = vld [vmem:[#allocation2 + $0xdc0] sm:$0xff]  ;;  %v3045_v0 = vld [vmem:[#allocation2 + $0xdc8] sm:$0xff] }
 0x1cd   :  { %2903 = vmatprep.subr.bf16.mxu0 %v14068_v9  ;;  %2944 = vmatprep.subr.bf16.mxu1 %v14070_v15  ;;  %v2158_v9 = vld [vmem:[#allocation2 + $0xb78] sm:$0xff]  ;;  %v14140_v13 = vcombine.high %v2153_v5, %v2157_v6  ;;  %v2149_v15 = vld [vmem:[#allocation2 + $0xb30] sm:$0xff] }
 0x1ce   :  { %v14141_v20 = vcombine.low %v2154_v7, %v2158_v9  ;;  %v14132_v21 = vcombine.high %v2145_v14, %v2149_v15 }
 0x1d0   :  { %2904 = vmatpush1.bf16.msra.mxu0 %v14067_v17  ;;  %2945 = vmatpush1.bf16.msra.mxu1 %v14069_v18  ;;  %v14142_v17 = vcombine.high %v2154_v7, %v2158_v9  ;;  %v2150_v18 = vld [vmem:[#allocation2 + $0xb38] sm:$0xff]  ;;  %v3036_v7 = vld [vmem:[#allocation2 + $0xd80] sm:$0xff]  ;;  %v3037_v9 = vld [vmem:[#allocation2 + $0xd88] sm:$0xff] }
 0x1d1   :  { %2905 = vmatprep.subr.bf16.mxu0 %v14060_v19  ;;  %2946 = vmatprep.subr.bf16.mxu1 %v14062_v23  ;;  %v14139_v19 = vcombine.low %v2153_v5, %v2157_v6  ;;  %v2141_v23 = vld [vmem:[#allocation2 + $0xaf0] sm:$0xff]  ;;  %v14133_v28 = vcombine.low %v2146_v16, %v2150_v18 }
 0x1d2   :  { %v14124_v29 = vcombine.high %v2137_v22, %v2141_v23 }
 0x1d4   :  { %2906 = vmatpush1.bf16.msra.mxu0 %v14059_v25  ;;  %2947 = vmatpush1.bf16.msra.mxu1 %v14061_v26  ;;  %v14134_v25 = vcombine.high %v2146_v16, %v2150_v18  ;;  %v2142_v26 = vld [vmem:[#allocation2 + $0xaf8] sm:$0xff]  ;;  %v3029_v18 = vld [vmem:[#allocation2 + $0xd48] sm:$0xff] }
 0x1d5   :  { %2907 = vmatprep.subr.bf16.mxu0 %v14052_v27  ;;  %2948 = vmatprep.subr.bf16.mxu1 %v14054_v31  ;;  %v14131_v27 = vcombine.low %v2145_v14, %v2149_v15  ;;  %v2133_v31 = vld [vmem:[#allocation2 + $0xab0] sm:$0xff]  ;;  %v14125_v39 = vcombine.low %v2138_v24, %v2142_v26  ;;  %v3028_v14 = vld [vmem:[#allocation2 + $0xd40] sm:$0xff] }
 0x1d6   :  { %v14116_v40 = vcombine.high %v2129_v30, %v2133_v31  ;;  %v3032_v15 = vld [vmem:[#allocation2 + $0xd60] sm:$0xff] }
 0x1d8   :  { %2908 = vmatpush1.bf16.msra.mxu0 %v14051_v33  ;;  %2949 = vmatpush1.bf16.msra.mxu1 %v14053_v34  ;;  %v14126_v33 = vcombine.high %v2138_v24, %v2142_v26  ;;  %v2134_v34 = vld [vmem:[#allocation2 + $0xab8] sm:$0xff]  ;;  %v3020_v24 = vld [vmem:[#allocation2 + $0xd00] sm:$0xff] }
 0x1d9   :  { %2909 = vmatprep.subr.bf16.mxu0 %v14044_v37  ;;  %2950 = vmatprep.subr.bf16.mxu1 %v14046_v42  ;;  %v14123_v37 = vcombine.low %v2137_v22, %v2141_v23  ;;  %v2125_v42 = vld [vmem:[#allocation2 + $0xa70] sm:$0xff]  ;;  %v14117_v48 = vcombine.low %v2130_v32, %v2134_v34 }
 0x1da   :  { %v14108_v49 = vcombine.high %v2121_v41, %v2125_v42 }
 0x1dc   :  { %2910 = vmatpush1.bf16.msra.mxu0 %v14043_v45  ;;  %2951 = vmatpush1.bf16.msra.mxu1 %v14045_v46  ;;  %v14118_v45 = vcombine.high %v2130_v32, %v2134_v34  ;;  %v2126_v46 = vld [vmem:[#allocation2 + $0xa78] sm:$0xff] }
 0x1dd   :  { %2911 = vmatprep.subr.bf16.mxu0 %v14036_v47  ;;  %2952 = vmatprep.subr.bf16.mxu1 %v14038_v51  ;;  %v14115_v47 = vcombine.low %v2129_v30, %v2133_v31  ;;  %v2117_v51 = vld [vmem:[#allocation2 + $0xa30] sm:$0xff]  ;;  %v14109_v60 = vcombine.low %v2122_v43, %v2126_v46  ;;  %v3025_v30 = vld [vmem:[#allocation2 + $0xd28] sm:$0xff] }
 0x1de   :  { %v14100_v61 = vcombine.high %v2113_v50, %v2117_v51 }
 0x1e0   :  { %2912 = vmatpush1.bf16.msra.mxu0 %v14035_v53  ;;  %2953 = vmatpush1.bf16.msra.mxu1 %v14037_v54  ;;  %v14110_v53 = vcombine.high %v2122_v43, %v2126_v46  ;;  %v2118_v54 = vld [vmem:[#allocation2 + $0xa38] sm:$0xff]  ;;  %v3017_v46 = vld [vmem:[#allocation2 + $0xce8] sm:$0xff] }
 0x1e1   :  { %2913 = vmatprep.subr.bf16.mxu0 %v14156_v58  ;;  %2954 = vmatprep.subr.bf16.mxu1 %v14158_v63  ;;  %v14107_v58 = vcombine.low %v2121_v41, %v2125_v42  ;;  %v3048_v63 = vld [vmem:[#allocation2 + $0xde0] sm:$0xff]  ;;  %v14101_v5 = vcombine.low %v2114_v52, %v2118_v54 }
 0x1e2   :  { %v14216_v6 = vcombine.high %v3044_v62, %v3048_v63 }
 0x1e4   :  { %2914 = vmatpush2.bf16.msra.mxu0 %v14155_v2  ;;  %2955 = vmatpush2.bf16.msra.mxu1 %v14157_v3  ;;  %v14102_v2 = vcombine.high %v2114_v52, %v2118_v54  ;;  %v3049_v3 = vld [vmem:[#allocation2 + $0xde8] sm:$0xff] }
 0x1e5   :  { %2915 = vmatprep.subr.bf16.mxu0 %v14148_v4  ;;  %2956 = vmatprep.subr.bf16.mxu1 %v14150_v8  ;;  %v14099_v4 = vcombine.low %v2113_v50, %v2117_v51  ;;  %v3040_v8 = vld [vmem:[#allocation2 + $0xda0] sm:$0xff]  ;;  %v14217_v16 = vcombine.low %v3045_v0, %v3049_v3  ;;  %v3005_v54 = vld [vmem:[#allocation2 + $0xc88] sm:$0xff] }
 0x1e6   :  { %v14207_v23 = vcombine.low %v3036_v7, %v3040_v8  ;;  %v3004_v50 = vld [vmem:[#allocation2 + $0xc80] sm:$0xff] }
 0x1e7   :  { %v3008_v51 = vld [vmem:[#allocation2 + $0xca0] sm:$0xff] }
 0x1e8   :  { %2916 = vmatpush2.bf16.msra.mxu0 %v14147_v10  ;;  %2957 = vmatpush2.bf16.msra.mxu1 %v14149_v11  ;;  %v14218_v10 = vcombine.high %v3045_v0, %v3049_v3  ;;  %v3041_v11 = vld [vmem:[#allocation2 + $0xda8] sm:$0xff] }
 0x1e9   :  { %2917 = vmatprep.subr.bf16.mxu0 %v14140_v13  ;;  %2958 = vmatprep.subr.bf16.mxu1 %v14142_v17  ;;  %v14215_v13 = vcombine.low %v3044_v62, %v3048_v63  ;;  %v14208_v17 = vcombine.high %v3036_v7, %v3040_v8  ;;  %v2996_v62 = vld [vmem:[#allocation2 + $0xc40] sm:$0xff]  ;;  %v2997_v3 = vld [vmem:[#allocation2 + $0xc48] sm:$0xff] }
 0x1ea   :  { %v3000_v63 = vld [vmem:[#allocation2 + $0xc60] sm:$0xff] }
 0x1eb   :  { %v2988_v7 = vld [vmem:[#allocation2 + $0xc00] sm:$0xff] }
 0x1ec   :  { %2918 = vmatpush2.bf16.msra.mxu0 %v14139_v19  ;;  %2959 = vmatpush2.bf16.msra.mxu1 %v14141_v20  ;;  %v3033_v19 = vld [vmem:[#allocation2 + $0xd68] sm:$0xff]  ;;  %v14210_v20 = vcombine.high %v3037_v9, %v3041_v11  ;;  %v2992_v8 = vld [vmem:[#allocation2 + $0xc20] sm:$0xff] }
 0x1ed   :  { %2919 = vmatprep.subr.bf16.mxu0 %v14132_v21  ;;  %2960 = vmatprep.subr.bf16.mxu1 %v14134_v25  ;;  %v3024_v25 = vld [vmem:[#allocation2 + $0xd20] sm:$0xff]  ;;  %v14202_v32 = vcombine.high %v3029_v18, %v3033_v19  ;;  %v14201_v42 = vcombine.low %v3029_v18, %v3033_v19  ;;  %v14160_v19 = vcombine.high %v2988_v7, %v2992_v8 }
 0x1ee   :  { %v14192_v43 = vcombine.high %v3020_v24, %v3024_v25 }
 0x1f0   :  { %2920 = vmatpush2.bf16.msra.mxu0 %v14131_v27  ;;  %2961 = vmatpush2.bf16.msra.mxu1 %v14133_v28  ;;  %v14209_v27 = vcombine.low %v3037_v9, %v3041_v11  ;;  %v14200_v28 = vcombine.high %v3028_v14, %v3032_v15  ;;  %v2989_v11 = vld [vmem:[#allocation2 + $0xc08] sm:$0xff] }
 0x1f1   :  { %2921 = vmatprep.subr.bf16.mxu0 %v14124_v29  ;;  %2962 = vmatprep.subr.bf16.mxu1 %v14126_v33  ;;  %v3021_v29 = vld [vmem:[#allocation2 + $0xd08] sm:$0xff] }
 0x1f2   :  { %v14193_v52 = vcombine.low %v3021_v29, %v3025_v30 }
 0x1f4   :  { %2922 = vmatpush2.bf16.msra.mxu0 %v14123_v37  ;;  %2963 = vmatpush2.bf16.msra.mxu1 %v14125_v39  ;;  %v14199_v37 = vcombine.low %v3028_v14, %v3032_v15  ;;  %v3012_v39 = vld [vmem:[#allocation2 + $0xcc0] sm:$0xff]  ;;  %v14167_v15 = vcombine.low %v2996_v62, %v3000_v63 }
 0x1f5   :  { %2923 = vmatprep.subr.bf16.mxu0 %v14116_v40  ;;  %2964 = vmatprep.subr.bf16.mxu1 %v14118_v45  ;;  %v3016_v40 = vld [vmem:[#allocation2 + $0xce0] sm:$0xff]  ;;  %v3013_v45 = vld [vmem:[#allocation2 + $0xcc8] sm:$0xff] }
 0x1f6   :  { %v14185_v0 = vcombine.low %v3013_v45, %v3017_v46 }
 0x1f8   :  { %2924 = vmatpush2.bf16.msra.mxu0 %v14115_v47  ;;  %2965 = vmatpush2.bf16.msra.mxu1 %v14117_v48  ;;  %v14194_v48 = vcombine.high %v3021_v29, %v3025_v30 }
 0x1f9   :  { %2925 = vmatprep.subr.bf16.mxu0 %v14108_v49  ;;  %2966 = vmatprep.subr.bf16.mxu1 %v14110_v53  ;;  %v14191_v49 = vcombine.low %v3020_v24, %v3024_v25  ;;  %v14184_v53 = vcombine.high %v3012_v39, %v3016_v40  ;;  %v14159_v25 = vcombine.low %v2988_v7, %v2992_v8 }
 0x1fc   :  { %2926 = vmatpush2.bf16.msra.mxu0 %v14107_v58  ;;  %2967 = vmatpush2.bf16.msra.mxu1 %v14109_v60  ;;  %v3009_v58 = vld [vmem:[#allocation2 + $0xca8] sm:$0xff]  ;;  %v14186_v60 = vcombine.high %v3013_v45, %v3017_v46 }
 0x1fd   :  { %2927 = vmatprep.subr.bf16.mxu0 %v14100_v61  ;;  %2968 = vmatprep.subr.bf16.mxu1 %v14102_v2  ;;  %v14183_v61 = vcombine.low %v3012_v39, %v3016_v40  ;;  %v14176_v2 = vcombine.high %v3004_v50, %v3008_v51  ;;  %v14177_v9 = vcombine.low %v3005_v54, %v3009_v58  ;;  %v3092_v39 = vld [vmem:[#allocation2 + $0xf40] sm:$0xff]  ;;  %v3097_v45 = vld [vmem:[#allocation2 + $0xf68] sm:$0xff] }
 0x1fe   :  { %v3096_v40 = vld [vmem:[#allocation2 + $0xf60] sm:$0xff] }
 0x200   :  { %2928 = vmatpush2.bf16.msra.mxu0 %v14099_v4  ;;  %2969 = vmatpush2.bf16.msra.mxu1 %v14101_v5  ;;  %v3001_v4 = vld [vmem:[#allocation2 + $0xc68] sm:$0xff]  ;;  %v14178_v5 = vcombine.high %v3005_v54, %v3009_v58  ;;  %v14263_v58 = vcombine.low %v3092_v39, %v3096_v40 }
 0x201   :  { %3756 = vmatprep.subr.bf16.mxu0 %v14216_v6  ;;  %3797 = vmatprep.subr.bf16.mxu1 %v14218_v10  ;;  %v14175_v6 = vcombine.low %v3004_v50, %v3008_v51  ;;  %v14168_v10 = vcombine.high %v2996_v62, %v3000_v63  ;;  %v14170_v14 = vcombine.high %v2997_v3, %v3001_v4 }
 0x202   :  { %v14169_v18 = vcombine.low %v2997_v3, %v3001_v4  ;;  %v14264_v51 = vcombine.high %v3092_v39, %v3096_v40 }
 0x203   :  { %v18015_v21 = vpop.f32.mrf.mxu0  ;;  %2930 = vmatmul.mubr.bf16.vlgmr.msra.gmra.mxu0 %v17977_v12  ;;  %v18018_v22 = vpop.f32.mrf.mxu1  ;;  %2971 = vmatmul.mubr.bf16.vlgmr.msra.gmra.mxu1 %v17977_v12 }
 0x204   :  { %3757 = vmatpush1.bf16.msra.mxu0 %v14215_v13  ;;  %3798 = vmatpush1.bf16.msra.mxu1 %v14217_v16  ;;  %v2993_v13 = vld [vmem:[#allocation2 + $0xc28] sm:$0xff]  ;;  %v3108_v16 = vld [vmem:[#allocation2 + $0xfc0] sm:$0xff] }
 0x205   :  { %v18021_v26 = vpop.f32.mrf.mxu0  ;;  %3758 = vmatprep.subr.bf16.mxu0 %v14208_v17  ;;  %v18023_v31 = vpop.f32.mrf.mxu1  ;;  %3799 = vmatprep.subr.bf16.mxu1 %v14210_v20  ;;  %v3112_v17 = vld [vmem:[#allocation2 + $0xfe0] sm:$0xff]  ;;  %v3109_v20 = vld [vmem:[#allocation2 + $0xfc8] sm:$0xff]  ;;  %v14162_v24 = vcombine.high %v2989_v11, %v2993_v13  ;;  %v14161_v29 = vcombine.low %v2989_v11, %v2993_v13 }
 0x206   :  { %3788 = vmatprep.mubr.bf16.mxu0 %v17970_v57  ;;  %3829 = vmatprep.mubr.bf16.mxu1 %v17970_v57  ;;  %v14280_v30 = vcombine.high %v3108_v16, %v3112_v17 }
 0x207   :  { %v1912_v33 = vpop.f32.mrf.mxu0  ;;  %v1953_v34 = vpop.f32.mrf.mxu1 }
 0x208   :  { %3759 = vmatpush1.bf16.msra.mxu0 %v14207_v23  ;;  %3800 = vmatpush1.bf16.msra.mxu1 %v14209_v27  ;;  %v3113_v23 = vld [vmem:[#allocation2 + $0xfe8] sm:$0xff]  ;;  %v3100_v27 = vld [vmem:[#allocation2 + $0xf80] sm:$0xff] }
 0x209   :  { %v1913_v41 = vpop.f32.mrf.mxu0  ;;  %3760 = vmatprep.subr.bf16.mxu0 %v14200_v28  ;;  %v1954_v47 = vpop.f32.mrf.mxu1  ;;  %3801 = vmatprep.subr.bf16.mxu1 %v14202_v32  ;;  %v3104_v28 = vld [vmem:[#allocation2 + $0xfa0] sm:$0xff]  ;;  %v3101_v32 = vld [vmem:[#allocation2 + $0xf88] sm:$0xff]  ;;  %v14282_v34 = vcombine.high %v3109_v20, %v3113_v23 }
 0x20a   :  { %v3105_v33 = vld [vmem:[#allocation2 + $0xfa8] sm:$0xff]  ;;  %v14281_v41 = vcombine.low %v3109_v20, %v3113_v23  ;;  %v14271_v47 = vcombine.low %v3100_v27, %v3104_v28 }
 0x20b   :  { %v14274_v46 = vcombine.high %v3101_v32, %v3105_v33  ;;  %v14273_v50 = vcombine.low %v3101_v32, %v3105_v33 }
 0x20c   :  { %3761 = vmatpush1.bf16.msra.mxu0 %v14199_v37  ;;  %3802 = vmatpush1.bf16.msra.mxu1 %v14201_v42  ;;  %v14279_v37 = vcombine.low %v3108_v16, %v3112_v17  ;;  %v14272_v42 = vcombine.high %v3100_v27, %v3104_v28 }
 0x20d   :  { %3762 = vmatprep.subr.bf16.mxu0 %v14192_v43  ;;  %3803 = vmatprep.subr.bf16.mxu1 %v14194_v48  ;;  %v3093_v43 = vld [vmem:[#allocation2 + $0xf48] sm:$0xff]  ;;  %v3084_v48 = vld [vmem:[#allocation2 + $0xf00] sm:$0xff] }
 0x20e   :  { %v14266_v54 = vcombine.high %v3093_v43, %v3097_v45  ;;  %v14265_v62 = vcombine.low %v3093_v43, %v3097_v45 }
 0x210   :  { %3763 = vmatpush1.bf16.msra.mxu0 %v14191_v49  ;;  %3804 = vmatpush1.bf16.msra.mxu1 %v14193_v52  ;;  %v3088_v49 = vld [vmem:[#allocation2 + $0xf20] sm:$0xff]  ;;  %v3085_v52 = vld [vmem:[#allocation2 + $0xf08] sm:$0xff] }
 0x211   :  { %3764 = vmatprep.subr.bf16.mxu0 %v14184_v53  ;;  %3805 = vmatprep.subr.bf16.mxu1 %v14186_v60  ;;  %v3089_v53 = vld [vmem:[#allocation2 + $0xf28] sm:$0xff]  ;;  %v3076_v60 = vld [vmem:[#allocation2 + $0xec0] sm:$0xff]  ;;  %v14256_v63 = vcombine.high %v3084_v48, %v3088_v49  ;;  %v14255_v4 = vcombine.low %v3084_v48, %v3088_v49 }
 0x212   :  { %v14258_v3 = vcombine.high %v3085_v52, %v3089_v53  ;;  %v14257_v7 = vcombine.low %v3085_v52, %v3089_v53 }
 0x214   :  { %3765 = vmatpush1.bf16.msra.mxu0 %v14183_v61  ;;  %3806 = vmatpush1.bf16.msra.mxu1 %v14185_v0  ;;  %v3080_v61 = vld [vmem:[#allocation2 + $0xee0] sm:$0xff]  ;;  %v3077_v0 = vld [vmem:[#allocation2 + $0xec8] sm:$0xff] }
 0x215   :  { %3766 = vmatprep.subr.bf16.mxu0 %v14176_v2  ;;  %3807 = vmatprep.subr.bf16.mxu1 %v14178_v5  ;;  %v3081_v2 = vld [vmem:[#allocation2 + $0xee8] sm:$0xff]  ;;  %v3068_v5 = vld [vmem:[#allocation2 + $0xe80] sm:$0xff]  ;;  %v14248_v8 = vcombine.high %v3076_v60, %v3080_v61  ;;  %v14247_v13 = vcombine.low %v3076_v60, %v3080_v61 }
 0x216   :  { %v14250_v11 = vcombine.high %v3077_v0, %v3081_v2  ;;  %v14249_v16 = vcombine.low %v3077_v0, %v3081_v2 }
 0x218   :  { %3767 = vmatpush1.bf16.msra.mxu0 %v14175_v6  ;;  %3808 = vmatpush1.bf16.msra.mxu1 %v14177_v9  ;;  %v3072_v6 = vld [vmem:[#allocation2 + $0xea0] sm:$0xff]  ;;  %v3069_v9 = vld [vmem:[#allocation2 + $0xe88] sm:$0xff] }
 0x219   :  { %3768 = vmatprep.subr.bf16.mxu0 %v14168_v10  ;;  %3809 = vmatprep.subr.bf16.mxu1 %v14170_v14  ;;  %v3073_v10 = vld [vmem:[#allocation2 + $0xea8] sm:$0xff]  ;;  %v3060_v14 = vld [vmem:[#allocation2 + $0xe40] sm:$0xff]  ;;  %v14240_v17 = vcombine.high %v3068_v5, %v3072_v6  ;;  %v14239_v23 = vcombine.low %v3068_v5, %v3072_v6  ;;  %v3022_v5 = vld [vmem:[#allocation2 + $0xd10] sm:$0xff] }
 0x21a   :  { %v14242_v20 = vcombine.high %v3069_v9, %v3073_v10  ;;  %v14241_v27 = vcombine.low %v3069_v9, %v3073_v10  ;;  %v3026_v6 = vld [vmem:[#allocation2 + $0xd30] sm:$0xff]  ;;  %v3023_v10 = vld [vmem:[#allocation2 + $0xd18] sm:$0xff] }
 0x21c   :  { %3769 = vmatpush1.bf16.msra.mxu0 %v14167_v15  ;;  %3810 = vmatpush1.bf16.msra.mxu1 %v14169_v18  ;;  %v3064_v15 = vld [vmem:[#allocation2 + $0xe60] sm:$0xff]  ;;  %v3061_v18 = vld [vmem:[#allocation2 + $0xe48] sm:$0xff] }
 0x21d   :  { %3770 = vmatprep.subr.bf16.mxu0 %v14160_v19  ;;  %3811 = vmatprep.subr.bf16.mxu1 %v14162_v24  ;;  %v3065_v19 = vld [vmem:[#allocation2 + $0xe68] sm:$0xff]  ;;  %v3052_v24 = vld [vmem:[#allocation2 + $0xe00] sm:$0xff]  ;;  %v14232_v28 = vcombine.high %v3060_v14, %v3064_v15  ;;  %v14231_v33 = vcombine.low %v3060_v14, %v3064_v15 }
 0x21e   :  { %v14234_v32 = vcombine.high %v3061_v18, %v3065_v19  ;;  %v14233_v39 = vcombine.low %v3061_v18, %v3065_v19 }
 0x220   :  { %3771 = vmatpush1.bf16.msra.mxu0 %v14159_v25  ;;  %3812 = vmatpush1.bf16.msra.mxu1 %v14161_v29  ;;  %v3056_v25 = vld [vmem:[#allocation2 + $0xe20] sm:$0xff]  ;;  %v3053_v29 = vld [vmem:[#allocation2 + $0xe08] sm:$0xff] }
 0x221   :  { %3772 = vmatprep.subr.bf16.mxu0 %v14280_v30  ;;  %3813 = vmatprep.subr.bf16.mxu1 %v14282_v34  ;;  %v3057_v30 = vld [vmem:[#allocation2 + $0xe28] sm:$0xff]  ;;  %v3046_v34 = vld [vmem:[#allocation2 + $0xdd0] sm:$0xff]  ;;  %v14224_v40 = vcombine.high %v3052_v24, %v3056_v25  ;;  %v14223_v45 = vcombine.low %v3052_v24, %v3056_v25 }
 0x222   :  { %v14226_v43 = vcombine.high %v3053_v29, %v3057_v30  ;;  %v14225_v48 = vcombine.low %v3053_v29, %v3057_v30  ;;  %v3014_v25 = vld [vmem:[#allocation2 + $0xcd0] sm:$0xff]  ;;  %v3019_v29 = vld [vmem:[#allocation2 + $0xcf8] sm:$0xff]  ;;  %v14195_v30 = vcombine.low %v3022_v5, %v3026_v6 }
 0x224   :  { %3773 = vmatpush2.bf16.msra.mxu0 %v14279_v37  ;;  %3814 = vmatpush2.bf16.msra.mxu1 %v14281_v41  ;;  %v3050_v37 = vld [vmem:[#allocation2 + $0xdf0] sm:$0xff]  ;;  %v3047_v41 = vld [vmem:[#allocation2 + $0xdd8] sm:$0xff] }
 0x225   :  { %3774 = vmatprep.subr.bf16.mxu0 %v14272_v42  ;;  %3815 = vmatprep.subr.bf16.mxu1 %v14274_v46  ;;  %v3051_v42 = vld [vmem:[#allocation2 + $0xdf8] sm:$0xff]  ;;  %v3038_v46 = vld [vmem:[#allocation2 + $0xd90] sm:$0xff]  ;;  %v14220_v49 = vcombine.high %v3046_v34, %v3050_v37  ;;  %v14219_v53 = vcombine.low %v3046_v34, %v3050_v37 }
 0x226   :  { %v14222_v52 = vcombine.high %v3047_v41, %v3051_v42  ;;  %v14221_v60 = vcombine.low %v3047_v41, %v3051_v42  ;;  %v3006_v34 = vld [vmem:[#allocation2 + $0xc90] sm:$0xff] }
 0x227   :  { %v3010_v37 = vld [vmem:[#allocation2 + $0xcb0] sm:$0xff] }
 0x228   :  { %3775 = vmatpush2.bf16.msra.mxu0 %v14271_v47  ;;  %3816 = vmatpush2.bf16.msra.mxu1 %v14273_v50  ;;  %v3042_v47 = vld [vmem:[#allocation2 + $0xdb0] sm:$0xff]  ;;  %v3039_v50 = vld [vmem:[#allocation2 + $0xd98] sm:$0xff] }
 0x229   :  { %3776 = vmatprep.subr.bf16.mxu0 %v14264_v51  ;;  %3817 = vmatprep.subr.bf16.mxu1 %v14266_v54  ;;  %v3043_v51 = vld [vmem:[#allocation2 + $0xdb8] sm:$0xff]  ;;  %v3030_v54 = vld [vmem:[#allocation2 + $0xd50] sm:$0xff]  ;;  %v14212_v61 = vcombine.high %v3038_v46, %v3042_v47 }
 0x22a   :  { %v14214_v0 = vcombine.high %v3039_v50, %v3043_v51 }
 0x22c   :  { %3777 = vmatpush2.bf16.msra.mxu0 %v14263_v58  ;;  %3818 = vmatpush2.bf16.msra.mxu1 %v14265_v62  ;;  %v3034_v58 = vld [vmem:[#allocation2 + $0xd70] sm:$0xff]  ;;  %v3031_v62 = vld [vmem:[#allocation2 + $0xd58] sm:$0xff] }
 0x22d   :  { %3778 = vmatprep.subr.bf16.mxu0 %v14256_v63  ;;  %3819 = vmatprep.subr.bf16.mxu1 %v14258_v3  ;;  %v3035_v63 = vld [vmem:[#allocation2 + $0xd78] sm:$0xff]  ;;  %v14204_v9 = vcombine.high %v3030_v54, %v3034_v58 }
 0x22e   :  { %v14206_v14 = vcombine.high %v3031_v62, %v3035_v63  ;;  %v14205_v19 = vcombine.low %v3031_v62, %v3035_v63 }
 0x230   :  { %3779 = vmatpush2.bf16.msra.mxu0 %v14255_v4  ;;  %3820 = vmatpush2.bf16.msra.mxu1 %v14257_v7  ;;  %v14211_v4 = vcombine.low %v3038_v46, %v3042_v47  ;;  %v2998_v46 = vld [vmem:[#allocation2 + $0xc50] sm:$0xff] }
 0x231   :  { %3780 = vmatprep.subr.bf16.mxu0 %v14248_v8  ;;  %3821 = vmatprep.subr.bf16.mxu1 %v14250_v11  ;;  %v14213_v8 = vcombine.low %v3039_v50, %v3043_v51  ;;  %v3027_v11 = vld [vmem:[#allocation2 + $0xd38] sm:$0xff]  ;;  %v3002_v47 = vld [vmem:[#allocation2 + $0xc70] sm:$0xff]  ;;  %v14179_v50 = vcombine.low %v3006_v34, %v3010_v37 }
 0x232   :  { %v14198_v24 = vcombine.high %v3023_v10, %v3027_v11  ;;  %v14171_v62 = vcombine.low %v2998_v46, %v3002_v47 }
 0x234   :  { %3781 = vmatpush2.bf16.msra.mxu0 %v14247_v13  ;;  %3822 = vmatpush2.bf16.msra.mxu1 %v14249_v16 }
 0x235   :  { %3782 = vmatprep.subr.bf16.mxu0 %v14240_v17  ;;  %3823 = vmatprep.subr.bf16.mxu1 %v14242_v20  ;;  %v14203_v17 = vcombine.low %v3030_v54, %v3034_v58  ;;  %v14196_v20 = vcombine.high %v3022_v5, %v3026_v6  ;;  %v2990_v54 = vld [vmem:[#allocation2 + $0xc10] sm:$0xff] }
 0x236   :  { %v2994_v58 = vld [vmem:[#allocation2 + $0xc30] sm:$0xff] }
 0x237   :  { %v3110_v5 = vld [vmem:[#allocation2 + $0xfd0] sm:$0xff] }
 0x238   :  { %3783 = vmatpush2.bf16.msra.mxu0 %v14239_v23  ;;  %3824 = vmatpush2.bf16.msra.mxu1 %v14241_v27  ;;  %v3018_v27 = vld [vmem:[#allocation2 + $0xcf0] sm:$0xff] }
 0x239   :  { %3784 = vmatprep.subr.bf16.mxu0 %v14232_v28  ;;  %3825 = vmatprep.subr.bf16.mxu1 %v14234_v32  ;;  %v3015_v28 = vld [vmem:[#allocation2 + $0xcd8] sm:$0xff]  ;;  %v14188_v32 = vcombine.high %v3014_v25, %v3018_v27  ;;  %v14187_v41 = vcombine.low %v3014_v25, %v3018_v27  ;;  %v3114_v6 = vld [vmem:[#allocation2 + $0xff0] sm:$0xff] }
 0x23a   :  { %v14189_v42 = vcombine.low %v3015_v28, %v3019_v29 }
 0x23c   :  { %3785 = vmatpush2.bf16.msra.mxu0 %v14231_v33  ;;  %3826 = vmatpush2.bf16.msra.mxu1 %v14233_v39  ;;  %v14190_v33 = vcombine.high %v3015_v28, %v3019_v29  ;;  %v3007_v39 = vld [vmem:[#allocation2 + $0xc98] sm:$0xff] }
 0x23d   :  { %3786 = vmatprep.subr.bf16.mxu0 %v14224_v40  ;;  %3827 = vmatprep.subr.bf16.mxu1 %v14226_v43  ;;  %v3011_v40 = vld [vmem:[#allocation2 + $0xcb8] sm:$0xff]  ;;  %v14180_v43 = vcombine.high %v3006_v34, %v3010_v37 }
 0x23e   :  { %v14181_v51 = vcombine.low %v3007_v39, %v3011_v40  ;;  %v3095_v28 = vld [vmem:[#allocation2 + $0xf58] sm:$0xff] }
 0x23f   :  { %v3099_v29 = vld [vmem:[#allocation2 + $0xf78] sm:$0xff] }
 0x240   :  { %3787 = vmatpush2.bf16.msra.mxu0 %v14223_v45  ;;  %3828 = vmatpush2.bf16.msra.mxu1 %v14225_v48  ;;  %v14182_v45 = vcombine.high %v3007_v39, %v3011_v40  ;;  %v2999_v48 = vld [vmem:[#allocation2 + $0xc58] sm:$0xff] }
 0x241   :  { %3838 = vmatprep.subr.bf16.mxu0 %v14220_v49  ;;  %3879 = vmatprep.subr.bf16.mxu1 %v14222_v52  ;;  %v3003_v49 = vld [vmem:[#allocation2 + $0xc78] sm:$0xff]  ;;  %v14172_v52 = vcombine.high %v2998_v46, %v3002_v47  ;;  %v14269_v46 = vcombine.low %v3095_v28, %v3099_v29 }
 0x242   :  { %v14173_v63 = vcombine.low %v2999_v48, %v3003_v49  ;;  %v3087_v39 = vld [vmem:[#allocation2 + $0xf18] sm:$0xff] }
 0x243   :  { %v18027_v2 = vpop.f32.mrf.mxu0  ;;  %3789 = vmatmul.mubr.bf16.vlgmr.msra.gmra.mxu0 %v17977_v12  ;;  %v18030_v3 = vpop.f32.mrf.mxu1  ;;  %3830 = vmatmul.mubr.bf16.vlgmr.msra.gmra.mxu1 %v17977_v12  ;;  %v3091_v40 = vld [vmem:[#allocation2 + $0xf38] sm:$0xff] }
 0x244   :  { %3839 = vmatpush1.bf16.msra.mxu0 %v14219_v53  ;;  %3880 = vmatpush1.bf16.msra.mxu1 %v14221_v60  ;;  %v14174_v53 = vcombine.high %v2999_v48, %v3003_v49  ;;  %v2991_v60 = vld [vmem:[#allocation2 + $0xc18] sm:$0xff] }
 0x245   :  { %v18033_v7 = vpop.f32.mrf.mxu0  ;;  %3840 = vmatprep.subr.bf16.mxu0 %v14212_v61  ;;  %v18035_v13 = vpop.f32.mrf.mxu1  ;;  %3881 = vmatprep.subr.bf16.mxu1 %v14214_v0  ;;  %v2995_v61 = vld [vmem:[#allocation2 + $0xc38] sm:$0xff]  ;;  %v14164_v0 = vcombine.high %v2990_v54, %v2994_v58 }
 0x246   :  { %3870 = vmatprep.mubr.bf16.mxu0 %v17970_v57  ;;  %3911 = vmatprep.mubr.bf16.mxu1 %v17970_v57  ;;  %v14197_v57 = vcombine.low %v3023_v10, %v3027_v11  ;;  %v14163_v10 = vcombine.low %v2990_v54, %v2994_v58  ;;  %v3102_v11 = vld [vmem:[#allocation2 + $0xf90] sm:$0xff]  ;;  %v3079_v48 = vld [vmem:[#allocation2 + $0xed8] sm:$0xff]  ;;  %v14261_v54 = vcombine.low %v3087_v39, %v3091_v40 }
 0x247   :  { %v1994_v15 = vpop.f32.mrf.mxu0  ;;  %v2035_v16 = vpop.f32.mrf.mxu1  ;;  %v3083_v49 = vld [vmem:[#allocation2 + $0xef8] sm:$0xff] }
 0x248   :  { %3841 = vmatpush1.bf16.msra.mxu0 %v14211_v4  ;;  %3882 = vmatpush1.bf16.msra.mxu1 %v14213_v8  ;;  %v14166_v4 = vcombine.high %v2991_v60, %v2995_v61  ;;  %v3111_v8 = vld [vmem:[#allocation2 + $0xfd8] sm:$0xff]  ;;  %v14165_v15 = vcombine.low %v2991_v60, %v2995_v61  ;;  %v14284_v16 = vcombine.high %v3110_v5, %v3114_v6 }
 0x249   :  { %v1995_v18 = vpop.f32.mrf.mxu0  ;;  %3842 = vmatprep.subr.bf16.mxu0 %v14204_v9  ;;  %v2036_v23 = vpop.f32.mrf.mxu1  ;;  %3883 = vmatprep.subr.bf16.mxu1 %v14206_v14  ;;  %v3115_v9 = vld [vmem:[#allocation2 + $0xff8] sm:$0xff]  ;;  %v3106_v14 = vld [vmem:[#allocation2 + $0xfb0] sm:$0xff] }
 0x24a   :  { %v3107_v18 = vld [vmem:[#allocation2 + $0xfb8] sm:$0xff]  ;;  %v3094_v23 = vld [vmem:[#allocation2 + $0xf50] sm:$0xff]  ;;  %v14285_v25 = vcombine.low %v3111_v8, %v3115_v9  ;;  %v14276_v27 = vcombine.high %v3102_v11, %v3106_v14 }
 0x24b   :  { %v3071_v60 = vld [vmem:[#allocation2 + $0xe98] sm:$0xff] }
 0x24c   :  { %3843 = vmatpush1.bf16.msra.mxu0 %v14203_v17  ;;  %3884 = vmatpush1.bf16.msra.mxu1 %v14205_v19  ;;  %v3103_v17 = vld [vmem:[#allocation2 + $0xf98] sm:$0xff]  ;;  %v14286_v19 = vcombine.high %v3111_v8, %v3115_v9 }
 0x24d   :  { %3844 = vmatprep.subr.bf16.mxu0 %v14196_v20  ;;  %3885 = vmatprep.subr.bf16.mxu1 %v14198_v24  ;;  %v14283_v20 = vcombine.low %v3110_v5, %v3114_v6  ;;  %v3098_v24 = vld [vmem:[#allocation2 + $0xf70] sm:$0xff]  ;;  %v14277_v34 = vcombine.low %v3103_v17, %v3107_v18  ;;  %v3075_v61 = vld [vmem:[#allocation2 + $0xeb8] sm:$0xff]  ;;  %v14253_v5 = vcombine.low %v3079_v48, %v3083_v49 }
 0x24e   :  { %v14268_v37 = vcombine.high %v3094_v23, %v3098_v24  ;;  %v3063_v8 = vld [vmem:[#allocation2 + $0xe58] sm:$0xff] }
 0x24f   :  { %v3067_v9 = vld [vmem:[#allocation2 + $0xe78] sm:$0xff] }
 0x250   :  { %3845 = vmatpush1.bf16.msra.mxu0 %v14195_v30  ;;  %3886 = vmatpush1.bf16.msra.mxu1 %v14197_v57  ;;  %v14278_v30 = vcombine.high %v3103_v17, %v3107_v18  ;;  %v14275_v57 = vcombine.low %v3102_v11, %v3106_v14  ;;  %v3054_v14 = vld [vmem:[#allocation2 + $0xe10] sm:$0xff]  ;;  %v3055_v18 = vld [vmem:[#allocation2 + $0xe18] sm:$0xff] }
 0x251   :  { %3846 = vmatprep.subr.bf16.mxu0 %v14188_v32  ;;  %3887 = vmatprep.subr.bf16.mxu1 %v14190_v33  ;;  %v3086_v32 = vld [vmem:[#allocation2 + $0xf10] sm:$0xff] }
 0x252   :  { %v3090_v33 = vld [vmem:[#allocation2 + $0xf30] sm:$0xff] }
 0x253   :  { %v14260_v47 = vcombine.high %v3086_v32, %v3090_v33 }
 0x254   :  { %3847 = vmatpush1.bf16.msra.mxu0 %v14187_v41  ;;  %3888 = vmatpush1.bf16.msra.mxu1 %v14189_v42  ;;  %v14270_v41 = vcombine.high %v3095_v28, %v3099_v29  ;;  %v14267_v42 = vcombine.low %v3094_v23, %v3098_v24  ;;  %v14237_v24 = vcombine.low %v3063_v8, %v3067_v9  ;;  %v15689_v28 = vld [vmem:[#allocation6 + $0xe4] ss:$16 sps:$4 sm:$0xff]  }
 0x255   :  { %3848 = vmatprep.subr.bf16.mxu0 %v14180_v43  ;;  %3889 = vmatprep.subr.bf16.mxu1 %v14182_v45  ;;  %v3078_v43 = vld [vmem:[#allocation2 + $0xed0] sm:$0xff] }
 0x256   :  { %v3082_v45 = vld [vmem:[#allocation2 + $0xef0] sm:$0xff] }
 0x257   :  { %v14252_v58 = vcombine.high %v3078_v43, %v3082_v45 }
 0x258   :  { %3849 = vmatpush1.bf16.msra.mxu0 %v14179_v50  ;;  %3890 = vmatpush1.bf16.msra.mxu1 %v14181_v51  ;;  %v14262_v50 = vcombine.high %v3087_v39, %v3091_v40  ;;  %v14259_v51 = vcombine.low %v3086_v32, %v3090_v33  ;;  %v15687_v32 = vld [vmem:[#allocation6 + $0xe0] ss:$16 sps:$4 sm:$0xff]   ;;  %v2038_v39 = vmax.f32 %v17991_v35, %v18015_v21 }
 0x259   :  { %3850 = vmatprep.subr.bf16.mxu0 %v14172_v52  ;;  %3891 = vmatprep.subr.bf16.mxu1 %v14174_v53  ;;  %v3070_v52 = vld [vmem:[#allocation2 + $0xe90] sm:$0xff]  ;;  %v15690_v33 = vld [vmem:[#allocation6 + $0x2e0] ss:$16 sps:$4 sm:$0xff]   ;;  %v2040_v40 = vmax.f32 %v17994_v36, %v18018_v22  ;;  %v2041_v35 = vmax.f32 %v17999_v44, %v18023_v31  ;;  %v15701_v22 = vld [vmem:[#allocation6 + $0xa4] ss:$16 sps:$4 sm:$0xff]  }
 0x25a   :  { %v3074_v53 = vld [vmem:[#allocation2 + $0xeb0] sm:$0xff]  ;;  %v15696_v36 = vld [vmem:[#allocation6 + $0x2c0] ss:$16 sps:$4 sm:$0xff]   ;;  %v15707_v31 = vld [vmem:[#allocation6 + $0x84] ss:$16 sps:$4 sm:$0xff]  }
 0x25b   :  { %v14244_v6 = vcombine.high %v3070_v52, %v3074_v53  ;;  %v14243_v11 = vcombine.low %v3070_v52, %v3074_v53  ;;  %v15702_v44 = vld [vmem:[#allocation6 + $0x2a0] ss:$16 sps:$4 sm:$0xff]  }
 0x25c   :  { %3851 = vmatpush1.bf16.msra.mxu0 %v14171_v62  ;;  %3892 = vmatpush1.bf16.msra.mxu1 %v14173_v63  ;;  %v14254_v62 = vcombine.high %v3079_v48, %v3083_v49  ;;  %v14251_v63 = vcombine.low %v3078_v43, %v3082_v45  ;;  %v15704_v49 = vld [vmem:[#allocation6 + $0x2a4] ss:$16 sps:$4 sm:$0xff]  }
 0x25d   :  { %3852 = vmatprep.subr.bf16.mxu0 %v14164_v0  ;;  %3893 = vmatprep.subr.bf16.mxu1 %v14166_v4  ;;  %v3062_v0 = vld [vmem:[#allocation2 + $0xe50] sm:$0xff] }
 0x25e   :  { %v3066_v4 = vld [vmem:[#allocation2 + $0xe70] sm:$0xff] }
 0x25f   :  { %v14236_v17 = vcombine.high %v3062_v0, %v3066_v4  ;;  %v14235_v23 = vcombine.low %v3062_v0, %v3066_v4  ;;  %v15714_v0 = vld [vmem:[#allocation6 + $0x260] ss:$16 sps:$4 sm:$0xff]   ;;  %v15719_v4 = vld [vmem:[#allocation6 + $0x44] ss:$16 sps:$4 sm:$0xff]  }
 0x260   :  { %3853 = vmatpush1.bf16.msra.mxu0 %v14163_v10  ;;  %3894 = vmatpush1.bf16.msra.mxu1 %v14165_v15  ;;  %v14246_v10 = vcombine.high %v3071_v60, %v3075_v61  ;;  %v3058_v15 = vld [vmem:[#allocation2 + $0xe30] sm:$0xff] }
 0x261   :  { %3854 = vmatprep.subr.bf16.mxu0 %v14284_v16  ;;  %3895 = vmatprep.subr.bf16.mxu1 %v14286_v19  ;;  %v14245_v16 = vcombine.low %v3071_v60, %v3075_v61  ;;  %v3059_v19 = vld [vmem:[#allocation2 + $0xe38] sm:$0xff]  ;;  %v14227_v29 = vcombine.low %v3054_v14, %v3058_v15 }
 0x262   :  { %v15708_v60 = vld [vmem:[#allocation6 + $0x280] ss:$16 sps:$4 sm:$0xff]   ;;  %v15713_v61 = vld [vmem:[#allocation6 + $0x64] ss:$16 sps:$4 sm:$0xff]  }
 0x264   :  { %3855 = vmatpush2.bf16.msra.mxu0 %v14283_v20  ;;  %3896 = vmatpush2.bf16.msra.mxu1 %v14285_v25  ;;  %v14238_v20 = vcombine.high %v3063_v8, %v3067_v9  ;;  %v14228_v25 = vcombine.high %v3054_v14, %v3058_v15  ;;  %v15720_v8 = vld [vmem:[#allocation6 + $0x240] ss:$16 sps:$4 sm:$0xff]   ;;  %v15725_v9 = vld [vmem:[#allocation6 + $0x24] ss:$16 sps:$4 sm:$0xff]  }
 0x265   :  { %3856 = vmatprep.subr.bf16.mxu0 %v14276_v27  ;;  %3897 = vmatprep.subr.bf16.mxu1 %v14278_v30  ;;  %v14230_v27 = vcombine.high %v3055_v18, %v3059_v19  ;;  %v15692_v30 = vld [vmem:[#allocation6 + $0x2e4] ss:$16 sps:$4 sm:$0xff]   ;;  %v15726_v14 = vld [vmem:[#allocation6 + $0x220] ss:$16 sps:$4 sm:$0xff]  }
 0x266   :  { %v15731_v15 = vld [vmem:[#allocation6 + $0x4] ss:$16 sps:$4 sm:$0xff]  }
 0x268   :  { %3857 = vmatpush2.bf16.msra.mxu0 %v14275_v57  ;;  %3898 = vmatpush2.bf16.msra.mxu1 %v14277_v34  ;;  %v14229_v57 = vcombine.low %v3055_v18, %v3059_v19  ;;  %v15695_v34 = vld [vmem:[#allocation6 + $0xc4] ss:$16 sps:$4 sm:$0xff]   ;;  %v15732_v18 = vld [vmem:[#allocation6 + $0x200] ss:$16 sps:$4 sm:$0xff]  }
 0x269   :  { %3858 = vmatprep.subr.bf16.mxu0 %v14268_v37  ;;  %3899 = vmatprep.subr.bf16.mxu1 %v14270_v41  ;;  %v15698_v37 = vld [vmem:[#allocation6 + $0x2c4] ss:$16 sps:$4 sm:$0xff]  }
 0x26a   :  { %v15737_v19 = vld [vmem:[#allocation6 + $0x1e4] ss:$16 sps:$4 sm:$0xff]  }
 0x26c   :  { %3859 = vmatpush2.bf16.msra.mxu0 %v14267_v42  ;;  %3900 = vmatpush2.bf16.msra.mxu1 %v14269_v46  ;;  %v2039_v42 = vmax.f32 %v17997_v38, %v18021_v26  ;;  %v15693_v46 = vld [vmem:[#allocation6 + $0xc0] ss:$16 sps:$4 sm:$0xff]  }
 0x26d   :  { %3860 = vmatprep.subr.bf16.mxu0 %v14260_v47  ;;  %3901 = vmatprep.subr.bf16.mxu1 %v14262_v50  ;;  %v15699_v26 = vld [vmem:[#allocation6 + $0xa0] ss:$16 sps:$4 sm:$0xff]  }
 0x270   :  { %3861 = vmatpush2.bf16.msra.mxu0 %v14259_v51  ;;  %3902 = vmatpush2.bf16.msra.mxu1 %v14261_v54  ;;  %v15705_v54 = vld [vmem:[#allocation6 + $0x80] ss:$16 sps:$4 sm:$0xff]  }
 0x271   :  { %3862 = vmatprep.subr.bf16.mxu0 %v14252_v58  ;;  %3903 = vmatprep.subr.bf16.mxu1 %v14254_v62  ;;  %v15710_v58 = vld [vmem:[#allocation6 + $0x284] ss:$16 sps:$4 sm:$0xff]   ;;  %v15711_v62 = vld [vmem:[#allocation6 + $0x60] ss:$16 sps:$4 sm:$0xff]  }
 0x274   :  { %3863 = vmatpush2.bf16.msra.mxu0 %v14251_v63  ;;  %3904 = vmatpush2.bf16.msra.mxu1 %v14253_v5  ;;  %v15716_v63 = vld [vmem:[#allocation6 + $0x264] ss:$16 sps:$4 sm:$0xff]   ;;  %v15717_v5 = vld [vmem:[#allocation6 + $0x40] ss:$16 sps:$4 sm:$0xff]  }
 0x275   :  { %3864 = vmatprep.subr.bf16.mxu0 %v14244_v6  ;;  %3905 = vmatprep.subr.bf16.mxu1 %v14246_v10  ;;  %v15722_v6 = vld [vmem:[#allocation6 + $0x244] ss:$16 sps:$4 sm:$0xff]   ;;  %v15723_v10 = vld [vmem:[#allocation6 + $0x20] ss:$16 sps:$4 sm:$0xff]  }
 0x278   :  { %3865 = vmatpush2.bf16.msra.mxu0 %v14243_v11  ;;  %3906 = vmatpush2.bf16.msra.mxu1 %v14245_v16  ;;  %v15728_v11 = vld [vmem:[#allocation6 + $0x224] ss:$16 sps:$4 sm:$0xff]   ;;  %v15729_v16 = vld [vmem:[#allocation6] ss:$16 sps:$4 sm:$0xff]  }
 0x279   :  { %3866 = vmatprep.subr.bf16.mxu0 %v14236_v17  ;;  %3907 = vmatprep.subr.bf16.mxu1 %v14238_v20  ;;  %v15734_v17 = vld [vmem:[#allocation6 + $0x204] ss:$16 sps:$4 sm:$0xff]   ;;  %v15735_v20 = vld [vmem:[#allocation6 + $0x1e0] ss:$16 sps:$4 sm:$0xff]  }
 0x27c   :  { %3867 = vmatpush2.bf16.msra.mxu0 %v14235_v23  ;;  %3908 = vmatpush2.bf16.msra.mxu1 %v14237_v24  ;;  %v15740_v23 = vld [vmem:[#allocation6 + $0x3e4] ss:$16 sps:$4 sm:$0xff]   ;;  %v15738_v24 = vld [vmem:[#allocation6 + $0x3e0] ss:$16 sps:$4 sm:$0xff]  }
 0x27d   :  { %3868 = vmatprep.subr.bf16.mxu0 %v14228_v25  ;;  %3909 = vmatprep.subr.bf16.mxu1 %v14230_v27  ;;  %v15743_v25 = vld [vmem:[#allocation6 + $0x1c4] ss:$16 sps:$4 sm:$0xff]   ;;  %v15741_v27 = vld [vmem:[#allocation6 + $0x1c0] ss:$16 sps:$4 sm:$0xff]  }
 0x280   :  { %3869 = vmatpush2.bf16.msra.mxu0 %v14227_v29  ;;  %3910 = vmatpush2.bf16.msra.mxu1 %v14229_v57  ;;  %v15744_v29 = vld [vmem:[#allocation6 + $0x3c0] ss:$16 sps:$4 sm:$0xff]  }
 0x281   :  { %5530 = vmatprep.subr.bf16.mxu0 %v15689_v28  ;;  %5571 = vmatprep.subr.bf16.mxu1 %v15692_v30  ;;  %v15746_v28 = vld [vmem:[#allocation6 + $0x3c4] ss:$16 sps:$4 sm:$0xff]   ;;  %v15747_v57 = vld [vmem:[#allocation6 + $0x1a0] ss:$16 sps:$4 sm:$0xff]  }
 0x282   :  { %v15749_v30 = vld [vmem:[#allocation6 + $0x1a4] ss:$16 sps:$4 sm:$0xff]  }
 0x283   :  { %v2849_v41 = vpop.f32.mrf.mxu0  ;;  %3871 = vmatmul.mubr.bf16.vlgmr.msra.gmra.mxu0 %v17977_v12  ;;  %v2890_v45 = vpop.f32.mrf.mxu1  ;;  %3912 = vmatmul.mubr.bf16.vlgmr.msra.gmra.mxu1 %v17977_v12 }
 0x284   :  { %v18046_v43 = vmax.f32 %v2038_v39, %v2849_v41  ;;  %5531 = vmatpush1.bf16.msra.mxu0 %v15687_v32  ;;  %v18051_v21 = vmax.f32 %v2040_v40, %v2890_v45  ;;  %5572 = vmatpush1.bf16.msra.mxu1 %v15690_v33  ;;  %v15752_v32 = vld [vmem:[#allocation6 + $0x3a4] ss:$16 sps:$4 sm:$0xff]   ;;  %v15750_v33 = vld [vmem:[#allocation6 + $0x3a0] ss:$16 sps:$4 sm:$0xff]  }
 0x285   :  { %v2851_v47 = vpop.f32.mrf.mxu0  ;;  %5532 = vmatprep.subr.bf16.mxu0 %v15695_v34  ;;  %v2892_v38 = vpop.f32.mrf.mxu1  ;;  %5573 = vmatprep.subr.bf16.mxu1 %v15698_v37  ;;  %v15755_v34 = vld [vmem:[#allocation6 + $0x184] ss:$16 sps:$4 sm:$0xff]   ;;  %v15753_v37 = vld [vmem:[#allocation6 + $0x180] ss:$16 sps:$4 sm:$0xff]  }
 0x286   :  { %v18053_v48 = vmax.f32 %v2039_v42, %v2851_v47  ;;  %v18055_v50 = vmax.f32 %v2041_v35, %v2892_v38  ;;  %v15758_v39 = vld [vmem:[#allocation6 + $0x384] ss:$16 sps:$4 sm:$0xff]   ;;  %v15756_v40 = vld [vmem:[#allocation6 + $0x380] ss:$16 sps:$4 sm:$0xff]  }
 0x287   :  { %v2853_v12 = vpop.f32.mrf.mxu0  ;;  %v2894_v51 = vpop.f32.mrf.mxu1  ;;  %v15761_v41 = vld [vmem:[#allocation6 + $0x164] ss:$16 sps:$4 sm:$0xff]   ;;  %v15759_v42 = vld [vmem:[#allocation6 + $0x160] ss:$16 sps:$4 sm:$0xff]  }
 0x288   :  { %5533 = vmatpush1.bf16.msra.mxu0 %v15693_v46  ;;  %5574 = vmatpush1.bf16.msra.mxu1 %v15696_v36  ;;  %v15764_v45 = vld [vmem:[#allocation6 + $0x364] ss:$16 sps:$4 sm:$0xff]   ;;  %v15762_v46 = vld [vmem:[#allocation6 + $0x360] ss:$16 sps:$4 sm:$0xff]  }
 0x289   :  { %v2854_v52 = vpop.f32.mrf.mxu0  ;;  %5534 = vmatprep.subr.bf16.mxu0 %v15701_v22  ;;  %v2895_v53 = vpop.f32.mrf.mxu1  ;;  %5575 = vmatprep.subr.bf16.mxu1 %v15704_v49  ;;  %v15767_v35 = vld [vmem:[#allocation6 + $0x144] ss:$16 sps:$4 sm:$0xff]   ;;  %v15765_v47 = vld [vmem:[#allocation6 + $0x140] ss:$16 sps:$4 sm:$0xff]  }
 0x28a   :  { %v15770_v36 = vld [vmem:[#allocation6 + $0x344] ss:$16 sps:$4 sm:$0xff]   ;;  %v15768_v22 = vld [vmem:[#allocation6 + $0x340] ss:$16 sps:$4 sm:$0xff]  }
 0x28b   :  { %v15773_v38 = vld [vmem:[#allocation6 + $0x124] ss:$16 sps:$4 sm:$0xff]   ;;  %v15771_v49 = vld [vmem:[#allocation6 + $0x120] ss:$16 sps:$4 sm:$0xff]  }
 0x28c   :  { %5535 = vmatpush1.bf16.msra.mxu0 %v15699_v26  ;;  %5576 = vmatpush1.bf16.msra.mxu1 %v15702_v44  ;;  %v15776_v26 = vld [vmem:[#allocation6 + $0x324] ss:$16 sps:$4 sm:$0xff]   ;;  %v15774_v12 = vld [vmem:[#allocation6 + $0x320] ss:$16 sps:$4 sm:$0xff]  }
 0x28d   :  { %5536 = vmatprep.subr.bf16.mxu0 %v15707_v31  ;;  %5577 = vmatprep.subr.bf16.mxu1 %v15710_v58  ;;  %v15779_v51 = vld [vmem:[#allocation6 + $0x104] ss:$16 sps:$4 sm:$0xff]   ;;  %v15777_v44 = vld [vmem:[#allocation6 + $0x100] ss:$16 sps:$4 sm:$0xff]   ;;  %v2042_v58 = vmax.f32 %v18003_v55, %v18027_v2 }
 0x28e   :  { %v15782_v52 = vld [vmem:[#allocation6 + $0x304] ss:$16 sps:$4 sm:$0xff]   ;;  %v15780_v31 = vld [vmem:[#allocation6 + $0x300] ss:$16 sps:$4 sm:$0xff]  }
 0x28f   :  { %v15785_v53 = vld [vmem:[#allocation6 + $0x4e4] ss:$16 sps:$4 sm:$0xff]  }
 0x290   :  { %5537 = vmatpush1.bf16.msra.mxu0 %v15705_v54  ;;  %5578 = vmatpush1.bf16.msra.mxu1 %v15708_v60  ;;  %v15788_v54 = vld [vmem:[#allocation6 + $0x6e4] ss:$16 sps:$4 sm:$0xff]   ;;  %v2044_v60 = vmax.f32 %v18006_v56, %v18030_v3 }
 0x291   :  { %5538 = vmatprep.subr.bf16.mxu0 %v15713_v61  ;;  %5579 = vmatprep.subr.bf16.mxu1 %v15716_v63 }
 0x294   :  { %5539 = vmatpush1.bf16.msra.mxu0 %v15711_v62  ;;  %5580 = vmatpush1.bf16.msra.mxu1 %v15714_v0  ;;  %v2043_v62 = vmax.f32 %v18009_v59, %v18033_v7  ;;  %v18075_v7 = vld [vmem:[#allocation4] sm:$0xff] }
 0x295   :  { %5540 = vmatprep.subr.bf16.mxu0 %v15719_v4  ;;  %5581 = vmatprep.subr.bf16.mxu1 %v15722_v6  ;;  %v2045_v4 = vmax.f32 %v18011_v1, %v18035_v13 }
 0x298   :  { %5541 = vmatpush1.bf16.msra.mxu0 %v15717_v5  ;;  %5582 = vmatpush1.bf16.msra.mxu1 %v15720_v8 }
 0x299   :  { %5542 = vmatprep.subr.bf16.mxu0 %v15725_v9  ;;  %5583 = vmatprep.subr.bf16.mxu1 %v15728_v11  ;;  %v3930_v11 = vlaneseq }
 0x29b   :  { %v18073_v59 = vshrl.u32 %v3930_v11, 7  ;;  %v15822_v11 = vld [vmem:[#allocation6 + $0x620] ss:$16 sps:$4 sm:$0xff]  }
 0x29c   :  { %5543 = vmatpush1.bf16.msra.mxu0 %v15723_v10  ;;  %5584 = vmatpush1.bf16.msra.mxu1 %v15726_v14 }
 0x29d   :  { %5544 = vmatprep.subr.bf16.mxu0 %v15731_v15  ;;  %5585 = vmatprep.subr.bf16.mxu1 %v15734_v17  ;;  %v18078_v14 = vsub.s32 0, %v18073_v59  ;;  %v3940_v1 = vsub.s32 2, %v18073_v59  ;;  %v18082_v13 = vsub.s32 1, %v18073_v59  ;;  %v3944_v15 = vsub.s32 3, %v18073_v59 }
 0x2a0   :  { %5545 = vmatpush1.bf16.msra.mxu0 %v15729_v16  ;;  %5586 = vmatpush1.bf16.msra.mxu1 %v15732_v18  ;;  %v3933_v16 = vrot.slane %v18075_v7, %v18078_v14  ;;  %v3941_v18 = vrot.slane %v18075_v7, %v3940_v1 }
 0x2a1   :  { %5546 = vmatprep.subr.bf16.mxu0 %v15737_v19  ;;  %5587 = vmatprep.subr.bf16.mxu1 %v15740_v23  ;;  %v3937_v23 = vrot.slane %v18075_v7, %v18082_v13 }
 0x2a4   :  { %5547 = vmatpush2.bf16.msra.mxu0 %v15735_v20  ;;  %5588 = vmatpush2.bf16.msra.mxu1 %v15738_v24 }
 0x2a5   :  { %5548 = vmatprep.subr.bf16.mxu0 %v15743_v25  ;;  %5589 = vmatprep.subr.bf16.mxu1 %v15746_v28 }
 0x2a8   :  { %5549 = vmatpush2.bf16.msra.mxu0 %v15741_v27  ;;  %5590 = vmatpush2.bf16.msra.mxu1 %v15744_v29  ;;  %v3945_v27 = vrot.slane %v18075_v7, %v3944_v15 }
 0x2a9   :  { %5550 = vmatprep.subr.bf16.mxu0 %v15749_v30  ;;  %5591 = vmatprep.subr.bf16.mxu1 %v15752_v32 }
 0x2ac   :  { %5551 = vmatpush2.bf16.msra.mxu0 %v15747_v57  ;;  %5592 = vmatpush2.bf16.msra.mxu1 %v15750_v33 }
 0x2ad   :  { %5552 = vmatprep.subr.bf16.mxu0 %v15755_v34  ;;  %5593 = vmatprep.subr.bf16.mxu1 %v15758_v39 }
 0x2b0   :  { %5553 = vmatpush2.bf16.msra.mxu0 %v15753_v37  ;;  %5594 = vmatpush2.bf16.msra.mxu1 %v15756_v40 }
 0x2b1   :  { %5554 = vmatprep.subr.bf16.mxu0 %v15761_v41  ;;  %5595 = vmatprep.subr.bf16.mxu1 %v15764_v45  ;;  %v15783_v45 = vld [vmem:[#allocation6 + $0x4e0] ss:$16 sps:$4 sm:$0xff]  }
 0x2b4   :  { %5555 = vmatpush2.bf16.msra.mxu0 %v15759_v42  ;;  %5596 = vmatpush2.bf16.msra.mxu1 %v15762_v46 }
 0x2b5   :  { %5556 = vmatprep.subr.bf16.mxu0 %v15767_v35  ;;  %5597 = vmatprep.subr.bf16.mxu1 %v15770_v36  ;;  %v15786_v35 = vld [vmem:[#allocation6 + $0x6e0] ss:$16 sps:$4 sm:$0xff]  }
 0x2b8   :  { %5557 = vmatpush2.bf16.msra.mxu0 %v15765_v47  ;;  %5598 = vmatpush2.bf16.msra.mxu1 %v15768_v22  ;;  %v15791_v47 = vld [vmem:[#allocation6 + $0x4c4] ss:$16 sps:$4 sm:$0xff]  }
 0x2b9   :  { %5558 = vmatprep.subr.bf16.mxu0 %v15773_v38  ;;  %5599 = vmatprep.subr.bf16.mxu1 %v15776_v26  ;;  %v15789_v38 = vld [vmem:[#allocation6 + $0x4c0] ss:$16 sps:$4 sm:$0xff]   ;;  %v15794_v26 = vld [vmem:[#allocation6 + $0x6c4] ss:$16 sps:$4 sm:$0xff]  }
 0x2bc   :  { %5559 = vmatpush2.bf16.msra.mxu0 %v15771_v49  ;;  %5600 = vmatpush2.bf16.msra.mxu1 %v15774_v12  ;;  %v15792_v49 = vld [vmem:[#allocation6 + $0x6c0] ss:$16 sps:$4 sm:$0xff]   ;;  %v15797_v12 = vld [vmem:[#allocation6 + $0x4a4] ss:$16 sps:$4 sm:$0xff]  }
 0x2bd   :  { %5560 = vmatprep.subr.bf16.mxu0 %v15779_v51  ;;  %5601 = vmatprep.subr.bf16.mxu1 %v15782_v52  ;;  %v15800_v51 = vld [vmem:[#allocation6 + $0x6a4] ss:$16 sps:$4 sm:$0xff]   ;;  %v15795_v52 = vld [vmem:[#allocation6 + $0x4a0] ss:$16 sps:$4 sm:$0xff]  }
 0x2c0   :  { %5561 = vmatpush2.bf16.msra.mxu0 %v15777_v44  ;;  %5602 = vmatpush2.bf16.msra.mxu1 %v15780_v31  ;;  %v15798_v44 = vld [vmem:[#allocation6 + $0x6a0] ss:$16 sps:$4 sm:$0xff]   ;;  %v15803_v31 = vld [vmem:[#allocation6 + $0x484] ss:$16 sps:$4 sm:$0xff]  }
 0x2c1   :  { %5612 = vmatprep.subr.bf16.mxu0 %v15785_v53  ;;  %5653 = vmatprep.subr.bf16.mxu1 %v15788_v54  ;;  %v15801_v53 = vld [vmem:[#allocation6 + $0x480] ss:$16 sps:$4 sm:$0xff]   ;;  %v15806_v54 = vld [vmem:[#allocation6 + $0x684] ss:$16 sps:$4 sm:$0xff]  }
 0x2c3   :  { %v2931_v61 = vpop.f32.mrf.mxu0  ;;  %v2972_v0 = vpop.f32.mrf.mxu1 }
 0x2c4   :  { %v18063_v63 = vmax.f32 %v2042_v58, %v2931_v61  ;;  %v18067_v5 = vmax.f32 %v2044_v60, %v2972_v0  ;;  %v15804_v58 = vld [vmem:[#allocation6 + $0x680] ss:$16 sps:$4 sm:$0xff]   ;;  %v15809_v60 = vld [vmem:[#allocation6 + $0x464] ss:$16 sps:$4 sm:$0xff]  }
 0x2c5   :  { %v2933_v6 = vpop.f32.mrf.mxu0  ;;  %v2974_v55 = vpop.f32.mrf.mxu1  ;;  %v15807_v61 = vld [vmem:[#allocation6 + $0x460] ss:$16 sps:$4 sm:$0xff]  }
 0x2c6   :  { %v18069_v8 = vmax.f32 %v2043_v62, %v2933_v6  ;;  %v18071_v2 = vmax.f32 %v2045_v4, %v2974_v55  ;;  %v15812_v62 = vld [vmem:[#allocation6 + $0x664] ss:$16 sps:$4 sm:$0xff]   ;;  %v15810_v0 = vld [vmem:[#allocation6 + $0x660] ss:$16 sps:$4 sm:$0xff]  }
 0x2c7   :  { %v2935_v9 = vpop.f32.mrf.mxu0  ;;  %v2976_v56 = vpop.f32.mrf.mxu1  ;;  %v15815_v4 = vld [vmem:[#allocation6 + $0x444] ss:$16 sps:$4 sm:$0xff]   ;;  %v15813_v6 = vld [vmem:[#allocation6 + $0x440] ss:$16 sps:$4 sm:$0xff]  }
 0x2c8   :  { %v15818_v55 = vld [vmem:[#allocation6 + $0x644] ss:$16 sps:$4 sm:$0xff]   ;;  %v15816_v9 = vld [vmem:[#allocation6 + $0x640] ss:$16 sps:$4 sm:$0xff]  }
 0x2c9   :  { %v2936_v3 = vpop.f32.mrf.mxu0  ;;  %v2977_v10 = vpop.f32.mrf.mxu1  ;;  %v15821_v56 = vld [vmem:[#allocation6 + $0x424] ss:$16 sps:$4 sm:$0xff]  }
 0x2ca   :  { %v15819_v3 = vld [vmem:[#allocation6 + $0x420] ss:$16 sps:$4 sm:$0xff]   ;;  %v15824_v10 = vld [vmem:[#allocation6 + $0x624] ss:$16 sps:$4 sm:$0xff]  }
 0x303   :  { %v3790_v17 = vpop.f32.mrf.mxu0  ;;  %v3831_v20 = vpop.f32.mrf.mxu1 }
 0x304   :  { %v3920_v19 = vmax.f32 %v18046_v43, %v3790_v17  ;;  %v3922_v24 = vmax.f32 %v18051_v21, %v3831_v20  ;;  %v15825_v17 = vld [vmem:[#allocation6 + $0x400] ss:$16 sps:$4 sm:$0xff]   ;;  %v15833_v20 = vld [vmem:[#allocation6 + $0x5e4] ss:$16 sps:$4 sm:$0xff]  }
 0x305   :  { %v3792_v25 = vpop.f32.mrf.mxu0  ;;  %v3833_v30 = vpop.f32.mrf.mxu1 }
 0x306   :  { %v3970_v28 = vadd.f32 %v3933_v16, %v3920_v19  ;;  %v3921_v29 = vmax.f32 %v18053_v48, %v3792_v25  ;;  %v3972_v57 = vadd.f32 %v3941_v18, %v3922_v24  ;;  %v3923_v32 = vmax.f32 %v18055_v50, %v3833_v30  ;;  %v15827_v16 = vld [vmem:[#allocation6 + $0x404] ss:$16 sps:$4 sm:$0xff]   ;;  %v15828_v19 = vld [vmem:[#allocation6 + $0x600] ss:$16 sps:$4 sm:$0xff]  }
 0x307   :  { %v3794_v33 = vpop.f32.mrf.mxu0  ;;  %v3835_v34 = vpop.f32.mrf.mxu1  ;;  %v15830_v18 = vld [vmem:[#allocation6 + $0x604] ss:$16 sps:$4 sm:$0xff]   ;;  %v15834_v25 = vld [vmem:[#allocation6 + $0x7e0] ss:$16 sps:$4 sm:$0xff]  }
 0x308   :  { %v3971_v43 = vadd.f32 %v3937_v23, %v3921_v29  ;;  %v3978_v37 = vmax.f32 %v3970_v28, 0.0  ;;  %v3973_v39 = vadd.f32 %v3945_v27, %v3923_v32  ;;  %v3980_v41 = vmax.f32 %v3972_v57, 0.0  ;;  %v15831_v23 = vld [vmem:[#allocation6 + $0x5e0] ss:$16 sps:$4 sm:$0xff]   ;;  %v15836_v24 = vld [vmem:[#allocation6 + $0x7e4] ss:$16 sps:$4 sm:$0xff]  }
 0x309   :  { %v3795_v40 = vpop.f32.mrf.mxu0  ;;  %v3836_v42 = vpop.f32.mrf.mxu1  ;;  %v15839_v27 = vld [vmem:[#allocation6 + $0x5c4] ss:$16 sps:$4 sm:$0xff]   ;;  %v15837_v28 = vld [vmem:[#allocation6 + $0x5c0] ss:$16 sps:$4 sm:$0xff]  }
 0x30a   :  { %v3979_v21 = vmax.f32 %v3971_v43, 0.0  ;;  %v3981_v46 = vmax.f32 %v3973_v39, 0.0  ;;  %v18101_v48 = vpack.c.bf16 %v3978_v37, %v3978_v37  ;;  %v18105_v50 = vpack.c.bf16 %v3980_v41, %v3980_v41  ;;  %v15842_v29 = vld [vmem:[#allocation6 + $0x7c4] ss:$16 sps:$4 sm:$0xff]   ;;  %v15840_v30 = vld [vmem:[#allocation6 + $0x7c0] ss:$16 sps:$4 sm:$0xff]  }
 0x30b   :  { %v15845_v57 = vld [vmem:[#allocation6 + $0x5a4] ss:$16 sps:$4 sm:$0xff]   ;;  %v15843_v32 = vld [vmem:[#allocation6 + $0x5a0] ss:$16 sps:$4 sm:$0xff]  }
 0x30c   :  { %v18099_v36 = vpack.c.bf16 %v3979_v21, %v3979_v21  ;;  %v18103_v22 = vpack.c.bf16 %v3981_v46, %v3981_v46  ;;  %v15848_v33 = vld [vmem:[#allocation6 + $0x7a4] ss:$16 sps:$4 sm:$0xff]   ;;  %v15846_v43 = vld [vmem:[#allocation6 + $0x7a0] ss:$16 sps:$4 sm:$0xff]  }
 0x30d   :  { %v15851_v34 = vld [vmem:[#allocation6 + $0x584] ss:$16 sps:$4 sm:$0xff]   ;;  %v15849_v39 = vld [vmem:[#allocation6 + $0x580] ss:$16 sps:$4 sm:$0xff]  }
 0x30e   :  { %5562 = vmatprep.mubr.bf16.mxu0 %v18099_v36  ;;  %5603 = vmatprep.mubr.bf16.mxu1 %v18103_v22  ;;  %v15854_v37 = vld [vmem:[#allocation6 + $0x784] ss:$16 sps:$4 sm:$0xff]   ;;  %v15852_v40 = vld [vmem:[#allocation6 + $0x780] ss:$16 sps:$4 sm:$0xff]  }
 0x30f   :  { %5563 = vmatmul.mubr.bf16.vlgmr.msra.gmra.mxu0 %v18101_v48  ;;  %5604 = vmatmul.mubr.bf16.vlgmr.msra.gmra.mxu1 %v18105_v50  ;;  %v15857_v41 = vld [vmem:[#allocation6 + $0x564] ss:$16 sps:$4 sm:$0xff]   ;;  %v15855_v42 = vld [vmem:[#allocation6 + $0x560] ss:$16 sps:$4 sm:$0xff]  }
 0x310   :  { %5613 = vmatpush1.bf16.msra.mxu0 %v15783_v45  ;;  %5654 = vmatpush1.bf16.msra.mxu1 %v15786_v35  ;;  %v15860_v21 = vld [vmem:[#allocation6 + $0x764] ss:$16 sps:$4 sm:$0xff]   ;;  %v15858_v45 = vld [vmem:[#allocation6 + $0x760] ss:$16 sps:$4 sm:$0xff]  }
 0x311   :  { %5614 = vmatprep.subr.bf16.mxu0 %v15791_v47  ;;  %5655 = vmatprep.subr.bf16.mxu1 %v15794_v26  ;;  %v15863_v46 = vld [vmem:[#allocation6 + $0x544] ss:$16 sps:$4 sm:$0xff]   ;;  %v3948_v47 = vsub.s32 4, %v18073_v59  ;;  %v15861_v26 = vld [vmem:[#allocation6 + $0x540] ss:$16 sps:$4 sm:$0xff]  }
 0x312   :  { %v15866_v35 = vld [vmem:[#allocation6 + $0x744] ss:$16 sps:$4 sm:$0xff]  }
 0x314   :  { %5615 = vmatpush1.bf16.msra.mxu0 %v15789_v38  ;;  %5656 = vmatpush1.bf16.msra.mxu1 %v15792_v49  ;;  %v3956_v38 = vsub.s32 6, %v18073_v59  ;;  %v3952_v49 = vsub.s32 5, %v18073_v59 }
 0x315   :  { %5616 = vmatprep.subr.bf16.mxu0 %v15797_v12  ;;  %5657 = vmatprep.subr.bf16.mxu1 %v15800_v51  ;;  %v15864_v12 = vld [vmem:[#allocation6 + $0x740] ss:$16 sps:$4 sm:$0xff]   ;;  %v3960_v51 = vsub.s32 7, %v18073_v59 }
 0x318   :  { %5617 = vmatpush1.bf16.msra.mxu0 %v15795_v52  ;;  %5658 = vmatpush1.bf16.msra.mxu1 %v15798_v44  ;;  %v15869_v52 = vld [vmem:[#allocation6 + $0x524] ss:$16 sps:$4 sm:$0xff]   ;;  %v3949_v44 = vrot.slane %v18075_v7, %v3948_v47  ;;  %v15902_v47 = vld [vmem:[#allocation6 + $0x28c] ss:$16 sps:$4 sm:$0xff]  }
 0x319   :  { %5618 = vmatprep.subr.bf16.mxu0 %v15803_v31  ;;  %5659 = vmatprep.subr.bf16.mxu1 %v15806_v54  ;;  %v15872_v31 = vld [vmem:[#allocation6 + $0x724] ss:$16 sps:$4 sm:$0xff]   ;;  %v3957_v54 = vrot.slane %v18075_v7, %v3956_v38  ;;  %v15897_v38 = vld [vmem:[#allocation6 + $0x88] ss:$16 sps:$4 sm:$0xff]  }
 0x31c   :  { %5619 = vmatpush1.bf16.msra.mxu0 %v15801_v53  ;;  %5660 = vmatpush1.bf16.msra.mxu1 %v15804_v58 }
 0x31d   :  { %5620 = vmatprep.subr.bf16.mxu0 %v15809_v60  ;;  %5661 = vmatprep.subr.bf16.mxu1 %v15812_v62  ;;  %v15867_v62 = vld [vmem:[#allocation6 + $0x520] ss:$16 sps:$4 sm:$0xff]  }
 0x320   :  { %5621 = vmatpush1.bf16.msra.mxu0 %v15807_v61  ;;  %5662 = vmatpush1.bf16.msra.mxu1 %v15810_v0  ;;  %v3953_v61 = vrot.slane %v18075_v7, %v3952_v49  ;;  %v15905_v49 = vld [vmem:[#allocation6 + $0x6c] ss:$16 sps:$4 sm:$0xff]  }
 0x321   :  { %5622 = vmatprep.subr.bf16.mxu0 %v15815_v4  ;;  %5663 = vmatprep.subr.bf16.mxu1 %v15818_v55  ;;  %v15870_v55 = vld [vmem:[#allocation6 + $0x720] ss:$16 sps:$4 sm:$0xff]  }
 0x324   :  { %5623 = vmatpush1.bf16.msra.mxu0 %v15813_v6  ;;  %5664 = vmatpush1.bf16.msra.mxu1 %v15816_v9  ;;  %v3961_v6 = vrot.slane %v18075_v7, %v3960_v51  ;;  %v15875_v9 = vld [vmem:[#allocation6 + $0x504] ss:$16 sps:$4 sm:$0xff]   ;;  %v15903_v51 = vld [vmem:[#allocation6 + $0x68] ss:$16 sps:$4 sm:$0xff]  }
 0x325   :  { %5624 = vmatprep.subr.bf16.mxu0 %v15821_v56  ;;  %5665 = vmatprep.subr.bf16.mxu1 %v15824_v10 }
 0x328   :  { %5625 = vmatpush1.bf16.msra.mxu0 %v15819_v3  ;;  %5666 = vmatpush1.bf16.msra.mxu1 %v15822_v11 }
 0x329   :  { %5626 = vmatprep.subr.bf16.mxu0 %v15827_v16  ;;  %5667 = vmatprep.subr.bf16.mxu1 %v15830_v18 }
 0x32c   :  { %5627 = vmatpush1.bf16.msra.mxu0 %v15825_v17  ;;  %5668 = vmatpush1.bf16.msra.mxu1 %v15828_v19 }
 0x32d   :  { %5628 = vmatprep.subr.bf16.mxu0 %v15833_v20  ;;  %5669 = vmatprep.subr.bf16.mxu1 %v15836_v24  ;;  %v15876_v24 = vld [vmem:[#allocation6 + $0x700] ss:$16 sps:$4 sm:$0xff]  }
 0x330   :  { %5629 = vmatpush2.bf16.msra.mxu0 %v15831_v23  ;;  %5670 = vmatpush2.bf16.msra.mxu1 %v15834_v25  ;;  %v15881_v25 = vld [vmem:[#allocation6 + $0xec] ss:$16 sps:$4 sm:$0xff]  }
 0x331   :  { %5630 = vmatprep.subr.bf16.mxu0 %v15839_v27  ;;  %5671 = vmatprep.subr.bf16.mxu1 %v15842_v29  ;;  %v15884_v29 = vld [vmem:[#allocation6 + $0x2ec] ss:$16 sps:$4 sm:$0xff]  }
 0x334   :  { %5631 = vmatpush2.bf16.msra.mxu0 %v15837_v28  ;;  %5672 = vmatpush2.bf16.msra.mxu1 %v15840_v30 }
 0x335   :  { %5632 = vmatprep.subr.bf16.mxu0 %v15845_v57  ;;  %5673 = vmatprep.subr.bf16.mxu1 %v15848_v33 }
 0x338   :  { %5633 = vmatpush2.bf16.msra.mxu0 %v15843_v32  ;;  %5674 = vmatpush2.bf16.msra.mxu1 %v15846_v43  ;;  %v15882_v43 = vld [vmem:[#allocation6 + $0x2e8] ss:$16 sps:$4 sm:$0xff]  }
 0x339   :  { %5634 = vmatprep.subr.bf16.mxu0 %v15851_v34  ;;  %5675 = vmatprep.subr.bf16.mxu1 %v15854_v37  ;;  %v15887_v37 = vld [vmem:[#allocation6 + $0xcc] ss:$16 sps:$4 sm:$0xff]  }
 0x33c   :  { %5635 = vmatpush2.bf16.msra.mxu0 %v15849_v39  ;;  %5676 = vmatpush2.bf16.msra.mxu1 %v15852_v40  ;;  %v15890_v39 = vld [vmem:[#allocation6 + $0x2cc] ss:$16 sps:$4 sm:$0xff]   ;;  %v15885_v40 = vld [vmem:[#allocation6 + $0xc8] ss:$16 sps:$4 sm:$0xff]  }
 0x33d   :  { %5636 = vmatprep.subr.bf16.mxu0 %v15857_v41  ;;  %5677 = vmatprep.subr.bf16.mxu1 %v15860_v21  ;;  %v15888_v41 = vld [vmem:[#allocation6 + $0x2c8] ss:$16 sps:$4 sm:$0xff]   ;;  %v15893_v21 = vld [vmem:[#allocation6 + $0xac] ss:$16 sps:$4 sm:$0xff]  }
 0x340   :  { %5637 = vmatpush2.bf16.msra.mxu0 %v15855_v42  ;;  %5678 = vmatpush2.bf16.msra.mxu1 %v15858_v45  ;;  %v15896_v42 = vld [vmem:[#allocation6 + $0x2ac] ss:$16 sps:$4 sm:$0xff]   ;;  %v15891_v45 = vld [vmem:[#allocation6 + $0xa8] ss:$16 sps:$4 sm:$0xff]  }
 0x341   :  { %5638 = vmatprep.subr.bf16.mxu0 %v15863_v46  ;;  %5679 = vmatprep.subr.bf16.mxu1 %v15866_v35  ;;  %v15894_v46 = vld [vmem:[#allocation6 + $0x2a8] ss:$16 sps:$4 sm:$0xff]   ;;  %v15899_v35 = vld [vmem:[#allocation6 + $0x8c] ss:$16 sps:$4 sm:$0xff]  }
 0x343   :  { %v3872_v53 = vpop.f32.mrf.mxu0  ;;  %v3913_v60 = vpop.f32.mrf.mxu1 }
 0x344   :  { %v3924_v58 = vmax.f32 %v18063_v63, %v3872_v53  ;;  %5639 = vmatpush2.bf16.msra.mxu0 %v15861_v26  ;;  %v3926_v0 = vmax.f32 %v18067_v5, %v3913_v60  ;;  %5680 = vmatpush2.bf16.msra.mxu1 %v15864_v12  ;;  %v15878_v63 = vld [vmem:[#allocation6 + $0x704] ss:$16 sps:$4 sm:$0xff]   ;;  %v15873_v5 = vld [vmem:[#allocation6 + $0x500] ss:$16 sps:$4 sm:$0xff]   ;;  %v15900_v26 = vld [vmem:[#allocation6 + $0x288] ss:$16 sps:$4 sm:$0xff]  }
 0x345   :  { %v3874_v4 = vpop.f32.mrf.mxu0  ;;  %5640 = vmatprep.subr.bf16.mxu0 %v15869_v52  ;;  %v3915_v10 = vpop.f32.mrf.mxu1  ;;  %5681 = vmatprep.subr.bf16.mxu1 %v15872_v31  ;;  %v15908_v12 = vld [vmem:[#allocation6 + $0x26c] ss:$16 sps:$4 sm:$0xff]   ;;  %v15906_v52 = vld [vmem:[#allocation6 + $0x268] ss:$16 sps:$4 sm:$0xff]  }
 0x346   :  { %v3974_v56 = vadd.f32 %v3949_v44, %v3924_v58  ;;  %v3925_v3 = vmax.f32 %v18069_v8, %v3874_v4  ;;  %v3976_v11 = vadd.f32 %v3957_v54, %v3926_v0  ;;  %v3927_v16 = vmax.f32 %v18071_v2, %v3915_v10  ;;  %v15879_v2 = vld [vmem:[#allocation6 + $0xe8] ss:$16 sps:$4 sm:$0xff]   ;;  %v15911_v44 = vld [vmem:[#allocation6 + $0x4c] ss:$16 sps:$4 sm:$0xff]  }
 0x347   :  { %v3876_v17 = vpop.f32.mrf.mxu0  ;;  %v3917_v19 = vpop.f32.mrf.mxu1  ;;  %v15914_v31 = vld [vmem:[#allocation6 + $0x24c] ss:$16 sps:$4 sm:$0xff]   ;;  %v15909_v53 = vld [vmem:[#allocation6 + $0x48] ss:$16 sps:$4 sm:$0xff]  }
 0x348   :  { %v3975_v18 = vadd.f32 %v3953_v61, %v3925_v3  ;;  %5641 = vmatpush2.bf16.msra.mxu0 %v15867_v62  ;;  %v3982_v20 = vmax.f32 %v3974_v56, 0.0  ;;  %v3977_v23 = vadd.f32 %v3961_v6, %v3927_v16  ;;  %5682 = vmatpush2.bf16.msra.mxu1 %v15870_v55  ;;  %v3984_v27 = vmax.f32 %v3976_v11, 0.0  ;;  %v15912_v54 = vld [vmem:[#allocation6 + $0x248] ss:$16 sps:$4 sm:$0xff]   ;;  %v15917_v58 = vld [vmem:[#allocation6 + $0x2c] ss:$16 sps:$4 sm:$0xff]  }
 0x349   :  { %v3877_v7 = vpop.f32.mrf.mxu0  ;;  %5642 = vmatprep.subr.bf16.mxu0 %v15875_v9  ;;  %v3918_v28 = vpop.f32.mrf.mxu1  ;;  %5683 = vmatprep.subr.bf16.mxu1 %v15878_v63  ;;  %v15920_v60 = vld [vmem:[#allocation6 + $0x22c] ss:$16 sps:$4 sm:$0xff]   ;;  %v15915_v61 = vld [vmem:[#allocation6 + $0x28] ss:$16 sps:$4 sm:$0xff]  }
 0x34a   :  { %v3983_v8 = vmax.f32 %v3975_v18, 0.0  ;;  %v3985_v30 = vmax.f32 %v3977_v23, 0.0  ;;  %v18125_v32 = vpack.c.bf16 %v3982_v20, %v3982_v20  ;;  %v18129_v34 = vpack.c.bf16 %v3984_v27, %v3984_v27  ;;  %v15918_v62 = vld [vmem:[#allocation6 + $0x228] ss:$16 sps:$4 sm:$0xff]   ;;  %v15923_v0 = vld [vmem:[#allocation6 + $0xc] ss:$16 sps:$4 sm:$0xff]  }
 0x34b   :  { %v15926_v4 = vld [vmem:[#allocation6 + $0x20c] ss:$16 sps:$4 sm:$0xff]   ;;  %v15921_v6 = vld [vmem:[#allocation6 + $0x8] ss:$16 sps:$4 sm:$0xff]  }
 0x34c   :  { %v18123_v57 = vpack.c.bf16 %v3983_v8, %v3983_v8  ;;  %5643 = vmatpush2.bf16.msra.mxu0 %v15873_v5  ;;  %v18127_v33 = vpack.c.bf16 %v3985_v30, %v3985_v30  ;;  %5684 = vmatpush2.bf16.msra.mxu1 %v15876_v24  ;;  %v15924_v55 = vld [vmem:[#allocation6 + $0x208] ss:$16 sps:$4 sm:$0xff]   ;;  %v15929_v9 = vld [vmem:[#allocation6 + $0x1ec] ss:$16 sps:$4 sm:$0xff]  }
 0x34d   :  { %5694 = vmatprep.subr.bf16.mxu0 %v15881_v25  ;;  %5735 = vmatprep.subr.bf16.mxu1 %v15884_v29  ;;  %v15932_v56 = vld [vmem:[#allocation6 + $0x3ec] ss:$16 sps:$4 sm:$0xff]   ;;  %v15927_v3 = vld [vmem:[#allocation6 + $0x1e8] ss:$16 sps:$4 sm:$0xff]  }
 0x34e   :  { %5644 = vmatprep.mubr.bf16.mxu0 %v18123_v57  ;;  %5685 = vmatprep.mubr.bf16.mxu1 %v18127_v33  ;;  %v15930_v10 = vld [vmem:[#allocation6 + $0x3e8] ss:$16 sps:$4 sm:$0xff]   ;;  %v15935_v63 = vld [vmem:[#allocation6 + $0x1cc] ss:$16 sps:$4 sm:$0xff]  }
 0x34f   :  { %5645 = vmatmul.mubr.bf16.vlgmr.msra.gmra.mxu0 %v18125_v32  ;;  %5686 = vmatmul.mubr.bf16.vlgmr.msra.gmra.mxu1 %v18129_v34  ;;  %v15938_v11 = vld [vmem:[#allocation6 + $0x3cc] ss:$16 sps:$4 sm:$0xff]   ;;  %v15933_v16 = vld [vmem:[#allocation6 + $0x1c8] ss:$16 sps:$4 sm:$0xff]  }
 0x350   :  { %5695 = vmatpush1.bf16.msra.mxu0 %v15879_v2  ;;  %5736 = vmatpush1.bf16.msra.mxu1 %v15882_v43  ;;  %v15936_v17 = vld [vmem:[#allocation6 + $0x3c8] ss:$16 sps:$4 sm:$0xff]   ;;  %v15941_v18 = vld [vmem:[#allocation6 + $0x1ac] ss:$16 sps:$4 sm:$0xff]  }
 0x351   :  { %5726 = vmatprep.mubr.bf16.mxu0 %v18099_v36  ;;  %5767 = vmatprep.mubr.bf16.mxu1 %v18103_v22  ;;  %v15944_v19 = vld [vmem:[#allocation6 + $0x3ac] ss:$16 sps:$4 sm:$0xff]   ;;  %v15939_v5 = vld [vmem:[#allocation6 + $0x1a8] ss:$16 sps:$4 sm:$0xff]  }
 0x352   :  { %5696 = vmatprep.subr.bf16.mxu0 %v15887_v37  ;;  %5737 = vmatprep.subr.bf16.mxu1 %v15890_v39  ;;  %v15942_v20 = vld [vmem:[#allocation6 + $0x3a8] ss:$16 sps:$4 sm:$0xff]   ;;  %v15947_v23 = vld [vmem:[#allocation6 + $0x18c] ss:$16 sps:$4 sm:$0xff]  }
 0x353   :  { %v15950_v7 = vld [vmem:[#allocation6 + $0x38c] ss:$16 sps:$4 sm:$0xff]   ;;  %v15945_v24 = vld [vmem:[#allocation6 + $0x188] ss:$16 sps:$4 sm:$0xff]  }
 0x354   :  { %5697 = vmatpush1.bf16.msra.mxu0 %v15885_v40  ;;  %5738 = vmatpush1.bf16.msra.mxu1 %v15888_v41  ;;  %v15948_v25 = vld [vmem:[#allocation6 + $0x388] ss:$16 sps:$4 sm:$0xff]   ;;  %v15953_v27 = vld [vmem:[#allocation6 + $0x16c] ss:$16 sps:$4 sm:$0xff]  }
 0x355   :  { %5698 = vmatprep.subr.bf16.mxu0 %v15893_v21  ;;  %5739 = vmatprep.subr.bf16.mxu1 %v15896_v42  ;;  %v15956_v8 = vld [vmem:[#allocation6 + $0x36c] ss:$16 sps:$4 sm:$0xff]   ;;  %v15951_v28 = vld [vmem:[#allocation6 + $0x168] ss:$16 sps:$4 sm:$0xff]  }
 0x356   :  { %v15954_v29 = vld [vmem:[#allocation6 + $0x368] ss:$16 sps:$4 sm:$0xff]   ;;  %v15959_v30 = vld [vmem:[#allocation6 + $0x14c] ss:$16 sps:$4 sm:$0xff]  }
 0x357   :  { %v15962_v2 = vld [vmem:[#allocation6 + $0x34c] ss:$16 sps:$4 sm:$0xff]   ;;  %v15957_v43 = vld [vmem:[#allocation6 + $0x148] ss:$16 sps:$4 sm:$0xff]  }
 0x358   :  { %5699 = vmatpush1.bf16.msra.mxu0 %v15891_v45  ;;  %5740 = vmatpush1.bf16.msra.mxu1 %v15894_v46  ;;  %v15960_v37 = vld [vmem:[#allocation6 + $0x348] ss:$16 sps:$4 sm:$0xff]   ;;  %v15965_v39 = vld [vmem:[#allocation6 + $0x12c] ss:$16 sps:$4 sm:$0xff]  }
 0x359   :  { %5700 = vmatprep.subr.bf16.mxu0 %v15899_v35  ;;  %5741 = vmatprep.subr.bf16.mxu1 %v15902_v47  ;;  %v15968_v40 = vld [vmem:[#allocation6 + $0x32c] ss:$16 sps:$4 sm:$0xff]   ;;  %v15963_v41 = vld [vmem:[#allocation6 + $0x128] ss:$16 sps:$4 sm:$0xff]  }
 0x35a   :  { %v15966_v21 = vld [vmem:[#allocation6 + $0x328] ss:$16 sps:$4 sm:$0xff]   ;;  %v15971_v42 = vld [vmem:[#allocation6 + $0x10c] ss:$16 sps:$4 sm:$0xff]  }
 0x35b   :  { %v15974_v45 = vld [vmem:[#allocation6 + $0x30c] ss:$16 sps:$4 sm:$0xff]   ;;  %v15969_v46 = vld [vmem:[#allocation6 + $0x108] ss:$16 sps:$4 sm:$0xff]  }
 0x35c   :  { %5701 = vmatpush1.bf16.msra.mxu0 %v15897_v38  ;;  %5742 = vmatpush1.bf16.msra.mxu1 %v15900_v26  ;;  %v15972_v35 = vld [vmem:[#allocation6 + $0x308] ss:$16 sps:$4 sm:$0xff]   ;;  %v15977_v47 = vld [vmem:[#allocation6 + $0x4ec] ss:$16 sps:$4 sm:$0xff]  }
 0x35d   :  { %5702 = vmatprep.subr.bf16.mxu0 %v15905_v49  ;;  %5743 = vmatprep.subr.bf16.mxu1 %v15908_v12  ;;  %v15980_v38 = vld [vmem:[#allocation6 + $0x6ec] ss:$16 sps:$4 sm:$0xff]   ;;  %v15975_v26 = vld [vmem:[#allocation6 + $0x4e8] ss:$16 sps:$4 sm:$0xff]  }
 0x35e   :  { %v15978_v49 = vld [vmem:[#allocation6 + $0x6e8] ss:$16 sps:$4 sm:$0xff]   ;;  %v15983_v12 = vld [vmem:[#allocation6 + $0x4cc] ss:$16 sps:$4 sm:$0xff]  }
 0x360   :  { %5703 = vmatpush1.bf16.msra.mxu0 %v15903_v51  ;;  %5744 = vmatpush1.bf16.msra.mxu1 %v15906_v52  ;;  %v15986_v51 = vld [vmem:[#allocation6 + $0x6cc] ss:$16 sps:$4 sm:$0xff]   ;;  %v15981_v52 = vld [vmem:[#allocation6 + $0x4c8] ss:$16 sps:$4 sm:$0xff]  }
 0x361   :  { %5704 = vmatprep.subr.bf16.mxu0 %v15911_v44  ;;  %5745 = vmatprep.subr.bf16.mxu1 %v15914_v31  ;;  %v15984_v44 = vld [vmem:[#allocation6 + $0x6c8] ss:$16 sps:$4 sm:$0xff]   ;;  %v15989_v31 = vld [vmem:[#allocation6 + $0x4ac] ss:$16 sps:$4 sm:$0xff]  }
 0x364   :  { %5705 = vmatpush1.bf16.msra.mxu0 %v15909_v53  ;;  %5746 = vmatpush1.bf16.msra.mxu1 %v15912_v54  ;;  %v15992_v53 = vld [vmem:[#allocation6 + $0x6ac] ss:$16 sps:$4 sm:$0xff]   ;;  %v15987_v54 = vld [vmem:[#allocation6 + $0x4a8] ss:$16 sps:$4 sm:$0xff]  }
 0x365   :  { %5706 = vmatprep.subr.bf16.mxu0 %v15917_v58  ;;  %5747 = vmatprep.subr.bf16.mxu1 %v15920_v60  ;;  %v15990_v58 = vld [vmem:[#allocation6 + $0x6a8] ss:$16 sps:$4 sm:$0xff]   ;;  %v15995_v60 = vld [vmem:[#allocation6 + $0x48c] ss:$16 sps:$4 sm:$0xff]  }
 0x368   :  { %5707 = vmatpush1.bf16.msra.mxu0 %v15915_v61  ;;  %5748 = vmatpush1.bf16.msra.mxu1 %v15918_v62  ;;  %v15998_v61 = vld [vmem:[#allocation6 + $0x68c] ss:$16 sps:$4 sm:$0xff]   ;;  %v15993_v62 = vld [vmem:[#allocation6 + $0x488] ss:$16 sps:$4 sm:$0xff]  }
 0x369   :  { %5708 = vmatprep.subr.bf16.mxu0 %v15923_v0  ;;  %5749 = vmatprep.subr.bf16.mxu1 %v15926_v4  ;;  %v15996_v0 = vld [vmem:[#allocation6 + $0x688] ss:$16 sps:$4 sm:$0xff]   ;;  %v16001_v4 = vld [vmem:[#allocation6 + $0x46c] ss:$16 sps:$4 sm:$0xff]  }
 0x36c   :  { %5709 = vmatpush1.bf16.msra.mxu0 %v15921_v6  ;;  %5750 = vmatpush1.bf16.msra.mxu1 %v15924_v55  ;;  %v16004_v6 = vld [vmem:[#allocation6 + $0x66c] ss:$16 sps:$4 sm:$0xff]   ;;  %v15999_v55 = vld [vmem:[#allocation6 + $0x468] ss:$16 sps:$4 sm:$0xff]  }
 0x36d   :  { %5710 = vmatprep.subr.bf16.mxu0 %v15929_v9  ;;  %5751 = vmatprep.subr.bf16.mxu1 %v15932_v56  ;;  %v16002_v9 = vld [vmem:[#allocation6 + $0x668] ss:$16 sps:$4 sm:$0xff]   ;;  %v16007_v56 = vld [vmem:[#allocation6 + $0x44c] ss:$16 sps:$4 sm:$0xff]  }
 0x370   :  { %5711 = vmatpush2.bf16.msra.mxu0 %v15927_v3  ;;  %5752 = vmatpush2.bf16.msra.mxu1 %v15930_v10  ;;  %v16010_v3 = vld [vmem:[#allocation6 + $0x64c] ss:$16 sps:$4 sm:$0xff]   ;;  %v16005_v10 = vld [vmem:[#allocation6 + $0x448] ss:$16 sps:$4 sm:$0xff]  }
 0x371   :  { %5712 = vmatprep.subr.bf16.mxu0 %v15935_v63  ;;  %5753 = vmatprep.subr.bf16.mxu1 %v15938_v11  ;;  %v16008_v63 = vld [vmem:[#allocation6 + $0x648] ss:$16 sps:$4 sm:$0xff]   ;;  %v16013_v11 = vld [vmem:[#allocation6 + $0x42c] ss:$16 sps:$4 sm:$0xff]  }
 0x374   :  { %5713 = vmatpush2.bf16.msra.mxu0 %v15933_v16  ;;  %5754 = vmatpush2.bf16.msra.mxu1 %v15936_v17  ;;  %v16016_v16 = vld [vmem:[#allocation6 + $0x62c] ss:$16 sps:$4 sm:$0xff]   ;;  %v16011_v17 = vld [vmem:[#allocation6 + $0x428] ss:$16 sps:$4 sm:$0xff]  }
 0x375   :  { %5714 = vmatprep.subr.bf16.mxu0 %v15941_v18  ;;  %5755 = vmatprep.subr.bf16.mxu1 %v15944_v19  ;;  %v16014_v18 = vld [vmem:[#allocation6 + $0x628] ss:$16 sps:$4 sm:$0xff]   ;;  %v16019_v19 = vld [vmem:[#allocation6 + $0x40c] ss:$16 sps:$4 sm:$0xff]  }
 0x378   :  { %5715 = vmatpush2.bf16.msra.mxu0 %v15939_v5  ;;  %5756 = vmatpush2.bf16.msra.mxu1 %v15942_v20  ;;  %v16022_v5 = vld [vmem:[#allocation6 + $0x60c] ss:$16 sps:$4 sm:$0xff]   ;;  %v16017_v20 = vld [vmem:[#allocation6 + $0x408] ss:$16 sps:$4 sm:$0xff]  }
 0x379   :  { %5716 = vmatprep.subr.bf16.mxu0 %v15947_v23  ;;  %5757 = vmatprep.subr.bf16.mxu1 %v15950_v7  ;;  %v16020_v23 = vld [vmem:[#allocation6 + $0x608] ss:$16 sps:$4 sm:$0xff]   ;;  %v16025_v7 = vld [vmem:[#allocation6 + $0x5ec] ss:$16 sps:$4 sm:$0xff]  }
 0x37c   :  { %5717 = vmatpush2.bf16.msra.mxu0 %v15945_v24  ;;  %5758 = vmatpush2.bf16.msra.mxu1 %v15948_v25  ;;  %v16028_v24 = vld [vmem:[#allocation6 + $0x7ec] ss:$16 sps:$4 sm:$0xff]   ;;  %v16023_v25 = vld [vmem:[#allocation6 + $0x5e8] ss:$16 sps:$4 sm:$0xff]  }
 0x37d   :  { %5718 = vmatprep.subr.bf16.mxu0 %v15953_v27  ;;  %5759 = vmatprep.subr.bf16.mxu1 %v15956_v8  ;;  %v16026_v27 = vld [vmem:[#allocation6 + $0x7e8] ss:$16 sps:$4 sm:$0xff]   ;;  %v16031_v8 = vld [vmem:[#allocation6 + $0x5cc] ss:$16 sps:$4 sm:$0xff]  }
 0x380   :  { %5719 = vmatpush2.bf16.msra.mxu0 %v15951_v28  ;;  %5760 = vmatpush2.bf16.msra.mxu1 %v15954_v29  ;;  %v16034_v28 = vld [vmem:[#allocation6 + $0x7cc] ss:$16 sps:$4 sm:$0xff]   ;;  %v16029_v29 = vld [vmem:[#allocation6 + $0x5c8] ss:$16 sps:$4 sm:$0xff]  }
 0x381   :  { %5720 = vmatprep.subr.bf16.mxu0 %v15959_v30  ;;  %5761 = vmatprep.subr.bf16.mxu1 %v15962_v2  ;;  %v16032_v30 = vld [vmem:[#allocation6 + $0x7c8] ss:$16 sps:$4 sm:$0xff]   ;;  %v16037_v2 = vld [vmem:[#allocation6 + $0x5ac] ss:$16 sps:$4 sm:$0xff]  }
 0x384   :  { %5721 = vmatpush2.bf16.msra.mxu0 %v15957_v43  ;;  %5762 = vmatpush2.bf16.msra.mxu1 %v15960_v37  ;;  %v16040_v43 = vld [vmem:[#allocation6 + $0x7ac] ss:$16 sps:$4 sm:$0xff]   ;;  %v16035_v37 = vld [vmem:[#allocation6 + $0x5a8] ss:$16 sps:$4 sm:$0xff]  }
 0x385   :  { %5722 = vmatprep.subr.bf16.mxu0 %v15965_v39  ;;  %5763 = vmatprep.subr.bf16.mxu1 %v15968_v40  ;;  %v16038_v39 = vld [vmem:[#allocation6 + $0x7a8] ss:$16 sps:$4 sm:$0xff]   ;;  %v16043_v40 = vld [vmem:[#allocation6 + $0x58c] ss:$16 sps:$4 sm:$0xff]  }
 0x388   :  { %5723 = vmatpush2.bf16.msra.mxu0 %v15963_v41  ;;  %5764 = vmatpush2.bf16.msra.mxu1 %v15966_v21  ;;  %v16046_v41 = vld [vmem:[#allocation6 + $0x78c] ss:$16 sps:$4 sm:$0xff]   ;;  %v16041_v21 = vld [vmem:[#allocation6 + $0x588] ss:$16 sps:$4 sm:$0xff]  }
 0x389   :  { %5724 = vmatprep.subr.bf16.mxu0 %v15971_v42  ;;  %5765 = vmatprep.subr.bf16.mxu1 %v15974_v45  ;;  %v16044_v42 = vld [vmem:[#allocation6 + $0x788] ss:$16 sps:$4 sm:$0xff]   ;;  %v16049_v45 = vld [vmem:[#allocation6 + $0x56c] ss:$16 sps:$4 sm:$0xff]  }
 0x38c   :  { %5725 = vmatpush2.bf16.msra.mxu0 %v15969_v46  ;;  %5766 = vmatpush2.bf16.msra.mxu1 %v15972_v35  ;;  %v16052_v46 = vld [vmem:[#allocation6 + $0x76c] ss:$16 sps:$4 sm:$0xff]   ;;  %v16047_v35 = vld [vmem:[#allocation6 + $0x568] ss:$16 sps:$4 sm:$0xff]  }
 0x38d   :  { %5776 = vmatprep.subr.bf16.mxu0 %v15977_v47  ;;  %5817 = vmatprep.subr.bf16.mxu1 %v15980_v38  ;;  %v16050_v47 = vld [vmem:[#allocation6 + $0x768] ss:$16 sps:$4 sm:$0xff]   ;;  %v16055_v38 = vld [vmem:[#allocation6 + $0x54c] ss:$16 sps:$4 sm:$0xff]  }
 0x38f   :  { %5727 = vmatmul.mubr.bf16.vlgmr.msra.gmra.mxu0 %v18101_v48  ;;  %5768 = vmatmul.mubr.bf16.vlgmr.msra.gmra.mxu1 %v18105_v50 }
 0x390   :  { %5777 = vmatpush1.bf16.msra.mxu0 %v15975_v26  ;;  %5808 = vmatprep.mubr.bf16.mxu0 %v18123_v57  ;;  %v16058_v26 = vld [vmem:[#allocation6 + $0x74c] ss:$16 sps:$4 sm:$0xff]  }
 0x391   :  { %5818 = vmatpush1.bf16.msra.mxu1 %v15978_v49  ;;  %5849 = vmatprep.mubr.bf16.mxu1 %v18127_v33  ;;  %v16053_v49 = vld [vmem:[#allocation6 + $0x548] ss:$16 sps:$4 sm:$0xff]  }
 0x392   :  { %5778 = vmatprep.subr.bf16.mxu0 %v15983_v12  ;;  %5819 = vmatprep.subr.bf16.mxu1 %v15986_v51  ;;  %v16056_v12 = vld [vmem:[#allocation6 + $0x748] ss:$16 sps:$4 sm:$0xff]   ;;  %v16061_v51 = vld [vmem:[#allocation6 + $0x52c] ss:$16 sps:$4 sm:$0xff]  }
 0x394   :  { %5779 = vmatpush1.bf16.msra.mxu0 %v15981_v52  ;;  %v16064_v52 = vld [vmem:[#allocation6 + $0x72c] ss:$16 sps:$4 sm:$0xff]  }
 0x395   :  { %5820 = vmatpush1.bf16.msra.mxu1 %v15984_v44  ;;  %5780 = vmatprep.subr.bf16.mxu0 %v15989_v31  ;;  %v16059_v44 = vld [vmem:[#allocation6 + $0x528] ss:$16 sps:$4 sm:$0xff]  }
 0x396   :  { %5821 = vmatprep.subr.bf16.mxu1 %v15992_v53  ;;  %v16062_v31 = vld [vmem:[#allocation6 + $0x728] ss:$16 sps:$4 sm:$0xff]   ;;  %v16067_v53 = vld [vmem:[#allocation6 + $0x50c] ss:$16 sps:$4 sm:$0xff]  }
 0x398   :  { %5781 = vmatpush1.bf16.msra.mxu0 %v15987_v54  ;;  %v16070_v54 = vld [vmem:[#allocation6 + $0x70c] ss:$16 sps:$4 sm:$0xff]  }
 0x399   :  { %5822 = vmatpush1.bf16.msra.mxu1 %v15990_v58  ;;  %5782 = vmatprep.subr.bf16.mxu0 %v15995_v60  ;;  %v16065_v58 = vld [vmem:[#allocation6 + $0x508] ss:$16 sps:$4 sm:$0xff]  }
 0x39a   :  { %5823 = vmatprep.subr.bf16.mxu1 %v15998_v61  ;;  %v16068_v60 = vld [vmem:[#allocation6 + $0x708] ss:$16 sps:$4 sm:$0xff]   ;;  %v16073_v61 = vld [vmem:[#allocation6 + $0x8e4] ss:$16 sps:$4 sm:$0xff]  }
 0x39c   :  { %5783 = vmatpush1.bf16.msra.mxu0 %v15993_v62  ;;  %v16076_v62 = vld [vmem:[#allocation6 + $0xae4] ss:$16 sps:$4 sm:$0xff]  }
 0x39d   :  { %5824 = vmatpush1.bf16.msra.mxu1 %v15996_v0  ;;  %5784 = vmatprep.subr.bf16.mxu0 %v16001_v4  ;;  %v16071_v0 = vld [vmem:[#allocation6 + $0x8e0] ss:$16 sps:$4 sm:$0xff]  }
 0x39e   :  { %5825 = vmatprep.subr.bf16.mxu1 %v16004_v6  ;;  %v16074_v4 = vld [vmem:[#allocation6 + $0xae0] ss:$16 sps:$4 sm:$0xff]   ;;  %v16079_v6 = vld [vmem:[#allocation6 + $0x8c4] ss:$16 sps:$4 sm:$0xff]  }
 0x3a0   :  { %5785 = vmatpush1.bf16.msra.mxu0 %v15999_v55 }
 0x3a1   :  { %5826 = vmatpush1.bf16.msra.mxu1 %v16002_v9  ;;  %5786 = vmatprep.subr.bf16.mxu0 %v16007_v56  ;;  %v16082_v9 = vld [vmem:[#allocation6 + $0xac4] ss:$16 sps:$4 sm:$0xff]  }
 0x3a2   :  { %5827 = vmatprep.subr.bf16.mxu1 %v16010_v3  ;;  %v16077_v3 = vld [vmem:[#allocation6 + $0x8c0] ss:$16 sps:$4 sm:$0xff]  }
 0x3a4   :  { %5787 = vmatpush1.bf16.msra.mxu0 %v16005_v10 }
 0x3a5   :  { %5828 = vmatpush1.bf16.msra.mxu1 %v16008_v63  ;;  %5788 = vmatprep.subr.bf16.mxu0 %v16013_v11  ;;  %v16080_v11 = vld [vmem:[#allocation6 + $0xac0] ss:$16 sps:$4 sm:$0xff]  }
 0x3a6   :  { %5829 = vmatprep.subr.bf16.mxu1 %v16016_v16  ;;  %v16085_v16 = vld [vmem:[#allocation6 + $0x8a4] ss:$16 sps:$4 sm:$0xff]  }
 0x3a8   :  { %5789 = vmatpush1.bf16.msra.mxu0 %v16011_v17 }
 0x3a9   :  { %5830 = vmatpush1.bf16.msra.mxu1 %v16014_v18  ;;  %5790 = vmatprep.subr.bf16.mxu0 %v16019_v19  ;;  %v16088_v18 = vld [vmem:[#allocation6 + $0xaa4] ss:$16 sps:$4 sm:$0xff]  }
 0x3aa   :  { %5831 = vmatprep.subr.bf16.mxu1 %v16022_v5 }
 0x3ac   :  { %5791 = vmatpush1.bf16.msra.mxu0 %v16017_v20 }
 0x3ad   :  { %5832 = vmatpush1.bf16.msra.mxu1 %v16020_v23  ;;  %5792 = vmatprep.subr.bf16.mxu0 %v16025_v7  ;;  %v16083_v23 = vld [vmem:[#allocation6 + $0x8a0] ss:$16 sps:$4 sm:$0xff]  }
 0x3ae   :  { %5833 = vmatprep.subr.bf16.mxu1 %v16028_v24  ;;  %v16086_v24 = vld [vmem:[#allocation6 + $0xaa0] ss:$16 sps:$4 sm:$0xff]  }
 0x3b0   :  { %5793 = vmatpush2.bf16.msra.mxu0 %v16023_v25  ;;  %v16091_v25 = vld [vmem:[#allocation6 + $0x884] ss:$16 sps:$4 sm:$0xff]  }
 0x3b1   :  { %5834 = vmatpush2.bf16.msra.mxu1 %v16026_v27  ;;  %5794 = vmatprep.subr.bf16.mxu0 %v16031_v8  ;;  %v16094_v8 = vld [vmem:[#allocation6 + $0xa84] ss:$16 sps:$4 sm:$0xff]  }
 0x3b2   :  { %5835 = vmatprep.subr.bf16.mxu1 %v16034_v28  ;;  %v16089_v28 = vld [vmem:[#allocation6 + $0x880] ss:$16 sps:$4 sm:$0xff]  }
 0x3b4   :  { %5795 = vmatpush2.bf16.msra.mxu0 %v16029_v29  ;;  %v16092_v29 = vld [vmem:[#allocation6 + $0xa80] ss:$16 sps:$4 sm:$0xff]  }
 0x3b5   :  { %5836 = vmatpush2.bf16.msra.mxu1 %v16032_v30  ;;  %5796 = vmatprep.subr.bf16.mxu0 %v16037_v2  ;;  %v16097_v30 = vld [vmem:[#allocation6 + $0x864] ss:$16 sps:$4 sm:$0xff]  }
 0x3b6   :  { %5837 = vmatprep.subr.bf16.mxu1 %v16040_v43  ;;  %v16100_v2 = vld [vmem:[#allocation6 + $0xa64] ss:$16 sps:$4 sm:$0xff]   ;;  %v16095_v43 = vld [vmem:[#allocation6 + $0x860] ss:$16 sps:$4 sm:$0xff]  }
 0x3b8   :  { %5797 = vmatpush2.bf16.msra.mxu0 %v16035_v37  ;;  %v16098_v37 = vld [vmem:[#allocation6 + $0xa60] ss:$16 sps:$4 sm:$0xff]  }
 0x3b9   :  { %5838 = vmatpush2.bf16.msra.mxu1 %v16038_v39  ;;  %5798 = vmatprep.subr.bf16.mxu0 %v16043_v40  ;;  %v16103_v39 = vld [vmem:[#allocation6 + $0x844] ss:$16 sps:$4 sm:$0xff]  }
 0x3ba   :  { %5839 = vmatprep.subr.bf16.mxu1 %v16046_v41  ;;  %v16106_v40 = vld [vmem:[#allocation6 + $0xa44] ss:$16 sps:$4 sm:$0xff]   ;;  %v16101_v41 = vld [vmem:[#allocation6 + $0x840] ss:$16 sps:$4 sm:$0xff]  }
 0x3bc   :  { %5799 = vmatpush2.bf16.msra.mxu0 %v16041_v21  ;;  %v16104_v21 = vld [vmem:[#allocation6 + $0xa40] ss:$16 sps:$4 sm:$0xff]  }
 0x3bd   :  { %5840 = vmatpush2.bf16.msra.mxu1 %v16044_v42  ;;  %5800 = vmatprep.subr.bf16.mxu0 %v16049_v45  ;;  %v16109_v42 = vld [vmem:[#allocation6 + $0x824] ss:$16 sps:$4 sm:$0xff]  }
 0x3be   :  { %5841 = vmatprep.subr.bf16.mxu1 %v16052_v46  ;;  %v16112_v45 = vld [vmem:[#allocation6 + $0xa24] ss:$16 sps:$4 sm:$0xff]   ;;  %v16107_v46 = vld [vmem:[#allocation6 + $0x820] ss:$16 sps:$4 sm:$0xff]  }
 0x3c0   :  { %5801 = vmatpush2.bf16.msra.mxu0 %v16047_v35  ;;  %v16110_v35 = vld [vmem:[#allocation6 + $0xa20] ss:$16 sps:$4 sm:$0xff]  }
 0x3c1   :  { %5842 = vmatpush2.bf16.msra.mxu1 %v16050_v47  ;;  %5802 = vmatprep.subr.bf16.mxu0 %v16055_v38  ;;  %v16115_v47 = vld [vmem:[#allocation6 + $0x804] ss:$16 sps:$4 sm:$0xff]  }
 0x3c2   :  { %5843 = vmatprep.subr.bf16.mxu1 %v16058_v26  ;;  %v16118_v38 = vld [vmem:[#allocation6 + $0xa04] ss:$16 sps:$4 sm:$0xff]   ;;  %v16113_v26 = vld [vmem:[#allocation6 + $0x800] ss:$16 sps:$4 sm:$0xff]  }
 0x3c4   :  { %5803 = vmatpush2.bf16.msra.mxu0 %v16053_v49  ;;  %v16116_v49 = vld [vmem:[#allocation6 + $0xa00] ss:$16 sps:$4 sm:$0xff]  }
 0x3c5   :  { %5844 = vmatpush2.bf16.msra.mxu1 %v16056_v12  ;;  %5804 = vmatprep.subr.bf16.mxu0 %v16061_v51  ;;  %v16121_v12 = vld [vmem:[#allocation6 + $0x9e4] ss:$16 sps:$4 sm:$0xff]  }
 0x3c6   :  { %5845 = vmatprep.subr.bf16.mxu1 %v16064_v52  ;;  %v16124_v51 = vld [vmem:[#allocation6 + $0xbe4] ss:$16 sps:$4 sm:$0xff]   ;;  %v16119_v52 = vld [vmem:[#allocation6 + $0x9e0] ss:$16 sps:$4 sm:$0xff]  }
 0x3c8   :  { %5805 = vmatpush2.bf16.msra.mxu0 %v16059_v44  ;;  %v16122_v44 = vld [vmem:[#allocation6 + $0xbe0] ss:$16 sps:$4 sm:$0xff]  }
 0x3c9   :  { %5846 = vmatpush2.bf16.msra.mxu1 %v16062_v31  ;;  %5806 = vmatprep.subr.bf16.mxu0 %v16067_v53  ;;  %v16127_v31 = vld [vmem:[#allocation6 + $0x9c4] ss:$16 sps:$4 sm:$0xff]  }
 0x3ca   :  { %5847 = vmatprep.subr.bf16.mxu1 %v16070_v54  ;;  %v16130_v53 = vld [vmem:[#allocation6 + $0xbc4] ss:$16 sps:$4 sm:$0xff]   ;;  %v16125_v54 = vld [vmem:[#allocation6 + $0x9c0] ss:$16 sps:$4 sm:$0xff]  }
 0x3cc   :  { %5807 = vmatpush2.bf16.msra.mxu0 %v16065_v58  ;;  %v16128_v58 = vld [vmem:[#allocation6 + $0xbc0] ss:$16 sps:$4 sm:$0xff]  }
 0x3cd   :  { %5848 = vmatpush2.bf16.msra.mxu1 %v16068_v60  ;;  %7395 = vmatprep.subr.bf16.mxu0 %v16073_v61  ;;  %v16133_v60 = vld [vmem:[#allocation6 + $0x9a4] ss:$16 sps:$4 sm:$0xff]  }
 0x3ce   :  { %7436 = vmatprep.subr.bf16.mxu1 %v16076_v62  ;;  %v16136_v61 = vld [vmem:[#allocation6 + $0xba4] ss:$16 sps:$4 sm:$0xff]   ;;  %v16131_v62 = vld [vmem:[#allocation6 + $0x9a0] ss:$16 sps:$4 sm:$0xff]  }
 0x3cf   :  { %5809 = vmatmul.mubr.bf16.vlgmr.msra.gmra.mxu0 %v18125_v32  ;;  %v5564_v55 = vpop.f32.mrf.mxu0  ;;  %v5605_v56 = vpop.f32.mrf.mxu1 }
 0x3d0   :  { %5850 = vmatmul.mubr.bf16.vlgmr.msra.gmra.mxu1 %v18129_v34  ;;  %7396 = vmatpush1.bf16.msra.mxu0 %v16071_v0  ;;  %v18143_v10 = vadd.f32 %v5605_v56, %v5564_v55  ;;  %v16134_v0 = vld [vmem:[#allocation6 + $0xba0] ss:$16 sps:$4 sm:$0xff]   ;;  %v16145_v56 = vld [vmem:[#allocation6 + $0x964] ss:$16 sps:$4 sm:$0xff]  }
 0x3d1   :  { %7427 = vmatprep.mubr.bf16.mxu0 %v18099_v36  ;;  %7437 = vmatpush1.bf16.msra.mxu1 %v16074_v4  ;;  %v5566_v63 = vpop.f32.mrf.mxu0  ;;  %v5607_v17 = vpop.f32.mrf.mxu1  ;;  %v16139_v4 = vld [vmem:[#allocation6 + $0x984] ss:$16 sps:$4 sm:$0xff]   ;;  %v16137_v55 = vld [vmem:[#allocation6 + $0x980] ss:$16 sps:$4 sm:$0xff]  }
 0x3d2   :  { %7468 = vmatprep.mubr.bf16.mxu1 %v18103_v22  ;;  %7397 = vmatprep.subr.bf16.mxu0 %v16079_v6  ;;  %v18147_v19 = vadd.f32 %v5607_v17, %v5566_v63  ;;  %v16142_v6 = vld [vmem:[#allocation6 + $0xb84] ss:$16 sps:$4 sm:$0xff]   ;;  %v16143_v63 = vld [vmem:[#allocation6 + $0x960] ss:$16 sps:$4 sm:$0xff]  }
 0x3d3   :  { %7438 = vmatprep.subr.bf16.mxu1 %v16082_v9  ;;  %v5568_v5 = vpop.f32.mrf.mxu0  ;;  %v5609_v20 = vpop.f32.mrf.mxu1  ;;  %v16140_v9 = vld [vmem:[#allocation6 + $0xb80] ss:$16 sps:$4 sm:$0xff]   ;;  %v16154_v17 = vld [vmem:[#allocation6 + $0xb44] ss:$16 sps:$4 sm:$0xff]  }
 0x3d4   :  { %7398 = vmatpush1.bf16.msra.mxu0 %v16077_v3  ;;  %v16148_v3 = vld [vmem:[#allocation6 + $0xb64] ss:$16 sps:$4 sm:$0xff]   ;;  %v16152_v5 = vld [vmem:[#allocation6 + $0xb40] ss:$16 sps:$4 sm:$0xff]  }
 0x3d5   :  { %7439 = vmatpush1.bf16.msra.mxu1 %v16080_v11  ;;  %v5569_v7 = vpop.f32.mrf.mxu0  ;;  %7399 = vmatprep.subr.bf16.mxu0 %v16085_v16  ;;  %v5610_v27 = vpop.f32.mrf.mxu1  ;;  %v16146_v11 = vld [vmem:[#allocation6 + $0xb60] ss:$16 sps:$4 sm:$0xff]   ;;  %v16151_v16 = vld [vmem:[#allocation6 + $0x944] ss:$16 sps:$4 sm:$0xff]  }
 0x3d6   :  { %7440 = vmatprep.subr.bf16.mxu1 %v16088_v18  ;;  %v16149_v18 = vld [vmem:[#allocation6 + $0x940] ss:$16 sps:$4 sm:$0xff]   ;;  %v16157_v20 = vld [vmem:[#allocation6 + $0x924] ss:$16 sps:$4 sm:$0xff]  }
 0x3d7   :  { %v16155_v7 = vld [vmem:[#allocation6 + $0x920] ss:$16 sps:$4 sm:$0xff]   ;;  %v16166_v27 = vld [vmem:[#allocation6 + $0xb04] ss:$16 sps:$4 sm:$0xff]  }
 0x3d8   :  { %7400 = vmatpush1.bf16.msra.mxu0 %v16083_v23  ;;  %v16160_v23 = vld [vmem:[#allocation6 + $0xb24] ss:$16 sps:$4 sm:$0xff]  }
 0x3d9   :  { %7441 = vmatpush1.bf16.msra.mxu1 %v16086_v24  ;;  %7401 = vmatprep.subr.bf16.mxu0 %v16091_v25  ;;  %v16158_v24 = vld [vmem:[#allocation6 + $0xb20] ss:$16 sps:$4 sm:$0xff]   ;;  %v16163_v25 = vld [vmem:[#allocation6 + $0x904] ss:$16 sps:$4 sm:$0xff]  }
 0x3da   :  { %7442 = vmatprep.subr.bf16.mxu1 %v16094_v8  ;;  %v16161_v8 = vld [vmem:[#allocation6 + $0x900] ss:$16 sps:$4 sm:$0xff]  }
 0x3dc   :  { %7402 = vmatpush1.bf16.msra.mxu0 %v16089_v28  ;;  %v16164_v28 = vld [vmem:[#allocation6 + $0xb00] ss:$16 sps:$4 sm:$0xff]  }
 0x3dd   :  { %7443 = vmatpush1.bf16.msra.mxu1 %v16092_v29  ;;  %7403 = vmatprep.subr.bf16.mxu0 %v16097_v30  ;;  %v16169_v29 = vld [vmem:[#allocation6 + $0xce4] ss:$16 sps:$4 sm:$0xff]  }
 0x3de   :  { %7444 = vmatprep.subr.bf16.mxu1 %v16100_v2  ;;  %v16172_v30 = vld [vmem:[#allocation6 + $0xee4] ss:$16 sps:$4 sm:$0xff]   ;;  %v16167_v2 = vld [vmem:[#allocation6 + $0xce0] ss:$16 sps:$4 sm:$0xff]  }
 0x3e0   :  { %7404 = vmatpush1.bf16.msra.mxu0 %v16095_v43  ;;  %v16170_v43 = vld [vmem:[#allocation6 + $0xee0] ss:$16 sps:$4 sm:$0xff]  }
 0x3e1   :  { %7445 = vmatpush1.bf16.msra.mxu1 %v16098_v37  ;;  %7405 = vmatprep.subr.bf16.mxu0 %v16103_v39  ;;  %v16175_v37 = vld [vmem:[#allocation6 + $0xcc4] ss:$16 sps:$4 sm:$0xff]  }
 0x3e2   :  { %7446 = vmatprep.subr.bf16.mxu1 %v16106_v40  ;;  %v16178_v40 = vld [vmem:[#allocation6 + $0xec4] ss:$16 sps:$4 sm:$0xff]  }
 0x3e4   :  { %7406 = vmatpush1.bf16.msra.mxu0 %v16101_v41 }
 0x3e5   :  { %7447 = vmatpush1.bf16.msra.mxu1 %v16104_v21  ;;  %7407 = vmatprep.subr.bf16.mxu0 %v16109_v42  ;;  %v16173_v42 = vld [vmem:[#allocation6 + $0xcc0] ss:$16 sps:$4 sm:$0xff]  }
 0x3e6   :  { %7448 = vmatprep.subr.bf16.mxu1 %v16112_v45 }
 0x3e8   :  { %7408 = vmatpush1.bf16.msra.mxu0 %v16107_v46  ;;  %v16176_v46 = vld [vmem:[#allocation6 + $0xec0] ss:$16 sps:$4 sm:$0xff]  }
 0x3e9   :  { %7449 = vmatpush1.bf16.msra.mxu1 %v16110_v35  ;;  %7409 = vmatprep.subr.bf16.mxu0 %v16115_v47  ;;  %v16181_v35 = vld [vmem:[#allocation6 + $0xca4] ss:$16 sps:$4 sm:$0xff]  }
 0x3ea   :  { %7450 = vmatprep.subr.bf16.mxu1 %v16118_v38 }
 0x3ec   :  { %7410 = vmatpush1.bf16.msra.mxu0 %v16113_v26 }
 0x3ed   :  { %7451 = vmatpush1.bf16.msra.mxu1 %v16116_v49  ;;  %7411 = vmatprep.subr.bf16.mxu0 %v16121_v12  ;;  %v16184_v49 = vld [vmem:[#allocation6 + $0xea4] ss:$16 sps:$4 sm:$0xff]  }
 0x3ee   :  { %7452 = vmatprep.subr.bf16.mxu1 %v16124_v51 }
 0x3f0   :  { %7412 = vmatpush2.bf16.msra.mxu0 %v16119_v52  ;;  %v16179_v52 = vld [vmem:[#allocation6 + $0xca0] ss:$16 sps:$4 sm:$0xff]  }
 0x3f1   :  { %7453 = vmatpush2.bf16.msra.mxu1 %v16122_v44  ;;  %7413 = vmatprep.subr.bf16.mxu0 %v16127_v31  ;;  %v16182_v31 = vld [vmem:[#allocation6 + $0xea0] ss:$16 sps:$4 sm:$0xff]  }
 0x3f2   :  { %7454 = vmatprep.subr.bf16.mxu1 %v16130_v53  ;;  %v16187_v53 = vld [vmem:[#allocation6 + $0xc84] ss:$16 sps:$4 sm:$0xff]  }
 0x3f4   :  { %7414 = vmatpush2.bf16.msra.mxu0 %v16125_v54 }
 0x3f5   :  { %7455 = vmatpush2.bf16.msra.mxu1 %v16128_v58  ;;  %7415 = vmatprep.subr.bf16.mxu0 %v16133_v60  ;;  %v16190_v58 = vld [vmem:[#allocation6 + $0xe84] ss:$16 sps:$4 sm:$0xff]   ;;  %v16188_v60 = vld [vmem:[#allocation6 + $0xe80] ss:$16 sps:$4 sm:$0xff]  }
 0x3f6   :  { %7456 = vmatprep.subr.bf16.mxu1 %v16136_v61  ;;  %v16193_v61 = vld [vmem:[#allocation6 + $0xc64] ss:$16 sps:$4 sm:$0xff]  }
 0x3f8   :  { %7416 = vmatpush2.bf16.msra.mxu0 %v16131_v62  ;;  %v16196_v62 = vld [vmem:[#allocation6 + $0xe64] ss:$16 sps:$4 sm:$0xff]  }
 0x3f9   :  { %7457 = vmatpush2.bf16.msra.mxu1 %v16134_v0  ;;  %7417 = vmatprep.subr.bf16.mxu0 %v16139_v4  ;;  %v16191_v0 = vld [vmem:[#allocation6 + $0xc60] ss:$16 sps:$4 sm:$0xff]  }
 0x3fa   :  { %7458 = vmatprep.subr.bf16.mxu1 %v16142_v6  ;;  %v16194_v4 = vld [vmem:[#allocation6 + $0xe60] ss:$16 sps:$4 sm:$0xff]   ;;  %v16199_v6 = vld [vmem:[#allocation6 + $0xc44] ss:$16 sps:$4 sm:$0xff]  }
 0x3fc   :  { %7418 = vmatpush2.bf16.msra.mxu0 %v16137_v55  ;;  %v16202_v55 = vld [vmem:[#allocation6 + $0xe44] ss:$16 sps:$4 sm:$0xff]  }
 0x3fd   :  { %7459 = vmatpush2.bf16.msra.mxu1 %v16140_v9  ;;  %7419 = vmatprep.subr.bf16.mxu0 %v16145_v56  ;;  %v16197_v9 = vld [vmem:[#allocation6 + $0xc40] ss:$16 sps:$4 sm:$0xff]  }
 0x3fe   :  { %7460 = vmatprep.subr.bf16.mxu1 %v16148_v3  ;;  %v16200_v56 = vld [vmem:[#allocation6 + $0xe40] ss:$16 sps:$4 sm:$0xff]   ;;  %v16205_v3 = vld [vmem:[#allocation6 + $0xc24] ss:$16 sps:$4 sm:$0xff]  }
 0x400   :  { %7420 = vmatpush2.bf16.msra.mxu0 %v16143_v63  ;;  %v16208_v63 = vld [vmem:[#allocation6 + $0xe24] ss:$16 sps:$4 sm:$0xff]  }
 0x401   :  { %7461 = vmatpush2.bf16.msra.mxu1 %v16146_v11  ;;  %7421 = vmatprep.subr.bf16.mxu0 %v16151_v16  ;;  %v16203_v11 = vld [vmem:[#allocation6 + $0xc20] ss:$16 sps:$4 sm:$0xff]  }
 0x402   :  { %7462 = vmatprep.subr.bf16.mxu1 %v16154_v17  ;;  %v16206_v16 = vld [vmem:[#allocation6 + $0xe20] ss:$16 sps:$4 sm:$0xff]   ;;  %v16211_v17 = vld [vmem:[#allocation6 + $0xc04] ss:$16 sps:$4 sm:$0xff]  }
 0x404   :  { %7422 = vmatpush2.bf16.msra.mxu0 %v16149_v18  ;;  %v16214_v18 = vld [vmem:[#allocation6 + $0xe04] ss:$16 sps:$4 sm:$0xff]  }
 0x405   :  { %7463 = vmatpush2.bf16.msra.mxu1 %v16152_v5  ;;  %7423 = vmatprep.subr.bf16.mxu0 %v16157_v20  ;;  %v16209_v5 = vld [vmem:[#allocation6 + $0xc00] ss:$16 sps:$4 sm:$0xff]  }
 0x406   :  { %7464 = vmatprep.subr.bf16.mxu1 %v16160_v23  ;;  %v16212_v20 = vld [vmem:[#allocation6 + $0xe00] ss:$16 sps:$4 sm:$0xff]   ;;  %v16217_v23 = vld [vmem:[#allocation6 + $0xde4] ss:$16 sps:$4 sm:$0xff]  }
 0x408   :  { %7424 = vmatpush2.bf16.msra.mxu0 %v16155_v7  ;;  %v16220_v7 = vld [vmem:[#allocation6 + $0xfe4] ss:$16 sps:$4 sm:$0xff]  }
 0x409   :  { %7465 = vmatpush2.bf16.msra.mxu1 %v16158_v24  ;;  %7425 = vmatprep.subr.bf16.mxu0 %v16163_v25  ;;  %v16215_v24 = vld [vmem:[#allocation6 + $0xde0] ss:$16 sps:$4 sm:$0xff]  }
 0x40a   :  { %7466 = vmatprep.subr.bf16.mxu1 %v16166_v27  ;;  %v16218_v25 = vld [vmem:[#allocation6 + $0xfe0] ss:$16 sps:$4 sm:$0xff]   ;;  %v16223_v27 = vld [vmem:[#allocation6 + $0xdc4] ss:$16 sps:$4 sm:$0xff]  }
 0x40c   :  { %7426 = vmatpush2.bf16.msra.mxu0 %v16161_v8  ;;  %v16226_v8 = vld [vmem:[#allocation6 + $0xfc4] ss:$16 sps:$4 sm:$0xff]  }
 0x40d   :  { %7467 = vmatpush2.bf16.msra.mxu1 %v16164_v28  ;;  %7477 = vmatprep.subr.bf16.mxu0 %v16169_v29  ;;  %v16221_v28 = vld [vmem:[#allocation6 + $0xdc0] ss:$16 sps:$4 sm:$0xff]  }
 0x40e   :  { %7518 = vmatprep.subr.bf16.mxu1 %v16172_v30  ;;  %v16224_v29 = vld [vmem:[#allocation6 + $0xfc0] ss:$16 sps:$4 sm:$0xff]   ;;  %v16229_v30 = vld [vmem:[#allocation6 + $0xda4] ss:$16 sps:$4 sm:$0xff]  }
 0x40f   :  { %7428 = vmatmul.mubr.bf16.vlgmr.msra.gmra.mxu0 %v18101_v48  ;;  %v5646_v39 = vpop.f32.mrf.mxu0  ;;  %v5687_v21 = vpop.f32.mrf.mxu1 }
 0x410   :  { %7469 = vmatmul.mubr.bf16.vlgmr.msra.gmra.mxu1 %v18105_v50  ;;  %v5647_v41 = vadd.f32 %v5646_v39, %v18143_v10  ;;  %7478 = vmatpush1.bf16.msra.mxu0 %v16167_v2  ;;  %v16232_v2 = vld [vmem:[#allocation6 + $0xfa4] ss:$16 sps:$4 sm:$0xff]  }
 0x411   :  { %7509 = vmatprep.mubr.bf16.mxu0 %v18123_v57  ;;  %7519 = vmatpush1.bf16.msra.mxu1 %v16170_v43  ;;  %v5648_v45 = vpop.f32.mrf.mxu0  ;;  %v5689_v26 = vpop.f32.mrf.mxu1  ;;  %v16227_v43 = vld [vmem:[#allocation6 + $0xda0] ss:$16 sps:$4 sm:$0xff]   ;;  %v16235_v39 = vld [vmem:[#allocation6 + $0xd84] ss:$16 sps:$4 sm:$0xff]  }
 0x412   :  { %v18153_v47 = vadd.f32 %v5687_v21, %v5647_v41  ;;  %7550 = vmatprep.mubr.bf16.mxu1 %v18127_v33  ;;  %v5649_v38 = vadd.f32 %v5648_v45, %v18147_v19  ;;  %7479 = vmatprep.subr.bf16.mxu0 %v16175_v37  ;;  %v16185_v19 = vld [vmem:[#allocation6 + $0xc80] ss:$16 sps:$4 sm:$0xff]   ;;  %v16244_v45 = vld [vmem:[#allocation6 + $0xf64] ss:$16 sps:$4 sm:$0xff]  }
 0x413   :  { %7520 = vmatprep.subr.bf16.mxu1 %v16178_v40  ;;  %v5650_v10 = vpop.f32.mrf.mxu0  ;;  %v5691_v51 = vpop.f32.mrf.mxu1  ;;  %v16230_v37 = vld [vmem:[#allocation6 + $0xfa0] ss:$16 sps:$4 sm:$0xff]   ;;  %v16238_v40 = vld [vmem:[#allocation6 + $0xf84] ss:$16 sps:$4 sm:$0xff]  }
 0x414   :  { %v18157_v12 = vadd.f32 %v5689_v26, %v5649_v38  ;;  %7480 = vmatpush1.bf16.msra.mxu0 %v16173_v42  ;;  %v16233_v41 = vld [vmem:[#allocation6 + $0xd80] ss:$16 sps:$4 sm:$0xff]   ;;  %v16241_v42 = vld [vmem:[#allocation6 + $0xd64] ss:$16 sps:$4 sm:$0xff]  }
 0x415   :  { %7521 = vmatpush1.bf16.msra.mxu1 %v16176_v46  ;;  %v5651_v44 = vpop.f32.mrf.mxu0  ;;  %7481 = vmatprep.subr.bf16.mxu0 %v16181_v35  ;;  %v5692_v54 = vpop.f32.mrf.mxu1  ;;  %v16236_v21 = vld [vmem:[#allocation6 + $0xf80] ss:$16 sps:$4 sm:$0xff]   ;;  %v16247_v38 = vld [vmem:[#allocation6 + $0xd44] ss:$16 sps:$4 sm:$0xff]  }
 0x416   :  { %7522 = vmatprep.subr.bf16.mxu1 %v16184_v49  ;;  %v16239_v46 = vld [vmem:[#allocation6 + $0xd60] ss:$16 sps:$4 sm:$0xff]   ;;  %v16250_v26 = vld [vmem:[#allocation6 + $0xf44] ss:$16 sps:$4 sm:$0xff]  }
 0x417   :  { %v16242_v35 = vld [vmem:[#allocation6 + $0xf60] ss:$16 sps:$4 sm:$0xff]   ;;  %v16253_v51 = vld [vmem:[#allocation6 + $0xd24] ss:$16 sps:$4 sm:$0xff]  }
 0x418   :  { %7482 = vmatpush1.bf16.msra.mxu0 %v16179_v52  ;;  %v16245_v49 = vld [vmem:[#allocation6 + $0xd40] ss:$16 sps:$4 sm:$0xff]   ;;  %v16256_v52 = vld [vmem:[#allocation6 + $0xf24] ss:$16 sps:$4 sm:$0xff]  }
 0x419   :  { %7523 = vmatpush1.bf16.msra.mxu1 %v16182_v31  ;;  %7483 = vmatprep.subr.bf16.mxu0 %v16187_v53  ;;  %v16248_v10 = vld [vmem:[#allocation6 + $0xf40] ss:$16 sps:$4 sm:$0xff]   ;;  %v16259_v53 = vld [vmem:[#allocation6 + $0xd04] ss:$16 sps:$4 sm:$0xff]  }
 0x41a   :  { %7524 = vmatprep.subr.bf16.mxu1 %v16190_v58  ;;  %v16251_v44 = vld [vmem:[#allocation6 + $0xd20] ss:$16 sps:$4 sm:$0xff]   ;;  %v16262_v54 = vld [vmem:[#allocation6 + $0xf04] ss:$16 sps:$4 sm:$0xff]  }
 0x41b   :  { %v16254_v31 = vld [vmem:[#allocation6 + $0xf20] ss:$16 sps:$4 sm:$0xff]  }
 0x41c   :  { %7484 = vmatpush1.bf16.msra.mxu0 %v16185_v19  ;;  %v16257_v58 = vld [vmem:[#allocation6 + $0xd00] ss:$16 sps:$4 sm:$0xff]  }
 0x41d   :  { %7525 = vmatpush1.bf16.msra.mxu1 %v16188_v60  ;;  %7485 = vmatprep.subr.bf16.mxu0 %v16193_v61  ;;  %v16260_v19 = vld [vmem:[#allocation6 + $0xf00] ss:$16 sps:$4 sm:$0xff]   ;;  %v16265_v60 = vld [vmem:[#allocation6 + $0x8ec] ss:$16 sps:$4 sm:$0xff]  }
 0x41e   :  { %7526 = vmatprep.subr.bf16.mxu1 %v16196_v62  ;;  %v16268_v61 = vld [vmem:[#allocation6 + $0xaec] ss:$16 sps:$4 sm:$0xff]   ;;  %v16263_v62 = vld [vmem:[#allocation6 + $0x8e8] ss:$16 sps:$4 sm:$0xff]  }
 0x420   :  { %7486 = vmatpush1.bf16.msra.mxu0 %v16191_v0  ;;  %v16266_v0 = vld [vmem:[#allocation6 + $0xae8] ss:$16 sps:$4 sm:$0xff]  }
 0x421   :  { %7527 = vmatpush1.bf16.msra.mxu1 %v16194_v4  ;;  %7487 = vmatprep.subr.bf16.mxu0 %v16199_v6  ;;  %v16271_v4 = vld [vmem:[#allocation6 + $0x8cc] ss:$16 sps:$4 sm:$0xff]  }
 0x422   :  { %7528 = vmatprep.subr.bf16.mxu1 %v16202_v55  ;;  %v16274_v55 = vld [vmem:[#allocation6 + $0xacc] ss:$16 sps:$4 sm:$0xff]  }
 0x424   :  { %7488 = vmatpush1.bf16.msra.mxu0 %v16197_v9 }
 0x425   :  { %7529 = vmatpush1.bf16.msra.mxu1 %v16200_v56  ;;  %7489 = vmatprep.subr.bf16.mxu0 %v16205_v3  ;;  %v16269_v56 = vld [vmem:[#allocation6 + $0x8c8] ss:$16 sps:$4 sm:$0xff]  }
 0x426   :  { %7530 = vmatprep.subr.bf16.mxu1 %v16208_v63 }
 0x428   :  { %7490 = vmatpush1.bf16.msra.mxu0 %v16203_v11  ;;  %v16272_v11 = vld [vmem:[#allocation6 + $0xac8] ss:$16 sps:$4 sm:$0xff]  }
 0x429   :  { %7531 = vmatpush1.bf16.msra.mxu1 %v16206_v16  ;;  %7491 = vmatprep.subr.bf16.mxu0 %v16211_v17  ;;  %v16277_v16 = vld [vmem:[#allocation6 + $0x8ac] ss:$16 sps:$4 sm:$0xff]  }
 0x42a   :  { %7532 = vmatprep.subr.bf16.mxu1 %v16214_v18  ;;  %v16280_v18 = vld [vmem:[#allocation6 + $0xaac] ss:$16 sps:$4 sm:$0xff]  }
 0x42c   :  { %7492 = vmatpush1.bf16.msra.mxu0 %v16209_v5 }
 0x42d   :  { %7533 = vmatpush1.bf16.msra.mxu1 %v16212_v20  ;;  %7493 = vmatprep.subr.bf16.mxu0 %v16217_v23 }
 0x42e   :  { %7534 = vmatprep.subr.bf16.mxu1 %v16220_v7  ;;  %v16275_v7 = vld [vmem:[#allocation6 + $0x8a8] ss:$16 sps:$4 sm:$0xff]  }
 0x430   :  { %7494 = vmatpush2.bf16.msra.mxu0 %v16215_v24 }
 0x431   :  { %7535 = vmatpush2.bf16.msra.mxu1 %v16218_v25  ;;  %7495 = vmatprep.subr.bf16.mxu0 %v16223_v27  ;;  %v16278_v25 = vld [vmem:[#allocation6 + $0xaa8] ss:$16 sps:$4 sm:$0xff]   ;;  %v16283_v27 = vld [vmem:[#allocation6 + $0x88c] ss:$16 sps:$4 sm:$0xff]  }
 0x432   :  { %7536 = vmatprep.subr.bf16.mxu1 %v16226_v8 }
 0x434   :  { %7496 = vmatpush2.bf16.msra.mxu0 %v16221_v28  ;;  %v16286_v28 = vld [vmem:[#allocation6 + $0xa8c] ss:$16 sps:$4 sm:$0xff]  }
 0x435   :  { %7537 = vmatpush2.bf16.msra.mxu1 %v16224_v29  ;;  %7497 = vmatprep.subr.bf16.mxu0 %v16229_v30  ;;  %v16281_v29 = vld [vmem:[#allocation6 + $0x888] ss:$16 sps:$4 sm:$0xff]  }
 0x436   :  { %7538 = vmatprep.subr.bf16.mxu1 %v16232_v2  ;;  %v16284_v30 = vld [vmem:[#allocation6 + $0xa88] ss:$16 sps:$4 sm:$0xff]   ;;  %v16289_v2 = vld [vmem:[#allocation6 + $0x86c] ss:$16 sps:$4 sm:$0xff]  }
 0x438   :  { %7498 = vmatpush2.bf16.msra.mxu0 %v16227_v43  ;;  %v16292_v43 = vld [vmem:[#allocation6 + $0xa6c] ss:$16 sps:$4 sm:$0xff]  }
 0x439   :  { %7539 = vmatpush2.bf16.msra.mxu1 %v16230_v37  ;;  %7499 = vmatprep.subr.bf16.mxu0 %v16235_v39  ;;  %v16287_v37 = vld [vmem:[#allocation6 + $0x868] ss:$16 sps:$4 sm:$0xff]  }
 0x43a   :  { %7540 = vmatprep.subr.bf16.mxu1 %v16238_v40  ;;  %v16290_v39 = vld [vmem:[#allocation6 + $0xa68] ss:$16 sps:$4 sm:$0xff]   ;;  %v16295_v40 = vld [vmem:[#allocation6 + $0x84c] ss:$16 sps:$4 sm:$0xff]  }
 0x43c   :  { %7500 = vmatpush2.bf16.msra.mxu0 %v16233_v41  ;;  %v16298_v41 = vld [vmem:[#allocation6 + $0xa4c] ss:$16 sps:$4 sm:$0xff]  }
 0x43d   :  { %7541 = vmatpush2.bf16.msra.mxu1 %v16236_v21  ;;  %7501 = vmatprep.subr.bf16.mxu0 %v16241_v42  ;;  %v16293_v21 = vld [vmem:[#allocation6 + $0x848] ss:$16 sps:$4 sm:$0xff]  }
 0x43e   :  { %7542 = vmatprep.subr.bf16.mxu1 %v16244_v45  ;;  %v16296_v42 = vld [vmem:[#allocation6 + $0xa48] ss:$16 sps:$4 sm:$0xff]   ;;  %v16301_v45 = vld [vmem:[#allocation6 + $0x82c] ss:$16 sps:$4 sm:$0xff]  }
 0x440   :  { %7502 = vmatpush2.bf16.msra.mxu0 %v16239_v46  ;;  %v16304_v46 = vld [vmem:[#allocation6 + $0xa2c] ss:$16 sps:$4 sm:$0xff]  }
 0x441   :  { %7543 = vmatpush2.bf16.msra.mxu1 %v16242_v35  ;;  %7503 = vmatprep.subr.bf16.mxu0 %v16247_v38  ;;  %v16299_v35 = vld [vmem:[#allocation6 + $0x828] ss:$16 sps:$4 sm:$0xff]  }
 0x442   :  { %7544 = vmatprep.subr.bf16.mxu1 %v16250_v26  ;;  %v16302_v38 = vld [vmem:[#allocation6 + $0xa28] ss:$16 sps:$4 sm:$0xff]   ;;  %v16307_v26 = vld [vmem:[#allocation6 + $0x80c] ss:$16 sps:$4 sm:$0xff]  }
 0x444   :  { %7504 = vmatpush2.bf16.msra.mxu0 %v16245_v49  ;;  %v16310_v49 = vld [vmem:[#allocation6 + $0xa0c] ss:$16 sps:$4 sm:$0xff]  }
 0x445   :  { %7545 = vmatpush2.bf16.msra.mxu1 %v16248_v10  ;;  %7505 = vmatprep.subr.bf16.mxu0 %v16253_v51  ;;  %v16305_v10 = vld [vmem:[#allocation6 + $0x808] ss:$16 sps:$4 sm:$0xff]  }
 0x446   :  { %7546 = vmatprep.subr.bf16.mxu1 %v16256_v52  ;;  %v16308_v51 = vld [vmem:[#allocation6 + $0xa08] ss:$16 sps:$4 sm:$0xff]   ;;  %v16313_v52 = vld [vmem:[#allocation6 + $0x9ec] ss:$16 sps:$4 sm:$0xff]  }
 0x448   :  { %7506 = vmatpush2.bf16.msra.mxu0 %v16251_v44  ;;  %v16316_v44 = vld [vmem:[#allocation6 + $0xbec] ss:$16 sps:$4 sm:$0xff]  }
 0x449   :  { %7547 = vmatpush2.bf16.msra.mxu1 %v16254_v31  ;;  %7507 = vmatprep.subr.bf16.mxu0 %v16259_v53  ;;  %v16311_v31 = vld [vmem:[#allocation6 + $0x9e8] ss:$16 sps:$4 sm:$0xff]  }
 0x44a   :  { %7548 = vmatprep.subr.bf16.mxu1 %v16262_v54  ;;  %v16314_v53 = vld [vmem:[#allocation6 + $0xbe8] ss:$16 sps:$4 sm:$0xff]   ;;  %v16319_v54 = vld [vmem:[#allocation6 + $0x9cc] ss:$16 sps:$4 sm:$0xff]  }
 0x44c   :  { %7508 = vmatpush2.bf16.msra.mxu0 %v16257_v58  ;;  %v16322_v58 = vld [vmem:[#allocation6 + $0xbcc] ss:$16 sps:$4 sm:$0xff]  }
 0x44d   :  { %7549 = vmatpush2.bf16.msra.mxu1 %v16260_v19  ;;  %7559 = vmatprep.subr.bf16.mxu0 %v16265_v60  ;;  %v16317_v19 = vld [vmem:[#allocation6 + $0x9c8] ss:$16 sps:$4 sm:$0xff]  }
 0x44e   :  { %7600 = vmatprep.subr.bf16.mxu1 %v16268_v61  ;;  %v16320_v60 = vld [vmem:[#allocation6 + $0xbc8] ss:$16 sps:$4 sm:$0xff]   ;;  %v16325_v61 = vld [vmem:[#allocation6 + $0x9ac] ss:$16 sps:$4 sm:$0xff]  }
 0x44f   :  { %v5728_v6 = vpop.f32.mrf.mxu0  ;;  %7510 = vmatmul.mubr.bf16.vlgmr.msra.gmra.mxu0 %v18125_v32  ;;  %v5769_v9 = vpop.f32.mrf.mxu1 }
 0x450   :  { %7551 = vmatmul.mubr.bf16.vlgmr.msra.gmra.mxu1 %v18129_v34  ;;  %7560 = vmatpush1.bf16.msra.mxu0 %v16263_v62  ;;  %v18161_v3 = vadd.f32 %v5769_v9, %v5728_v6  ;;  %v16328_v62 = vld [vmem:[#allocation6 + $0xbac] ss:$16 sps:$4 sm:$0xff]   ;;  %v16329_v9 = vld [vmem:[#allocation6 + $0x988] ss:$16 sps:$4 sm:$0xff]  }
 0x451   :  { %7591 = vmatprep.mubr.bf16.mxu0 %v18099_v36  ;;  %7601 = vmatpush1.bf16.msra.mxu1 %v16266_v0  ;;  %v5730_v63 = vpop.f32.mrf.mxu0  ;;  %v5771_v17 = vpop.f32.mrf.mxu1  ;;  %v16323_v0 = vld [vmem:[#allocation6 + $0x9a8] ss:$16 sps:$4 sm:$0xff]   ;;  %v16331_v6 = vld [vmem:[#allocation6 + $0x98c] ss:$16 sps:$4 sm:$0xff]  }
 0x452   :  { %7632 = vmatprep.mubr.bf16.mxu1 %v18103_v22  ;;  %7561 = vmatprep.subr.bf16.mxu0 %v16271_v4  ;;  %v18165_v5 = vadd.f32 %v5771_v17, %v5730_v63  ;;  %v16326_v4 = vld [vmem:[#allocation6 + $0xba8] ss:$16 sps:$4 sm:$0xff]   ;;  %v16337_v63 = vld [vmem:[#allocation6 + $0x96c] ss:$16 sps:$4 sm:$0xff]  }
 0x453   :  { %v5732_v20 = vpop.f32.mrf.mxu0  ;;  %7602 = vmatprep.subr.bf16.mxu1 %v16274_v55  ;;  %v5773_v23 = vpop.f32.mrf.mxu1  ;;  %v16334_v55 = vld [vmem:[#allocation6 + $0xb8c] ss:$16 sps:$4 sm:$0xff]   ;;  %v16338_v17 = vld [vmem:[#allocation6 + $0xb68] ss:$16 sps:$4 sm:$0xff]  }
 0x454   :  { %7562 = vmatpush1.bf16.msra.mxu0 %v16269_v56  ;;  %v16332_v56 = vld [vmem:[#allocation6 + $0xb88] ss:$16 sps:$4 sm:$0xff]   ;;  %v16346_v20 = vld [vmem:[#allocation6 + $0xb4c] ss:$16 sps:$4 sm:$0xff]  }
 0x455   :  { %7603 = vmatpush1.bf16.msra.mxu1 %v16272_v11  ;;  %v5733_v24 = vpop.f32.mrf.mxu0  ;;  %7563 = vmatprep.subr.bf16.mxu0 %v16277_v16  ;;  %v5774_v8 = vpop.f32.mrf.mxu1  ;;  %v16340_v11 = vld [vmem:[#allocation6 + $0xb6c] ss:$16 sps:$4 sm:$0xff]   ;;  %v16335_v16 = vld [vmem:[#allocation6 + $0x968] ss:$16 sps:$4 sm:$0xff]  }
 0x456   :  { %7604 = vmatprep.subr.bf16.mxu1 %v16280_v18  ;;  %v16343_v18 = vld [vmem:[#allocation6 + $0x94c] ss:$16 sps:$4 sm:$0xff]   ;;  %v16341_v23 = vld [vmem:[#allocation6 + $0x948] ss:$16 sps:$4 sm:$0xff]  }
 0x457   :  { %v16349_v24 = vld [vmem:[#allocation6 + $0x92c] ss:$16 sps:$4 sm:$0xff]   ;;  %v16350_v8 = vld [vmem:[#allocation6 + $0xb28] ss:$16 sps:$4 sm:$0xff]  }
 0x458   :  { %7564 = vmatpush1.bf16.msra.mxu0 %v16275_v7  ;;  %v16344_v7 = vld [vmem:[#allocation6 + $0xb48] ss:$16 sps:$4 sm:$0xff]  }
 0x459   :  { %7605 = vmatpush1.bf16.msra.mxu1 %v16278_v25  ;;  %7565 = vmatprep.subr.bf16.mxu0 %v16283_v27  ;;  %v16352_v25 = vld [vmem:[#allocation6 + $0xb2c] ss:$16 sps:$4 sm:$0xff]   ;;  %v16347_v27 = vld [vmem:[#allocation6 + $0x928] ss:$16 sps:$4 sm:$0xff]  }
 0x45a   :  { %7606 = vmatprep.subr.bf16.mxu1 %v16286_v28  ;;  %v16355_v28 = vld [vmem:[#allocation6 + $0x90c] ss:$16 sps:$4 sm:$0xff]  }
 0x45c   :  { %7566 = vmatpush1.bf16.msra.mxu0 %v16281_v29  ;;  %v16358_v29 = vld [vmem:[#allocation6 + $0xb0c] ss:$16 sps:$4 sm:$0xff]  }
 0x45d   :  { %7607 = vmatpush1.bf16.msra.mxu1 %v16284_v30  ;;  %7567 = vmatprep.subr.bf16.mxu0 %v16289_v2  ;;  %v16353_v30 = vld [vmem:[#allocation6 + $0x908] ss:$16 sps:$4 sm:$0xff]  }
 0x45e   :  { %7608 = vmatprep.subr.bf16.mxu1 %v16292_v43  ;;  %v16356_v2 = vld [vmem:[#allocation6 + $0xb08] ss:$16 sps:$4 sm:$0xff]   ;;  %v16361_v43 = vld [vmem:[#allocation6 + $0xcec] ss:$16 sps:$4 sm:$0xff]  }
 0x460   :  { %7568 = vmatpush1.bf16.msra.mxu0 %v16287_v37  ;;  %v16364_v37 = vld [vmem:[#allocation6 + $0xeec] ss:$16 sps:$4 sm:$0xff]  }
 0x461   :  { %7609 = vmatpush1.bf16.msra.mxu1 %v16290_v39  ;;  %7569 = vmatprep.subr.bf16.mxu0 %v16295_v40  ;;  %v16359_v39 = vld [vmem:[#allocation6 + $0xce8] ss:$16 sps:$4 sm:$0xff]  }
 0x462   :  { %7610 = vmatprep.subr.bf16.mxu1 %v16298_v41  ;;  %v16362_v40 = vld [vmem:[#allocation6 + $0xee8] ss:$16 sps:$4 sm:$0xff]   ;;  %v16367_v41 = vld [vmem:[#allocation6 + $0xccc] ss:$16 sps:$4 sm:$0xff]  }
 0x464   :  { %7570 = vmatpush1.bf16.msra.mxu0 %v16293_v21 }
 0x465   :  { %7611 = vmatpush1.bf16.msra.mxu1 %v16296_v42  ;;  %7571 = vmatprep.subr.bf16.mxu0 %v16301_v45  ;;  %v16370_v42 = vld [vmem:[#allocation6 + $0xecc] ss:$16 sps:$4 sm:$0xff]  }
 0x466   :  { %7612 = vmatprep.subr.bf16.mxu1 %v16304_v46 }
 0x468   :  { %7572 = vmatpush1.bf16.msra.mxu0 %v16299_v35  ;;  %v16365_v35 = vld [vmem:[#allocation6 + $0xcc8] ss:$16 sps:$4 sm:$0xff]  }
 0x469   :  { %7613 = vmatpush1.bf16.msra.mxu1 %v16302_v38  ;;  %7573 = vmatprep.subr.bf16.mxu0 %v16307_v26  ;;  %v16368_v26 = vld [vmem:[#allocation6 + $0xec8] ss:$16 sps:$4 sm:$0xff]  }
 0x46a   :  { %7614 = vmatprep.subr.bf16.mxu1 %v16310_v49  ;;  %v16373_v49 = vld [vmem:[#allocation6 + $0xcac] ss:$16 sps:$4 sm:$0xff]  }
 0x46c   :  { %7574 = vmatpush1.bf16.msra.mxu0 %v16305_v10 }
 0x46d   :  { %7615 = vmatpush1.bf16.msra.mxu1 %v16308_v51  ;;  %7575 = vmatprep.subr.bf16.mxu0 %v16313_v52 }
 0x46e   :  { %7616 = vmatprep.subr.bf16.mxu1 %v16316_v44 }
 0x470   :  { %7576 = vmatpush2.bf16.msra.mxu0 %v16311_v31 }
 0x471   :  { %7617 = vmatpush2.bf16.msra.mxu1 %v16314_v53  ;;  %7577 = vmatprep.subr.bf16.mxu0 %v16319_v54  ;;  %v16371_v54 = vld [vmem:[#allocation6 + $0xca8] ss:$16 sps:$4 sm:$0xff]  }
 0x472   :  { %7618 = vmatprep.subr.bf16.mxu1 %v16322_v58 }
 0x474   :  { %7578 = vmatpush2.bf16.msra.mxu0 %v16317_v19  ;;  %v16374_v19 = vld [vmem:[#allocation6 + $0xea8] ss:$16 sps:$4 sm:$0xff]  }
 0x475   :  { %7619 = vmatpush2.bf16.msra.mxu1 %v16320_v60  ;;  %7579 = vmatprep.subr.bf16.mxu0 %v16325_v61  ;;  %v16379_v60 = vld [vmem:[#allocation6 + $0xc8c] ss:$16 sps:$4 sm:$0xff]  }
 0x476   :  { %7620 = vmatprep.subr.bf16.mxu1 %v16328_v62  ;;  %v16382_v62 = vld [vmem:[#allocation6 + $0xe8c] ss:$16 sps:$4 sm:$0xff]  }
 0x478   :  { %7580 = vmatpush2.bf16.msra.mxu0 %v16323_v0  ;;  %v16380_v0 = vld [vmem:[#allocation6 + $0xe88] ss:$16 sps:$4 sm:$0xff]  }
 0x479   :  { %7621 = vmatpush2.bf16.msra.mxu1 %v16326_v4  ;;  %7581 = vmatprep.subr.bf16.mxu0 %v16331_v6  ;;  %v16385_v4 = vld [vmem:[#allocation6 + $0xc6c] ss:$16 sps:$4 sm:$0xff]  }
 0x47a   :  { %7622 = vmatprep.subr.bf16.mxu1 %v16334_v55  ;;  %v16388_v6 = vld [vmem:[#allocation6 + $0xe6c] ss:$16 sps:$4 sm:$0xff]   ;;  %v16383_v55 = vld [vmem:[#allocation6 + $0xc68] ss:$16 sps:$4 sm:$0xff]  }
 0x47c   :  { %7582 = vmatpush2.bf16.msra.mxu0 %v16329_v9  ;;  %v16386_v9 = vld [vmem:[#allocation6 + $0xe68] ss:$16 sps:$4 sm:$0xff]  }
 0x47d   :  { %7623 = vmatpush2.bf16.msra.mxu1 %v16332_v56  ;;  %7583 = vmatprep.subr.bf16.mxu0 %v16337_v63  ;;  %v16391_v56 = vld [vmem:[#allocation6 + $0xc4c] ss:$16 sps:$4 sm:$0xff]  }
 0x47e   :  { %7624 = vmatprep.subr.bf16.mxu1 %v16340_v11  ;;  %v16394_v63 = vld [vmem:[#allocation6 + $0xe4c] ss:$16 sps:$4 sm:$0xff]   ;;  %v16389_v11 = vld [vmem:[#allocation6 + $0xc48] ss:$16 sps:$4 sm:$0xff]  }
 0x480   :  { %7584 = vmatpush2.bf16.msra.mxu0 %v16335_v16  ;;  %v16392_v16 = vld [vmem:[#allocation6 + $0xe48] ss:$16 sps:$4 sm:$0xff]  }
 0x481   :  { %7625 = vmatpush2.bf16.msra.mxu1 %v16338_v17  ;;  %7585 = vmatprep.subr.bf16.mxu0 %v16343_v18  ;;  %v16397_v17 = vld [vmem:[#allocation6 + $0xc2c] ss:$16 sps:$4 sm:$0xff]  }
 0x482   :  { %7626 = vmatprep.subr.bf16.mxu1 %v16346_v20  ;;  %v16400_v18 = vld [vmem:[#allocation6 + $0xe2c] ss:$16 sps:$4 sm:$0xff]   ;;  %v16395_v20 = vld [vmem:[#allocation6 + $0xc28] ss:$16 sps:$4 sm:$0xff]  }
 0x484   :  { %7586 = vmatpush2.bf16.msra.mxu0 %v16341_v23  ;;  %v16398_v23 = vld [vmem:[#allocation6 + $0xe28] ss:$16 sps:$4 sm:$0xff]  }
 0x485   :  { %7627 = vmatpush2.bf16.msra.mxu1 %v16344_v7  ;;  %7587 = vmatprep.subr.bf16.mxu0 %v16349_v24  ;;  %v16403_v7 = vld [vmem:[#allocation6 + $0xc0c] ss:$16 sps:$4 sm:$0xff]  }
 0x486   :  { %7628 = vmatprep.subr.bf16.mxu1 %v16352_v25  ;;  %v16406_v24 = vld [vmem:[#allocation6 + $0xe0c] ss:$16 sps:$4 sm:$0xff]   ;;  %v16401_v25 = vld [vmem:[#allocation6 + $0xc08] ss:$16 sps:$4 sm:$0xff]  }
 0x488   :  { %7588 = vmatpush2.bf16.msra.mxu0 %v16347_v27  ;;  %v16404_v27 = vld [vmem:[#allocation6 + $0xe08] ss:$16 sps:$4 sm:$0xff]  }
 0x489   :  { %7629 = vmatpush2.bf16.msra.mxu1 %v16350_v8  ;;  %7589 = vmatprep.subr.bf16.mxu0 %v16355_v28  ;;  %v16409_v8 = vld [vmem:[#allocation6 + $0xdec] ss:$16 sps:$4 sm:$0xff]  }
 0x48a   :  { %7630 = vmatprep.subr.bf16.mxu1 %v16358_v29  ;;  %v16412_v28 = vld [vmem:[#allocation6 + $0xfec] ss:$16 sps:$4 sm:$0xff]   ;;  %v16407_v29 = vld [vmem:[#allocation6 + $0xde8] ss:$16 sps:$4 sm:$0xff]  }
 0x48c   :  { %7590 = vmatpush2.bf16.msra.mxu0 %v16353_v30  ;;  %v16410_v30 = vld [vmem:[#allocation6 + $0xfe8] ss:$16 sps:$4 sm:$0xff]  }
 0x48d   :  { %7631 = vmatpush2.bf16.msra.mxu1 %v16356_v2  ;;  %7641 = vmatprep.subr.bf16.mxu0 %v16361_v43  ;;  %v16415_v2 = vld [vmem:[#allocation6 + $0xdcc] ss:$16 sps:$4 sm:$0xff]  }
 0x48e   :  { %7682 = vmatprep.subr.bf16.mxu1 %v16364_v37  ;;  %v16418_v43 = vld [vmem:[#allocation6 + $0xfcc] ss:$16 sps:$4 sm:$0xff]   ;;  %v16413_v37 = vld [vmem:[#allocation6 + $0xdc8] ss:$16 sps:$4 sm:$0xff]  }
 0x48f   :  { %v5810_v21 = vpop.f32.mrf.mxu0  ;;  %7592 = vmatmul.mubr.bf16.vlgmr.msra.gmra.mxu0 %v18101_v48 }
 0x490   :  { %v5811_v45 = vadd.f32 %v5810_v21, %v18161_v3  ;;  %v5851_v46 = vpop.f32.mrf.mxu1  ;;  %7633 = vmatmul.mubr.bf16.vlgmr.msra.gmra.mxu1 %v18105_v50  ;;  %7642 = vmatpush1.bf16.msra.mxu0 %v16359_v39  ;;  %v16376_v3 = vld [vmem:[#allocation6 + $0xeac] ss:$16 sps:$4 sm:$0xff]   ;;  %v16416_v39 = vld [vmem:[#allocation6 + $0xfc8] ss:$16 sps:$4 sm:$0xff]  }
 0x491   :  { %7673 = vmatprep.mubr.bf16.mxu0 %v18123_v57  ;;  %7683 = vmatpush1.bf16.msra.mxu1 %v16362_v40  ;;  %v5812_v38 = vpop.f32.mrf.mxu0  ;;  %v16421_v40 = vld [vmem:[#allocation6 + $0xdac] ss:$16 sps:$4 sm:$0xff]   ;;  %v16419_v21 = vld [vmem:[#allocation6 + $0xda8] ss:$16 sps:$4 sm:$0xff]  }
 0x492   :  { %v18171_v10 = vadd.f32 %v5851_v46, %v5811_v45  ;;  %7714 = vmatprep.mubr.bf16.mxu1 %v18127_v33  ;;  %v5813_v51 = vadd.f32 %v5812_v38, %v18165_v5  ;;  %v5853_v52 = vpop.f32.mrf.mxu1  ;;  %7643 = vmatprep.subr.bf16.mxu0 %v16367_v41  ;;  %v16377_v5 = vld [vmem:[#allocation6 + $0xc88] ss:$16 sps:$4 sm:$0xff]   ;;  %v16424_v41 = vld [vmem:[#allocation6 + $0xfac] ss:$16 sps:$4 sm:$0xff]  }
 0x493   :  { %v5814_v44 = vpop.f32.mrf.mxu0  ;;  %7684 = vmatprep.subr.bf16.mxu1 %v16370_v42  ;;  %v16422_v42 = vld [vmem:[#allocation6 + $0xfa8] ss:$16 sps:$4 sm:$0xff]   ;;  %v16427_v45 = vld [vmem:[#allocation6 + $0xd8c] ss:$16 sps:$4 sm:$0xff]  }
 0x494   :  { %v18175_v31 = vadd.f32 %v5853_v52, %v5813_v51  ;;  %v5855_v53 = vpop.f32.mrf.mxu1  ;;  %7644 = vmatpush1.bf16.msra.mxu0 %v16365_v35  ;;  %v16430_v46 = vld [vmem:[#allocation6 + $0xf8c] ss:$16 sps:$4 sm:$0xff]   ;;  %v16425_v35 = vld [vmem:[#allocation6 + $0xd88] ss:$16 sps:$4 sm:$0xff]  }
 0x495   :  { %7685 = vmatpush1.bf16.msra.mxu1 %v16368_v26  ;;  %v5815_v58 = vpop.f32.mrf.mxu0  ;;  %7645 = vmatprep.subr.bf16.mxu0 %v16373_v49  ;;  %v16428_v38 = vld [vmem:[#allocation6 + $0xf88] ss:$16 sps:$4 sm:$0xff]   ;;  %v16433_v26 = vld [vmem:[#allocation6 + $0xd6c] ss:$16 sps:$4 sm:$0xff]  }
 0x496   :  { %v5856_v61 = vpop.f32.mrf.mxu1  ;;  %7686 = vmatprep.subr.bf16.mxu1 %v16376_v3  ;;  %v16436_v49 = vld [vmem:[#allocation6 + $0xf6c] ss:$16 sps:$4 sm:$0xff]   ;;  %v16431_v51 = vld [vmem:[#allocation6 + $0xd68] ss:$16 sps:$4 sm:$0xff]  }
 0x497   :  { %v16434_v52 = vld [vmem:[#allocation6 + $0xf68] ss:$16 sps:$4 sm:$0xff]   ;;  %v16439_v3 = vld [vmem:[#allocation6 + $0xd4c] ss:$16 sps:$4 sm:$0xff]  }
 0x498   :  { %7646 = vmatpush1.bf16.msra.mxu0 %v16371_v54  ;;  %v16442_v44 = vld [vmem:[#allocation6 + $0xf4c] ss:$16 sps:$4 sm:$0xff]   ;;  %v16437_v53 = vld [vmem:[#allocation6 + $0xd48] ss:$16 sps:$4 sm:$0xff]  }
 0x499   :  { %7687 = vmatpush1.bf16.msra.mxu1 %v16374_v19  ;;  %7647 = vmatprep.subr.bf16.mxu0 %v16379_v60  ;;  %v16440_v54 = vld [vmem:[#allocation6 + $0xf48] ss:$16 sps:$4 sm:$0xff]   ;;  %v16445_v58 = vld [vmem:[#allocation6 + $0xd2c] ss:$16 sps:$4 sm:$0xff]  }
 0x49a   :  { %7688 = vmatprep.subr.bf16.mxu1 %v16382_v62  ;;  %v16448_v19 = vld [vmem:[#allocation6 + $0xf2c] ss:$16 sps:$4 sm:$0xff]   ;;  %v16443_v60 = vld [vmem:[#allocation6 + $0xd28] ss:$16 sps:$4 sm:$0xff]  }
 0x49b   :  { %v16446_v61 = vld [vmem:[#allocation6 + $0xf28] ss:$16 sps:$4 sm:$0xff]   ;;  %v16451_v62 = vld [vmem:[#allocation6 + $0xd0c] ss:$16 sps:$4 sm:$0xff]  }
 0x49c   :  { %7648 = vmatpush1.bf16.msra.mxu0 %v16377_v5  ;;  %v16454_v5 = vld [vmem:[#allocation6 + $0xf0c] ss:$16 sps:$4 sm:$0xff]  }
 0x49d   :  { %7689 = vmatpush1.bf16.msra.mxu1 %v16380_v0  ;;  %7649 = vmatprep.subr.bf16.mxu0 %v16385_v4  ;;  %v16449_v0 = vld [vmem:[#allocation6 + $0xd08] ss:$16 sps:$4 sm:$0xff]  }
 0x49e   :  { %7690 = vmatprep.subr.bf16.mxu1 %v16388_v6  ;;  %v16452_v4 = vld [vmem:[#allocation6 + $0xf08] ss:$16 sps:$4 sm:$0xff]   ;;  %v16457_v6 = vld [vmem:[#allocation6 + $0x10e4] ss:$16 sps:$4 sm:$0xff]  }
 0x4a0   :  { %7650 = vmatpush1.bf16.msra.mxu0 %v16383_v55  ;;  %v16460_v55 = vld [vmem:[#allocation6 + $0x12e4] ss:$16 sps:$4 sm:$0xff]  }
 0x4a1   :  { %7691 = vmatpush1.bf16.msra.mxu1 %v16386_v9  ;;  %7651 = vmatprep.subr.bf16.mxu0 %v16391_v56  ;;  %v16455_v9 = vld [vmem:[#allocation6 + $0x10e0] ss:$16 sps:$4 sm:$0xff]  }
 0x4a2   :  { %7692 = vmatprep.subr.bf16.mxu1 %v16394_v63  ;;  %v16458_v56 = vld [vmem:[#allocation6 + $0x12e0] ss:$16 sps:$4 sm:$0xff]   ;;  %v16463_v63 = vld [vmem:[#allocation6 + $0x10c4] ss:$16 sps:$4 sm:$0xff]  }
 0x4a4   :  { %7652 = vmatpush1.bf16.msra.mxu0 %v16389_v11 }
 0x4a5   :  { %7693 = vmatpush1.bf16.msra.mxu1 %v16392_v16  ;;  %7653 = vmatprep.subr.bf16.mxu0 %v16397_v17  ;;  %v16466_v16 = vld [vmem:[#allocation6 + $0x12c4] ss:$16 sps:$4 sm:$0xff]  }
 0x4a6   :  { %7694 = vmatprep.subr.bf16.mxu1 %v16400_v18  ;;  %v16461_v18 = vld [vmem:[#allocation6 + $0x10c0] ss:$16 sps:$4 sm:$0xff]  }
 0x4a8   :  { %7654 = vmatpush1.bf16.msra.mxu0 %v16395_v20 }
 0x4a9   :  { %7695 = vmatpush1.bf16.msra.mxu1 %v16398_v23  ;;  %7655 = vmatprep.subr.bf16.mxu0 %v16403_v7  ;;  %v16464_v7 = vld [vmem:[#allocation6 + $0x12c0] ss:$16 sps:$4 sm:$0xff]  }
 0x4aa   :  { %7696 = vmatprep.subr.bf16.mxu1 %v16406_v24  ;;  %v16469_v24 = vld [vmem:[#allocation6 + $0x10a4] ss:$16 sps:$4 sm:$0xff]  }
 0x4ac   :  { %7656 = vmatpush1.bf16.msra.mxu0 %v16401_v25 }
 0x4ad   :  { %7697 = vmatpush1.bf16.msra.mxu1 %v16404_v27  ;;  %7657 = vmatprep.subr.bf16.mxu0 %v16409_v8  ;;  %v16472_v27 = vld [vmem:[#allocation6 + $0x12a4] ss:$16 sps:$4 sm:$0xff]  }
 0x4ae   :  { %7698 = vmatprep.subr.bf16.mxu1 %v16412_v28 }
 0x4b0   :  { %7658 = vmatpush2.bf16.msra.mxu0 %v16407_v29 }
 0x4b1   :  { %7699 = vmatpush2.bf16.msra.mxu1 %v16410_v30  ;;  %7659 = vmatprep.subr.bf16.mxu0 %v16415_v2  ;;  %v16467_v30 = vld [vmem:[#allocation6 + $0x10a0] ss:$16 sps:$4 sm:$0xff]  }
 0x4b2   :  { %7700 = vmatprep.subr.bf16.mxu1 %v16418_v43  ;;  %v16470_v43 = vld [vmem:[#allocation6 + $0x12a0] ss:$16 sps:$4 sm:$0xff]  }
 0x4b4   :  { %7660 = vmatpush2.bf16.msra.mxu0 %v16413_v37  ;;  %v16475_v37 = vld [vmem:[#allocation6 + $0x1084] ss:$16 sps:$4 sm:$0xff]  }
 0x4b5   :  { %7701 = vmatpush2.bf16.msra.mxu1 %v16416_v39  ;;  %7661 = vmatprep.subr.bf16.mxu0 %v16421_v40  ;;  %v16478_v40 = vld [vmem:[#allocation6 + $0x1284] ss:$16 sps:$4 sm:$0xff]  }
 0x4b6   :  { %7702 = vmatprep.subr.bf16.mxu1 %v16424_v41  ;;  %v16473_v41 = vld [vmem:[#allocation6 + $0x1080] ss:$16 sps:$4 sm:$0xff]  }
 0x4b8   :  { %7662 = vmatpush2.bf16.msra.mxu0 %v16419_v21  ;;  %v16476_v21 = vld [vmem:[#allocation6 + $0x1280] ss:$16 sps:$4 sm:$0xff]  }
 0x4b9   :  { %7703 = vmatpush2.bf16.msra.mxu1 %v16422_v42  ;;  %7663 = vmatprep.subr.bf16.mxu0 %v16427_v45  ;;  %v16481_v42 = vld [vmem:[#allocation6 + $0x1064] ss:$16 sps:$4 sm:$0xff]  }
 0x4ba   :  { %7704 = vmatprep.subr.bf16.mxu1 %v16430_v46  ;;  %v16484_v45 = vld [vmem:[#allocation6 + $0x1264] ss:$16 sps:$4 sm:$0xff]   ;;  %v16479_v46 = vld [vmem:[#allocation6 + $0x1060] ss:$16 sps:$4 sm:$0xff]  }
 0x4bc   :  { %7664 = vmatpush2.bf16.msra.mxu0 %v16425_v35  ;;  %v16482_v35 = vld [vmem:[#allocation6 + $0x1260] ss:$16 sps:$4 sm:$0xff]  }
 0x4bd   :  { %7705 = vmatpush2.bf16.msra.mxu1 %v16428_v38  ;;  %7665 = vmatprep.subr.bf16.mxu0 %v16433_v26  ;;  %v16487_v38 = vld [vmem:[#allocation6 + $0x1044] ss:$16 sps:$4 sm:$0xff]  }
 0x4be   :  { %7706 = vmatprep.subr.bf16.mxu1 %v16436_v49  ;;  %v16490_v26 = vld [vmem:[#allocation6 + $0x1244] ss:$16 sps:$4 sm:$0xff]   ;;  %v16485_v49 = vld [vmem:[#allocation6 + $0x1040] ss:$16 sps:$4 sm:$0xff]  }
 0x4c0   :  { %7666 = vmatpush2.bf16.msra.mxu0 %v16431_v51  ;;  %v16488_v51 = vld [vmem:[#allocation6 + $0x1240] ss:$16 sps:$4 sm:$0xff]  }
 0x4c1   :  { %7707 = vmatpush2.bf16.msra.mxu1 %v16434_v52  ;;  %7667 = vmatprep.subr.bf16.mxu0 %v16439_v3  ;;  %v16493_v52 = vld [vmem:[#allocation6 + $0x1024] ss:$16 sps:$4 sm:$0xff]  }
 0x4c2   :  { %7708 = vmatprep.subr.bf16.mxu1 %v16442_v44  ;;  %v16496_v3 = vld [vmem:[#allocation6 + $0x1224] ss:$16 sps:$4 sm:$0xff]   ;;  %v16491_v44 = vld [vmem:[#allocation6 + $0x1020] ss:$16 sps:$4 sm:$0xff]  }
 0x4c4   :  { %7668 = vmatpush2.bf16.msra.mxu0 %v16437_v53  ;;  %v16494_v53 = vld [vmem:[#allocation6 + $0x1220] ss:$16 sps:$4 sm:$0xff]  }
 0x4c5   :  { %7709 = vmatpush2.bf16.msra.mxu1 %v16440_v54  ;;  %7669 = vmatprep.subr.bf16.mxu0 %v16445_v58  ;;  %v16499_v54 = vld [vmem:[#allocation6 + $0x1004] ss:$16 sps:$4 sm:$0xff]  }
 0x4c6   :  { %7710 = vmatprep.subr.bf16.mxu1 %v16448_v19  ;;  %v16502_v58 = vld [vmem:[#allocation6 + $0x1204] ss:$16 sps:$4 sm:$0xff]   ;;  %v16497_v19 = vld [vmem:[#allocation6 + $0x1000] ss:$16 sps:$4 sm:$0xff]  }
 0x4c8   :  { %7670 = vmatpush2.bf16.msra.mxu0 %v16443_v60  ;;  %v16500_v60 = vld [vmem:[#allocation6 + $0x1200] ss:$16 sps:$4 sm:$0xff]  }
 0x4c9   :  { %7711 = vmatpush2.bf16.msra.mxu1 %v16446_v61  ;;  %7671 = vmatprep.subr.bf16.mxu0 %v16451_v62  ;;  %v16505_v61 = vld [vmem:[#allocation6 + $0x11e4] ss:$16 sps:$4 sm:$0xff]  }
 0x4ca   :  { %7712 = vmatprep.subr.bf16.mxu1 %v16454_v5  ;;  %v16508_v62 = vld [vmem:[#allocation6 + $0x13e4] ss:$16 sps:$4 sm:$0xff]   ;;  %v16503_v5 = vld [vmem:[#allocation6 + $0x11e0] ss:$16 sps:$4 sm:$0xff]  }
 0x4cc   :  { %7672 = vmatpush2.bf16.msra.mxu0 %v16449_v0  ;;  %v16506_v0 = vld [vmem:[#allocation6 + $0x13e0] ss:$16 sps:$4 sm:$0xff]  }
 0x4cd   :  { %7713 = vmatpush2.bf16.msra.mxu1 %v16452_v4  ;;  %9264 = vmatprep.subr.bf16.mxu0 %v16457_v6  ;;  %v16511_v4 = vld [vmem:[#allocation6 + $0x11c4] ss:$16 sps:$4 sm:$0xff]  }
 0x4ce   :  { %9305 = vmatprep.subr.bf16.mxu1 %v16460_v55  ;;  %v16514_v6 = vld [vmem:[#allocation6 + $0x13c4] ss:$16 sps:$4 sm:$0xff]   ;;  %v16509_v55 = vld [vmem:[#allocation6 + $0x11c0] ss:$16 sps:$4 sm:$0xff]  }
 0x4cf   :  { %v7429_v11 = vpop.f32.mrf.mxu0  ;;  %7674 = vmatmul.mubr.bf16.vlgmr.msra.gmra.mxu0 %v18125_v32 }
 0x4d0   :  { %v7470_v17 = vpop.f32.mrf.mxu1  ;;  %7715 = vmatmul.mubr.bf16.vlgmr.msra.gmra.mxu1 %v18129_v34  ;;  %9265 = vmatpush1.bf16.msra.mxu0 %v16455_v9  ;;  %v16512_v9 = vld [vmem:[#allocation6 + $0x13c0] ss:$16 sps:$4 sm:$0xff]  }
 0x4d1   :  { %v18179_v20 = vadd.f32 %v7470_v17, %v7429_v11  ;;  %9296 = vmatprep.mubr.bf16.mxu0 %v18099_v36  ;;  %9306 = vmatpush1.bf16.msra.mxu1 %v16458_v56  ;;  %v7431_v23 = vpop.f32.mrf.mxu0  ;;  %v16517_v56 = vld [vmem:[#allocation6 + $0x11a4] ss:$16 sps:$4 sm:$0xff]   ;;  %v16515_v11 = vld [vmem:[#allocation6 + $0x11a0] ss:$16 sps:$4 sm:$0xff]  }
 0x4d2   :  { %9337 = vmatprep.mubr.bf16.mxu1 %v18103_v22  ;;  %v7472_v25 = vpop.f32.mrf.mxu1  ;;  %9266 = vmatprep.subr.bf16.mxu0 %v16463_v63  ;;  %v16520_v63 = vld [vmem:[#allocation6 + $0x13a4] ss:$16 sps:$4 sm:$0xff]  }
 0x4d3   :  { %v18183_v8 = vadd.f32 %v7472_v25, %v7431_v23  ;;  %v7433_v28 = vpop.f32.mrf.mxu0  ;;  %9307 = vmatprep.subr.bf16.mxu1 %v16466_v16  ;;  %v16518_v16 = vld [vmem:[#allocation6 + $0x13a0] ss:$16 sps:$4 sm:$0xff]   ;;  %v16523_v17 = vld [vmem:[#allocation6 + $0x1184] ss:$16 sps:$4 sm:$0xff]  }
 0x4d4   :  { %v7474_v29 = vpop.f32.mrf.mxu1  ;;  %9267 = vmatpush1.bf16.msra.mxu0 %v16461_v18  ;;  %v16526_v18 = vld [vmem:[#allocation6 + $0x1384] ss:$16 sps:$4 sm:$0xff]   ;;  %v16521_v23 = vld [vmem:[#allocation6 + $0x1180] ss:$16 sps:$4 sm:$0xff]  }
 0x4d5   :  { %9308 = vmatpush1.bf16.msra.mxu1 %v16464_v7  ;;  %v7434_v2 = vpop.f32.mrf.mxu0  ;;  %9268 = vmatprep.subr.bf16.mxu0 %v16469_v24  ;;  %v16524_v7 = vld [vmem:[#allocation6 + $0x1380] ss:$16 sps:$4 sm:$0xff]   ;;  %v16529_v24 = vld [vmem:[#allocation6 + $0x1164] ss:$16 sps:$4 sm:$0xff]  }
 0x4d6   :  { %v7475_v39 = vpop.f32.mrf.mxu1  ;;  %9309 = vmatprep.subr.bf16.mxu1 %v16472_v27  ;;  %v16532_v25 = vld [vmem:[#allocation6 + $0x1364] ss:$16 sps:$4 sm:$0xff]   ;;  %v16527_v27 = vld [vmem:[#allocation6 + $0x1160] ss:$16 sps:$4 sm:$0xff]  }
 0x4d7   :  { %v16530_v28 = vld [vmem:[#allocation6 + $0x1360] ss:$16 sps:$4 sm:$0xff]   ;;  %v16535_v29 = vld [vmem:[#allocation6 + $0x1144] ss:$16 sps:$4 sm:$0xff]  }
 0x4d8   :  { %9269 = vmatpush1.bf16.msra.mxu0 %v16467_v30  ;;  %v16538_v30 = vld [vmem:[#allocation6 + $0x1344] ss:$16 sps:$4 sm:$0xff]   ;;  %v16533_v2 = vld [vmem:[#allocation6 + $0x1140] ss:$16 sps:$4 sm:$0xff]  }
 0x4d9   :  { %9310 = vmatpush1.bf16.msra.mxu1 %v16470_v43  ;;  %9270 = vmatprep.subr.bf16.mxu0 %v16475_v37  ;;  %v16536_v43 = vld [vmem:[#allocation6 + $0x1340] ss:$16 sps:$4 sm:$0xff]   ;;  %v16541_v37 = vld [vmem:[#allocation6 + $0x1124] ss:$16 sps:$4 sm:$0xff]  }
 0x4da   :  { %9311 = vmatprep.subr.bf16.mxu1 %v16478_v40  ;;  %v16544_v39 = vld [vmem:[#allocation6 + $0x1324] ss:$16 sps:$4 sm:$0xff]   ;;  %v16539_v40 = vld [vmem:[#allocation6 + $0x1120] ss:$16 sps:$4 sm:$0xff]  }
 0x4dc   :  { %9271 = vmatpush1.bf16.msra.mxu0 %v16473_v41  ;;  %v16542_v41 = vld [vmem:[#allocation6 + $0x1320] ss:$16 sps:$4 sm:$0xff]  }
 0x4dd   :  { %9312 = vmatpush1.bf16.msra.mxu1 %v16476_v21  ;;  %9272 = vmatprep.subr.bf16.mxu0 %v16481_v42  ;;  %v16547_v21 = vld [vmem:[#allocation6 + $0x1104] ss:$16 sps:$4 sm:$0xff]  }
 0x4de   :  { %9313 = vmatprep.subr.bf16.mxu1 %v16484_v45  ;;  %v16550_v42 = vld [vmem:[#allocation6 + $0x1304] ss:$16 sps:$4 sm:$0xff]   ;;  %v16545_v45 = vld [vmem:[#allocation6 + $0x1100] ss:$16 sps:$4 sm:$0xff]  }
 0x4e0   :  { %9273 = vmatpush1.bf16.msra.mxu0 %v16479_v46  ;;  %v16548_v46 = vld [vmem:[#allocation6 + $0x1300] ss:$16 sps:$4 sm:$0xff]  }
 0x4e1   :  { %9314 = vmatpush1.bf16.msra.mxu1 %v16482_v35  ;;  %9274 = vmatprep.subr.bf16.mxu0 %v16487_v38  ;;  %v16553_v35 = vld [vmem:[#allocation6 + $0x14e4] ss:$16 sps:$4 sm:$0xff]  }
 0x4e2   :  { %9315 = vmatprep.subr.bf16.mxu1 %v16490_v26  ;;  %v16556_v38 = vld [vmem:[#allocation6 + $0x16e4] ss:$16 sps:$4 sm:$0xff]   ;;  %v16551_v26 = vld [vmem:[#allocation6 + $0x14e0] ss:$16 sps:$4 sm:$0xff]  }
 0x4e4   :  { %9275 = vmatpush1.bf16.msra.mxu0 %v16485_v49  ;;  %v16554_v49 = vld [vmem:[#allocation6 + $0x16e0] ss:$16 sps:$4 sm:$0xff]  }
 0x4e5   :  { %9316 = vmatpush1.bf16.msra.mxu1 %v16488_v51  ;;  %9276 = vmatprep.subr.bf16.mxu0 %v16493_v52  ;;  %v16559_v51 = vld [vmem:[#allocation6 + $0x14c4] ss:$16 sps:$4 sm:$0xff]  }
 0x4e6   :  { %9317 = vmatprep.subr.bf16.mxu1 %v16496_v3  ;;  %v16562_v3 = vld [vmem:[#allocation6 + $0x16c4] ss:$16 sps:$4 sm:$0xff]  }
 0x4e8   :  { %9277 = vmatpush1.bf16.msra.mxu0 %v16491_v44 }
 0x4e9   :  { %9318 = vmatpush1.bf16.msra.mxu1 %v16494_v53  ;;  %9278 = vmatprep.subr.bf16.mxu0 %v16499_v54  ;;  %v16557_v54 = vld [vmem:[#allocation6 + $0x14c0] ss:$16 sps:$4 sm:$0xff]  }
 0x4ea   :  { %9319 = vmatprep.subr.bf16.mxu1 %v16502_v58 }
 0x4ec   :  { %9279 = vmatpush1.bf16.msra.mxu0 %v16497_v19  ;;  %v16560_v19 = vld [vmem:[#allocation6 + $0x16c0] ss:$16 sps:$4 sm:$0xff]  }
 0x4ed   :  { %9320 = vmatpush1.bf16.msra.mxu1 %v16500_v60  ;;  %9280 = vmatprep.subr.bf16.mxu0 %v16505_v61  ;;  %v16565_v60 = vld [vmem:[#allocation6 + $0x14a4] ss:$16 sps:$4 sm:$0xff]  }
 0x4ee   :  { %9321 = vmatprep.subr.bf16.mxu1 %v16508_v62 }
 0x4f0   :  { %9281 = vmatpush2.bf16.msra.mxu0 %v16503_v5 }
 0x4f1   :  { %9322 = vmatpush2.bf16.msra.mxu1 %v16506_v0  ;;  %9282 = vmatprep.subr.bf16.mxu0 %v16511_v4 }
 0x4f2   :  { %9323 = vmatprep.subr.bf16.mxu1 %v16514_v6 }
 0x4f4   :  { %9283 = vmatpush2.bf16.msra.mxu0 %v16509_v55 }
 0x4f5   :  { %9324 = vmatpush2.bf16.msra.mxu1 %v16512_v9  ;;  %9284 = vmatprep.subr.bf16.mxu0 %v16517_v56  ;;  %v16563_v9 = vld [vmem:[#allocation6 + $0x14a0] ss:$16 sps:$4 sm:$0xff]  }
 0x4f6   :  { %9325 = vmatprep.subr.bf16.mxu1 %v16520_v63  ;;  %v16566_v63 = vld [vmem:[#allocation6 + $0x16a0] ss:$16 sps:$4 sm:$0xff]  }
 0x4f8   :  { %9285 = vmatpush2.bf16.msra.mxu0 %v16515_v11  ;;  %v16571_v11 = vld [vmem:[#allocation6 + $0x1484] ss:$16 sps:$4 sm:$0xff]  }
 0x4f9   :  { %9326 = vmatpush2.bf16.msra.mxu1 %v16518_v16  ;;  %9286 = vmatprep.subr.bf16.mxu0 %v16523_v17  ;;  %v16574_v17 = vld [vmem:[#allocation6 + $0x1684] ss:$16 sps:$4 sm:$0xff]  }
 0x4fa   :  { %9327 = vmatprep.subr.bf16.mxu1 %v16526_v18  ;;  %v16569_v18 = vld [vmem:[#allocation6 + $0x1480] ss:$16 sps:$4 sm:$0xff]  }
 0x4fc   :  { %9287 = vmatpush2.bf16.msra.mxu0 %v16521_v23  ;;  %v16572_v23 = vld [vmem:[#allocation6 + $0x1680] ss:$16 sps:$4 sm:$0xff]  }
 0x4fd   :  { %9328 = vmatpush2.bf16.msra.mxu1 %v16524_v7  ;;  %9288 = vmatprep.subr.bf16.mxu0 %v16529_v24  ;;  %v16577_v7 = vld [vmem:[#allocation6 + $0x1464] ss:$16 sps:$4 sm:$0xff]  }
 0x4fe   :  { %9329 = vmatprep.subr.bf16.mxu1 %v16532_v25  ;;  %v16580_v24 = vld [vmem:[#allocation6 + $0x1664] ss:$16 sps:$4 sm:$0xff]   ;;  %v16575_v25 = vld [vmem:[#allocation6 + $0x1460] ss:$16 sps:$4 sm:$0xff]  }
 0x500   :  { %9289 = vmatpush2.bf16.msra.mxu0 %v16527_v27  ;;  %v16578_v27 = vld [vmem:[#allocation6 + $0x1660] ss:$16 sps:$4 sm:$0xff]  }
 0x501   :  { %9330 = vmatpush2.bf16.msra.mxu1 %v16530_v28  ;;  %9290 = vmatprep.subr.bf16.mxu0 %v16535_v29  ;;  %v16583_v28 = vld [vmem:[#allocation6 + $0x1444] ss:$16 sps:$4 sm:$0xff]  }
 0x502   :  { %9331 = vmatprep.subr.bf16.mxu1 %v16538_v30  ;;  %v16586_v29 = vld [vmem:[#allocation6 + $0x1644] ss:$16 sps:$4 sm:$0xff]   ;;  %v16581_v30 = vld [vmem:[#allocation6 + $0x1440] ss:$16 sps:$4 sm:$0xff]  }
 0x504   :  { %9291 = vmatpush2.bf16.msra.mxu0 %v16533_v2  ;;  %v16584_v2 = vld [vmem:[#allocation6 + $0x1640] ss:$16 sps:$4 sm:$0xff]  }
 0x505   :  { %9332 = vmatpush2.bf16.msra.mxu1 %v16536_v43  ;;  %9292 = vmatprep.subr.bf16.mxu0 %v16541_v37  ;;  %v16589_v43 = vld [vmem:[#allocation6 + $0x1424] ss:$16 sps:$4 sm:$0xff]  }
 0x506   :  { %9333 = vmatprep.subr.bf16.mxu1 %v16544_v39  ;;  %v16592_v37 = vld [vmem:[#allocation6 + $0x1624] ss:$16 sps:$4 sm:$0xff]   ;;  %v16587_v39 = vld [vmem:[#allocation6 + $0x1420] ss:$16 sps:$4 sm:$0xff]  }
 0x508   :  { %9293 = vmatpush2.bf16.msra.mxu0 %v16539_v40  ;;  %v16590_v40 = vld [vmem:[#allocation6 + $0x1620] ss:$16 sps:$4 sm:$0xff]  }
 0x509   :  { %9334 = vmatpush2.bf16.msra.mxu1 %v16542_v41  ;;  %9294 = vmatprep.subr.bf16.mxu0 %v16547_v21  ;;  %v16595_v41 = vld [vmem:[#allocation6 + $0x1404] ss:$16 sps:$4 sm:$0xff]  }
 0x50a   :  { %9335 = vmatprep.subr.bf16.mxu1 %v16550_v42  ;;  %v16598_v21 = vld [vmem:[#allocation6 + $0x1604] ss:$16 sps:$4 sm:$0xff]   ;;  %v16593_v42 = vld [vmem:[#allocation6 + $0x1400] ss:$16 sps:$4 sm:$0xff]  }
 0x50c   :  { %9295 = vmatpush2.bf16.msra.mxu0 %v16545_v45  ;;  %v16596_v45 = vld [vmem:[#allocation6 + $0x1600] ss:$16 sps:$4 sm:$0xff]  }
 0x50d   :  { %9336 = vmatpush2.bf16.msra.mxu1 %v16548_v46  ;;  %9346 = vmatprep.subr.bf16.mxu0 %v16553_v35  ;;  %v16601_v46 = vld [vmem:[#allocation6 + $0x15e4] ss:$16 sps:$4 sm:$0xff]  }
 0x50e   :  { %9387 = vmatprep.subr.bf16.mxu1 %v16556_v38  ;;  %v16604_v35 = vld [vmem:[#allocation6 + $0x17e4] ss:$16 sps:$4 sm:$0xff]   ;;  %v16599_v38 = vld [vmem:[#allocation6 + $0x15e0] ss:$16 sps:$4 sm:$0xff]  }
 0x50f   :  { %v7511_v52 = vpop.f32.mrf.mxu0  ;;  %9297 = vmatmul.mubr.bf16.vlgmr.msra.gmra.mxu0 %v18101_v48 }
 0x510   :  { %v7512_v44 = vadd.f32 %v7511_v52, %v18179_v20  ;;  %v7552_v53 = vpop.f32.mrf.mxu1  ;;  %9338 = vmatmul.mubr.bf16.vlgmr.msra.gmra.mxu1 %v18105_v50  ;;  %9347 = vmatpush1.bf16.msra.mxu0 %v16551_v26  ;;  %v16568_v20 = vld [vmem:[#allocation6 + $0x16a4] ss:$16 sps:$4 sm:$0xff]   ;;  %v16602_v26 = vld [vmem:[#allocation6 + $0x17e0] ss:$16 sps:$4 sm:$0xff]  }
 0x511   :  { %9378 = vmatprep.mubr.bf16.mxu0 %v18123_v57  ;;  %9388 = vmatpush1.bf16.msra.mxu1 %v16554_v49  ;;  %v7513_v58 = vpop.f32.mrf.mxu0  ;;  %v16607_v49 = vld [vmem:[#allocation6 + $0x15c4] ss:$16 sps:$4 sm:$0xff]   ;;  %v16605_v52 = vld [vmem:[#allocation6 + $0x15c0] ss:$16 sps:$4 sm:$0xff]  }
 0x512   :  { %v18189_v61 = vadd.f32 %v7552_v53, %v7512_v44  ;;  %9419 = vmatprep.mubr.bf16.mxu1 %v18127_v33  ;;  %v7514_v62 = vadd.f32 %v7513_v58, %v18183_v8  ;;  %v7554_v5 = vpop.f32.mrf.mxu1  ;;  %9348 = vmatprep.subr.bf16.mxu0 %v16559_v51  ;;  %v16610_v51 = vld [vmem:[#allocation6 + $0x17c4] ss:$16 sps:$4 sm:$0xff]   ;;  %v16614_v58 = vld [vmem:[#allocation6 + $0x17a0] ss:$16 sps:$4 sm:$0xff]  }
 0x513   :  { %v7515_v0 = vpop.f32.mrf.mxu0  ;;  %9389 = vmatprep.subr.bf16.mxu1 %v16562_v3  ;;  %v16608_v3 = vld [vmem:[#allocation6 + $0x17c0] ss:$16 sps:$4 sm:$0xff]   ;;  %v16613_v44 = vld [vmem:[#allocation6 + $0x15a4] ss:$16 sps:$4 sm:$0xff]  }
 0x514   :  { %v7723_v4 = vmax.f32 %v18153_v47, %v18189_v61  ;;  %v18195_v6 = vadd.f32 %v7554_v5, %v7514_v62  ;;  %v7556_v55 = vpop.f32.mrf.mxu1  ;;  %9349 = vmatpush1.bf16.msra.mxu0 %v16557_v54  ;;  %v16616_v53 = vld [vmem:[#allocation6 + $0x17a4] ss:$16 sps:$4 sm:$0xff]   ;;  %v16611_v54 = vld [vmem:[#allocation6 + $0x15a0] ss:$16 sps:$4 sm:$0xff]  }
 0x515   :  { %9390 = vmatpush1.bf16.msra.mxu1 %v16560_v19  ;;  %v7516_v56 = vpop.f32.mrf.mxu0  ;;  %9350 = vmatprep.subr.bf16.mxu0 %v16565_v60  ;;  %v16619_v19 = vld [vmem:[#allocation6 + $0x1584] ss:$16 sps:$4 sm:$0xff]   ;;  %v16617_v62 = vld [vmem:[#allocation6 + $0x1580] ss:$16 sps:$4 sm:$0xff]  }
 0x516   :  { %v7724_v8 = vmax.f32 %v18157_v12, %v18195_v6  ;;  %v7557_v16 = vpop.f32.mrf.mxu1  ;;  %9391 = vmatprep.subr.bf16.mxu1 %v16568_v20  ;;  %v16622_v60 = vld [vmem:[#allocation6 + $0x1784] ss:$16 sps:$4 sm:$0xff]   ;;  %v16620_v5 = vld [vmem:[#allocation6 + $0x1780] ss:$16 sps:$4 sm:$0xff]  }
 0x517   :  { %v16625_v20 = vld [vmem:[#allocation6 + $0x1564] ss:$16 sps:$4 sm:$0xff]   ;;  %v16623_v55 = vld [vmem:[#allocation6 + $0x1560] ss:$16 sps:$4 sm:$0xff]  }
 0x518   :  { %9351 = vmatpush1.bf16.msra.mxu0 %v16563_v9  ;;  %v16628_v0 = vld [vmem:[#allocation6 + $0x1764] ss:$16 sps:$4 sm:$0xff]   ;;  %v16626_v9 = vld [vmem:[#allocation6 + $0x1760] ss:$16 sps:$4 sm:$0xff]  }
 0x519   :  { %9392 = vmatpush1.bf16.msra.mxu1 %v16566_v63  ;;  %9352 = vmatprep.subr.bf16.mxu0 %v16571_v11  ;;  %v16631_v56 = vld [vmem:[#allocation6 + $0x1544] ss:$16 sps:$4 sm:$0xff]   ;;  %v16629_v11 = vld [vmem:[#allocation6 + $0x1540] ss:$16 sps:$4 sm:$0xff]  }
 0x51a   :  { %9393 = vmatprep.subr.bf16.mxu1 %v16574_v17  ;;  %v16634_v63 = vld [vmem:[#allocation6 + $0x1744] ss:$16 sps:$4 sm:$0xff]   ;;  %v16632_v16 = vld [vmem:[#allocation6 + $0x1740] ss:$16 sps:$4 sm:$0xff]  }
 0x51b   :  { %v16637_v17 = vld [vmem:[#allocation6 + $0x1524] ss:$16 sps:$4 sm:$0xff]   ;;  %v16953_v47 = vld [vmem:[#allocation6 + $0x1c80] ss:$16 sps:$4 sm:$0xff]  }
 0x51c   :  { %9353 = vmatpush1.bf16.msra.mxu0 %v16569_v18  ;;  %v16640_v18 = vld [vmem:[#allocation6 + $0x1724] ss:$16 sps:$4 sm:$0xff]   ;;  %v16956_v61 = vld [vmem:[#allocation6 + $0x1e80] ss:$16 sps:$4 sm:$0xff]  }
 0x51d   :  { %9394 = vmatpush1.bf16.msra.mxu1 %v16572_v23  ;;  %9354 = vmatprep.subr.bf16.mxu0 %v16577_v7  ;;  %v16635_v23 = vld [vmem:[#allocation6 + $0x1520] ss:$16 sps:$4 sm:$0xff]   ;;  %v16970_v12 = vld [vmem:[#allocation6 + $0x1e44] ss:$16 sps:$4 sm:$0xff]  }
 0x51e   :  { %9395 = vmatprep.subr.bf16.mxu1 %v16580_v24  ;;  %v16638_v7 = vld [vmem:[#allocation6 + $0x1720] ss:$16 sps:$4 sm:$0xff]   ;;  %v16643_v24 = vld [vmem:[#allocation6 + $0x1504] ss:$16 sps:$4 sm:$0xff]  }
 0x51f   :  { %v16965_v6 = vld [vmem:[#allocation6 + $0x1c40] ss:$16 sps:$4 sm:$0xff]  }
 0x520   :  { %9355 = vmatpush1.bf16.msra.mxu0 %v16575_v25  ;;  %v16646_v25 = vld [vmem:[#allocation6 + $0x1704] ss:$16 sps:$4 sm:$0xff]  }
 0x521   :  { %9396 = vmatpush1.bf16.msra.mxu1 %v16578_v27  ;;  %9356 = vmatprep.subr.bf16.mxu0 %v16583_v28  ;;  %v16641_v27 = vld [vmem:[#allocation6 + $0x1500] ss:$16 sps:$4 sm:$0xff]  }
 0x522   :  { %9397 = vmatprep.subr.bf16.mxu1 %v16586_v29  ;;  %v16644_v28 = vld [vmem:[#allocation6 + $0x1700] ss:$16 sps:$4 sm:$0xff]   ;;  %v16649_v29 = vld [vmem:[#allocation6 + $0x10ec] ss:$16 sps:$4 sm:$0xff]  }
 0x524   :  { %9357 = vmatpush1.bf16.msra.mxu0 %v16581_v30  ;;  %v16652_v30 = vld [vmem:[#allocation6 + $0x12ec] ss:$16 sps:$4 sm:$0xff]  }
 0x525   :  { %9398 = vmatpush1.bf16.msra.mxu1 %v16584_v2  ;;  %9358 = vmatprep.subr.bf16.mxu0 %v16589_v43  ;;  %v16647_v2 = vld [vmem:[#allocation6 + $0x10e8] ss:$16 sps:$4 sm:$0xff]  }
 0x526   :  { %9399 = vmatprep.subr.bf16.mxu1 %v16592_v37  ;;  %v16650_v43 = vld [vmem:[#allocation6 + $0x12e8] ss:$16 sps:$4 sm:$0xff]   ;;  %v16655_v37 = vld [vmem:[#allocation6 + $0x10cc] ss:$16 sps:$4 sm:$0xff]  }
 0x528   :  { %9359 = vmatpush1.bf16.msra.mxu0 %v16587_v39 }
 0x529   :  { %9400 = vmatpush1.bf16.msra.mxu1 %v16590_v40  ;;  %9360 = vmatprep.subr.bf16.mxu0 %v16595_v41  ;;  %v16658_v40 = vld [vmem:[#allocation6 + $0x12cc] ss:$16 sps:$4 sm:$0xff]  }
 0x52a   :  { %9401 = vmatprep.subr.bf16.mxu1 %v16598_v21  ;;  %v16653_v21 = vld [vmem:[#allocation6 + $0x10c8] ss:$16 sps:$4 sm:$0xff]  }
 0x52c   :  { %9361 = vmatpush1.bf16.msra.mxu0 %v16593_v42 }
 0x52d   :  { %9402 = vmatpush1.bf16.msra.mxu1 %v16596_v45  ;;  %9362 = vmatprep.subr.bf16.mxu0 %v16601_v46  ;;  %v16656_v46 = vld [vmem:[#allocation6 + $0x12c8] ss:$16 sps:$4 sm:$0xff]  }
 0x52e   :  { %9403 = vmatprep.subr.bf16.mxu1 %v16604_v35  ;;  %v16661_v35 = vld [vmem:[#allocation6 + $0x10ac] ss:$16 sps:$4 sm:$0xff]  }
 0x530   :  { %9363 = vmatpush2.bf16.msra.mxu0 %v16599_v38 }
 0x531   :  { %9404 = vmatpush2.bf16.msra.mxu1 %v16602_v26  ;;  %9364 = vmatprep.subr.bf16.mxu0 %v16607_v49  ;;  %v16664_v26 = vld [vmem:[#allocation6 + $0x12ac] ss:$16 sps:$4 sm:$0xff]  }
 0x532   :  { %9405 = vmatprep.subr.bf16.mxu1 %v16610_v51 }
 0x534   :  { %9365 = vmatpush2.bf16.msra.mxu0 %v16605_v52 }
 0x535   :  { %9406 = vmatpush2.bf16.msra.mxu1 %v16608_v3  ;;  %9366 = vmatprep.subr.bf16.mxu0 %v16613_v44  ;;  %v16659_v3 = vld [vmem:[#allocation6 + $0x10a8] ss:$16 sps:$4 sm:$0xff]  }
 0x536   :  { %9407 = vmatprep.subr.bf16.mxu1 %v16616_v53  ;;  %v16662_v53 = vld [vmem:[#allocation6 + $0x12a8] ss:$16 sps:$4 sm:$0xff]  }
 0x538   :  { %9367 = vmatpush2.bf16.msra.mxu0 %v16611_v54  ;;  %v16667_v54 = vld [vmem:[#allocation6 + $0x108c] ss:$16 sps:$4 sm:$0xff]  }
 0x539   :  { %9408 = vmatpush2.bf16.msra.mxu1 %v16614_v58  ;;  %9368 = vmatprep.subr.bf16.mxu0 %v16619_v19  ;;  %v16670_v19 = vld [vmem:[#allocation6 + $0x128c] ss:$16 sps:$4 sm:$0xff]  }
 0x53a   :  { %9409 = vmatprep.subr.bf16.mxu1 %v16622_v60  ;;  %v16665_v60 = vld [vmem:[#allocation6 + $0x1088] ss:$16 sps:$4 sm:$0xff]  }
 0x53c   :  { %9369 = vmatpush2.bf16.msra.mxu0 %v16617_v62  ;;  %v16668_v62 = vld [vmem:[#allocation6 + $0x1288] ss:$16 sps:$4 sm:$0xff]  }
 0x53d   :  { %9410 = vmatpush2.bf16.msra.mxu1 %v16620_v5  ;;  %9370 = vmatprep.subr.bf16.mxu0 %v16625_v20  ;;  %v16673_v5 = vld [vmem:[#allocation6 + $0x106c] ss:$16 sps:$4 sm:$0xff]  }
 0x53e   :  { %9411 = vmatprep.subr.bf16.mxu1 %v16628_v0  ;;  %v16676_v20 = vld [vmem:[#allocation6 + $0x126c] ss:$16 sps:$4 sm:$0xff]   ;;  %v16671_v0 = vld [vmem:[#allocation6 + $0x1068] ss:$16 sps:$4 sm:$0xff]  }
 0x540   :  { %9371 = vmatpush2.bf16.msra.mxu0 %v16623_v55  ;;  %v16674_v55 = vld [vmem:[#allocation6 + $0x1268] ss:$16 sps:$4 sm:$0xff]  }
 0x541   :  { %9412 = vmatpush2.bf16.msra.mxu1 %v16626_v9  ;;  %9372 = vmatprep.subr.bf16.mxu0 %v16631_v56  ;;  %v16679_v9 = vld [vmem:[#allocation6 + $0x104c] ss:$16 sps:$4 sm:$0xff]  }
 0x542   :  { %9413 = vmatprep.subr.bf16.mxu1 %v16634_v63  ;;  %v16682_v56 = vld [vmem:[#allocation6 + $0x124c] ss:$16 sps:$4 sm:$0xff]   ;;  %v16677_v63 = vld [vmem:[#allocation6 + $0x1048] ss:$16 sps:$4 sm:$0xff]  }
 0x544   :  { %9373 = vmatpush2.bf16.msra.mxu0 %v16629_v11  ;;  %v16680_v11 = vld [vmem:[#allocation6 + $0x1248] ss:$16 sps:$4 sm:$0xff]  }
 0x545   :  { %9414 = vmatpush2.bf16.msra.mxu1 %v16632_v16  ;;  %9374 = vmatprep.subr.bf16.mxu0 %v16637_v17  ;;  %v16685_v16 = vld [vmem:[#allocation6 + $0x102c] ss:$16 sps:$4 sm:$0xff]  }
 0x546   :  { %9415 = vmatprep.subr.bf16.mxu1 %v16640_v18  ;;  %v16688_v17 = vld [vmem:[#allocation6 + $0x122c] ss:$16 sps:$4 sm:$0xff]   ;;  %v16683_v18 = vld [vmem:[#allocation6 + $0x1028] ss:$16 sps:$4 sm:$0xff]  }
 0x548   :  { %9375 = vmatpush2.bf16.msra.mxu0 %v16635_v23  ;;  %v16686_v23 = vld [vmem:[#allocation6 + $0x1228] ss:$16 sps:$4 sm:$0xff]  }
 0x549   :  { %9416 = vmatpush2.bf16.msra.mxu1 %v16638_v7  ;;  %9376 = vmatprep.subr.bf16.mxu0 %v16643_v24  ;;  %v16691_v7 = vld [vmem:[#allocation6 + $0x100c] ss:$16 sps:$4 sm:$0xff]  }
 0x54a   :  { %9417 = vmatprep.subr.bf16.mxu1 %v16646_v25  ;;  %v16694_v24 = vld [vmem:[#allocation6 + $0x120c] ss:$16 sps:$4 sm:$0xff]   ;;  %v16689_v25 = vld [vmem:[#allocation6 + $0x1008] ss:$16 sps:$4 sm:$0xff]  }
 0x54c   :  { %9377 = vmatpush2.bf16.msra.mxu0 %v16641_v27  ;;  %v16692_v27 = vld [vmem:[#allocation6 + $0x1208] ss:$16 sps:$4 sm:$0xff]  }
 0x54d   :  { %9418 = vmatpush2.bf16.msra.mxu1 %v16644_v28  ;;  %9428 = vmatprep.subr.bf16.mxu0 %v16649_v29  ;;  %v16697_v28 = vld [vmem:[#allocation6 + $0x11ec] ss:$16 sps:$4 sm:$0xff]  }
 0x54e   :  { %9469 = vmatprep.subr.bf16.mxu1 %v16652_v30  ;;  %v16700_v29 = vld [vmem:[#allocation6 + $0x13ec] ss:$16 sps:$4 sm:$0xff]   ;;  %v16695_v30 = vld [vmem:[#allocation6 + $0x11e8] ss:$16 sps:$4 sm:$0xff]  }
 0x54f   :  { %v7593_v39 = vpop.f32.mrf.mxu0  ;;  %9379 = vmatmul.mubr.bf16.vlgmr.msra.gmra.mxu0 %v18125_v32 }
 0x550   :  { %v7634_v41 = vpop.f32.mrf.mxu1  ;;  %9420 = vmatmul.mubr.bf16.vlgmr.msra.gmra.mxu1 %v18129_v34  ;;  %9429 = vmatpush1.bf16.msra.mxu0 %v16647_v2  ;;  %v16698_v2 = vld [vmem:[#allocation6 + $0x13e8] ss:$16 sps:$4 sm:$0xff]  }
 0x551   :  { %v18201_v42 = vadd.f32 %v7634_v41, %v7593_v39  ;;  %9460 = vmatprep.mubr.bf16.mxu0 %v18099_v36  ;;  %9470 = vmatpush1.bf16.msra.mxu1 %v16650_v43  ;;  %v7595_v45 = vpop.f32.mrf.mxu0  ;;  %v16703_v43 = vld [vmem:[#allocation6 + $0x11cc] ss:$16 sps:$4 sm:$0xff]   ;;  %v16701_v39 = vld [vmem:[#allocation6 + $0x11c8] ss:$16 sps:$4 sm:$0xff]  }
 0x552   :  { %9501 = vmatprep.mubr.bf16.mxu1 %v18103_v22  ;;  %v7636_v38 = vpop.f32.mrf.mxu1  ;;  %9430 = vmatprep.subr.bf16.mxu0 %v16655_v37  ;;  %v16706_v37 = vld [vmem:[#allocation6 + $0x13cc] ss:$16 sps:$4 sm:$0xff]  }
 0x553   :  { %v18205_v49 = vadd.f32 %v7636_v38, %v7595_v45  ;;  %v7597_v51 = vpop.f32.mrf.mxu0  ;;  %9471 = vmatprep.subr.bf16.mxu1 %v16658_v40  ;;  %v16704_v40 = vld [vmem:[#allocation6 + $0x13c8] ss:$16 sps:$4 sm:$0xff]   ;;  %v16709_v41 = vld [vmem:[#allocation6 + $0x11ac] ss:$16 sps:$4 sm:$0xff]  }
 0x554   :  { %v7638_v52 = vpop.f32.mrf.mxu1  ;;  %9431 = vmatpush1.bf16.msra.mxu0 %v16653_v21  ;;  %v16712_v21 = vld [vmem:[#allocation6 + $0x13ac] ss:$16 sps:$4 sm:$0xff]   ;;  %v16707_v45 = vld [vmem:[#allocation6 + $0x11a8] ss:$16 sps:$4 sm:$0xff]  }
 0x555   :  { %9472 = vmatpush1.bf16.msra.mxu1 %v16656_v46  ;;  %v7598_v44 = vpop.f32.mrf.mxu0  ;;  %9432 = vmatprep.subr.bf16.mxu0 %v16661_v35  ;;  %v16710_v46 = vld [vmem:[#allocation6 + $0x13a8] ss:$16 sps:$4 sm:$0xff]   ;;  %v16715_v35 = vld [vmem:[#allocation6 + $0x118c] ss:$16 sps:$4 sm:$0xff]  }
 0x556   :  { %v7639_v58 = vpop.f32.mrf.mxu1  ;;  %9473 = vmatprep.subr.bf16.mxu1 %v16664_v26  ;;  %v16718_v38 = vld [vmem:[#allocation6 + $0x138c] ss:$16 sps:$4 sm:$0xff]   ;;  %v16713_v26 = vld [vmem:[#allocation6 + $0x1188] ss:$16 sps:$4 sm:$0xff]  }
 0x557   :  { %v16716_v51 = vld [vmem:[#allocation6 + $0x1388] ss:$16 sps:$4 sm:$0xff]   ;;  %v16721_v52 = vld [vmem:[#allocation6 + $0x116c] ss:$16 sps:$4 sm:$0xff]  }
 0x558   :  { %9433 = vmatpush1.bf16.msra.mxu0 %v16659_v3  ;;  %v16724_v3 = vld [vmem:[#allocation6 + $0x136c] ss:$16 sps:$4 sm:$0xff]   ;;  %v16719_v44 = vld [vmem:[#allocation6 + $0x1168] ss:$16 sps:$4 sm:$0xff]  }
 0x559   :  { %9474 = vmatpush1.bf16.msra.mxu1 %v16662_v53  ;;  %9434 = vmatprep.subr.bf16.mxu0 %v16667_v54  ;;  %v16722_v53 = vld [vmem:[#allocation6 + $0x1368] ss:$16 sps:$4 sm:$0xff]   ;;  %v16727_v54 = vld [vmem:[#allocation6 + $0x114c] ss:$16 sps:$4 sm:$0xff]  }
 0x55a   :  { %9475 = vmatprep.subr.bf16.mxu1 %v16670_v19  ;;  %v16730_v58 = vld [vmem:[#allocation6 + $0x134c] ss:$16 sps:$4 sm:$0xff]   ;;  %v16725_v19 = vld [vmem:[#allocation6 + $0x1148] ss:$16 sps:$4 sm:$0xff]  }
 0x55c   :  { %9435 = vmatpush1.bf16.msra.mxu0 %v16665_v60  ;;  %v16728_v60 = vld [vmem:[#allocation6 + $0x1348] ss:$16 sps:$4 sm:$0xff]  }
 0x55d   :  { %9476 = vmatpush1.bf16.msra.mxu1 %v16668_v62  ;;  %9436 = vmatprep.subr.bf16.mxu0 %v16673_v5  ;;  %v16733_v62 = vld [vmem:[#allocation6 + $0x112c] ss:$16 sps:$4 sm:$0xff]  }
 0x55e   :  { %9477 = vmatprep.subr.bf16.mxu1 %v16676_v20  ;;  %v16736_v5 = vld [vmem:[#allocation6 + $0x132c] ss:$16 sps:$4 sm:$0xff]   ;;  %v16731_v20 = vld [vmem:[#allocation6 + $0x1128] ss:$16 sps:$4 sm:$0xff]  }
 0x560   :  { %9437 = vmatpush1.bf16.msra.mxu0 %v16671_v0  ;;  %v16734_v0 = vld [vmem:[#allocation6 + $0x1328] ss:$16 sps:$4 sm:$0xff]  }
 0x561   :  { %9478 = vmatpush1.bf16.msra.mxu1 %v16674_v55  ;;  %9438 = vmatprep.subr.bf16.mxu0 %v16679_v9  ;;  %v16739_v55 = vld [vmem:[#allocation6 + $0x110c] ss:$16 sps:$4 sm:$0xff]  }
 0x562   :  { %9479 = vmatprep.subr.bf16.mxu1 %v16682_v56  ;;  %v16742_v9 = vld [vmem:[#allocation6 + $0x130c] ss:$16 sps:$4 sm:$0xff]   ;;  %v16737_v56 = vld [vmem:[#allocation6 + $0x1108] ss:$16 sps:$4 sm:$0xff]  }
 0x564   :  { %9439 = vmatpush1.bf16.msra.mxu0 %v16677_v63  ;;  %v16740_v63 = vld [vmem:[#allocation6 + $0x1308] ss:$16 sps:$4 sm:$0xff]  }
 0x565   :  { %9480 = vmatpush1.bf16.msra.mxu1 %v16680_v11  ;;  %9440 = vmatprep.subr.bf16.mxu0 %v16685_v16  ;;  %v16745_v11 = vld [vmem:[#allocation6 + $0x14ec] ss:$16 sps:$4 sm:$0xff]  }
 0x566   :  { %9481 = vmatprep.subr.bf16.mxu1 %v16688_v17  ;;  %v16748_v16 = vld [vmem:[#allocation6 + $0x16ec] ss:$16 sps:$4 sm:$0xff]   ;;  %v16743_v17 = vld [vmem:[#allocation6 + $0x14e8] ss:$16 sps:$4 sm:$0xff]  }
 0x568   :  { %9441 = vmatpush1.bf16.msra.mxu0 %v16683_v18  ;;  %v16746_v18 = vld [vmem:[#allocation6 + $0x16e8] ss:$16 sps:$4 sm:$0xff]  }
 0x569   :  { %9482 = vmatpush1.bf16.msra.mxu1 %v16686_v23  ;;  %9442 = vmatprep.subr.bf16.mxu0 %v16691_v7  ;;  %v16751_v23 = vld [vmem:[#allocation6 + $0x14cc] ss:$16 sps:$4 sm:$0xff]  }
 0x56a   :  { %9483 = vmatprep.subr.bf16.mxu1 %v16694_v24  ;;  %v16754_v24 = vld [vmem:[#allocation6 + $0x16cc] ss:$16 sps:$4 sm:$0xff]  }
 0x56c   :  { %9443 = vmatpush1.bf16.msra.mxu0 %v16689_v25 }
 0x56d   :  { %9484 = vmatpush1.bf16.msra.mxu1 %v16692_v27  ;;  %9444 = vmatprep.subr.bf16.mxu0 %v16697_v28  ;;  %v16749_v28 = vld [vmem:[#allocation6 + $0x14c8] ss:$16 sps:$4 sm:$0xff]  }
 0x56e   :  { %9485 = vmatprep.subr.bf16.mxu1 %v16700_v29 }
 0x570   :  { %9445 = vmatpush2.bf16.msra.mxu0 %v16695_v30  ;;  %v16752_v30 = vld [vmem:[#allocation6 + $0x16c8] ss:$16 sps:$4 sm:$0xff]  }
 0x571   :  { %9486 = vmatpush2.bf16.msra.mxu1 %v16698_v2  ;;  %9446 = vmatprep.subr.bf16.mxu0 %v16703_v43  ;;  %v16757_v2 = vld [vmem:[#allocation6 + $0x14ac] ss:$16 sps:$4 sm:$0xff]  }
 0x572   :  { %9487 = vmatprep.subr.bf16.mxu1 %v16706_v37 }
 0x574   :  { %9447 = vmatpush2.bf16.msra.mxu0 %v16701_v39 }
 0x575   :  { %9488 = vmatpush2.bf16.msra.mxu1 %v16704_v40  ;;  %9448 = vmatprep.subr.bf16.mxu0 %v16709_v41 }
 0x576   :  { %9489 = vmatprep.subr.bf16.mxu1 %v16712_v21 }
 0x578   :  { %9449 = vmatpush2.bf16.msra.mxu0 %v16707_v45 }
 0x579   :  { %9490 = vmatpush2.bf16.msra.mxu1 %v16710_v46  ;;  %9450 = vmatprep.subr.bf16.mxu0 %v16715_v35  ;;  %v16755_v46 = vld [vmem:[#allocation6 + $0x14a8] ss:$16 sps:$4 sm:$0xff]  }
 0x57a   :  { %9491 = vmatprep.subr.bf16.mxu1 %v16718_v38  ;;  %v16758_v38 = vld [vmem:[#allocation6 + $0x16a8] ss:$16 sps:$4 sm:$0xff]  }
 0x57c   :  { %9451 = vmatpush2.bf16.msra.mxu0 %v16713_v26  ;;  %v16763_v26 = vld [vmem:[#allocation6 + $0x148c] ss:$16 sps:$4 sm:$0xff]  }
 0x57d   :  { %9492 = vmatpush2.bf16.msra.mxu1 %v16716_v51  ;;  %9452 = vmatprep.subr.bf16.mxu0 %v16721_v52  ;;  %v16766_v52 = vld [vmem:[#allocation6 + $0x168c] ss:$16 sps:$4 sm:$0xff]  }
 0x57e   :  { %9493 = vmatprep.subr.bf16.mxu1 %v16724_v3  ;;  %v16761_v3 = vld [vmem:[#allocation6 + $0x1488] ss:$16 sps:$4 sm:$0xff]  }
 0x580   :  { %9453 = vmatpush2.bf16.msra.mxu0 %v16719_v44  ;;  %v16764_v44 = vld [vmem:[#allocation6 + $0x1688] ss:$16 sps:$4 sm:$0xff]  }
 0x581   :  { %9494 = vmatpush2.bf16.msra.mxu1 %v16722_v53  ;;  %9454 = vmatprep.subr.bf16.mxu0 %v16727_v54  ;;  %v16769_v53 = vld [vmem:[#allocation6 + $0x146c] ss:$16 sps:$4 sm:$0xff]  }
 0x582   :  { %9495 = vmatprep.subr.bf16.mxu1 %v16730_v58  ;;  %v16772_v54 = vld [vmem:[#allocation6 + $0x166c] ss:$16 sps:$4 sm:$0xff]   ;;  %v16767_v58 = vld [vmem:[#allocation6 + $0x1468] ss:$16 sps:$4 sm:$0xff]  }
 0x584   :  { %9455 = vmatpush2.bf16.msra.mxu0 %v16725_v19  ;;  %v16770_v19 = vld [vmem:[#allocation6 + $0x1668] ss:$16 sps:$4 sm:$0xff]  }
 0x585   :  { %9496 = vmatpush2.bf16.msra.mxu1 %v16728_v60  ;;  %9456 = vmatprep.subr.bf16.mxu0 %v16733_v62  ;;  %v16775_v60 = vld [vmem:[#allocation6 + $0x144c] ss:$16 sps:$4 sm:$0xff]  }
 0x586   :  { %9497 = vmatprep.subr.bf16.mxu1 %v16736_v5  ;;  %v16778_v62 = vld [vmem:[#allocation6 + $0x164c] ss:$16 sps:$4 sm:$0xff]   ;;  %v16773_v5 = vld [vmem:[#allocation6 + $0x1448] ss:$16 sps:$4 sm:$0xff]  }
 0x588   :  { %9457 = vmatpush2.bf16.msra.mxu0 %v16731_v20  ;;  %v16776_v20 = vld [vmem:[#allocation6 + $0x1648] ss:$16 sps:$4 sm:$0xff]  }
 0x589   :  { %9498 = vmatpush2.bf16.msra.mxu1 %v16734_v0  ;;  %9458 = vmatprep.subr.bf16.mxu0 %v16739_v55  ;;  %v16781_v0 = vld [vmem:[#allocation6 + $0x142c] ss:$16 sps:$4 sm:$0xff]  }
 0x58a   :  { %9499 = vmatprep.subr.bf16.mxu1 %v16742_v9  ;;  %v16784_v55 = vld [vmem:[#allocation6 + $0x162c] ss:$16 sps:$4 sm:$0xff]   ;;  %v16779_v9 = vld [vmem:[#allocation6 + $0x1428] ss:$16 sps:$4 sm:$0xff]  }
 0x58c   :  { %9459 = vmatpush2.bf16.msra.mxu0 %v16737_v56  ;;  %v16782_v56 = vld [vmem:[#allocation6 + $0x1628] ss:$16 sps:$4 sm:$0xff]  }
 0x58d   :  { %9500 = vmatpush2.bf16.msra.mxu1 %v16740_v63  ;;  %9510 = vmatprep.subr.bf16.mxu0 %v16745_v11  ;;  %v16787_v63 = vld [vmem:[#allocation6 + $0x140c] ss:$16 sps:$4 sm:$0xff]  }
 0x58e   :  { %9551 = vmatprep.subr.bf16.mxu1 %v16748_v16  ;;  %v16790_v11 = vld [vmem:[#allocation6 + $0x160c] ss:$16 sps:$4 sm:$0xff]   ;;  %v16785_v16 = vld [vmem:[#allocation6 + $0x1408] ss:$16 sps:$4 sm:$0xff]  }
 0x58f   :  { %v7675_v7 = vpop.f32.mrf.mxu0  ;;  %9461 = vmatmul.mubr.bf16.vlgmr.msra.gmra.mxu0 %v18101_v48 }
 0x590   :  { %v7676_v25 = vadd.f32 %v7675_v7, %v18201_v42  ;;  %v7716_v27 = vpop.f32.mrf.mxu1  ;;  %9502 = vmatmul.mubr.bf16.vlgmr.msra.gmra.mxu1 %v18105_v50  ;;  %9511 = vmatpush1.bf16.msra.mxu0 %v16743_v17  ;;  %v16760_v42 = vld [vmem:[#allocation6 + $0x16ac] ss:$16 sps:$4 sm:$0xff]   ;;  %v16788_v17 = vld [vmem:[#allocation6 + $0x1608] ss:$16 sps:$4 sm:$0xff]  }
 0x591   :  { %9542 = vmatprep.mubr.bf16.mxu0 %v18123_v57  ;;  %9552 = vmatpush1.bf16.msra.mxu1 %v16746_v18  ;;  %v7677_v29 = vpop.f32.mrf.mxu0  ;;  %v16793_v18 = vld [vmem:[#allocation6 + $0x15ec] ss:$16 sps:$4 sm:$0xff]   ;;  %v16791_v7 = vld [vmem:[#allocation6 + $0x15e8] ss:$16 sps:$4 sm:$0xff]  }
 0x592   :  { %v18211_v43 = vadd.f32 %v7716_v27, %v7676_v25  ;;  %9583 = vmatprep.mubr.bf16.mxu1 %v18127_v33  ;;  %v7678_v37 = vadd.f32 %v7677_v29, %v18205_v49  ;;  %v7718_v39 = vpop.f32.mrf.mxu1  ;;  %9512 = vmatprep.subr.bf16.mxu0 %v16751_v23  ;;  %v16796_v23 = vld [vmem:[#allocation6 + $0x17ec] ss:$16 sps:$4 sm:$0xff]   ;;  %v16800_v29 = vld [vmem:[#allocation6 + $0x17c8] ss:$16 sps:$4 sm:$0xff]  }
 0x593   :  { %v7679_v40 = vpop.f32.mrf.mxu0  ;;  %9553 = vmatprep.subr.bf16.mxu1 %v16754_v24  ;;  %v16794_v24 = vld [vmem:[#allocation6 + $0x17e8] ss:$16 sps:$4 sm:$0xff]   ;;  %v16799_v25 = vld [vmem:[#allocation6 + $0x15cc] ss:$16 sps:$4 sm:$0xff]  }
 0x594   :  { %v7725_v41 = vmax.f32 %v18171_v10, %v18211_v43  ;;  %v18217_v21 = vadd.f32 %v7718_v39, %v7678_v37  ;;  %v7720_v45 = vpop.f32.mrf.mxu1  ;;  %9513 = vmatpush1.bf16.msra.mxu0 %v16749_v28  ;;  %v16802_v27 = vld [vmem:[#allocation6 + $0x17cc] ss:$16 sps:$4 sm:$0xff]   ;;  %v16797_v28 = vld [vmem:[#allocation6 + $0x15c8] ss:$16 sps:$4 sm:$0xff]  }
 0x595   :  { %9554 = vmatpush1.bf16.msra.mxu1 %v16752_v30  ;;  %v7680_v35 = vpop.f32.mrf.mxu0  ;;  %9514 = vmatprep.subr.bf16.mxu0 %v16757_v2  ;;  %v16805_v30 = vld [vmem:[#allocation6 + $0x15ac] ss:$16 sps:$4 sm:$0xff]   ;;  %v16803_v37 = vld [vmem:[#allocation6 + $0x15a8] ss:$16 sps:$4 sm:$0xff]  }
 0x596   :  { %v7726_v49 = vmax.f32 %v18175_v31, %v18217_v21  ;;  %v7721_v51 = vpop.f32.mrf.mxu1  ;;  %9555 = vmatprep.subr.bf16.mxu1 %v16760_v42  ;;  %v16808_v2 = vld [vmem:[#allocation6 + $0x17ac] ss:$16 sps:$4 sm:$0xff]   ;;  %v16806_v39 = vld [vmem:[#allocation6 + $0x17a8] ss:$16 sps:$4 sm:$0xff]  }
 0x597   :  { %v16811_v42 = vld [vmem:[#allocation6 + $0x158c] ss:$16 sps:$4 sm:$0xff]   ;;  %v16809_v45 = vld [vmem:[#allocation6 + $0x1588] ss:$16 sps:$4 sm:$0xff]  }
 0x598   :  { %9515 = vmatpush1.bf16.msra.mxu0 %v16755_v46  ;;  %v16814_v40 = vld [vmem:[#allocation6 + $0x178c] ss:$16 sps:$4 sm:$0xff]   ;;  %v16812_v46 = vld [vmem:[#allocation6 + $0x1788] ss:$16 sps:$4 sm:$0xff]  }
 0x599   :  { %9556 = vmatpush1.bf16.msra.mxu1 %v16758_v38  ;;  %9516 = vmatprep.subr.bf16.mxu0 %v16763_v26  ;;  %v16817_v35 = vld [vmem:[#allocation6 + $0x156c] ss:$16 sps:$4 sm:$0xff]   ;;  %v16815_v26 = vld [vmem:[#allocation6 + $0x1568] ss:$16 sps:$4 sm:$0xff]  }
 0x59a   :  { %9557 = vmatprep.subr.bf16.mxu1 %v16766_v52  ;;  %v16820_v38 = vld [vmem:[#allocation6 + $0x176c] ss:$16 sps:$4 sm:$0xff]   ;;  %v16818_v51 = vld [vmem:[#allocation6 + $0x1768] ss:$16 sps:$4 sm:$0xff]  }
 0x59b   :  { %v16823_v52 = vld [vmem:[#allocation6 + $0x154c] ss:$16 sps:$4 sm:$0xff]   ;;  %v17145_v10 = vld [vmem:[#allocation6 + $0x1c88] ss:$16 sps:$4 sm:$0xff]  }
 0x59c   :  { %9517 = vmatpush1.bf16.msra.mxu0 %v16761_v3  ;;  %v16826_v3 = vld [vmem:[#allocation6 + $0x174c] ss:$16 sps:$4 sm:$0xff]   ;;  %v17148_v43 = vld [vmem:[#allocation6 + $0x1e88] ss:$16 sps:$4 sm:$0xff]  }
 0x59d   :  { %9558 = vmatpush1.bf16.msra.mxu1 %v16764_v44  ;;  %9518 = vmatprep.subr.bf16.mxu0 %v16769_v53  ;;  %v16821_v44 = vld [vmem:[#allocation6 + $0x1548] ss:$16 sps:$4 sm:$0xff]   ;;  %v17162_v31 = vld [vmem:[#allocation6 + $0x1e4c] ss:$16 sps:$4 sm:$0xff]  }
 0x59e   :  { %9559 = vmatprep.subr.bf16.mxu1 %v16772_v54  ;;  %v16824_v53 = vld [vmem:[#allocation6 + $0x1748] ss:$16 sps:$4 sm:$0xff]   ;;  %v16829_v54 = vld [vmem:[#allocation6 + $0x152c] ss:$16 sps:$4 sm:$0xff]  }
 0x59f   :  { %v17157_v21 = vld [vmem:[#allocation6 + $0x1c48] ss:$16 sps:$4 sm:$0xff]  }
 0x5a0   :  { %9519 = vmatpush1.bf16.msra.mxu0 %v16767_v58  ;;  %v16832_v58 = vld [vmem:[#allocation6 + $0x172c] ss:$16 sps:$4 sm:$0xff]  }
 0x5a1   :  { %9560 = vmatpush1.bf16.msra.mxu1 %v16770_v19  ;;  %9520 = vmatprep.subr.bf16.mxu0 %v16775_v60  ;;  %v16827_v19 = vld [vmem:[#allocation6 + $0x1528] ss:$16 sps:$4 sm:$0xff]  }
 0x5a2   :  { %9561 = vmatprep.subr.bf16.mxu1 %v16778_v62  ;;  %v16830_v60 = vld [vmem:[#allocation6 + $0x1728] ss:$16 sps:$4 sm:$0xff]   ;;  %v16835_v62 = vld [vmem:[#allocation6 + $0x150c] ss:$16 sps:$4 sm:$0xff]  }
 0x5a4   :  { %9521 = vmatpush1.bf16.msra.mxu0 %v16773_v5  ;;  %v16838_v5 = vld [vmem:[#allocation6 + $0x170c] ss:$16 sps:$4 sm:$0xff]  }
 0x5a5   :  { %9562 = vmatpush1.bf16.msra.mxu1 %v16776_v20  ;;  %9522 = vmatprep.subr.bf16.mxu0 %v16781_v0  ;;  %v16833_v20 = vld [vmem:[#allocation6 + $0x1508] ss:$16 sps:$4 sm:$0xff]  }
 0x5a6   :  { %9563 = vmatprep.subr.bf16.mxu1 %v16784_v55  ;;  %v16836_v0 = vld [vmem:[#allocation6 + $0x1708] ss:$16 sps:$4 sm:$0xff]   ;;  %v16841_v55 = vld [vmem:[#allocation6 + $0x18e4] ss:$16 sps:$4 sm:$0xff]  }
 0x5a8   :  { %9523 = vmatpush1.bf16.msra.mxu0 %v16779_v9  ;;  %v16844_v9 = vld [vmem:[#allocation6 + $0x1ae4] ss:$16 sps:$4 sm:$0xff]  }
 0x5a9   :  { %9564 = vmatpush1.bf16.msra.mxu1 %v16782_v56  ;;  %9524 = vmatprep.subr.bf16.mxu0 %v16787_v63  ;;  %v16839_v56 = vld [vmem:[#allocation6 + $0x18e0] ss:$16 sps:$4 sm:$0xff]  }
 0x5aa   :  { %9565 = vmatprep.subr.bf16.mxu1 %v16790_v11  ;;  %v16842_v63 = vld [vmem:[#allocation6 + $0x1ae0] ss:$16 sps:$4 sm:$0xff]   ;;  %v16847_v11 = vld [vmem:[#allocation6 + $0x18c4] ss:$16 sps:$4 sm:$0xff]  }
 0x5ac   :  { %9525 = vmatpush1.bf16.msra.mxu0 %v16785_v16 }
 0x5ad   :  { %9566 = vmatpush1.bf16.msra.mxu1 %v16788_v17  ;;  %9526 = vmatprep.subr.bf16.mxu0 %v16793_v18  ;;  %v16850_v17 = vld [vmem:[#allocation6 + $0x1ac4] ss:$16 sps:$4 sm:$0xff]  }
 0x5ae   :  { %9567 = vmatprep.subr.bf16.mxu1 %v16796_v23  ;;  %v16845_v23 = vld [vmem:[#allocation6 + $0x18c0] ss:$16 sps:$4 sm:$0xff]  }
 0x5b0   :  { %9527 = vmatpush2.bf16.msra.mxu0 %v16791_v7 }
 0x5b1   :  { %9568 = vmatpush2.bf16.msra.mxu1 %v16794_v24  ;;  %9528 = vmatprep.subr.bf16.mxu0 %v16799_v25  ;;  %v16848_v25 = vld [vmem:[#allocation6 + $0x1ac0] ss:$16 sps:$4 sm:$0xff]  }
 0x5b2   :  { %9569 = vmatprep.subr.bf16.mxu1 %v16802_v27  ;;  %v16853_v27 = vld [vmem:[#allocation6 + $0x18a4] ss:$16 sps:$4 sm:$0xff]  }
 0x5b4   :  { %9529 = vmatpush2.bf16.msra.mxu0 %v16797_v28 }
 0x5b5   :  { %9570 = vmatpush2.bf16.msra.mxu1 %v16800_v29  ;;  %9530 = vmatprep.subr.bf16.mxu0 %v16805_v30  ;;  %v16856_v29 = vld [vmem:[#allocation6 + $0x1aa4] ss:$16 sps:$4 sm:$0xff]  }
 0x5b6   :  { %9571 = vmatprep.subr.bf16.mxu1 %v16808_v2 }
 0x5b8   :  { %9531 = vmatpush2.bf16.msra.mxu0 %v16803_v37 }
 0x5b9   :  { %9572 = vmatpush2.bf16.msra.mxu1 %v16806_v39  ;;  %9532 = vmatprep.subr.bf16.mxu0 %v16811_v42  ;;  %v16851_v39 = vld [vmem:[#allocation6 + $0x18a0] ss:$16 sps:$4 sm:$0xff]  }
 0x5ba   :  { %9573 = vmatprep.subr.bf16.mxu1 %v16814_v40  ;;  %v16854_v40 = vld [vmem:[#allocation6 + $0x1aa0] ss:$16 sps:$4 sm:$0xff]  }
 0x5bc   :  { %9533 = vmatpush2.bf16.msra.mxu0 %v16809_v45  ;;  %v16859_v45 = vld [vmem:[#allocation6 + $0x1884] ss:$16 sps:$4 sm:$0xff]  }
 0x5bd   :  { %9574 = vmatpush2.bf16.msra.mxu1 %v16812_v46  ;;  %9534 = vmatprep.subr.bf16.mxu0 %v16817_v35  ;;  %v16862_v35 = vld [vmem:[#allocation6 + $0x1a84] ss:$16 sps:$4 sm:$0xff]  }
 0x5be   :  { %9575 = vmatprep.subr.bf16.mxu1 %v16820_v38  ;;  %v16857_v38 = vld [vmem:[#allocation6 + $0x1880] ss:$16 sps:$4 sm:$0xff]  }
 0x5c0   :  { %9535 = vmatpush2.bf16.msra.mxu0 %v16815_v26  ;;  %v16860_v26 = vld [vmem:[#allocation6 + $0x1a80] ss:$16 sps:$4 sm:$0xff]  }
 0x5c1   :  { %9576 = vmatpush2.bf16.msra.mxu1 %v16818_v51  ;;  %9536 = vmatprep.subr.bf16.mxu0 %v16823_v52  ;;  %v16865_v51 = vld [vmem:[#allocation6 + $0x1864] ss:$16 sps:$4 sm:$0xff]  }
 0x5c2   :  { %9577 = vmatprep.subr.bf16.mxu1 %v16826_v3  ;;  %v16868_v52 = vld [vmem:[#allocation6 + $0x1a64] ss:$16 sps:$4 sm:$0xff]   ;;  %v16863_v3 = vld [vmem:[#allocation6 + $0x1860] ss:$16 sps:$4 sm:$0xff]  }
 0x5c4   :  { %9537 = vmatpush2.bf16.msra.mxu0 %v16821_v44  ;;  %v16866_v44 = vld [vmem:[#allocation6 + $0x1a60] ss:$16 sps:$4 sm:$0xff]  }
 0x5c5   :  { %9578 = vmatpush2.bf16.msra.mxu1 %v16824_v53  ;;  %9538 = vmatprep.subr.bf16.mxu0 %v16829_v54  ;;  %v16871_v53 = vld [vmem:[#allocation6 + $0x1844] ss:$16 sps:$4 sm:$0xff]  }
 0x5c6   :  { %9579 = vmatprep.subr.bf16.mxu1 %v16832_v58  ;;  %v16874_v54 = vld [vmem:[#allocation6 + $0x1a44] ss:$16 sps:$4 sm:$0xff]   ;;  %v16869_v58 = vld [vmem:[#allocation6 + $0x1840] ss:$16 sps:$4 sm:$0xff]  }
 0x5c8   :  { %9539 = vmatpush2.bf16.msra.mxu0 %v16827_v19  ;;  %v16872_v19 = vld [vmem:[#allocation6 + $0x1a40] ss:$16 sps:$4 sm:$0xff]  }
 0x5c9   :  { %9580 = vmatpush2.bf16.msra.mxu1 %v16830_v60  ;;  %9540 = vmatprep.subr.bf16.mxu0 %v16835_v62  ;;  %v16877_v60 = vld [vmem:[#allocation6 + $0x1824] ss:$16 sps:$4 sm:$0xff]  }
 0x5ca   :  { %9581 = vmatprep.subr.bf16.mxu1 %v16838_v5  ;;  %v16880_v62 = vld [vmem:[#allocation6 + $0x1a24] ss:$16 sps:$4 sm:$0xff]   ;;  %v16875_v5 = vld [vmem:[#allocation6 + $0x1820] ss:$16 sps:$4 sm:$0xff]  }
 0x5cc   :  { %9541 = vmatpush2.bf16.msra.mxu0 %v16833_v20  ;;  %v16878_v20 = vld [vmem:[#allocation6 + $0x1a20] ss:$16 sps:$4 sm:$0xff]  }
 0x5cd   :  { %9582 = vmatpush2.bf16.msra.mxu1 %v16836_v0  ;;  %11133 = vmatprep.subr.bf16.mxu0 %v16841_v55  ;;  %v16883_v0 = vld [vmem:[#allocation6 + $0x1804] ss:$16 sps:$4 sm:$0xff]  }
 0x5ce   :  { %11174 = vmatprep.subr.bf16.mxu1 %v16844_v9  ;;  %v16886_v55 = vld [vmem:[#allocation6 + $0x1a04] ss:$16 sps:$4 sm:$0xff]   ;;  %v16881_v9 = vld [vmem:[#allocation6 + $0x1800] ss:$16 sps:$4 sm:$0xff]  }
 0x5cf   :  { %v9298_v16 = vpop.f32.mrf.mxu0  ;;  %9543 = vmatmul.mubr.bf16.vlgmr.msra.gmra.mxu0 %v18125_v32 }
 0x5d0   :  { %v9339_v18 = vpop.f32.mrf.mxu1  ;;  %9584 = vmatmul.mubr.bf16.vlgmr.msra.gmra.mxu1 %v18129_v34  ;;  %11134 = vmatpush1.bf16.msra.mxu0 %v16839_v56  ;;  %v16884_v56 = vld [vmem:[#allocation6 + $0x1a00] ss:$16 sps:$4 sm:$0xff]  }
 0x5d1   :  { %v18223_v7 = vadd.f32 %v9339_v18, %v9298_v16  ;;  %11165 = vmatprep.mubr.bf16.mxu0 %v18099_v36  ;;  %11175 = vmatpush1.bf16.msra.mxu1 %v16842_v63  ;;  %v9300_v24 = vpop.f32.mrf.mxu0  ;;  %v16889_v63 = vld [vmem:[#allocation6 + $0x19e4] ss:$16 sps:$4 sm:$0xff]   ;;  %v16887_v16 = vld [vmem:[#allocation6 + $0x19e0] ss:$16 sps:$4 sm:$0xff]  }
 0x5d2   :  { %11206 = vmatprep.mubr.bf16.mxu1 %v18103_v22  ;;  %v9341_v28 = vpop.f32.mrf.mxu1  ;;  %11135 = vmatprep.subr.bf16.mxu0 %v16847_v11  ;;  %v16892_v11 = vld [vmem:[#allocation6 + $0x1be4] ss:$16 sps:$4 sm:$0xff]  }
 0x5d3   :  { %v18227_v30 = vadd.f32 %v9341_v28, %v9300_v24  ;;  %v9302_v2 = vpop.f32.mrf.mxu0  ;;  %11176 = vmatprep.subr.bf16.mxu1 %v16850_v17  ;;  %v16890_v17 = vld [vmem:[#allocation6 + $0x1be0] ss:$16 sps:$4 sm:$0xff]   ;;  %v16895_v18 = vld [vmem:[#allocation6 + $0x19c4] ss:$16 sps:$4 sm:$0xff]  }
 0x5d4   :  { %v9343_v37 = vpop.f32.mrf.mxu1  ;;  %11136 = vmatpush1.bf16.msra.mxu0 %v16845_v23  ;;  %v16898_v23 = vld [vmem:[#allocation6 + $0x1bc4] ss:$16 sps:$4 sm:$0xff]   ;;  %v16893_v24 = vld [vmem:[#allocation6 + $0x19c0] ss:$16 sps:$4 sm:$0xff]  }
 0x5d5   :  { %11177 = vmatpush1.bf16.msra.mxu1 %v16848_v25  ;;  %v9303_v42 = vpop.f32.mrf.mxu0  ;;  %11137 = vmatprep.subr.bf16.mxu0 %v16853_v27  ;;  %v16896_v25 = vld [vmem:[#allocation6 + $0x1bc0] ss:$16 sps:$4 sm:$0xff]   ;;  %v16901_v27 = vld [vmem:[#allocation6 + $0x19a4] ss:$16 sps:$4 sm:$0xff]  }
 0x5d6   :  { %v9344_v46 = vpop.f32.mrf.mxu1  ;;  %11178 = vmatprep.subr.bf16.mxu1 %v16856_v29  ;;  %v16904_v28 = vld [vmem:[#allocation6 + $0x1ba4] ss:$16 sps:$4 sm:$0xff]   ;;  %v16899_v29 = vld [vmem:[#allocation6 + $0x19a0] ss:$16 sps:$4 sm:$0xff]  }
 0x5d7   :  { %v16902_v2 = vld [vmem:[#allocation6 + $0x1ba0] ss:$16 sps:$4 sm:$0xff]   ;;  %v16907_v37 = vld [vmem:[#allocation6 + $0x1984] ss:$16 sps:$4 sm:$0xff]  }
 0x5d8   :  { %11138 = vmatpush1.bf16.msra.mxu0 %v16851_v39  ;;  %v16910_v39 = vld [vmem:[#allocation6 + $0x1b84] ss:$16 sps:$4 sm:$0xff]   ;;  %v16905_v42 = vld [vmem:[#allocation6 + $0x1980] ss:$16 sps:$4 sm:$0xff]  }
 0x5d9   :  { %11179 = vmatpush1.bf16.msra.mxu1 %v16854_v40  ;;  %11139 = vmatprep.subr.bf16.mxu0 %v16859_v45  ;;  %v16908_v40 = vld [vmem:[#allocation6 + $0x1b80] ss:$16 sps:$4 sm:$0xff]   ;;  %v16913_v45 = vld [vmem:[#allocation6 + $0x1964] ss:$16 sps:$4 sm:$0xff]  }
 0x5da   :  { %11180 = vmatprep.subr.bf16.mxu1 %v16862_v35  ;;  %v16916_v46 = vld [vmem:[#allocation6 + $0x1b64] ss:$16 sps:$4 sm:$0xff]   ;;  %v16911_v35 = vld [vmem:[#allocation6 + $0x1960] ss:$16 sps:$4 sm:$0xff]  }
 0x5dc   :  { %11140 = vmatpush1.bf16.msra.mxu0 %v16857_v38  ;;  %v16914_v38 = vld [vmem:[#allocation6 + $0x1b60] ss:$16 sps:$4 sm:$0xff]  }
 0x5dd   :  { %11181 = vmatpush1.bf16.msra.mxu1 %v16860_v26  ;;  %11141 = vmatprep.subr.bf16.mxu0 %v16865_v51  ;;  %v16919_v26 = vld [vmem:[#allocation6 + $0x1944] ss:$16 sps:$4 sm:$0xff]  }
 0x5de   :  { %11182 = vmatprep.subr.bf16.mxu1 %v16868_v52  ;;  %v16922_v51 = vld [vmem:[#allocation6 + $0x1b44] ss:$16 sps:$4 sm:$0xff]   ;;  %v16917_v52 = vld [vmem:[#allocation6 + $0x1940] ss:$16 sps:$4 sm:$0xff]  }
 0x5e0   :  { %11142 = vmatpush1.bf16.msra.mxu0 %v16863_v3  ;;  %v16920_v3 = vld [vmem:[#allocation6 + $0x1b40] ss:$16 sps:$4 sm:$0xff]  }
 0x5e1   :  { %11183 = vmatpush1.bf16.msra.mxu1 %v16866_v44  ;;  %11143 = vmatprep.subr.bf16.mxu0 %v16871_v53  ;;  %v16925_v44 = vld [vmem:[#allocation6 + $0x1924] ss:$16 sps:$4 sm:$0xff]  }
 0x5e2   :  { %11184 = vmatprep.subr.bf16.mxu1 %v16874_v54  ;;  %v16928_v53 = vld [vmem:[#allocation6 + $0x1b24] ss:$16 sps:$4 sm:$0xff]   ;;  %v16923_v54 = vld [vmem:[#allocation6 + $0x1920] ss:$16 sps:$4 sm:$0xff]  }
 0x5e4   :  { %11144 = vmatpush1.bf16.msra.mxu0 %v16869_v58  ;;  %v16926_v58 = vld [vmem:[#allocation6 + $0x1b20] ss:$16 sps:$4 sm:$0xff]  }
 0x5e5   :  { %11185 = vmatpush1.bf16.msra.mxu1 %v16872_v19  ;;  %11145 = vmatprep.subr.bf16.mxu0 %v16877_v60  ;;  %v16931_v19 = vld [vmem:[#allocation6 + $0x1904] ss:$16 sps:$4 sm:$0xff]  }
 0x5e6   :  { %11186 = vmatprep.subr.bf16.mxu1 %v16880_v62  ;;  %v16934_v60 = vld [vmem:[#allocation6 + $0x1b04] ss:$16 sps:$4 sm:$0xff]   ;;  %v16929_v62 = vld [vmem:[#allocation6 + $0x1900] ss:$16 sps:$4 sm:$0xff]  }
 0x5e8   :  { %11146 = vmatpush1.bf16.msra.mxu0 %v16875_v5  ;;  %v16932_v5 = vld [vmem:[#allocation6 + $0x1b00] ss:$16 sps:$4 sm:$0xff]  }
 0x5e9   :  { %11187 = vmatpush1.bf16.msra.mxu1 %v16878_v20  ;;  %11147 = vmatprep.subr.bf16.mxu0 %v16883_v0  ;;  %v16937_v20 = vld [vmem:[#allocation6 + $0x1ce4] ss:$16 sps:$4 sm:$0xff]  }
 0x5ea   :  { %11188 = vmatprep.subr.bf16.mxu1 %v16886_v55  ;;  %v16940_v0 = vld [vmem:[#allocation6 + $0x1ee4] ss:$16 sps:$4 sm:$0xff]   ;;  %v16935_v55 = vld [vmem:[#allocation6 + $0x1ce0] ss:$16 sps:$4 sm:$0xff]  }
 0x5ec   :  { %11148 = vmatpush1.bf16.msra.mxu0 %v16881_v9  ;;  %v16938_v9 = vld [vmem:[#allocation6 + $0x1ee0] ss:$16 sps:$4 sm:$0xff]  }
 0x5ed   :  { %11189 = vmatpush1.bf16.msra.mxu1 %v16884_v56  ;;  %11149 = vmatprep.subr.bf16.mxu0 %v16889_v63  ;;  %v16943_v56 = vld [vmem:[#allocation6 + $0x1cc4] ss:$16 sps:$4 sm:$0xff]  }
 0x5ee   :  { %11190 = vmatprep.subr.bf16.mxu1 %v16892_v11  ;;  %v16946_v11 = vld [vmem:[#allocation6 + $0x1ec4] ss:$16 sps:$4 sm:$0xff]  }
 0x5f0   :  { %11150 = vmatpush2.bf16.msra.mxu0 %v16887_v16 }
 0x5f1   :  { %11191 = vmatpush2.bf16.msra.mxu1 %v16890_v17  ;;  %11151 = vmatprep.subr.bf16.mxu0 %v16895_v18  ;;  %v16941_v18 = vld [vmem:[#allocation6 + $0x1cc0] ss:$16 sps:$4 sm:$0xff]  }
 0x5f2   :  { %11192 = vmatprep.subr.bf16.mxu1 %v16898_v23 }
 0x5f4   :  { %11152 = vmatpush2.bf16.msra.mxu0 %v16893_v24  ;;  %v16944_v24 = vld [vmem:[#allocation6 + $0x1ec0] ss:$16 sps:$4 sm:$0xff]  }
 0x5f5   :  { %11193 = vmatpush2.bf16.msra.mxu1 %v16896_v25  ;;  %11153 = vmatprep.subr.bf16.mxu0 %v16901_v27  ;;  %v16949_v25 = vld [vmem:[#allocation6 + $0x1ca4] ss:$16 sps:$4 sm:$0xff]  }
 0x5f6   :  { %11194 = vmatprep.subr.bf16.mxu1 %v16904_v28 }
 0x5f8   :  { %11154 = vmatpush2.bf16.msra.mxu0 %v16899_v29 }
 0x5f9   :  { %11195 = vmatpush2.bf16.msra.mxu1 %v16902_v2  ;;  %11155 = vmatprep.subr.bf16.mxu0 %v16907_v37  ;;  %v16952_v2 = vld [vmem:[#allocation6 + $0x1ea4] ss:$16 sps:$4 sm:$0xff]  }
 0x5fa   :  { %11196 = vmatprep.subr.bf16.mxu1 %v16910_v39 }
 0x5fc   :  { %11156 = vmatpush2.bf16.msra.mxu0 %v16905_v42 }
 0x5fd   :  { %11197 = vmatpush2.bf16.msra.mxu1 %v16908_v40  ;;  %11157 = vmatprep.subr.bf16.mxu0 %v16913_v45  ;;  %v16947_v40 = vld [vmem:[#allocation6 + $0x1ca0] ss:$16 sps:$4 sm:$0xff]  }
 0x5fe   :  { %11198 = vmatprep.subr.bf16.mxu1 %v16916_v46  ;;  %v16950_v46 = vld [vmem:[#allocation6 + $0x1ea0] ss:$16 sps:$4 sm:$0xff]  }
 0x600   :  { %11158 = vmatpush2.bf16.msra.mxu0 %v16911_v35  ;;  %v16955_v35 = vld [vmem:[#allocation6 + $0x1c84] ss:$16 sps:$4 sm:$0xff]  }
 0x601   :  { %11199 = vmatpush2.bf16.msra.mxu1 %v16914_v38  ;;  %11159 = vmatprep.subr.bf16.mxu0 %v16919_v26  ;;  %v16958_v26 = vld [vmem:[#allocation6 + $0x1e84] ss:$16 sps:$4 sm:$0xff]  }
 0x602   :  { %11200 = vmatprep.subr.bf16.mxu1 %v16922_v51  ;;  %v16964_v51 = vld [vmem:[#allocation6 + $0x1e64] ss:$16 sps:$4 sm:$0xff]  }
 0x604   :  { %11160 = vmatpush2.bf16.msra.mxu0 %v16917_v52  ;;  %v16959_v52 = vld [vmem:[#allocation6 + $0x1c60] ss:$16 sps:$4 sm:$0xff]  }
 0x605   :  { %11201 = vmatpush2.bf16.msra.mxu1 %v16920_v3  ;;  %11161 = vmatprep.subr.bf16.mxu0 %v16925_v44  ;;  %v16962_v3 = vld [vmem:[#allocation6 + $0x1e60] ss:$16 sps:$4 sm:$0xff]   ;;  %v16967_v44 = vld [vmem:[#allocation6 + $0x1c44] ss:$16 sps:$4 sm:$0xff]  }
 0x606   :  { %11202 = vmatprep.subr.bf16.mxu1 %v16928_v53  ;;  %v16973_v53 = vld [vmem:[#allocation6 + $0x1c24] ss:$16 sps:$4 sm:$0xff]  }
 0x608   :  { %11162 = vmatpush2.bf16.msra.mxu0 %v16923_v54  ;;  %v16976_v54 = vld [vmem:[#allocation6 + $0x1e24] ss:$16 sps:$4 sm:$0xff]  }
 0x609   :  { %11203 = vmatpush2.bf16.msra.mxu1 %v16926_v58  ;;  %11163 = vmatprep.subr.bf16.mxu0 %v16931_v19  ;;  %v16971_v58 = vld [vmem:[#allocation6 + $0x1c20] ss:$16 sps:$4 sm:$0xff]  }
 0x60a   :  { %11204 = vmatprep.subr.bf16.mxu1 %v16934_v60  ;;  %v16974_v19 = vld [vmem:[#allocation6 + $0x1e20] ss:$16 sps:$4 sm:$0xff]   ;;  %v16979_v60 = vld [vmem:[#allocation6 + $0x1c04] ss:$16 sps:$4 sm:$0xff]  }
 0x60c   :  { %11164 = vmatpush2.bf16.msra.mxu0 %v16929_v62  ;;  %v16982_v62 = vld [vmem:[#allocation6 + $0x1e04] ss:$16 sps:$4 sm:$0xff]  }
 0x60d   :  { %11205 = vmatpush2.bf16.msra.mxu1 %v16932_v5  ;;  %11215 = vmatprep.subr.bf16.mxu0 %v16937_v20  ;;  %v16977_v5 = vld [vmem:[#allocation6 + $0x1c00] ss:$16 sps:$4 sm:$0xff]  }
 0x60e   :  { %11256 = vmatprep.subr.bf16.mxu1 %v16940_v0  ;;  %v16980_v20 = vld [vmem:[#allocation6 + $0x1e00] ss:$16 sps:$4 sm:$0xff]   ;;  %v16985_v0 = vld [vmem:[#allocation6 + $0x1de4] ss:$16 sps:$4 sm:$0xff]  }
 0x60f   :  { %v9380_v63 = vpop.f32.mrf.mxu0  ;;  %11166 = vmatmul.mubr.bf16.vlgmr.msra.gmra.mxu0 %v18101_v48 }
 0x610   :  { %v9381_v16 = vadd.f32 %v9380_v63, %v18223_v7  ;;  %v9421_v17 = vpop.f32.mrf.mxu1  ;;  %11207 = vmatmul.mubr.bf16.vlgmr.msra.gmra.mxu1 %v18105_v50  ;;  %11216 = vmatpush1.bf16.msra.mxu0 %v16935_v55  ;;  %v16988_v55 = vld [vmem:[#allocation6 + $0x1fe4] ss:$16 sps:$4 sm:$0xff]  }
 0x611   :  { %11247 = vmatprep.mubr.bf16.mxu0 %v18123_v57  ;;  %11257 = vmatpush1.bf16.msra.mxu1 %v16938_v9  ;;  %v9382_v23 = vpop.f32.mrf.mxu0  ;;  %v16983_v9 = vld [vmem:[#allocation6 + $0x1de0] ss:$16 sps:$4 sm:$0xff]   ;;  %v16991_v63 = vld [vmem:[#allocation6 + $0x1dc4] ss:$16 sps:$4 sm:$0xff]  }
 0x612   :  { %v9422_v27 = vadd.f32 %v9421_v17, %v9381_v16  ;;  %11288 = vmatprep.mubr.bf16.mxu1 %v18127_v33  ;;  %v9383_v28 = vadd.f32 %v9382_v23, %v18227_v30  ;;  %v9423_v29 = vpop.f32.mrf.mxu1  ;;  %11217 = vmatprep.subr.bf16.mxu0 %v16943_v56  ;;  %v16986_v56 = vld [vmem:[#allocation6 + $0x1fe0] ss:$16 sps:$4 sm:$0xff]   ;;  %v17000_v23 = vld [vmem:[#allocation6 + $0x1fa4] ss:$16 sps:$4 sm:$0xff]  }
 0x613   :  { %v9384_v7 = vpop.f32.mrf.mxu0  ;;  %11258 = vmatprep.subr.bf16.mxu1 %v16946_v11  ;;  %v16994_v11 = vld [vmem:[#allocation6 + $0x1fc4] ss:$16 sps:$4 sm:$0xff]   ;;  %v16989_v16 = vld [vmem:[#allocation6 + $0x1dc0] ss:$16 sps:$4 sm:$0xff]  }
 0x614   :  { %v18238_v37 = vmax.f32 %v7723_v4, %v9422_v27  ;;  %v9424_v39 = vadd.f32 %v9423_v29, %v9383_v28  ;;  %v9425_v42 = vpop.f32.mrf.mxu1  ;;  %11218 = vmatpush1.bf16.msra.mxu0 %v16941_v18  ;;  %v16961_v4 = vld [vmem:[#allocation6 + $0x1c64] ss:$16 sps:$4 sm:$0xff]   ;;  %v16992_v17 = vld [vmem:[#allocation6 + $0x1fc0] ss:$16 sps:$4 sm:$0xff]  }
 0x615   :  { %11259 = vmatpush1.bf16.msra.mxu1 %v16944_v24  ;;  %v9385_v45 = vpop.f32.mrf.mxu0  ;;  %11219 = vmatprep.subr.bf16.mxu0 %v16949_v25  ;;  %v16997_v18 = vld [vmem:[#allocation6 + $0x1da4] ss:$16 sps:$4 sm:$0xff]   ;;  %v16995_v24 = vld [vmem:[#allocation6 + $0x1da0] ss:$16 sps:$4 sm:$0xff]  }
 0x616   :  { %v18243_v30 = vmax.f32 %v7724_v8, %v9424_v39  ;;  %v9426_v38 = vpop.f32.mrf.mxu1  ;;  %11260 = vmatprep.subr.bf16.mxu1 %v16952_v2  ;;  %v16968_v8 = vld [vmem:[#allocation6 + $0x1e40] ss:$16 sps:$4 sm:$0xff]   ;;  %v17003_v27 = vld [vmem:[#allocation6 + $0x1d84] ss:$16 sps:$4 sm:$0xff]  }
 0x617   :  { %v16998_v25 = vld [vmem:[#allocation6 + $0x1fa0] ss:$16 sps:$4 sm:$0xff]   ;;  %v17006_v28 = vld [vmem:[#allocation6 + $0x1f84] ss:$16 sps:$4 sm:$0xff]  }
 0x618   :  { %11220 = vmatpush1.bf16.msra.mxu0 %v16947_v40  ;;  %v17001_v29 = vld [vmem:[#allocation6 + $0x1d80] ss:$16 sps:$4 sm:$0xff]   ;;  %v17009_v7 = vld [vmem:[#allocation6 + $0x1d64] ss:$16 sps:$4 sm:$0xff]  }
 0x619   :  { %11261 = vmatpush1.bf16.msra.mxu1 %v16950_v46  ;;  %11221 = vmatprep.subr.bf16.mxu0 %v16955_v35  ;;  %v17004_v2 = vld [vmem:[#allocation6 + $0x1f80] ss:$16 sps:$4 sm:$0xff]   ;;  %v17012_v39 = vld [vmem:[#allocation6 + $0x1f64] ss:$16 sps:$4 sm:$0xff]  }
 0x61a   :  { %11262 = vmatprep.subr.bf16.mxu1 %v16958_v26  ;;  %v17007_v42 = vld [vmem:[#allocation6 + $0x1d60] ss:$16 sps:$4 sm:$0xff]   ;;  %v17015_v45 = vld [vmem:[#allocation6 + $0x1d44] ss:$16 sps:$4 sm:$0xff]  }
 0x61b   :  { %v17010_v40 = vld [vmem:[#allocation6 + $0x1f60] ss:$16 sps:$4 sm:$0xff]   ;;  %v17018_v46 = vld [vmem:[#allocation6 + $0x1f44] ss:$16 sps:$4 sm:$0xff]  }
 0x61c   :  { %11222 = vmatpush1.bf16.msra.mxu0 %v16953_v47  ;;  %v17013_v35 = vld [vmem:[#allocation6 + $0x1d40] ss:$16 sps:$4 sm:$0xff]   ;;  %v17021_v26 = vld [vmem:[#allocation6 + $0x1d24] ss:$16 sps:$4 sm:$0xff]  }
 0x61d   :  { %11263 = vmatpush1.bf16.msra.mxu1 %v16956_v61  ;;  %11223 = vmatprep.subr.bf16.mxu0 %v16961_v4  ;;  %v17016_v38 = vld [vmem:[#allocation6 + $0x1f40] ss:$16 sps:$4 sm:$0xff]   ;;  %v17024_v47 = vld [vmem:[#allocation6 + $0x1f24] ss:$16 sps:$4 sm:$0xff]  }
 0x61e   :  { %11264 = vmatprep.subr.bf16.mxu1 %v16964_v51  ;;  %v17019_v61 = vld [vmem:[#allocation6 + $0x1d20] ss:$16 sps:$4 sm:$0xff]   ;;  %v17027_v51 = vld [vmem:[#allocation6 + $0x1d04] ss:$16 sps:$4 sm:$0xff]  }
 0x61f   :  { %v17022_v4 = vld [vmem:[#allocation6 + $0x1f20] ss:$16 sps:$4 sm:$0xff]  }
 0x620   :  { %11224 = vmatpush1.bf16.msra.mxu0 %v16959_v52  ;;  %v17030_v52 = vld [vmem:[#allocation6 + $0x1f04] ss:$16 sps:$4 sm:$0xff]  }
 0x621   :  { %11265 = vmatpush1.bf16.msra.mxu1 %v16962_v3  ;;  %11225 = vmatprep.subr.bf16.mxu0 %v16967_v44  ;;  %v17025_v3 = vld [vmem:[#allocation6 + $0x1d00] ss:$16 sps:$4 sm:$0xff]  }
 0x622   :  { %11266 = vmatprep.subr.bf16.mxu1 %v16970_v12  ;;  %v17028_v44 = vld [vmem:[#allocation6 + $0x1f00] ss:$16 sps:$4 sm:$0xff]   ;;  %v17033_v12 = vld [vmem:[#allocation6 + $0x18ec] ss:$16 sps:$4 sm:$0xff]  }
 0x624   :  { %11226 = vmatpush1.bf16.msra.mxu0 %v16965_v6  ;;  %v17036_v6 = vld [vmem:[#allocation6 + $0x1aec] ss:$16 sps:$4 sm:$0xff]  }
 0x625   :  { %11267 = vmatpush1.bf16.msra.mxu1 %v16968_v8  ;;  %11227 = vmatprep.subr.bf16.mxu0 %v16973_v53  ;;  %v17031_v8 = vld [vmem:[#allocation6 + $0x18e8] ss:$16 sps:$4 sm:$0xff]  }
 0x626   :  { %11268 = vmatprep.subr.bf16.mxu1 %v16976_v54  ;;  %v17034_v53 = vld [vmem:[#allocation6 + $0x1ae8] ss:$16 sps:$4 sm:$0xff]   ;;  %v17039_v54 = vld [vmem:[#allocation6 + $0x18cc] ss:$16 sps:$4 sm:$0xff]  }
 0x628   :  { %11228 = vmatpush1.bf16.msra.mxu0 %v16971_v58 }
 0x629   :  { %11269 = vmatpush1.bf16.msra.mxu1 %v16974_v19  ;;  %11229 = vmatprep.subr.bf16.mxu0 %v16979_v60  ;;  %v17042_v19 = vld [vmem:[#allocation6 + $0x1acc] ss:$16 sps:$4 sm:$0xff]  }
 0x62a   :  { %11270 = vmatprep.subr.bf16.mxu1 %v16982_v62  ;;  %v17037_v62 = vld [vmem:[#allocation6 + $0x18c8] ss:$16 sps:$4 sm:$0xff]  }
 0x62c   :  { %11230 = vmatpush1.bf16.msra.mxu0 %v16977_v5 }
 0x62d   :  { %11271 = vmatpush1.bf16.msra.mxu1 %v16980_v20  ;;  %11231 = vmatprep.subr.bf16.mxu0 %v16985_v0  ;;  %v17040_v0 = vld [vmem:[#allocation6 + $0x1ac8] ss:$16 sps:$4 sm:$0xff]  }
 0x62e   :  { %11272 = vmatprep.subr.bf16.mxu1 %v16988_v55  ;;  %v17045_v55 = vld [vmem:[#allocation6 + $0x18ac] ss:$16 sps:$4 sm:$0xff]  }
 0x630   :  { %11232 = vmatpush2.bf16.msra.mxu0 %v16983_v9 }
 0x631   :  { %11273 = vmatpush2.bf16.msra.mxu1 %v16986_v56  ;;  %11233 = vmatprep.subr.bf16.mxu0 %v16991_v63  ;;  %v17048_v56 = vld [vmem:[#allocation6 + $0x1aac] ss:$16 sps:$4 sm:$0xff]  }
 0x632   :  { %11274 = vmatprep.subr.bf16.mxu1 %v16994_v11 }
 0x634   :  { %11234 = vmatpush2.bf16.msra.mxu0 %v16989_v16 }
 0x635   :  { %11275 = vmatpush2.bf16.msra.mxu1 %v16992_v17  ;;  %11235 = vmatprep.subr.bf16.mxu0 %v16997_v18  ;;  %v17043_v17 = vld [vmem:[#allocation6 + $0x18a8] ss:$16 sps:$4 sm:$0xff]  }
 0x636   :  { %11276 = vmatprep.subr.bf16.mxu1 %v17000_v23  ;;  %v17051_v23 = vld [vmem:[#allocation6 + $0x188c] ss:$16 sps:$4 sm:$0xff]  }
 0x638   :  { %11236 = vmatpush2.bf16.msra.mxu0 %v16995_v24 }
 0x639   :  { %11277 = vmatpush2.bf16.msra.mxu1 %v16998_v25  ;;  %11237 = vmatprep.subr.bf16.mxu0 %v17003_v27  ;;  %v17054_v25 = vld [vmem:[#allocation6 + $0x1a8c] ss:$16 sps:$4 sm:$0xff]   ;;  %v17052_v27 = vld [vmem:[#allocation6 + $0x1a88] ss:$16 sps:$4 sm:$0xff]  }
 0x63a   :  { %11278 = vmatprep.subr.bf16.mxu1 %v17006_v28  ;;  %v17057_v28 = vld [vmem:[#allocation6 + $0x186c] ss:$16 sps:$4 sm:$0xff]  }
 0x63c   :  { %11238 = vmatpush2.bf16.msra.mxu0 %v17001_v29  ;;  %v17060_v29 = vld [vmem:[#allocation6 + $0x1a6c] ss:$16 sps:$4 sm:$0xff]  }
 0x63d   :  { %11279 = vmatpush2.bf16.msra.mxu1 %v17004_v2  ;;  %11239 = vmatprep.subr.bf16.mxu0 %v17009_v7  ;;  %v17055_v2 = vld [vmem:[#allocation6 + $0x1868] ss:$16 sps:$4 sm:$0xff]  }
 0x63e   :  { %11280 = vmatprep.subr.bf16.mxu1 %v17012_v39  ;;  %v17058_v7 = vld [vmem:[#allocation6 + $0x1a68] ss:$16 sps:$4 sm:$0xff]   ;;  %v17063_v39 = vld [vmem:[#allocation6 + $0x184c] ss:$16 sps:$4 sm:$0xff]  }
 0x640   :  { %11240 = vmatpush2.bf16.msra.mxu0 %v17007_v42  ;;  %v17066_v42 = vld [vmem:[#allocation6 + $0x1a4c] ss:$16 sps:$4 sm:$0xff]  }
 0x641   :  { %11281 = vmatpush2.bf16.msra.mxu1 %v17010_v40  ;;  %11241 = vmatprep.subr.bf16.mxu0 %v17015_v45  ;;  %v17061_v40 = vld [vmem:[#allocation6 + $0x1848] ss:$16 sps:$4 sm:$0xff]  }
 0x642   :  { %11282 = vmatprep.subr.bf16.mxu1 %v17018_v46  ;;  %v17064_v45 = vld [vmem:[#allocation6 + $0x1a48] ss:$16 sps:$4 sm:$0xff]   ;;  %v17069_v46 = vld [vmem:[#allocation6 + $0x182c] ss:$16 sps:$4 sm:$0xff]  }
 0x644   :  { %11242 = vmatpush2.bf16.msra.mxu0 %v17013_v35  ;;  %v17072_v35 = vld [vmem:[#allocation6 + $0x1a2c] ss:$16 sps:$4 sm:$0xff]  }
 0x645   :  { %11283 = vmatpush2.bf16.msra.mxu1 %v17016_v38  ;;  %11243 = vmatprep.subr.bf16.mxu0 %v17021_v26  ;;  %v17067_v38 = vld [vmem:[#allocation6 + $0x1828] ss:$16 sps:$4 sm:$0xff]  }
 0x646   :  { %11284 = vmatprep.subr.bf16.mxu1 %v17024_v47  ;;  %v17070_v26 = vld [vmem:[#allocation6 + $0x1a28] ss:$16 sps:$4 sm:$0xff]   ;;  %v17075_v47 = vld [vmem:[#allocation6 + $0x180c] ss:$16 sps:$4 sm:$0xff]  }
 0x648   :  { %11244 = vmatpush2.bf16.msra.mxu0 %v17019_v61  ;;  %v17078_v61 = vld [vmem:[#allocation6 + $0x1a0c] ss:$16 sps:$4 sm:$0xff]  }
 0x649   :  { %11285 = vmatpush2.bf16.msra.mxu1 %v17022_v4  ;;  %11245 = vmatprep.subr.bf16.mxu0 %v17027_v51  ;;  %v17073_v4 = vld [vmem:[#allocation6 + $0x1808] ss:$16 sps:$4 sm:$0xff]  }
 0x64a   :  { %11286 = vmatprep.subr.bf16.mxu1 %v17030_v52  ;;  %v17076_v51 = vld [vmem:[#allocation6 + $0x1a08] ss:$16 sps:$4 sm:$0xff]   ;;  %v17081_v52 = vld [vmem:[#allocation6 + $0x19ec] ss:$16 sps:$4 sm:$0xff]  }
 0x64c   :  { %11246 = vmatpush2.bf16.msra.mxu0 %v17025_v3  ;;  %v17084_v3 = vld [vmem:[#allocation6 + $0x1bec] ss:$16 sps:$4 sm:$0xff]  }
 0x64d   :  { %11287 = vmatpush2.bf16.msra.mxu1 %v17028_v44  ;;  %11297 = vmatprep.subr.bf16.mxu0 %v17033_v12  ;;  %v17079_v44 = vld [vmem:[#allocation6 + $0x19e8] ss:$16 sps:$4 sm:$0xff]  }
 0x64e   :  { %11338 = vmatprep.subr.bf16.mxu1 %v17036_v6  ;;  %v17082_v12 = vld [vmem:[#allocation6 + $0x1be8] ss:$16 sps:$4 sm:$0xff]   ;;  %v17087_v6 = vld [vmem:[#allocation6 + $0x19cc] ss:$16 sps:$4 sm:$0xff]  }
 0x64f   :  { %v9462_v58 = vpop.f32.mrf.mxu0  ;;  %11248 = vmatmul.mubr.bf16.vlgmr.msra.gmra.mxu0 %v18125_v32 }
 0x650   :  { %v9503_v60 = vpop.f32.mrf.mxu1  ;;  %11289 = vmatmul.mubr.bf16.vlgmr.msra.gmra.mxu1 %v18129_v34  ;;  %11298 = vmatpush1.bf16.msra.mxu0 %v17031_v8  ;;  %v17090_v8 = vld [vmem:[#allocation6 + $0x1bcc] ss:$16 sps:$4 sm:$0xff]  }
 0x651   :  { %v18247_v5 = vadd.f32 %v9503_v60, %v9462_v58  ;;  %11329 = vmatprep.mubr.bf16.mxu0 %v18099_v36  ;;  %11339 = vmatpush1.bf16.msra.mxu1 %v17034_v53  ;;  %v9464_v20 = vpop.f32.mrf.mxu0  ;;  %v17046_v36 = vld [vmem:[#allocation6 + $0x1aa8] ss:$16 sps:$4 sm:$0xff]   ;;  %v17093_v58 = vld [vmem:[#allocation6 + $0x19ac] ss:$16 sps:$4 sm:$0xff]  }
 0x652   :  { %11370 = vmatprep.mubr.bf16.mxu1 %v18103_v22  ;;  %v9505_v9 = vpop.f32.mrf.mxu1  ;;  %11299 = vmatprep.subr.bf16.mxu0 %v17039_v54  ;;  %v17049_v22 = vld [vmem:[#allocation6 + $0x1888] ss:$16 sps:$4 sm:$0xff]  }
 0x653   :  { %v18251_v63 = vadd.f32 %v9505_v9, %v9464_v20  ;;  %v9466_v11 = vpop.f32.mrf.mxu0  ;;  %11340 = vmatprep.subr.bf16.mxu1 %v17042_v19  ;;  %v17085_v53 = vld [vmem:[#allocation6 + $0x19c8] ss:$16 sps:$4 sm:$0xff]   ;;  %v17096_v19 = vld [vmem:[#allocation6 + $0x1bac] ss:$16 sps:$4 sm:$0xff]  }
 0x654   :  { %v9507_v16 = vpop.f32.mrf.mxu1  ;;  %11300 = vmatpush1.bf16.msra.mxu0 %v17037_v62  ;;  %v17088_v54 = vld [vmem:[#allocation6 + $0x1bc8] ss:$16 sps:$4 sm:$0xff]   ;;  %v17099_v20 = vld [vmem:[#allocation6 + $0x198c] ss:$16 sps:$4 sm:$0xff]  }
 0x655   :  { %11341 = vmatpush1.bf16.msra.mxu1 %v17040_v0  ;;  %v9467_v18 = vpop.f32.mrf.mxu0  ;;  %11301 = vmatprep.subr.bf16.mxu0 %v17045_v55  ;;  %v17091_v60 = vld [vmem:[#allocation6 + $0x19a8] ss:$16 sps:$4 sm:$0xff]   ;;  %v17102_v0 = vld [vmem:[#allocation6 + $0x1b8c] ss:$16 sps:$4 sm:$0xff]  }
 0x656   :  { %v9508_v24 = vpop.f32.mrf.mxu1  ;;  %11342 = vmatprep.subr.bf16.mxu1 %v17048_v56  ;;  %v17094_v62 = vld [vmem:[#allocation6 + $0x1ba8] ss:$16 sps:$4 sm:$0xff]   ;;  %v17105_v56 = vld [vmem:[#allocation6 + $0x196c] ss:$16 sps:$4 sm:$0xff]  }
 0x657   :  { %v17097_v55 = vld [vmem:[#allocation6 + $0x1988] ss:$16 sps:$4 sm:$0xff]   ;;  %v17108_v11 = vld [vmem:[#allocation6 + $0x1b6c] ss:$16 sps:$4 sm:$0xff]  }
 0x658   :  { %11302 = vmatpush1.bf16.msra.mxu0 %v17043_v17  ;;  %v17100_v9 = vld [vmem:[#allocation6 + $0x1b88] ss:$16 sps:$4 sm:$0xff]   ;;  %v17111_v18 = vld [vmem:[#allocation6 + $0x194c] ss:$16 sps:$4 sm:$0xff]  }
 0x659   :  { %11343 = vmatpush1.bf16.msra.mxu1 %v17046_v36  ;;  %11303 = vmatprep.subr.bf16.mxu0 %v17051_v23  ;;  %v17103_v16 = vld [vmem:[#allocation6 + $0x1968] ss:$16 sps:$4 sm:$0xff]   ;;  %v17114_v36 = vld [vmem:[#allocation6 + $0x1b4c] ss:$16 sps:$4 sm:$0xff]  }
 0x65a   :  { %11344 = vmatprep.subr.bf16.mxu1 %v17054_v25  ;;  %v17106_v17 = vld [vmem:[#allocation6 + $0x1b68] ss:$16 sps:$4 sm:$0xff]   ;;  %v17117_v25 = vld [vmem:[#allocation6 + $0x192c] ss:$16 sps:$4 sm:$0xff]  }
 0x65b   :  { %v17109_v23 = vld [vmem:[#allocation6 + $0x1948] ss:$16 sps:$4 sm:$0xff]  }
 0x65c   :  { %11304 = vmatpush1.bf16.msra.mxu0 %v17049_v22  ;;  %v17112_v24 = vld [vmem:[#allocation6 + $0x1b48] ss:$16 sps:$4 sm:$0xff]   ;;  %v17120_v22 = vld [vmem:[#allocation6 + $0x1b2c] ss:$16 sps:$4 sm:$0xff]  }
 0x65d   :  { %11345 = vmatpush1.bf16.msra.mxu1 %v17052_v27  ;;  %11305 = vmatprep.subr.bf16.mxu0 %v17057_v28  ;;  %v17115_v27 = vld [vmem:[#allocation6 + $0x1928] ss:$16 sps:$4 sm:$0xff]  }
 0x65e   :  { %11346 = vmatprep.subr.bf16.mxu1 %v17060_v29  ;;  %v17118_v28 = vld [vmem:[#allocation6 + $0x1b28] ss:$16 sps:$4 sm:$0xff]   ;;  %v17123_v29 = vld [vmem:[#allocation6 + $0x190c] ss:$16 sps:$4 sm:$0xff]  }
 0x660   :  { %11306 = vmatpush1.bf16.msra.mxu0 %v17055_v2  ;;  %v17126_v2 = vld [vmem:[#allocation6 + $0x1b0c] ss:$16 sps:$4 sm:$0xff]  }
 0x661   :  { %11347 = vmatpush1.bf16.msra.mxu1 %v17058_v7  ;;  %11307 = vmatprep.subr.bf16.mxu0 %v17063_v39  ;;  %v17121_v7 = vld [vmem:[#allocation6 + $0x1908] ss:$16 sps:$4 sm:$0xff]  }
 0x662   :  { %11348 = vmatprep.subr.bf16.mxu1 %v17066_v42  ;;  %v17124_v39 = vld [vmem:[#allocation6 + $0x1b08] ss:$16 sps:$4 sm:$0xff]   ;;  %v17129_v42 = vld [vmem:[#allocation6 + $0x1cec] ss:$16 sps:$4 sm:$0xff]  }
 0x664   :  { %11308 = vmatpush1.bf16.msra.mxu0 %v17061_v40  ;;  %v17132_v40 = vld [vmem:[#allocation6 + $0x1eec] ss:$16 sps:$4 sm:$0xff]  }
 0x665   :  { %11349 = vmatpush1.bf16.msra.mxu1 %v17064_v45  ;;  %11309 = vmatprep.subr.bf16.mxu0 %v17069_v46  ;;  %v17127_v45 = vld [vmem:[#allocation6 + $0x1ce8] ss:$16 sps:$4 sm:$0xff]  }
 0x666   :  { %11350 = vmatprep.subr.bf16.mxu1 %v17072_v35  ;;  %v17130_v46 = vld [vmem:[#allocation6 + $0x1ee8] ss:$16 sps:$4 sm:$0xff]   ;;  %v17135_v35 = vld [vmem:[#allocation6 + $0x1ccc] ss:$16 sps:$4 sm:$0xff]  }
 0x668   :  { %11310 = vmatpush1.bf16.msra.mxu0 %v17067_v38 }
 0x669   :  { %11351 = vmatpush1.bf16.msra.mxu1 %v17070_v26  ;;  %11311 = vmatprep.subr.bf16.mxu0 %v17075_v47  ;;  %v17138_v26 = vld [vmem:[#allocation6 + $0x1ecc] ss:$16 sps:$4 sm:$0xff]  }
 0x66a   :  { %11352 = vmatprep.subr.bf16.mxu1 %v17078_v61 }
 0x66c   :  { %11312 = vmatpush1.bf16.msra.mxu0 %v17073_v4  ;;  %v17133_v4 = vld [vmem:[#allocation6 + $0x1cc8] ss:$16 sps:$4 sm:$0xff]  }
 0x66d   :  { %11353 = vmatpush1.bf16.msra.mxu1 %v17076_v51  ;;  %11313 = vmatprep.subr.bf16.mxu0 %v17081_v52  ;;  %v17136_v52 = vld [vmem:[#allocation6 + $0x1ec8] ss:$16 sps:$4 sm:$0xff]  }
 0x66e   :  { %11354 = vmatprep.subr.bf16.mxu1 %v17084_v3  ;;  %v17141_v3 = vld [vmem:[#allocation6 + $0x1cac] ss:$16 sps:$4 sm:$0xff]  }
 0x670   :  { %11314 = vmatpush2.bf16.msra.mxu0 %v17079_v44 }
 0x671   :  { %11355 = vmatpush2.bf16.msra.mxu1 %v17082_v12  ;;  %11315 = vmatprep.subr.bf16.mxu0 %v17087_v6  ;;  %v17144_v6 = vld [vmem:[#allocation6 + $0x1eac] ss:$16 sps:$4 sm:$0xff]  }
 0x672   :  { %11356 = vmatprep.subr.bf16.mxu1 %v17090_v8 }
 0x674   :  { %11316 = vmatpush2.bf16.msra.mxu0 %v17085_v53  ;;  %v17139_v53 = vld [vmem:[#allocation6 + $0x1ca8] ss:$16 sps:$4 sm:$0xff]  }
 0x675   :  { %11357 = vmatpush2.bf16.msra.mxu1 %v17088_v54  ;;  %11317 = vmatprep.subr.bf16.mxu0 %v17093_v58  ;;  %v17147_v58 = vld [vmem:[#allocation6 + $0x1c8c] ss:$16 sps:$4 sm:$0xff]  }
 0x676   :  { %11358 = vmatprep.subr.bf16.mxu1 %v17096_v19 }
 0x678   :  { %11318 = vmatpush2.bf16.msra.mxu0 %v17091_v60  ;;  %v17150_v60 = vld [vmem:[#allocation6 + $0x1e8c] ss:$16 sps:$4 sm:$0xff]  }
 0x679   :  { %11359 = vmatpush2.bf16.msra.mxu1 %v17094_v62  ;;  %11319 = vmatprep.subr.bf16.mxu0 %v17099_v20  ;;  %v17156_v62 = vld [vmem:[#allocation6 + $0x1e6c] ss:$16 sps:$4 sm:$0xff]   ;;  %v17151_v20 = vld [vmem:[#allocation6 + $0x1c68] ss:$16 sps:$4 sm:$0xff]  }
 0x67a   :  { %11360 = vmatprep.subr.bf16.mxu1 %v17102_v0  ;;  %v17154_v0 = vld [vmem:[#allocation6 + $0x1e68] ss:$16 sps:$4 sm:$0xff]  }
 0x67c   :  { %11320 = vmatpush2.bf16.msra.mxu0 %v17097_v55  ;;  %v17159_v55 = vld [vmem:[#allocation6 + $0x1c4c] ss:$16 sps:$4 sm:$0xff]  }
 0x67d   :  { %11361 = vmatpush2.bf16.msra.mxu1 %v17100_v9  ;;  %11321 = vmatprep.subr.bf16.mxu0 %v17105_v56  ;;  %v17165_v9 = vld [vmem:[#allocation6 + $0x1c2c] ss:$16 sps:$4 sm:$0xff]  }
 0x67e   :  { %11362 = vmatprep.subr.bf16.mxu1 %v17108_v11  ;;  %v17168_v56 = vld [vmem:[#allocation6 + $0x1e2c] ss:$16 sps:$4 sm:$0xff]   ;;  %v17163_v11 = vld [vmem:[#allocation6 + $0x1c28] ss:$16 sps:$4 sm:$0xff]  }
 0x680   :  { %11322 = vmatpush2.bf16.msra.mxu0 %v17103_v16  ;;  %v17166_v16 = vld [vmem:[#allocation6 + $0x1e28] ss:$16 sps:$4 sm:$0xff]  }
 0x681   :  { %11363 = vmatpush2.bf16.msra.mxu1 %v17106_v17  ;;  %11323 = vmatprep.subr.bf16.mxu0 %v17111_v18  ;;  %v17171_v17 = vld [vmem:[#allocation6 + $0x1c0c] ss:$16 sps:$4 sm:$0xff]  }
 0x682   :  { %11364 = vmatprep.subr.bf16.mxu1 %v17114_v36  ;;  %v17174_v18 = vld [vmem:[#allocation6 + $0x1e0c] ss:$16 sps:$4 sm:$0xff]   ;;  %v17169_v36 = vld [vmem:[#allocation6 + $0x1c08] ss:$16 sps:$4 sm:$0xff]  }
 0x684   :  { %11324 = vmatpush2.bf16.msra.mxu0 %v17109_v23  ;;  %v17172_v23 = vld [vmem:[#allocation6 + $0x1e08] ss:$16 sps:$4 sm:$0xff]  }
 0x685   :  { %11365 = vmatpush2.bf16.msra.mxu1 %v17112_v24  ;;  %11325 = vmatprep.subr.bf16.mxu0 %v17117_v25  ;;  %v17177_v24 = vld [vmem:[#allocation6 + $0x1dec] ss:$16 sps:$4 sm:$0xff]  }
 0x686   :  { %11366 = vmatprep.subr.bf16.mxu1 %v17120_v22  ;;  %v17180_v25 = vld [vmem:[#allocation6 + $0x1fec] ss:$16 sps:$4 sm:$0xff]   ;;  %v17175_v22 = vld [vmem:[#allocation6 + $0x1de8] ss:$16 sps:$4 sm:$0xff]  }
 0x688   :  { %11326 = vmatpush2.bf16.msra.mxu0 %v17115_v27  ;;  %v17178_v27 = vld [vmem:[#allocation6 + $0x1fe8] ss:$16 sps:$4 sm:$0xff]  }
 0x689   :  { %11367 = vmatpush2.bf16.msra.mxu1 %v17118_v28  ;;  %11327 = vmatprep.subr.bf16.mxu0 %v17123_v29  ;;  %v17183_v28 = vld [vmem:[#allocation6 + $0x1dcc] ss:$16 sps:$4 sm:$0xff]  }
 0x68a   :  { %11368 = vmatprep.subr.bf16.mxu1 %v17126_v2  ;;  %v17186_v29 = vld [vmem:[#allocation6 + $0x1fcc] ss:$16 sps:$4 sm:$0xff]   ;;  %v17181_v2 = vld [vmem:[#allocation6 + $0x1dc8] ss:$16 sps:$4 sm:$0xff]  }
 0x68c   :  { %11328 = vmatpush2.bf16.msra.mxu0 %v17121_v7  ;;  %v17184_v7 = vld [vmem:[#allocation6 + $0x1fc8] ss:$16 sps:$4 sm:$0xff]  }
 0x68d   :  { %11369 = vmatpush2.bf16.msra.mxu1 %v17124_v39  ;;  %11379 = vmatprep.subr.bf16.mxu0 %v17129_v42  ;;  %v17189_v39 = vld [vmem:[#allocation6 + $0x1dac] ss:$16 sps:$4 sm:$0xff]  }
 0x68e   :  { %11420 = vmatprep.subr.bf16.mxu1 %v17132_v40  ;;  %v17192_v42 = vld [vmem:[#allocation6 + $0x1fac] ss:$16 sps:$4 sm:$0xff]   ;;  %v17187_v40 = vld [vmem:[#allocation6 + $0x1da8] ss:$16 sps:$4 sm:$0xff]  }
 0x68f   :  { %v9544_v38 = vpop.f32.mrf.mxu0  ;;  %11330 = vmatmul.mubr.bf16.vlgmr.msra.gmra.mxu0 %v18101_v48 }
 0x690   :  { %v9545_v47 = vadd.f32 %v9544_v38, %v18247_v5  ;;  %v9585_v61 = vpop.f32.mrf.mxu1  ;;  %11371 = vmatmul.mubr.bf16.vlgmr.msra.gmra.mxu1 %v18105_v50  ;;  %11380 = vmatpush1.bf16.msra.mxu0 %v17127_v45  ;;  %v17190_v45 = vld [vmem:[#allocation6 + $0x1fa8] ss:$16 sps:$4 sm:$0xff]  }
 0x691   :  { %11411 = vmatprep.mubr.bf16.mxu0 %v18123_v57  ;;  %11421 = vmatpush1.bf16.msra.mxu1 %v17130_v46  ;;  %v9546_v51 = vpop.f32.mrf.mxu0  ;;  %v17195_v46 = vld [vmem:[#allocation6 + $0x1d8c] ss:$16 sps:$4 sm:$0xff]   ;;  %v17193_v38 = vld [vmem:[#allocation6 + $0x1d88] ss:$16 sps:$4 sm:$0xff]  }
 0x692   :  { %v9586_v44 = vadd.f32 %v9585_v61, %v9545_v47  ;;  %11452 = vmatprep.mubr.bf16.mxu1 %v18127_v33  ;;  %v9547_v12 = vadd.f32 %v9546_v51, %v18251_v63  ;;  %v9587_v48 = vpop.f32.mrf.mxu1  ;;  %11381 = vmatprep.subr.bf16.mxu0 %v17135_v35  ;;  %v17142_v33 = vld [vmem:[#allocation6 + $0x1ea8] ss:$16 sps:$4 sm:$0xff]   ;;  %v17198_v35 = vld [vmem:[#allocation6 + $0x1f8c] ss:$16 sps:$4 sm:$0xff]  }
 0x693   :  { %v9548_v5 = vpop.f32.mrf.mxu0  ;;  %11422 = vmatprep.subr.bf16.mxu1 %v17138_v26  ;;  %v17196_v26 = vld [vmem:[#allocation6 + $0x1f88] ss:$16 sps:$4 sm:$0xff]   ;;  %v17201_v47 = vld [vmem:[#allocation6 + $0x1d6c] ss:$16 sps:$4 sm:$0xff]  }
 0x694   :  { %v18262_v50 = vmax.f32 %v7725_v41, %v9586_v44  ;;  %v9588_v57 = vadd.f32 %v9587_v48, %v9547_v12  ;;  %v9589_v8 = vpop.f32.mrf.mxu1  ;;  %11382 = vmatpush1.bf16.msra.mxu0 %v17133_v4  ;;  %v17153_v41 = vld [vmem:[#allocation6 + $0x1c6c] ss:$16 sps:$4 sm:$0xff]   ;;  %v17199_v4 = vld [vmem:[#allocation6 + $0x1d68] ss:$16 sps:$4 sm:$0xff]  }
 0x695   :  { %11423 = vmatpush1.bf16.msra.mxu1 %v17136_v52  ;;  %v9549_v54 = vpop.f32.mrf.mxu0  ;;  %11383 = vmatprep.subr.bf16.mxu0 %v17141_v3  ;;  %v17204_v61 = vld [vmem:[#allocation6 + $0x1f6c] ss:$16 sps:$4 sm:$0xff]   ;;  %v17202_v51 = vld [vmem:[#allocation6 + $0x1f68] ss:$16 sps:$4 sm:$0xff]  }
 0x696   :  { %v18267_v63 = vmax.f32 %v7726_v49, %v9588_v57  ;;  %v9590_v19 = vpop.f32.mrf.mxu1  ;;  %11424 = vmatprep.subr.bf16.mxu1 %v17144_v6  ;;  %v17160_v49 = vld [vmem:[#allocation6 + $0x1e48] ss:$16 sps:$4 sm:$0xff]   ;;  %v17207_v52 = vld [vmem:[#allocation6 + $0x1d4c] ss:$16 sps:$4 sm:$0xff]  }
 0x697   :  { %v17210_v3 = vld [vmem:[#allocation6 + $0x1f4c] ss:$16 sps:$4 sm:$0xff]   ;;  %v17205_v44 = vld [vmem:[#allocation6 + $0x1d48] ss:$16 sps:$4 sm:$0xff]  }
 0x698   :  { %11384 = vmatpush1.bf16.msra.mxu0 %v17139_v53  ;;  %v17208_v12 = vld [vmem:[#allocation6 + $0x1f48] ss:$16 sps:$4 sm:$0xff]   ;;  %v17213_v48 = vld [vmem:[#allocation6 + $0x1d2c] ss:$16 sps:$4 sm:$0xff]  }
 0x699   :  { %11425 = vmatpush1.bf16.msra.mxu1 %v17142_v33  ;;  %11385 = vmatprep.subr.bf16.mxu0 %v17147_v58  ;;  %v17216_v6 = vld [vmem:[#allocation6 + $0x1f2c] ss:$16 sps:$4 sm:$0xff]   ;;  %v17211_v5 = vld [vmem:[#allocation6 + $0x1d28] ss:$16 sps:$4 sm:$0xff]  }
 0x69a   :  { %11426 = vmatprep.subr.bf16.mxu1 %v17150_v60  ;;  %v17214_v57 = vld [vmem:[#allocation6 + $0x1f28] ss:$16 sps:$4 sm:$0xff]   ;;  %v17219_v8 = vld [vmem:[#allocation6 + $0x1d0c] ss:$16 sps:$4 sm:$0xff]  }
 0x69b   :  { %v17222_v53 = vld [vmem:[#allocation6 + $0x1f0c] ss:$16 sps:$4 sm:$0xff]   ;;  %v17217_v54 = vld [vmem:[#allocation6 + $0x1d08] ss:$16 sps:$4 sm:$0xff]  }
 0x69c   :  { %11386 = vmatpush1.bf16.msra.mxu0 %v17145_v10  ;;  %v17220_v33 = vld [vmem:[#allocation6 + $0x1f08] ss:$16 sps:$4 sm:$0xff]   ;;  %v17223_v19 = vld [vmem:[#allocation9 + $0x70] ss:$8 sps:$4 sm:$0xff]  }
 0x69d   :  { %11427 = vmatpush1.bf16.msra.mxu1 %v17148_v43  ;;  %11387 = vmatprep.subr.bf16.mxu0 %v17153_v41  ;;  %v17225_v58 = vld [vmem:[#allocation9 + $0x74] ss:$8 sps:$4 sm:$0xff]   ;;  %v17228_v60 = vld [vmem:[#allocation9 + $0x64] ss:$8 sps:$4 sm:$0xff]   ;;  %v17226_v41 = vld [vmem:[#allocation9 + $0x60] ss:$8 sps:$4 sm:$0xff]  }
 0x69e   :  { %11428 = vmatprep.subr.bf16.mxu1 %v17156_v62 }
 0x6a0   :  { %11388 = vmatpush1.bf16.msra.mxu0 %v17151_v20 }
 0x6a1   :  { %11429 = vmatpush1.bf16.msra.mxu1 %v17154_v0  ;;  %11389 = vmatprep.subr.bf16.mxu0 %v17159_v55  ;;  %v17231_v0 = vld [vmem:[#allocation9 + $0x54] ss:$8 sps:$4 sm:$0xff]  }
 0x6a2   :  { %11430 = vmatprep.subr.bf16.mxu1 %v17162_v31 }
 0x6a4   :  { %11390 = vmatpush1.bf16.msra.mxu0 %v17157_v21 }
 0x6a5   :  { %11431 = vmatpush1.bf16.msra.mxu1 %v17160_v49  ;;  %11391 = vmatprep.subr.bf16.mxu0 %v17165_v9  ;;  %v17229_v49 = vld [vmem:[#allocation9 + $0x50] ss:$8 sps:$4 sm:$0xff]  }
 0x6a6   :  { %11432 = vmatprep.subr.bf16.mxu1 %v17168_v56 }
 0x6a8   :  { %11392 = vmatpush1.bf16.msra.mxu0 %v17163_v11  ;;  %v17237_v11 = vld [vmem:[#allocation9 + $0x34] ss:$8 sps:$4 sm:$0xff]  }
 0x6a9   :  { %11433 = vmatpush1.bf16.msra.mxu1 %v17166_v16  ;;  %11393 = vmatprep.subr.bf16.mxu0 %v17171_v17  ;;  %v17235_v16 = vld [vmem:[#allocation9 + $0x30] ss:$8 sps:$4 sm:$0xff]  }
 0x6aa   :  { %11434 = vmatprep.subr.bf16.mxu1 %v17174_v18  ;;  %v17319_v17 = vld [vmem:[#allocation9 + $0x170] ss:$8 sps:$4 sm:$0xff]   ;;  %v17321_v18 = vld [vmem:[#allocation9 + $0x174] ss:$8 sps:$4 sm:$0xff]  }
 0x6ac   :  { %11394 = vmatpush1.bf16.msra.mxu0 %v17169_v36  ;;  %v17240_v36 = vld [vmem:[#allocation9 + $0x24] ss:$8 sps:$4 sm:$0xff]  }
 0x6ad   :  { %11435 = vmatpush1.bf16.msra.mxu1 %v17172_v23  ;;  %11395 = vmatprep.subr.bf16.mxu0 %v17177_v24  ;;  %v17238_v23 = vld [vmem:[#allocation9 + $0x20] ss:$8 sps:$4 sm:$0xff]  }
 0x6ae   :  { %11436 = vmatprep.subr.bf16.mxu1 %v17180_v25  ;;  %v17325_v24 = vld [vmem:[#allocation9 + $0x160] ss:$8 sps:$4 sm:$0xff]   ;;  %v17327_v25 = vld [vmem:[#allocation9 + $0x164] ss:$8 sps:$4 sm:$0xff]  }
 0x6b0   :  { %11396 = vmatpush2.bf16.msra.mxu0 %v17175_v22  ;;  %v17243_v22 = vld [vmem:[#allocation9 + $0x14] ss:$8 sps:$4 sm:$0xff]  }
 0x6b1   :  { %11437 = vmatpush2.bf16.msra.mxu1 %v17178_v27  ;;  %11397 = vmatprep.subr.bf16.mxu0 %v17183_v28  ;;  %v17241_v27 = vld [vmem:[#allocation9 + $0x10] ss:$8 sps:$4 sm:$0xff]  }
 0x6b2   :  { %11438 = vmatprep.subr.bf16.mxu1 %v17186_v29  ;;  %v17331_v28 = vld [vmem:[#allocation9 + $0x150] ss:$8 sps:$4 sm:$0xff]   ;;  %v17333_v29 = vld [vmem:[#allocation9 + $0x154] ss:$8 sps:$4 sm:$0xff]  }
 0x6b4   :  { %11398 = vmatpush2.bf16.msra.mxu0 %v17181_v2  ;;  %v17246_v2 = vld [vmem:[#allocation9 + $0x4] ss:$8 sps:$4 sm:$0xff]  }
 0x6b5   :  { %11439 = vmatpush2.bf16.msra.mxu1 %v17184_v7  ;;  %11399 = vmatprep.subr.bf16.mxu0 %v17189_v39  ;;  %v17244_v7 = vld [vmem:[#allocation9] ss:$8 sps:$4 sm:$0xff]  }
 0x6b6   :  { %11440 = vmatprep.subr.bf16.mxu1 %v17192_v42  ;;  %v17337_v39 = vld [vmem:[#allocation9 + $0x140] ss:$8 sps:$4 sm:$0xff]   ;;  %v17339_v42 = vld [vmem:[#allocation9 + $0x144] ss:$8 sps:$4 sm:$0xff]  }
 0x6b8   :  { %11400 = vmatpush2.bf16.msra.mxu0 %v17187_v40  ;;  %v17249_v40 = vld [vmem:[#allocation9 + $0xf4] ss:$8 sps:$4 sm:$0xff]  }
 0x6b9   :  { %11441 = vmatpush2.bf16.msra.mxu1 %v17190_v45  ;;  %11401 = vmatprep.subr.bf16.mxu0 %v17195_v46  ;;  %v17247_v45 = vld [vmem:[#allocation9 + $0xf0] ss:$8 sps:$4 sm:$0xff]  }
 0x6ba   :  { %11442 = vmatprep.subr.bf16.mxu1 %v17198_v35  ;;  %v17343_v46 = vld [vmem:[#allocation9 + $0x130] ss:$8 sps:$4 sm:$0xff]   ;;  %v17345_v35 = vld [vmem:[#allocation9 + $0x134] ss:$8 sps:$4 sm:$0xff]  }
 0x6bc   :  { %11402 = vmatpush2.bf16.msra.mxu0 %v17193_v38  ;;  %v17252_v38 = vld [vmem:[#allocation9 + $0xe4] ss:$8 sps:$4 sm:$0xff]  }
 0x6bd   :  { %11443 = vmatpush2.bf16.msra.mxu1 %v17196_v26  ;;  %11403 = vmatprep.subr.bf16.mxu0 %v17201_v47  ;;  %v17250_v26 = vld [vmem:[#allocation9 + $0xe0] ss:$8 sps:$4 sm:$0xff]  }
 0x6be   :  { %11444 = vmatprep.subr.bf16.mxu1 %v17204_v61  ;;  %v17349_v47 = vld [vmem:[#allocation9 + $0x120] ss:$8 sps:$4 sm:$0xff]   ;;  %v17351_v61 = vld [vmem:[#allocation9 + $0x124] ss:$8 sps:$4 sm:$0xff]  }
 0x6c0   :  { %11404 = vmatpush2.bf16.msra.mxu0 %v17199_v4  ;;  %v17255_v4 = vld [vmem:[#allocation9 + $0xd4] ss:$8 sps:$4 sm:$0xff]  }
 0x6c1   :  { %11445 = vmatpush2.bf16.msra.mxu1 %v17202_v51  ;;  %11405 = vmatprep.subr.bf16.mxu0 %v17207_v52  ;;  %v17253_v51 = vld [vmem:[#allocation9 + $0xd0] ss:$8 sps:$4 sm:$0xff]  }
 0x6c2   :  { %11446 = vmatprep.subr.bf16.mxu1 %v17210_v3  ;;  %v17355_v52 = vld [vmem:[#allocation9 + $0x110] ss:$8 sps:$4 sm:$0xff]   ;;  %v17357_v3 = vld [vmem:[#allocation9 + $0x114] ss:$8 sps:$4 sm:$0xff]  }
 0x6c4   :  { %11406 = vmatpush2.bf16.msra.mxu0 %v17205_v44  ;;  %v17258_v44 = vld [vmem:[#allocation9 + $0xc4] ss:$8 sps:$4 sm:$0xff]  }
 0x6c5   :  { %11447 = vmatpush2.bf16.msra.mxu1 %v17208_v12  ;;  %11407 = vmatprep.subr.bf16.mxu0 %v17213_v48  ;;  %v17256_v12 = vld [vmem:[#allocation9 + $0xc0] ss:$8 sps:$4 sm:$0xff]  }
 0x6c6   :  { %11448 = vmatprep.subr.bf16.mxu1 %v17216_v6  ;;  %v17361_v48 = vld [vmem:[#allocation9 + $0x100] ss:$8 sps:$4 sm:$0xff]   ;;  %v17363_v6 = vld [vmem:[#allocation9 + $0x104] ss:$8 sps:$4 sm:$0xff]  }
 0x6c8   :  { %11408 = vmatpush2.bf16.msra.mxu0 %v17211_v5  ;;  %v17261_v5 = vld [vmem:[#allocation9 + $0xb4] ss:$8 sps:$4 sm:$0xff]  }
 0x6c9   :  { %11449 = vmatpush2.bf16.msra.mxu1 %v17214_v57  ;;  %11409 = vmatprep.subr.bf16.mxu0 %v17219_v8  ;;  %v17259_v57 = vld [vmem:[#allocation9 + $0xb0] ss:$8 sps:$4 sm:$0xff]  }
 0x6ca   :  { %11450 = vmatprep.subr.bf16.mxu1 %v17222_v53  ;;  %v17367_v8 = vld [vmem:[#allocation9 + $0x1f0] ss:$8 sps:$4 sm:$0xff]   ;;  %v17369_v53 = vld [vmem:[#allocation9 + $0x1f4] ss:$8 sps:$4 sm:$0xff]  }
 0x6cc   :  { %11410 = vmatpush2.bf16.msra.mxu0 %v17217_v54  ;;  %v17264_v54 = vld [vmem:[#allocation9 + $0xa4] ss:$8 sps:$4 sm:$0xff]  }
 0x6cd   :  { %11451 = vmatpush2.bf16.msra.mxu1 %v17220_v33  ;;  %11883 = vmatprep.subr.bf16.mxu0 %v17225_v58  ;;  %v17262_v33 = vld [vmem:[#allocation9 + $0xa0] ss:$8 sps:$4 sm:$0xff]  }
 0x6ce   :  { %11924 = vmatprep.subr.bf16.mxu1 %v17321_v18  ;;  %v17373_v58 = vld [vmem:[#allocation9 + $0x1e0] ss:$8 sps:$4 sm:$0xff]  }
 0x6cf   :  { %v11167_v10 = vpop.f32.mrf.mxu0  ;;  %11412 = vmatmul.mubr.bf16.vlgmr.msra.gmra.mxu0 %v18125_v32  ;;  %v17234_v32 = vld [vmem:[#allocation9 + $0x44] ss:$8 sps:$4 sm:$0xff]  }
 0x6d0   :  { %v11208_v43 = vpop.f32.mrf.mxu1  ;;  %11453 = vmatmul.mubr.bf16.vlgmr.msra.gmra.mxu1 %v18129_v34  ;;  %11884 = vmatpush1.bf16.msra.mxu0 %v17223_v19  ;;  %v17232_v34 = vld [vmem:[#allocation9 + $0x40] ss:$8 sps:$4 sm:$0xff]   ;;  %v17375_v19 = vld [vmem:[#allocation9 + $0x1e4] ss:$8 sps:$4 sm:$0xff]  }
 0x6d1   :  { %v18271_v62 = vadd.f32 %v11208_v43, %v11167_v10  ;;  %v18273_v20 = vpop.f32.mrf.mxu0  ;;  %11885 = vmatprep.subr.bf16.mxu0 %v17228_v60  ;;  %11925 = vmatpush1.bf16.msra.mxu1 %v17319_v17  ;;  %v17267_v60 = vld [vmem:[#allocation9 + $0x94] ss:$8 sps:$4 sm:$0xff]   ;;  %v17265_v10 = vld [vmem:[#allocation9 + $0x90] ss:$8 sps:$4 sm:$0xff]  }
 0x6d2   :  { %v18275_v55 = vpop.f32.mrf.mxu1  ;;  %11926 = vmatprep.subr.bf16.mxu1 %v17327_v25  ;;  %v17379_v43 = vld [vmem:[#allocation9 + $0x1d0] ss:$8 sps:$4 sm:$0xff]  }
 0x6d3   :  { %v11171_v31 = vpop.f32.mrf.mxu0 }
 0x6d4   :  { %v11212_v21 = vpop.f32.mrf.mxu1  ;;  %11886 = vmatpush1.bf16.msra.mxu0 %v17226_v41  ;;  %v17381_v41 = vld [vmem:[#allocation9 + $0x1d4] ss:$8 sps:$4 sm:$0xff]   ;;  %v17268_v31 = vld [vmem:[#allocation9 + $0x80] ss:$8 sps:$4 sm:$0xff]  }
 0x6d5   :  { %v11172_v9 = vpop.f32.mrf.mxu0  ;;  %11887 = vmatprep.subr.bf16.mxu0 %v17231_v0  ;;  %11927 = vmatpush1.bf16.msra.mxu1 %v17325_v24  ;;  %v17270_v0 = vld [vmem:[#allocation9 + $0x84] ss:$8 sps:$4 sm:$0xff]   ;;  %v17385_v21 = vld [vmem:[#allocation9 + $0x1c0] ss:$8 sps:$4 sm:$0xff]  }
 0x6d6   :  { %v11213_v56 = vpop.f32.mrf.mxu1  ;;  %11928 = vmatprep.subr.bf16.mxu1 %v17333_v29  ;;  %v17273_v9 = vld [vmem:[#allocation9 + $0x274] ss:$8 sps:$4 sm:$0xff]   ;;  %v17397_v29 = vld [vmem:[#allocation9 + $0x1a0] ss:$8 sps:$4 sm:$0xff]  }
 0x6d7   :  { %v17393_v56 = vld [vmem:[#allocation9 + $0x1b4] ss:$8 sps:$4 sm:$0xff]  }
 0x6d8   :  { %11888 = vmatpush1.bf16.msra.mxu0 %v17229_v49  ;;  %v17387_v49 = vld [vmem:[#allocation9 + $0x1c4] ss:$8 sps:$4 sm:$0xff]  }
 0x6d9   :  { %11889 = vmatprep.subr.bf16.mxu0 %v17234_v32  ;;  %11929 = vmatpush1.bf16.msra.mxu1 %v17331_v28  ;;  %v17391_v32 = vld [vmem:[#allocation9 + $0x1b0] ss:$8 sps:$4 sm:$0xff]  }
 0x6da   :  { %11930 = vmatprep.subr.bf16.mxu1 %v17339_v42 }
 0x6dc   :  { %11890 = vmatpush1.bf16.msra.mxu0 %v17232_v34 }
 0x6dd   :  { %11891 = vmatprep.subr.bf16.mxu0 %v17237_v11  ;;  %11931 = vmatpush1.bf16.msra.mxu1 %v17337_v39  ;;  %v18277_v11 = vld [vmem:[#allocation7] sm:$0xf] }
 0x6de   :  { %11932 = vmatprep.subr.bf16.mxu1 %v17345_v35  ;;  %v11470_v24 = vrot.slane %v18277_v11, %v18078_v14  ;;  %v11474_v39 = vrot.slane %v18277_v11, %v18082_v13 }
 0x6e0   :  { %11892 = vmatpush1.bf16.msra.mxu0 %v17235_v16  ;;  %v11211_v16 = vadd.f32 %v18275_v55, %v18273_v20 }
 0x6e1   :  { %11893 = vmatprep.subr.bf16.mxu0 %v17240_v36  ;;  %11933 = vmatpush1.bf16.msra.mxu1 %v17343_v46  ;;  %v17403_v46 = vld [vmem:[#allocation9 + $0x190] ss:$8 sps:$4 sm:$0xff]  }
 0x6e2   :  { %11934 = vmatprep.subr.bf16.mxu1 %v17351_v61 }
 0x6e4   :  { %11894 = vmatpush1.bf16.msra.mxu0 %v17238_v23 }
 0x6e5   :  { %11895 = vmatprep.subr.bf16.mxu0 %v17243_v22  ;;  %11935 = vmatpush1.bf16.msra.mxu1 %v17349_v47  ;;  %v17409_v47 = vld [vmem:[#allocation9 + $0x180] ss:$8 sps:$4 sm:$0xff]  }
 0x6e6   :  { %11936 = vmatprep.subr.bf16.mxu1 %v17357_v3  ;;  %v17274_v3 = vld [vmem:[#allocation9 + $0x260] ss:$8 sps:$4 sm:$0xff]  }
 0x6e8   :  { %11896 = vmatpush1.bf16.msra.mxu0 %v17241_v27  ;;  %v17399_v27 = vld [vmem:[#allocation9 + $0x1a4] ss:$8 sps:$4 sm:$0xff]  }
 0x6e9   :  { %11897 = vmatprep.subr.bf16.mxu0 %v17246_v2  ;;  %11937 = vmatpush1.bf16.msra.mxu1 %v17355_v52  ;;  %v17276_v52 = vld [vmem:[#allocation9 + $0x264] ss:$8 sps:$4 sm:$0xff]  }
 0x6ea   :  { %11938 = vmatprep.subr.bf16.mxu1 %v17363_v6  ;;  %v17280_v6 = vld [vmem:[#allocation9 + $0x240] ss:$8 sps:$4 sm:$0xff]  }
 0x6ec   :  { %11898 = vmatpush1.bf16.msra.mxu0 %v17244_v7 }
 0x6ed   :  { %11899 = vmatprep.subr.bf16.mxu0 %v17249_v40  ;;  %11939 = vmatpush1.bf16.msra.mxu1 %v17361_v48  ;;  %v17282_v48 = vld [vmem:[#allocation9 + $0x244] ss:$8 sps:$4 sm:$0xff]  }
 0x6ee   :  { %11940 = vmatprep.subr.bf16.mxu1 %v17369_v53  ;;  %v17286_v53 = vld [vmem:[#allocation9 + $0x220] ss:$8 sps:$4 sm:$0xff]  }
 0x6f0   :  { %11900 = vmatpush2.bf16.msra.mxu0 %v17247_v45  ;;  %v17405_v45 = vld [vmem:[#allocation9 + $0x194] ss:$8 sps:$4 sm:$0xff]  }
 0x6f1   :  { %11901 = vmatprep.subr.bf16.mxu0 %v17252_v38  ;;  %11941 = vmatpush2.bf16.msra.mxu1 %v17367_v8  ;;  %v17288_v8 = vld [vmem:[#allocation9 + $0x224] ss:$8 sps:$4 sm:$0xff]  }
 0x6f2   :  { %11942 = vmatprep.subr.bf16.mxu1 %v17375_v19  ;;  %v17292_v19 = vld [vmem:[#allocation9 + $0x200] ss:$8 sps:$4 sm:$0xff]  }
 0x6f4   :  { %11902 = vmatpush2.bf16.msra.mxu0 %v17250_v26 }
 0x6f5   :  { %11903 = vmatprep.subr.bf16.mxu0 %v17255_v4  ;;  %11943 = vmatpush2.bf16.msra.mxu1 %v17373_v58  ;;  %v17271_v4 = vld [vmem:[#allocation9 + $0x270] ss:$8 sps:$4 sm:$0xff]   ;;  %v17294_v58 = vld [vmem:[#allocation9 + $0x204] ss:$8 sps:$4 sm:$0xff]  }
 0x6f6   :  { %11944 = vmatprep.subr.bf16.mxu1 %v17381_v41  ;;  %v17298_v41 = vld [vmem:[#allocation9 + $0x2e0] ss:$8 sps:$4 sm:$0xff]  }
 0x6f8   :  { %11904 = vmatpush2.bf16.msra.mxu0 %v17253_v51 }
 0x6f9   :  { %11905 = vmatprep.subr.bf16.mxu0 %v17258_v44  ;;  %11945 = vmatpush2.bf16.msra.mxu1 %v17379_v43  ;;  %v17279_v44 = vld [vmem:[#allocation9 + $0x254] ss:$8 sps:$4 sm:$0xff]   ;;  %v17300_v43 = vld [vmem:[#allocation9 + $0x2e4] ss:$8 sps:$4 sm:$0xff]  }
 0x6fa   :  { %11946 = vmatprep.subr.bf16.mxu1 %v17387_v49  ;;  %v17304_v49 = vld [vmem:[#allocation9 + $0x2c0] ss:$8 sps:$4 sm:$0xff]  }
 0x6fc   :  { %11906 = vmatpush2.bf16.msra.mxu0 %v17256_v12  ;;  %v17277_v12 = vld [vmem:[#allocation9 + $0x250] ss:$8 sps:$4 sm:$0xff]  }
 0x6fd   :  { %11907 = vmatprep.subr.bf16.mxu0 %v17261_v5  ;;  %11947 = vmatpush2.bf16.msra.mxu1 %v17385_v21  ;;  %v17285_v5 = vld [vmem:[#allocation9 + $0x234] ss:$8 sps:$4 sm:$0xff]   ;;  %v17306_v21 = vld [vmem:[#allocation9 + $0x2c4] ss:$8 sps:$4 sm:$0xff]  }
 0x6fe   :  { %11948 = vmatprep.subr.bf16.mxu1 %v17393_v56  ;;  %v17312_v56 = vld [vmem:[#allocation9 + $0x2a4] ss:$8 sps:$4 sm:$0xff]  }
 0x700   :  { %11908 = vmatpush2.bf16.msra.mxu0 %v17259_v57  ;;  %v17283_v57 = vld [vmem:[#allocation9 + $0x230] ss:$8 sps:$4 sm:$0xff]  }
 0x701   :  { %11909 = vmatprep.subr.bf16.mxu0 %v17264_v54  ;;  %11949 = vmatpush2.bf16.msra.mxu1 %v17391_v32  ;;  %v17291_v54 = vld [vmem:[#allocation9 + $0x214] ss:$8 sps:$4 sm:$0xff]   ;;  %v17307_v32 = vld [vmem:[#allocation9 + $0x2b0] ss:$8 sps:$4 sm:$0xff]  }
 0x702   :  { %11950 = vmatprep.subr.bf16.mxu1 %v17399_v27  ;;  %v17313_v27 = vld [vmem:[#allocation9 + $0x290] ss:$8 sps:$4 sm:$0xff]  }
 0x704   :  { %11910 = vmatpush2.bf16.msra.mxu0 %v17262_v33  ;;  %v17289_v33 = vld [vmem:[#allocation9 + $0x210] ss:$8 sps:$4 sm:$0xff]  }
 0x705   :  { %11911 = vmatprep.subr.bf16.mxu0 %v17267_v60  ;;  %11951 = vmatpush2.bf16.msra.mxu1 %v17397_v29  ;;  %v17297_v60 = vld [vmem:[#allocation9 + $0x2f4] ss:$8 sps:$4 sm:$0xff]   ;;  %v17318_v29 = vld [vmem:[#allocation9 + $0x284] ss:$8 sps:$4 sm:$0xff]  }
 0x706   :  { %11952 = vmatprep.subr.bf16.mxu1 %v17405_v45  ;;  %v17342_v45 = vld [vmem:[#allocation9 + $0x444] ss:$8 sps:$4 sm:$0xff]  }
 0x708   :  { %11912 = vmatpush2.bf16.msra.mxu0 %v17265_v10  ;;  %v17295_v10 = vld [vmem:[#allocation9 + $0x2f0] ss:$8 sps:$4 sm:$0xff]  }
 0x709   :  { %11913 = vmatprep.subr.bf16.mxu0 %v17270_v0  ;;  %11953 = vmatpush2.bf16.msra.mxu1 %v17403_v46  ;;  %v17303_v0 = vld [vmem:[#allocation9 + $0x2d4] ss:$8 sps:$4 sm:$0xff]   ;;  %v17340_v46 = vld [vmem:[#allocation9 + $0x440] ss:$8 sps:$4 sm:$0xff]  }
 0x70c   :  { %11914 = vmatpush2.bf16.msra.mxu0 %v17268_v31  ;;  %v17301_v31 = vld [vmem:[#allocation9 + $0x2d0] ss:$8 sps:$4 sm:$0xff]  }
 0x70d   :  { %12350 = vmatprep.subr.bf16.mxu0 %v17273_v9  ;;  %v17309_v9 = vld [vmem:[#allocation9 + $0x2b4] ss:$8 sps:$4 sm:$0xff]  }
 0x70f   :  { %v11249_v34 = vpop.f32.mrf.mxu0 }
 0x710   :  { %v11250_v17 = vadd.f32 %v11249_v34, %v18271_v62  ;;  %v11290_v18 = vpop.f32.mrf.mxu1 }
 0x711   :  { %v11251_v36 = vpop.f32.mrf.mxu0 }
 0x712   :  { %v11291_v23 = vadd.f32 %v11290_v18, %v11250_v17  ;;  %v11252_v25 = vadd.f32 %v11251_v36, %v11211_v16  ;;  %v11292_v22 = vpop.f32.mrf.mxu1  ;;  %v17310_v17 = vld [vmem:[#allocation9 + $0x2a0] ss:$8 sps:$4 sm:$0xff]  }
 0x713   :  { %v11253_v28 = vpop.f32.mrf.mxu0 }
 0x714   :  { %v11461_v2 = vmax.f32 %v18238_v37, %v11291_v23  ;;  %v11293_v7 = vadd.f32 %v11292_v22, %v11252_v25  ;;  %v11294_v20 = vpop.f32.mrf.mxu1  ;;  %v17411_v37 = vld [vmem:[#allocation9 + $0x184] ss:$8 sps:$4 sm:$0xff]   ;;  %v17315_v23 = vld [vmem:[#allocation9 + $0x294] ss:$8 sps:$4 sm:$0xff]  }
 0x715   :  { %v11254_v62 = vpop.f32.mrf.mxu0  ;;  %11954 = vmatprep.subr.bf16.mxu1 %v17411_v37  ;;  %v17322_v20 = vld [vmem:[#allocation9 + $0x470] ss:$8 sps:$4 sm:$0xff]   ;;  %v17352_v37 = vld [vmem:[#allocation9 + $0x420] ss:$8 sps:$4 sm:$0xff]  }
 0x716   :  { %v11487_v55 = vadd.f32 %v11470_v24, %v11461_v2  ;;  %v11462_v42 = vmax.f32 %v18243_v30, %v11293_v7  ;;  %v11295_v40 = vpop.f32.mrf.mxu1  ;;  %11955 = vmatpush2.bf16.msra.mxu1 %v17409_v47  ;;  %v17417_v30 = vld [vmem:[#allocation9 + $0x374] ss:$8 sps:$4 sm:$0xff]   ;;  %v17316_v7 = vld [vmem:[#allocation9 + $0x280] ss:$8 sps:$4 sm:$0xff]   ;;  %v17330_v62 = vld [vmem:[#allocation9 + $0x464] ss:$8 sps:$4 sm:$0xff]  }
 0x717   :  { %12391 = vmatprep.subr.bf16.mxu1 %v17417_v30  ;;  %v17334_v40 = vld [vmem:[#allocation9 + $0x450] ss:$8 sps:$4 sm:$0xff]   ;;  %v17360_v47 = vld [vmem:[#allocation9 + $0x414] ss:$8 sps:$4 sm:$0xff]   ;;  %v17364_v30 = vld [vmem:[#allocation9 + $0x400] ss:$8 sps:$4 sm:$0xff]  }
 0x718   :  { %v11488_v35 = vadd.f32 %v11474_v39, %v11462_v42  ;;  %v11491_v38 = vmax.f32 %v11487_v55, 0.0  ;;  %v17324_v39 = vld [vmem:[#allocation9 + $0x474] ss:$8 sps:$4 sm:$0xff]   ;;  %v17328_v55 = vld [vmem:[#allocation9 + $0x460] ss:$8 sps:$4 sm:$0xff]  }
 0x719   :  { %v17336_v42 = vld [vmem:[#allocation9 + $0x454] ss:$8 sps:$4 sm:$0xff]  }
 0x71a   :  { %v11492_v26 = vmax.f32 %v11488_v35, 0.0  ;;  %v18290_v51 = vpack.c.bf16 %v11491_v38, %v11491_v38  ;;  %v17348_v35 = vld [vmem:[#allocation9 + $0x434] ss:$8 sps:$4 sm:$0xff]   ;;  %v17346_v38 = vld [vmem:[#allocation9 + $0x430] ss:$8 sps:$4 sm:$0xff]  }
 0x71c   :  { %v18288_v61 = vpack.c.bf16 %v11492_v26, %v11492_v26  ;;  %v17354_v26 = vld [vmem:[#allocation9 + $0x424] ss:$8 sps:$4 sm:$0xff]  }
 0x71e   :  { %11915 = vmatprep.mubr.bf16.mxu0 %v18288_v61 }
 0x71f   :  { %11916 = vmatmul.mubr.bf16.vlgmr.msra.gmra.mxu0 %v18290_v51 }
 0x720   :  { %12351 = vmatpush1.bf16.msra.mxu0 %v17271_v4  ;;  %12382 = vmatprep.mubr.bf16.mxu0 %v18288_v61  ;;  %v17358_v4 = vld [vmem:[#allocation9 + $0x410] ss:$8 sps:$4 sm:$0xff]  }
 0x721   :  { %12352 = vmatprep.subr.bf16.mxu0 %v17276_v52  ;;  %v17366_v52 = vld [vmem:[#allocation9 + $0x404] ss:$8 sps:$4 sm:$0xff]  }
 0x724   :  { %12353 = vmatpush1.bf16.msra.mxu0 %v17274_v3  ;;  %v17372_v3 = vld [vmem:[#allocation9 + $0x4f4] ss:$8 sps:$4 sm:$0xff]  }
 0x725   :  { %12354 = vmatprep.subr.bf16.mxu0 %v17279_v44  ;;  %v17370_v44 = vld [vmem:[#allocation9 + $0x4f0] ss:$8 sps:$4 sm:$0xff]  }
 0x728   :  { %12355 = vmatpush1.bf16.msra.mxu0 %v17277_v12  ;;  %v17378_v12 = vld [vmem:[#allocation9 + $0x4e4] ss:$8 sps:$4 sm:$0xff]  }
 0x729   :  { %12356 = vmatprep.subr.bf16.mxu0 %v17282_v48  ;;  %v17376_v48 = vld [vmem:[#allocation9 + $0x4e0] ss:$8 sps:$4 sm:$0xff]  }
 0x72c   :  { %12357 = vmatpush1.bf16.msra.mxu0 %v17280_v6  ;;  %v17384_v6 = vld [vmem:[#allocation9 + $0x4d4] ss:$8 sps:$4 sm:$0xff]  }
 0x72d   :  { %12358 = vmatprep.subr.bf16.mxu0 %v17285_v5  ;;  %v17382_v5 = vld [vmem:[#allocation9 + $0x4d0] ss:$8 sps:$4 sm:$0xff]  }
 0x730   :  { %12359 = vmatpush1.bf16.msra.mxu0 %v17283_v57  ;;  %v17390_v57 = vld [vmem:[#allocation9 + $0x4c4] ss:$8 sps:$4 sm:$0xff]  }
 0x731   :  { %12360 = vmatprep.subr.bf16.mxu0 %v17288_v8  ;;  %v17388_v8 = vld [vmem:[#allocation9 + $0x4c0] ss:$8 sps:$4 sm:$0xff]  }
 0x734   :  { %12361 = vmatpush1.bf16.msra.mxu0 %v17286_v53  ;;  %v17396_v53 = vld [vmem:[#allocation9 + $0x4b4] ss:$8 sps:$4 sm:$0xff]  }
 0x735   :  { %12362 = vmatprep.subr.bf16.mxu0 %v17291_v54  ;;  %v17394_v54 = vld [vmem:[#allocation9 + $0x4b0] ss:$8 sps:$4 sm:$0xff]  }
 0x738   :  { %12363 = vmatpush1.bf16.msra.mxu0 %v17289_v33  ;;  %v17402_v33 = vld [vmem:[#allocation9 + $0x4a4] ss:$8 sps:$4 sm:$0xff]  }
 0x739   :  { %12364 = vmatprep.subr.bf16.mxu0 %v17294_v58 }
 0x73c   :  { %12365 = vmatpush1.bf16.msra.mxu0 %v17292_v19 }
 0x73d   :  { %12366 = vmatprep.subr.bf16.mxu0 %v17297_v60 }
 0x740   :  { %12367 = vmatpush2.bf16.msra.mxu0 %v17295_v10 }
 0x741   :  { %12368 = vmatprep.subr.bf16.mxu0 %v17300_v43  ;;  %v17400_v43 = vld [vmem:[#allocation9 + $0x4a0] ss:$8 sps:$4 sm:$0xff]  }
 0x744   :  { %12369 = vmatpush2.bf16.msra.mxu0 %v17298_v41 }
 0x745   :  { %12370 = vmatprep.subr.bf16.mxu0 %v17303_v0  ;;  %v17408_v0 = vld [vmem:[#allocation9 + $0x494] ss:$8 sps:$4 sm:$0xff]  }
 0x748   :  { %12371 = vmatpush2.bf16.msra.mxu0 %v17301_v31 }
 0x749   :  { %12372 = vmatprep.subr.bf16.mxu0 %v17306_v21  ;;  %v11478_v21 = vrot.slane %v18277_v11, %v3940_v1 }
 0x74c   :  { %12373 = vmatpush2.bf16.msra.mxu0 %v17304_v49 }
 0x74d   :  { %12374 = vmatprep.subr.bf16.mxu0 %v17309_v9 }
 0x74f   :  { %v11331_v34 = vpop.f32.mrf.mxu0 }
 0x750   :  { %v11372_v16 = vpop.f32.mrf.mxu1  ;;  %12375 = vmatpush2.bf16.msra.mxu0 %v17307_v32 }
 0x751   :  { %v18295_v18 = vadd.f32 %v11372_v16, %v11331_v34  ;;  %v18297_v36 = vpop.f32.mrf.mxu0  ;;  %12376 = vmatprep.subr.bf16.mxu0 %v17312_v56  ;;  %v11482_v16 = vrot.slane %v18277_v11, %v3944_v15  ;;  %v17415_v15 = vld [vmem:[#allocation9 + $0x370] ss:$8 sps:$4 sm:$0xff]  }
 0x752   :  { %v18299_v24 = vpop.f32.mrf.mxu1  ;;  %v17418_v11 = vld [vmem:[#allocation9 + $0x670] ss:$8 sps:$4 sm:$0xff]  }
 0x753   :  { %v11335_v25 = vpop.f32.mrf.mxu0  ;;  %v11375_v19 = vadd.f32 %v18299_v24, %v18297_v36 }
 0x754   :  { %v11376_v22 = vpop.f32.mrf.mxu1  ;;  %12377 = vmatpush2.bf16.msra.mxu0 %v17310_v17 }
 0x755   :  { %v11336_v28 = vpop.f32.mrf.mxu0  ;;  %12378 = vmatprep.subr.bf16.mxu0 %v17315_v23  ;;  %v17414_v23 = vld [vmem:[#allocation9 + $0x484] ss:$8 sps:$4 sm:$0xff]  }
 0x756   :  { %v11377_v2 = vpop.f32.mrf.mxu1 }
 0x758   :  { %12379 = vmatpush2.bf16.msra.mxu0 %v17313_v27  ;;  %v17412_v27 = vld [vmem:[#allocation9 + $0x480] ss:$8 sps:$4 sm:$0xff]  }
 0x759   :  { %12380 = vmatprep.subr.bf16.mxu0 %v17318_v29 }
 0x75c   :  { %12381 = vmatpush2.bf16.msra.mxu0 %v17316_v7  ;;  %v17423_v7 = vld [vmem:[#allocation9 + $0x364] ss:$8 sps:$4 sm:$0xff]  }
 0x75d   :  { %12819 = vmatprep.subr.bf16.mxu0 %v17324_v39  ;;  %v17421_v39 = vld [vmem:[#allocation9 + $0x360] ss:$8 sps:$4 sm:$0xff]  }
 0x75f   :  { %12383 = vmatmul.mubr.bf16.vlgmr.msra.gmra.mxu0 %v18290_v51 }
 0x760   :  { %12820 = vmatpush1.bf16.msra.mxu0 %v17322_v20  ;;  %12851 = vmatprep.mubr.bf16.mxu0 %v18288_v61  ;;  %v17424_v20 = vld [vmem:[#allocation9 + $0x660] ss:$8 sps:$4 sm:$0xff]  }
 0x761   :  { %12821 = vmatprep.subr.bf16.mxu0 %v17330_v62  ;;  %v17429_v62 = vld [vmem:[#allocation9 + $0x354] ss:$8 sps:$4 sm:$0xff]  }
 0x764   :  { %12822 = vmatpush1.bf16.msra.mxu0 %v17328_v55  ;;  %v17432_v55 = vld [vmem:[#allocation9 + $0x654] ss:$8 sps:$4 sm:$0xff]  }
 0x765   :  { %12823 = vmatprep.subr.bf16.mxu0 %v17336_v42  ;;  %v17427_v42 = vld [vmem:[#allocation9 + $0x350] ss:$8 sps:$4 sm:$0xff]  }
 0x768   :  { %12824 = vmatpush1.bf16.msra.mxu0 %v17334_v40  ;;  %v17430_v40 = vld [vmem:[#allocation9 + $0x650] ss:$8 sps:$4 sm:$0xff]  }
 0x769   :  { %12825 = vmatprep.subr.bf16.mxu0 %v17342_v45  ;;  %v17435_v45 = vld [vmem:[#allocation9 + $0x344] ss:$8 sps:$4 sm:$0xff]  }
 0x76c   :  { %12826 = vmatpush1.bf16.msra.mxu0 %v17340_v46  ;;  %v17438_v46 = vld [vmem:[#allocation9 + $0x644] ss:$8 sps:$4 sm:$0xff]  }
 0x76d   :  { %12827 = vmatprep.subr.bf16.mxu0 %v17348_v35  ;;  %v17433_v35 = vld [vmem:[#allocation9 + $0x340] ss:$8 sps:$4 sm:$0xff]  }
 0x770   :  { %12828 = vmatpush1.bf16.msra.mxu0 %v17346_v38  ;;  %v17436_v38 = vld [vmem:[#allocation9 + $0x640] ss:$8 sps:$4 sm:$0xff]  }
 0x771   :  { %12829 = vmatprep.subr.bf16.mxu0 %v17354_v26  ;;  %v17444_v26 = vld [vmem:[#allocation9 + $0x634] ss:$8 sps:$4 sm:$0xff]  }
 0x774   :  { %12830 = vmatpush1.bf16.msra.mxu0 %v17352_v37  ;;  %v17439_v37 = vld [vmem:[#allocation9 + $0x330] ss:$8 sps:$4 sm:$0xff]  }
 0x775   :  { %12831 = vmatprep.subr.bf16.mxu0 %v17360_v47  ;;  %v17442_v47 = vld [vmem:[#allocation9 + $0x630] ss:$8 sps:$4 sm:$0xff]  }
 0x778   :  { %12832 = vmatpush1.bf16.msra.mxu0 %v17358_v4  ;;  %v17447_v4 = vld [vmem:[#allocation9 + $0x324] ss:$8 sps:$4 sm:$0xff]  }
 0x779   :  { %12833 = vmatprep.subr.bf16.mxu0 %v17366_v52  ;;  %v17450_v52 = vld [vmem:[#allocation9 + $0x624] ss:$8 sps:$4 sm:$0xff]  }
 0x77c   :  { %12834 = vmatpush1.bf16.msra.mxu0 %v17364_v30  ;;  %v17445_v30 = vld [vmem:[#allocation9 + $0x320] ss:$8 sps:$4 sm:$0xff]  }
 0x77d   :  { %12835 = vmatprep.subr.bf16.mxu0 %v17372_v3  ;;  %v17448_v3 = vld [vmem:[#allocation9 + $0x620] ss:$8 sps:$4 sm:$0xff]  }
 0x780   :  { %12836 = vmatpush2.bf16.msra.mxu0 %v17370_v44  ;;  %v17453_v44 = vld [vmem:[#allocation9 + $0x314] ss:$8 sps:$4 sm:$0xff]  }
 0x781   :  { %12837 = vmatprep.subr.bf16.mxu0 %v17378_v12  ;;  %v17456_v12 = vld [vmem:[#allocation9 + $0x614] ss:$8 sps:$4 sm:$0xff]  }
 0x784   :  { %12838 = vmatpush2.bf16.msra.mxu0 %v17376_v48  ;;  %v17451_v48 = vld [vmem:[#allocation9 + $0x310] ss:$8 sps:$4 sm:$0xff]  }
 0x785   :  { %12839 = vmatprep.subr.bf16.mxu0 %v17384_v6  ;;  %v17454_v6 = vld [vmem:[#allocation9 + $0x610] ss:$8 sps:$4 sm:$0xff]  }
 0x788   :  { %12840 = vmatpush2.bf16.msra.mxu0 %v17382_v5  ;;  %v17459_v5 = vld [vmem:[#allocation9 + $0x304] ss:$8 sps:$4 sm:$0xff]  }
 0x789   :  { %12841 = vmatprep.subr.bf16.mxu0 %v17390_v57  ;;  %v17462_v57 = vld [vmem:[#allocation9 + $0x604] ss:$8 sps:$4 sm:$0xff]  }
 0x78c   :  { %12842 = vmatpush2.bf16.msra.mxu0 %v17388_v8  ;;  %v17457_v8 = vld [vmem:[#allocation9 + $0x300] ss:$8 sps:$4 sm:$0xff]  }
 0x78d   :  { %12843 = vmatprep.subr.bf16.mxu0 %v17396_v53  ;;  %v17460_v53 = vld [vmem:[#allocation9 + $0x600] ss:$8 sps:$4 sm:$0xff]  }
 0x78f   :  { %v11413_v58 = vpop.f32.mrf.mxu0 }
 0x790   :  { %v11414_v60 = vadd.f32 %v11413_v58, %v18295_v18  ;;  %v11454_v10 = vpop.f32.mrf.mxu1  ;;  %12844 = vmatpush2.bf16.msra.mxu0 %v17394_v54  ;;  %v17406_v18 = vld [vmem:[#allocation9 + $0x490] ss:$8 sps:$4 sm:$0xff]   ;;  %v17465_v54 = vld [vmem:[#allocation9 + $0x3f4] ss:$8 sps:$4 sm:$0xff]  }
 0x791   :  { %v11415_v41 = vpop.f32.mrf.mxu0  ;;  %12845 = vmatprep.subr.bf16.mxu0 %v17402_v33  ;;  %v17468_v33 = vld [vmem:[#allocation9 + $0x6f4] ss:$8 sps:$4 sm:$0xff]   ;;  %v17463_v58 = vld [vmem:[#allocation9 + $0x3f0] ss:$8 sps:$4 sm:$0xff]  }
 0x792   :  { %v11455_v31 = vadd.f32 %v11454_v10, %v11414_v60  ;;  %v11416_v49 = vadd.f32 %v11415_v41, %v11375_v19  ;;  %v11456_v9 = vpop.f32.mrf.mxu1  ;;  %v17466_v19 = vld [vmem:[#allocation9 + $0x6f0] ss:$8 sps:$4 sm:$0xff]   ;;  %v17471_v60 = vld [vmem:[#allocation9 + $0x3e4] ss:$8 sps:$4 sm:$0xff]   ;;  %v17472_v41 = vld [vmem:[#allocation9 + $0x6e0] ss:$8 sps:$4 sm:$0xff]  }
 0x793   :  { %v11417_v32 = vpop.f32.mrf.mxu0  ;;  %v17474_v10 = vld [vmem:[#allocation9 + $0x6e4] ss:$8 sps:$4 sm:$0xff]  }
 0x794   :  { %v11463_v56 = vmax.f32 %v18262_v50, %v11455_v31  ;;  %v11457_v34 = vadd.f32 %v11456_v9, %v11416_v49  ;;  %v11458_v17 = vpop.f32.mrf.mxu1  ;;  %12846 = vmatpush2.bf16.msra.mxu0 %v17400_v43  ;;  %v17420_v50 = vld [vmem:[#allocation9 + $0x674] ss:$8 sps:$4 sm:$0xff]   ;;  %v17469_v43 = vld [vmem:[#allocation9 + $0x3e0] ss:$8 sps:$4 sm:$0xff]   ;;  %v17478_v49 = vld [vmem:[#allocation9 + $0x6d0] ss:$8 sps:$4 sm:$0xff]  }
 0x795   :  { %v11418_v36 = vpop.f32.mrf.mxu0  ;;  %12847 = vmatprep.subr.bf16.mxu0 %v17408_v0  ;;  %v17477_v0 = vld [vmem:[#allocation9 + $0x3d4] ss:$8 sps:$4 sm:$0xff]   ;;  %v17483_v9 = vld [vmem:[#allocation9 + $0x3c4] ss:$8 sps:$4 sm:$0xff]  }
 0x796   :  { %v11489_v24 = vadd.f32 %v11478_v21, %v11463_v56  ;;  %v11464_v25 = vmax.f32 %v18267_v63, %v11457_v34  ;;  %v11459_v1 = vpop.f32.mrf.mxu1  ;;  %v17426_v63 = vld [vmem:[#allocation9 + $0x664] ss:$8 sps:$4 sm:$0xff]   ;;  %v17480_v31 = vld [vmem:[#allocation9 + $0x6d4] ss:$8 sps:$4 sm:$0xff]   ;;  %v17475_v21 = vld [vmem:[#allocation9 + $0x3d0] ss:$8 sps:$4 sm:$0xff]  }
 0x797   :  { %v17486_v32 = vld [vmem:[#allocation9 + $0x6c4] ss:$8 sps:$4 sm:$0xff]   ;;  %v17481_v56 = vld [vmem:[#allocation9 + $0x3c0] ss:$8 sps:$4 sm:$0xff]   ;;  %v17492_v17 = vld [vmem:[#allocation9 + $0x6b4] ss:$8 sps:$4 sm:$0xff]  }
 0x798   :  { %v11490_v22 = vadd.f32 %v11482_v16, %v11464_v25  ;;  %12848 = vmatpush2.bf16.msra.mxu0 %v17406_v18  ;;  %v11493_v28 = vmax.f32 %v11489_v24, 0.0  ;;  %v17484_v34 = vld [vmem:[#allocation9 + $0x6c0] ss:$8 sps:$4 sm:$0xff]   ;;  %v17489_v16 = vld [vmem:[#allocation9 + $0x3b4] ss:$8 sps:$4 sm:$0xff]  }
 0x799   :  { %12849 = vmatprep.subr.bf16.mxu0 %v17414_v23  ;;  %v17487_v18 = vld [vmem:[#allocation9 + $0x3b0] ss:$8 sps:$4 sm:$0xff]   ;;  %v17495_v23 = vld [vmem:[#allocation9 + $0x3a4] ss:$8 sps:$4 sm:$0xff]   ;;  %v17493_v25 = vld [vmem:[#allocation9 + $0x3a0] ss:$8 sps:$4 sm:$0xff]  }
 0x79a   :  { %v11494_v29 = vmax.f32 %v11490_v22, 0.0  ;;  %v18316_v2 = vpack.c.bf16 %v11493_v28, %v11493_v28  ;;  %v17490_v36 = vld [vmem:[#allocation9 + $0x6b0] ss:$8 sps:$4 sm:$0xff]   ;;  %v17498_v24 = vld [vmem:[#allocation9 + $0x6a4] ss:$8 sps:$4 sm:$0xff]  }
 0x79b   :  { %v17496_v1 = vld [vmem:[#allocation9 + $0x6a0] ss:$8 sps:$4 sm:$0xff]   ;;  %v17501_v22 = vld [vmem:[#allocation9 + $0x394] ss:$8 sps:$4 sm:$0xff]   ;;  %v17499_v28 = vld [vmem:[#allocation9 + $0x390] ss:$8 sps:$4 sm:$0xff]  }
 0x79c   :  { %v18314_v59 = vpack.c.bf16 %v11494_v29, %v11494_v29  ;;  %12850 = vmatpush2.bf16.msra.mxu0 %v17412_v27  ;;  %v17504_v27 = vld [vmem:[#allocation9 + $0x694] ss:$8 sps:$4 sm:$0xff]   ;;  %v17507_v29 = vld [vmem:[#allocation9 + $0x384] ss:$8 sps:$4 sm:$0xff]  }
 0x79d   :  { %13288 = vmatprep.subr.bf16.mxu0 %v17420_v50  ;;  %v17502_v50 = vld [vmem:[#allocation9 + $0x690] ss:$8 sps:$4 sm:$0xff]  }
 0x79e   :  { %11956 = vmatprep.mubr.bf16.mxu1 %v18314_v59 }
 0x79f   :  { %12852 = vmatmul.mubr.bf16.vlgmr.msra.gmra.mxu0 %v18290_v51  ;;  %11957 = vmatmul.mubr.bf16.vlgmr.msra.gmra.mxu1 %v18316_v2 }
 0x7a0   :  { %12392 = vmatpush1.bf16.msra.mxu1 %v17415_v15  ;;  %13289 = vmatpush1.bf16.msra.mxu0 %v17418_v11  ;;  %v17510_v15 = vld [vmem:[#allocation9 + $0x684] ss:$8 sps:$4 sm:$0xff]   ;;  %v17505_v11 = vld [vmem:[#allocation9 + $0x380] ss:$8 sps:$4 sm:$0xff]  }
 0x7a1   :  { %13320 = vmatprep.mubr.bf16.mxu0 %v18288_v61  ;;  %12423 = vmatprep.mubr.bf16.mxu1 %v18314_v59  ;;  %v17441_v61 = vld [vmem:[#allocation9 + $0x334] ss:$8 sps:$4 sm:$0xff]  }
 0x7a2   :  { %12393 = vmatprep.subr.bf16.mxu1 %v17423_v7  ;;  %13290 = vmatprep.subr.bf16.mxu0 %v17426_v63  ;;  %v17508_v7 = vld [vmem:[#allocation9 + $0x680] ss:$8 sps:$4 sm:$0xff]   ;;  %v17513_v63 = vld [vmem:[#allocation9 + $0x574] ss:$8 sps:$4 sm:$0xff]  }
 0x7a4   :  { %12394 = vmatpush1.bf16.msra.mxu1 %v17421_v39  ;;  %13291 = vmatpush1.bf16.msra.mxu0 %v17424_v20  ;;  %v17511_v39 = vld [vmem:[#allocation9 + $0x570] ss:$8 sps:$4 sm:$0xff]   ;;  %v17516_v20 = vld [vmem:[#allocation9 + $0x564] ss:$8 sps:$4 sm:$0xff]  }
 0x7a5   :  { %12395 = vmatprep.subr.bf16.mxu1 %v17429_v62  ;;  %13292 = vmatprep.subr.bf16.mxu0 %v17432_v55  ;;  %v17514_v55 = vld [vmem:[#allocation9 + $0x560] ss:$8 sps:$4 sm:$0xff]  }
 0x7a8   :  { %12396 = vmatpush1.bf16.msra.mxu1 %v17427_v42  ;;  %13293 = vmatpush1.bf16.msra.mxu0 %v17430_v40  ;;  %v17519_v40 = vld [vmem:[#allocation9 + $0x554] ss:$8 sps:$4 sm:$0xff]  }
 0x7a9   :  { %12397 = vmatprep.subr.bf16.mxu1 %v17435_v45  ;;  %13294 = vmatprep.subr.bf16.mxu0 %v17438_v46  ;;  %v17517_v46 = vld [vmem:[#allocation9 + $0x550] ss:$8 sps:$4 sm:$0xff]  }
 0x7ac   :  { %12398 = vmatpush1.bf16.msra.mxu1 %v17433_v35  ;;  %13295 = vmatpush1.bf16.msra.mxu0 %v17436_v38  ;;  %v17522_v38 = vld [vmem:[#allocation9 + $0x544] ss:$8 sps:$4 sm:$0xff]  }
 0x7ad   :  { %12399 = vmatprep.subr.bf16.mxu1 %v17441_v61  ;;  %13296 = vmatprep.subr.bf16.mxu0 %v17444_v26  ;;  %v17520_v61 = vld [vmem:[#allocation9 + $0x540] ss:$8 sps:$4 sm:$0xff]   ;;  %v17523_v26 = vld [vmem:[#allocation9 + $0x530] ss:$8 sps:$4 sm:$0xff]  }
 0x7b0   :  { %12400 = vmatpush1.bf16.msra.mxu1 %v17439_v37  ;;  %13297 = vmatpush1.bf16.msra.mxu0 %v17442_v47  ;;  %v17528_v37 = vld [vmem:[#allocation9 + $0x524] ss:$8 sps:$4 sm:$0xff]   ;;  %v17526_v47 = vld [vmem:[#allocation9 + $0x520] ss:$8 sps:$4 sm:$0xff]  }
 0x7b1   :  { %12401 = vmatprep.subr.bf16.mxu1 %v17447_v4  ;;  %13298 = vmatprep.subr.bf16.mxu0 %v17450_v52  ;;  %v17531_v4 = vld [vmem:[#allocation9 + $0x514] ss:$8 sps:$4 sm:$0xff]   ;;  %v17529_v52 = vld [vmem:[#allocation9 + $0x510] ss:$8 sps:$4 sm:$0xff]  }
 0x7b4   :  { %12402 = vmatpush1.bf16.msra.mxu1 %v17445_v30  ;;  %13299 = vmatpush1.bf16.msra.mxu0 %v17448_v3  ;;  %v17534_v30 = vld [vmem:[#allocation9 + $0x504] ss:$8 sps:$4 sm:$0xff]   ;;  %v17532_v3 = vld [vmem:[#allocation9 + $0x500] ss:$8 sps:$4 sm:$0xff]  }
 0x7b5   :  { %12403 = vmatprep.subr.bf16.mxu1 %v17453_v44  ;;  %13300 = vmatprep.subr.bf16.mxu0 %v17456_v12  ;;  %v17537_v44 = vld [vmem:[#allocation9 + $0x5f4] ss:$8 sps:$4 sm:$0xff]   ;;  %v17535_v12 = vld [vmem:[#allocation9 + $0x5f0] ss:$8 sps:$4 sm:$0xff]  }
 0x7b8   :  { %12404 = vmatpush1.bf16.msra.mxu1 %v17451_v48  ;;  %13301 = vmatpush1.bf16.msra.mxu0 %v17454_v6  ;;  %v17540_v48 = vld [vmem:[#allocation9 + $0x5e4] ss:$8 sps:$4 sm:$0xff]   ;;  %v17538_v6 = vld [vmem:[#allocation9 + $0x5e0] ss:$8 sps:$4 sm:$0xff]  }
 0x7b9   :  { %12405 = vmatprep.subr.bf16.mxu1 %v17459_v5  ;;  %13302 = vmatprep.subr.bf16.mxu0 %v17462_v57  ;;  %v17543_v5 = vld [vmem:[#allocation9 + $0x5d4] ss:$8 sps:$4 sm:$0xff]   ;;  %v17541_v57 = vld [vmem:[#allocation9 + $0x5d0] ss:$8 sps:$4 sm:$0xff]  }
 0x7bc   :  { %12406 = vmatpush1.bf16.msra.mxu1 %v17457_v8  ;;  %13303 = vmatpush1.bf16.msra.mxu0 %v17460_v53  ;;  %v17546_v8 = vld [vmem:[#allocation9 + $0x5c4] ss:$8 sps:$4 sm:$0xff]   ;;  %v17544_v53 = vld [vmem:[#allocation9 + $0x5c0] ss:$8 sps:$4 sm:$0xff]  }
 0x7bd   :  { %12407 = vmatprep.subr.bf16.mxu1 %v17465_v54  ;;  %13304 = vmatprep.subr.bf16.mxu0 %v17468_v33  ;;  %v17549_v54 = vld [vmem:[#allocation9 + $0x5b4] ss:$8 sps:$4 sm:$0xff]   ;;  %v17547_v33 = vld [vmem:[#allocation9 + $0x5b0] ss:$8 sps:$4 sm:$0xff]  }
 0x7c0   :  { %12408 = vmatpush2.bf16.msra.mxu1 %v17463_v58  ;;  %13305 = vmatpush2.bf16.msra.mxu0 %v17466_v19  ;;  %v17552_v58 = vld [vmem:[#allocation9 + $0x5a4] ss:$8 sps:$4 sm:$0xff]   ;;  %v17550_v19 = vld [vmem:[#allocation9 + $0x5a0] ss:$8 sps:$4 sm:$0xff]  }
 0x7c1   :  { %12409 = vmatprep.subr.bf16.mxu1 %v17471_v60  ;;  %13306 = vmatprep.subr.bf16.mxu0 %v17474_v10  ;;  %v17555_v60 = vld [vmem:[#allocation9 + $0x594] ss:$8 sps:$4 sm:$0xff]   ;;  %v17553_v10 = vld [vmem:[#allocation9 + $0x590] ss:$8 sps:$4 sm:$0xff]  }
 0x7c4   :  { %12410 = vmatpush2.bf16.msra.mxu1 %v17469_v43  ;;  %13307 = vmatpush2.bf16.msra.mxu0 %v17472_v41  ;;  %v17558_v43 = vld [vmem:[#allocation9 + $0x584] ss:$8 sps:$4 sm:$0xff]   ;;  %v17556_v41 = vld [vmem:[#allocation9 + $0x580] ss:$8 sps:$4 sm:$0xff]  }
 0x7c5   :  { %12411 = vmatprep.subr.bf16.mxu1 %v17477_v0  ;;  %13308 = vmatprep.subr.bf16.mxu0 %v17480_v31  ;;  %v17561_v0 = vld [vmem:[#allocation9 + $0x774] ss:$8 sps:$4 sm:$0xff]   ;;  %v17559_v31 = vld [vmem:[#allocation9 + $0x770] ss:$8 sps:$4 sm:$0xff]  }
 0x7c8   :  { %12412 = vmatpush2.bf16.msra.mxu1 %v17475_v21  ;;  %13309 = vmatpush2.bf16.msra.mxu0 %v17478_v49  ;;  %v17564_v21 = vld [vmem:[#allocation9 + $0x764] ss:$8 sps:$4 sm:$0xff]  }
 0x7c9   :  { %12413 = vmatprep.subr.bf16.mxu1 %v17483_v9  ;;  %13310 = vmatprep.subr.bf16.mxu0 %v17486_v32  ;;  %v17562_v9 = vld [vmem:[#allocation9 + $0x760] ss:$8 sps:$4 sm:$0xff]  }
 0x7cc   :  { %12414 = vmatpush2.bf16.msra.mxu1 %v17481_v56  ;;  %13311 = vmatpush2.bf16.msra.mxu0 %v17484_v34  ;;  %v17567_v56 = vld [vmem:[#allocation9 + $0x754] ss:$8 sps:$4 sm:$0xff]  }
 0x7cd   :  { %12415 = vmatprep.subr.bf16.mxu1 %v17489_v16  ;;  %13312 = vmatprep.subr.bf16.mxu0 %v17492_v17  ;;  %v17565_v16 = vld [vmem:[#allocation9 + $0x750] ss:$8 sps:$4 sm:$0xff]  }
 0x7d0   :  { %12416 = vmatpush2.bf16.msra.mxu1 %v17487_v18  ;;  %13313 = vmatpush2.bf16.msra.mxu0 %v17490_v36  ;;  %v17570_v18 = vld [vmem:[#allocation9 + $0x744] ss:$8 sps:$4 sm:$0xff]   ;;  %v17568_v36 = vld [vmem:[#allocation9 + $0x740] ss:$8 sps:$4 sm:$0xff]  }
 0x7d1   :  { %12417 = vmatprep.subr.bf16.mxu1 %v17495_v23  ;;  %13314 = vmatprep.subr.bf16.mxu0 %v17498_v24  ;;  %v17573_v23 = vld [vmem:[#allocation9 + $0x734] ss:$8 sps:$4 sm:$0xff]   ;;  %v17571_v24 = vld [vmem:[#allocation9 + $0x730] ss:$8 sps:$4 sm:$0xff]  }
 0x7d4   :  { %12418 = vmatpush2.bf16.msra.mxu1 %v17493_v25  ;;  %13315 = vmatpush2.bf16.msra.mxu0 %v17496_v1  ;;  %v17576_v25 = vld [vmem:[#allocation9 + $0x724] ss:$8 sps:$4 sm:$0xff]   ;;  %v17579_v1 = vld [vmem:[#allocation9 + $0x714] ss:$8 sps:$4 sm:$0xff]  }
 0x7d5   :  { %12419 = vmatprep.subr.bf16.mxu1 %v17501_v22  ;;  %13316 = vmatprep.subr.bf16.mxu0 %v17504_v27  ;;  %v17577_v22 = vld [vmem:[#allocation9 + $0x710] ss:$8 sps:$4 sm:$0xff]   ;;  %v17582_v27 = vld [vmem:[#allocation9 + $0x704] ss:$8 sps:$4 sm:$0xff]  }
 0x7d8   :  { %12420 = vmatpush2.bf16.msra.mxu1 %v17499_v28  ;;  %13317 = vmatpush2.bf16.msra.mxu0 %v17502_v50  ;;  %v17580_v28 = vld [vmem:[#allocation9 + $0x700] ss:$8 sps:$4 sm:$0xff]   ;;  %v17585_v50 = vld [vmem:[#allocation9 + $0x7f4] ss:$8 sps:$4 sm:$0xff]  }
 0x7d9   :  { %12421 = vmatprep.subr.bf16.mxu1 %v17507_v29  ;;  %13318 = vmatprep.subr.bf16.mxu0 %v17510_v15  ;;  %v17583_v29 = vld [vmem:[#allocation9 + $0x7f0] ss:$8 sps:$4 sm:$0xff]   ;;  %v17588_v15 = vld [vmem:[#allocation9 + $0x7e4] ss:$8 sps:$4 sm:$0xff]  }
 0x7dc   :  { %12422 = vmatpush2.bf16.msra.mxu1 %v17505_v11  ;;  %13319 = vmatpush2.bf16.msra.mxu0 %v17508_v7  ;;  %v17586_v11 = vld [vmem:[#allocation9 + $0x7e0] ss:$8 sps:$4 sm:$0xff]   ;;  %v17591_v7 = vld [vmem:[#allocation9 + $0x7d4] ss:$8 sps:$4 sm:$0xff]  }
 0x7dd   :  { %12860 = vmatprep.subr.bf16.mxu1 %v17513_v63  ;;  %v17589_v63 = vld [vmem:[#allocation9 + $0x7d0] ss:$8 sps:$4 sm:$0xff]  }
 0x7df   :  { %12424 = vmatmul.mubr.bf16.vlgmr.msra.gmra.mxu1 %v18316_v2  ;;  %13321 = vmatmul.mubr.bf16.vlgmr.msra.gmra.mxu0 %v18290_v51  ;;  %v18325_v62 = vpop.f32.mrf.mxu0  ;;  %v17525_v51 = vld [vmem:[#allocation9 + $0x534] ss:$8 sps:$4 sm:$0xff]  }
 0x7e0   :  { %12861 = vmatpush1.bf16.msra.mxu1 %v17511_v39  ;;  %12892 = vmatprep.mubr.bf16.mxu1 %v18314_v59  ;;  %v17594_v39 = vld [vmem:[#allocation9 + $0x7c4] ss:$8 sps:$4 sm:$0xff]  }
 0x7e1   :  { %v18328_v42 = vpop.f32.mrf.mxu0  ;;  %12862 = vmatprep.subr.bf16.mxu1 %v17516_v20  ;;  %v17592_v20 = vld [vmem:[#allocation9 + $0x7c0] ss:$8 sps:$4 sm:$0xff]  }
 0x7e3   :  { %v11921_v45 = vpop.f32.mrf.mxu0 }
 0x7e4   :  { %12863 = vmatpush1.bf16.msra.mxu1 %v17514_v55  ;;  %v17597_v55 = vld [vmem:[#allocation9 + $0x7b4] ss:$8 sps:$4 sm:$0xff]   ;;  %v17600_v45 = vld [vmem:[#allocation9 + $0x7a4] ss:$8 sps:$4 sm:$0xff]  }
 0x7e5   :  { %v11922_v35 = vpop.f32.mrf.mxu0  ;;  %12864 = vmatprep.subr.bf16.mxu1 %v17519_v40  ;;  %v17595_v40 = vld [vmem:[#allocation9 + $0x7b0] ss:$8 sps:$4 sm:$0xff]  }
 0x7e6   :  { %v17603_v35 = vld [vmem:[#allocation9 + $0x794] ss:$8 sps:$4 sm:$0xff]  }
 0x7e8   :  { %12865 = vmatpush1.bf16.msra.mxu1 %v17517_v46  ;;  %v17598_v46 = vld [vmem:[#allocation9 + $0x7a0] ss:$8 sps:$4 sm:$0xff]  }
 0x7e9   :  { %12866 = vmatprep.subr.bf16.mxu1 %v17522_v38  ;;  %v17601_v38 = vld [vmem:[#allocation9 + $0x790] ss:$8 sps:$4 sm:$0xff]  }
 0x7ec   :  { %12867 = vmatpush1.bf16.msra.mxu1 %v17520_v61  ;;  %v17606_v61 = vld [vmem:[#allocation9 + $0x784] ss:$8 sps:$4 sm:$0xff]  }
 0x7ed   :  { %12868 = vmatprep.subr.bf16.mxu1 %v17525_v51  ;;  %v17604_v51 = vld [vmem:[#allocation9 + $0x780] ss:$8 sps:$4 sm:$0xff]  }
 0x7f0   :  { %12869 = vmatpush1.bf16.msra.mxu1 %v17523_v26 }
 0x7f1   :  { %12870 = vmatprep.subr.bf16.mxu1 %v17528_v37 }
 0x7f4   :  { %12871 = vmatpush1.bf16.msra.mxu1 %v17526_v47 }
 0x7f5   :  { %12872 = vmatprep.subr.bf16.mxu1 %v17531_v4 }
 0x7f8   :  { %12873 = vmatpush1.bf16.msra.mxu1 %v17529_v52 }
 0x7f9   :  { %12874 = vmatprep.subr.bf16.mxu1 %v17534_v30 }
 0x7fc   :  { %12875 = vmatpush1.bf16.msra.mxu1 %v17532_v3 }
 0x7fd   :  { %12876 = vmatprep.subr.bf16.mxu1 %v17537_v44 }
 0x800   :  { %12877 = vmatpush2.bf16.msra.mxu1 %v17535_v12  ;;  %v17607_v12 = vld [vmem:[#allocation12 + $0x78] sm:$0xff]  }
 0x801   :  { %12878 = vmatprep.subr.bf16.mxu1 %v17540_v48  ;;  %v17608_v48 = vld [vmem:[#allocation12 + $0x38] sm:$0xff]   ;;  %15599 = vmatprep.subr.bf16.mxu0 %v17607_v12  ;;  %v17631_v12 = vld [vmem:[%s18413_s11 + $0x18] sm:$0xff]  }
 0x802   :  { %15600 = vmatpush3.bf16.msra.mxu0 %v17608_v48  ;;  %v17632_v48 = vld [vmem:[%s18413_s11 + $0x10] sm:$0xff]  }
 0x804   :  { %12879 = vmatpush2.bf16.msra.mxu1 %v17538_v6  ;;  %v17609_v6 = vld [vmem:[#allocation12 + $0x70] sm:$0xff]  }
 0x805   :  { %12880 = vmatprep.subr.bf16.mxu1 %v17543_v5  ;;  %v17610_v5 = vld [vmem:[#allocation12 + $0x30] sm:$0xff]   ;;  %15601 = vmatprep.subr.bf16.mxu0 %v17609_v6 }
 0x806   :  { %15602 = vmatpush3.bf16.msra.mxu0 %v17610_v5  ;;  %v15567_v5 = vld [vmem:[#allocation13] ss:$0 sm:$0xff] }
 0x808   :  { %12881 = vmatpush2.bf16.msra.mxu1 %v17541_v57  ;;  %v17611_v57 = vld [vmem:[#allocation12 + $0x68] sm:$0xff]  }
 0x809   :  { %12882 = vmatprep.subr.bf16.mxu1 %v17546_v8  ;;  %v17612_v8 = vld [vmem:[#allocation12 + $0x28] sm:$0xff]   ;;  %15603 = vmatprep.subr.bf16.mxu0 %v17611_v57 }
 0x80a   :  { %15604 = vmatpush3.bf16.msra.mxu0 %v17612_v8 }
 0x80c   :  { %12883 = vmatpush2.bf16.msra.mxu1 %v17544_v53  ;;  %v17614_v53 = vld [vmem:[#allocation12 + $0x20] sm:$0xff]  }
 0x80d   :  { %12884 = vmatprep.subr.bf16.mxu1 %v17549_v54  ;;  %v17615_v54 = vld [vmem:[#allocation12 + $0x58] sm:$0xff]  }
 0x810   :  { %12885 = vmatpush2.bf16.msra.mxu1 %v17547_v33  ;;  %v17616_v33 = vld [vmem:[#allocation12 + $0x18] sm:$0xff]  }
 0x811   :  { %12886 = vmatprep.subr.bf16.mxu1 %v17552_v58 }
 0x814   :  { %12887 = vmatpush2.bf16.msra.mxu1 %v17550_v19 }
 0x815   :  { %12888 = vmatprep.subr.bf16.mxu1 %v17555_v60 }
 0x818   :  { %12889 = vmatpush2.bf16.msra.mxu1 %v17553_v10 }
 0x819   :  { %12890 = vmatprep.subr.bf16.mxu1 %v17558_v43  ;;  %v17617_v43 = vld [vmem:[#allocation12 + $0x50] sm:$0xff]  }
 0x81c   :  { %12891 = vmatpush2.bf16.msra.mxu1 %v17556_v41 }
 0x81d   :  { %13329 = vmatprep.subr.bf16.mxu1 %v17561_v0 }
 0x81f   :  { %v18330_v49 = vpop.f32.mrf.mxu0  ;;  %12893 = vmatmul.mubr.bf16.vlgmr.msra.gmra.mxu1 %v18316_v2 }
 0x820   :  { %13330 = vmatpush1.bf16.msra.mxu1 %v17559_v31  ;;  %13361 = vmatprep.mubr.bf16.mxu1 %v18314_v59  ;;  %v17574_v59 = vld [vmem:[#allocation9 + $0x720] ss:$8 sps:$4 sm:$0xff]   ;;  %v17618_v31 = vld [vmem:[#allocation12 + $0x10] sm:$0xff]  }
 0x821   :  { %v18334_v32 = vpop.f32.mrf.mxu0  ;;  %13331 = vmatprep.subr.bf16.mxu1 %v17564_v21 }
 0x823   :  { %v12388_v34 = vpop.f32.mrf.mxu0 }
 0x824   :  { %13332 = vmatpush1.bf16.msra.mxu1 %v17562_v9 }
 0x825   :  { %v12389_v17 = vpop.f32.mrf.mxu0  ;;  %13333 = vmatprep.subr.bf16.mxu1 %v17567_v56 }
 0x828   :  { %13334 = vmatpush1.bf16.msra.mxu1 %v17565_v16 }
 0x829   :  { %13335 = vmatprep.subr.bf16.mxu1 %v17570_v18  ;;  %v17619_v18 = vld [vmem:[#allocation12 + $0x48] sm:$0xff]  }
 0x82c   :  { %13336 = vmatpush1.bf16.msra.mxu1 %v17568_v36 }
 0x82d   :  { %13337 = vmatprep.subr.bf16.mxu1 %v17573_v23 }
 0x830   :  { %13338 = vmatpush1.bf16.msra.mxu1 %v17571_v24  ;;  %v17622_v24 = vld [vmem:[#allocation12] sm:$0xff]  }
 0x831   :  { %13339 = vmatprep.subr.bf16.mxu1 %v17576_v25  ;;  %v17624_v25 = vld [vmem:[%s18411_s9 + $0x30] sm:$0xff]  }
 0x834   :  { %13340 = vmatpush1.bf16.msra.mxu1 %v17574_v59  ;;  %v17625_v59 = vld [vmem:[%s18411_s9 + $0x28] sm:$0xff]  }
 0x835   :  { %13341 = vmatprep.subr.bf16.mxu1 %v17579_v1  ;;  %v17626_v1 = vld [vmem:[%s18411_s9 + $0x20] sm:$0xff]  }
 0x838   :  { %13342 = vmatpush1.bf16.msra.mxu1 %v17577_v22  ;;  %v17627_v22 = vld [vmem:[%s18411_s9 + $0x18] sm:$0xff]  }
 0x839   :  { %13343 = vmatprep.subr.bf16.mxu1 %v17582_v27 }
 0x83c   :  { %13344 = vmatpush1.bf16.msra.mxu1 %v17580_v28 }
 0x83d   :  { %13345 = vmatprep.subr.bf16.mxu1 %v17585_v50 }
 0x840   :  { %13346 = vmatpush2.bf16.msra.mxu1 %v17583_v29 }
 0x841   :  { %13347 = vmatprep.subr.bf16.mxu1 %v17588_v15 }
 0x844   :  { %13348 = vmatpush2.bf16.msra.mxu1 %v17586_v11 }
 0x845   :  { %13349 = vmatprep.subr.bf16.mxu1 %v17591_v7  ;;  %v13372_v7 = vld [vmem:[#allocation10] sm:$0x3] }
 0x848   :  { %13350 = vmatpush2.bf16.msra.mxu1 %v17589_v63 }
 0x849   :  { %13351 = vmatprep.subr.bf16.mxu1 %v17594_v39 }
 0x84c   :  { %13352 = vmatpush2.bf16.msra.mxu1 %v17592_v20 }
 0x84d   :  { %13353 = vmatprep.subr.bf16.mxu1 %v17597_v55  ;;  %v13377_v55 = vrot.slane %v13372_v7, %v18078_v14  ;;  %v17628_v14 = vld [vmem:[%s18411_s9 + $0x10] sm:$0xff]  }
 0x850   :  { %13354 = vmatpush2.bf16.msra.mxu1 %v17595_v40 }
 0x851   :  { %13355 = vmatprep.subr.bf16.mxu1 %v17600_v45 }
 0x854   :  { %13356 = vmatpush2.bf16.msra.mxu1 %v17598_v46 }
 0x855   :  { %13357 = vmatprep.subr.bf16.mxu1 %v17603_v35 }
 0x858   :  { %13358 = vmatpush2.bf16.msra.mxu1 %v17601_v38  ;;  %v13381_v38 = vrot.slane %v13372_v7, %v18082_v13  ;;  %v17629_v13 = vld [vmem:[%s18411_s9 + $0x8] sm:$0xff]  }
 0x859   :  { %13359 = vmatprep.subr.bf16.mxu1 %v17606_v61 }
 0x85c   :  { %13360 = vmatpush2.bf16.msra.mxu1 %v17604_v51 }
 0x85f   :  { %v18336_v26 = vpop.f32.mrf.mxu0  ;;  %13362 = vmatmul.mubr.bf16.vlgmr.msra.gmra.mxu1 %v18316_v2  ;;  %v11958_v37 = vpop.f32.mrf.mxu1  ;;  %v17613_v2 = vld [vmem:[#allocation12 + $0x60] sm:$0xff]  }
 0x860   :  { %15605 = vmatprep.subr.bf16.mxu0 %v17613_v2  ;;  %v11959_v60 = vadd.f32 %v11958_v37, %v18325_v62  ;;  %v17620_v62 = vld [vmem:[#allocation12 + $0x8] sm:$0xff]  }
 0x861   :  { %v18339_v47 = vpop.f32.mrf.mxu0  ;;  %v11960_v4 = vpop.f32.mrf.mxu1  ;;  %15606 = vmatpush3.bf16.msra.mxu0 %v17614_v53 }
 0x862   :  { %15607 = vmatprep.subr.bf16.mxu0 %v17615_v54  ;;  %v11961_v21 = vadd.f32 %v11960_v4, %v18328_v42  ;;  %v17623_v42 = vld [vmem:[%s18411_s9 + $0x38] sm:$0xff]  }
 0x863   :  { %v12857_v52 = vpop.f32.mrf.mxu0  ;;  %v11962_v30 = vpop.f32.mrf.mxu1 }
 0x865   :  { %v12858_v3 = vpop.f32.mrf.mxu0  ;;  %v11963_v44 = vpop.f32.mrf.mxu1  ;;  %15608 = vmatpush3.bf16.msra.mxu0 %v17616_v33 }
 0x866   :  { %15609 = vmatprep.subr.bf16.mxu0 %v17617_v43 }
 0x869   :  { %15610 = vmatpush3.bf16.msra.mxu0 %v17618_v31 }
 0x86a   :  { %15611 = vmatprep.subr.bf16.mxu0 %v17619_v18 }
 0x86d   :  { %15612 = vmatpush3.bf16.msra.mxu0 %v17620_v62 }
 0x89f   :  { %v12425_v58 = vpop.f32.mrf.mxu1  ;;  %v13322_v19 = vpop.f32.mrf.mxu0 }
 0x8a0   :  { %v12426_v10 = vadd.f32 %v12425_v58, %v18330_v49  ;;  %v17621_v49 = vld [vmem:[#allocation12 + $0x40] sm:$0xff]  }
 0x8a1   :  { %v12427_v41 = vpop.f32.mrf.mxu1  ;;  %v13324_v0 = vpop.f32.mrf.mxu0  ;;  %15613 = vmatprep.subr.bf16.mxu0 %v17621_v49 }
 0x8a2   :  { %v12432_v9 = vmax.f32 %v11959_v60, %v12426_v10  ;;  %v12428_v56 = vadd.f32 %v12427_v41, %v18334_v32  ;;  %15614 = vmatpush3.bf16.msra.mxu0 %v17622_v24  ;;  %v17865_v32 = vmov 0.0   ;;  %v17634_v60 = vld [vmem:[%s18413_s11] sm:$0xff]   ;;  %v15584_v10 = vld [vmem:[#allocation15] ss:$0 sm:$0xff] }
 0x8a3   :  { %v12429_v34 = vpop.f32.mrf.mxu1  ;;  %v13326_v16 = vpop.f32.mrf.mxu0  ;;  %15635 = vmatprep.subr.bf16.mxu1 %v17865_v32  ;;  %15655 = vmatprep.subr.bf16.mxu0 %v17865_v32 }
 0x8a4   :  { %v12433_v17 = vmax.f32 %v11961_v21, %v12428_v56  ;;  %15636 = vmatpush3.bf16.msra.mxu1 %v17623_v42  ;;  %15651 = vmatprep.mubr.msk.bf16.mxu1 %vm17866_vm0, %v17865_v32  ;;  %v15593_v34 = vld [vmem:[#allocation16] ss:$0 sm:$0xff] }
 0x8a5   :  { %v12430_v36 = vpop.f32.mrf.mxu1  ;;  %v13327_v23 = vpop.f32.mrf.mxu0  ;;  %15637 = vmatprep.subr.bf16.mxu1 %v17865_v32 }
 0x8a8   :  { %15638 = vmatpush3.bf16.msra.mxu1 %v17624_v25 }
 0x8a9   :  { %15639 = vmatprep.subr.bf16.mxu1 %v17865_v32 }
 0x8ac   :  { %15640 = vmatpush3.bf16.msra.mxu1 %v17625_v59 }
 0x8ad   :  { %15641 = vmatprep.subr.bf16.mxu1 %v17865_v32 }
 0x8b0   :  { %15642 = vmatpush3.bf16.msra.mxu1 %v17626_v1 }
 0x8b1   :  { %15643 = vmatprep.subr.bf16.mxu1 %v17865_v32 }
 0x8b4   :  { %15644 = vmatpush3.bf16.msra.mxu1 %v17627_v22 }
 0x8b5   :  { %15645 = vmatprep.subr.bf16.mxu1 %v17865_v32 }
 0x8b8   :  { %15646 = vmatpush3.bf16.msra.mxu1 %v17628_v14 }
 0x8b9   :  { %15647 = vmatprep.subr.bf16.mxu1 %v17865_v32 }
 0x8bc   :  { %15648 = vmatpush3.bf16.msra.mxu1 %v17629_v13 }
 0x8bd   :  { %15649 = vmatprep.subr.bf16.mxu1 %v17865_v32 }
 0x8df   :  { %v12894_v27 = vpop.f32.mrf.mxu1 }
 0x8e0   :  { %v12895_v28 = vadd.f32 %v12894_v27, %v18336_v26 }
 0x8e1   :  { %v12896_v50 = vpop.f32.mrf.mxu1 }
 0x8e2   :  { %v12901_v29 = vmax.f32 %v12432_v9, %v12895_v28  ;;  %v12897_v63 = vadd.f32 %v12896_v50, %v18339_v47  ;;  %v17630_v47 = vld [vmem:[%s18411_s9] sm:$0xff]  }
 0x8e3   :  { %v12898_v15 = vpop.f32.mrf.mxu1  ;;  %15650 = vmatpush3.bf16.msra.mxu1 %v17630_v47 }
 0x8e4   :  { %v12902_v45 = vmax.f32 %v12433_v17, %v12897_v63 }
 0x8e5   :  { %v12899_v11 = vpop.f32.mrf.mxu1 }
 0x91f   :  { %v13363_v39 = vpop.f32.mrf.mxu1 }
 0x920   :  { %v13364_v20 = vadd.f32 %v13363_v39, %v13322_v19  ;;  %v17633_v19 = vld [vmem:[%s18413_s11 + $0x8] sm:$0xff]  }
 0x921   :  { %v13365_v40 = vpop.f32.mrf.mxu1 }
 0x922   :  { %v13370_v46 = vmax.f32 %v12901_v29, %v13364_v20  ;;  %v13366_v35 = vadd.f32 %v13365_v40, %v13324_v0 }
 0x923   :  { %v13367_v61 = vpop.f32.mrf.mxu1 }
 0x924   :  { %v13384_v51 = vadd.f32 %v13377_v55, %v13370_v46  ;;  %v13371_v26 = vmax.f32 %v12902_v45, %v13366_v35 }
 0x925   :  { %v13368_v37 = vpop.f32.mrf.mxu1 }
 0x926   :  { %v13385_v4 = vadd.f32 %v13381_v38, %v13371_v26  ;;  %v13386_v52 = vmax.f32 %v13384_v51, 0.0 }
 0x928   :  { %v13387_v30 = vmax.f32 %v13385_v4, 0.0  ;;  %v13388_v44 = vpack.c.bf16 %v13386_v52, %v13386_v52 }
 0x92a   :  { %v13389_v3 = vpack.c.bf16 %v13387_v30, %v13387_v30 }
 0x92c   :  { %13557 = vmatprep.mubr.bf16.mxu0 %v13389_v3 }
 0x92d   :  { %13558 = vmatmul.mubr.bf16.vlgmr.msra.gmra.mxu0 %v13388_v44 }
 0x92e   :  { %15663 = vmatprep.mubr.msk.bf16.mxu0 %vm17866_vm0, %v17865_v32  ;;  %15656 = vmatpush3.bf16.msra.mxu0 %v17631_v12 }
 0x92f   :  { %15657 = vmatprep.subr.bf16.mxu0 %v17865_v32 }
 0x932   :  { %15658 = vmatpush3.bf16.msra.mxu0 %v17632_v48 }
 0x933   :  { %15659 = vmatprep.subr.bf16.mxu0 %v17865_v32 }
 0x936   :  { %15660 = vmatpush3.bf16.msra.mxu0 %v17633_v19 }
 0x937   :  { %15661 = vmatprep.subr.bf16.mxu0 %v17865_v32 }
 0x93a   :  { %15662 = vmatpush3.bf16.msra.mxu0 %v17634_v60 }
 0x9ed   :  { %v15615_v6 = vpop.f32.mrf.mxu0 }
 0x9ef   :  { %v15616_v57 = vpop.f32.mrf.mxu0 }
 0x9f0   :  { %v15617_v8 = vadd.f32 %v15616_v57, %v15615_v6 }
 0x9f1   :  { %v15618_v2 = vpop.f32.mrf.mxu0 }
 0x9f2   :  { %v13560_v53 = vadd.f32 %v15617_v8, %v15567_v5 }
 0x9f3   :  { %v15619_v54 = vpop.f32.mrf.mxu0 }
 0x9f4   :  { %v13565_v33 = vmax.f32 %v13560_v53, 0.0 }
 0x9f6   :  { %v13566_v58 = vpack.c.bf16 %v13565_v33, %v13565_v33 }
 0x9f8   :  { %15652 = vmatmul.mubr.bf16.vlgmr.msra.gmra.mxu1 %v13566_v58 }
 0xab8   :  { %v13672_v43 = vpop.f32.mrf.mxu1 }
 0xab9   :  { %v13673_v41 = vadd.f32 %v15584_v10, %v13672_v43 }
 0xaba   :  { %v15653_v0 = vpop.f32.mrf.mxu1 }
 0xabb   :  { %v13678_v31 = vmax.f32 %v13673_v41, 0.0 }
 0xabc   :  { %v13675_v21 = vpop.f32.mrf.mxu1 }
 0xabd   :  { %v13679_v9 = vpack.c.bf16 %v13678_v31, %v13678_v31 }
 0xabe   :  { %v15654_v56 = vpop.f32.mrf.mxu1 }
 0xabf   :  { %15664 = vmatmul.mubr.msk.bf16.vlgmr.msra.gmra.mxu0 %vm13719_vm1, %v13679_v9 }
 0xb7f   :  { %v13757_v16 = vpop.f32.mrf.mxu0 }
 0xb80   :  { %v13758_v17 = vadd.f32 %v15593_v34, %v13757_v16 }
 0xb81   :  { %v15665_v18 = vpop.f32.mrf.mxu0 }
 0xb82   :  { %13764 = vst.msk [vmem:[%s18415_s13] sm:$0xff] %vm13763_vm2, %v13758_v17 }
 0xb83   :  { %v13760_v36 = vpop.f32.mrf.mxu0 }
 0xb85   :  { %v15666_v23 = vpop.f32.mrf.mxu0 }
 0xb86   :  { %13769 = vsyncpa [#allocation3], 1 }
 0xb87   :  { %13770 = vsyncpa [#allocation5], 1 }
 0xb88   :  { %13771 = vsyncpa [#allocation8], 1 }
 0xb89   :  { %13772 = vsyncpa [#allocation11], 1 }
 0xb8a   :  { %13773 = vsyncpa [#allocation14], 1 }
 0xb8b   :  { %13774 = vsyncpa [#allocation17], 1 }

</bundles_post_ra>
